<compile_context>
chip_gen: v6e
topology: v6e:2x2x1
jax: 0.10.0
libtpu: 0.0.40
codegen_flags: <defaults>
</compile_context>

<pallas_src>
import functools

import numpy as np
import jax
import jax.numpy as jnp
from jax.experimental import pallas as pl
from jax.experimental.pallas import tpu as pltpu


_VMEM_SPEC = pl.BlockSpec(memory_space=pltpu.MemorySpace.VMEM)


# ---------------------------------------------------------------------------
# Pallas kernels
# ---------------------------------------------------------------------------
def _bn_lrelu(y, gamma, beta, eps, slope):
    """Train-mode BatchNorm2d (biased var, one-pass stats) + LeakyReLU."""
    mean = jnp.mean(y, axis=0, keepdims=True)               # (1, C)
    msq = jnp.mean(y * y, axis=0, keepdims=True)            # (1, C)
    var = msq - mean * mean                                  # biased variance
    z = (y - mean) * jax.lax.rsqrt(var + eps) * gamma + beta
    return jnp.maximum(z, slope * z)                         # LeakyReLU(0.2)


def encoder_kernel(cols1_ref, w1_ref, b1_ref, g1_ref, be1_ref,
                   sel2_ref, w2_ref, b2_ref, g2_ref, be2_ref,
                   o_ref, *, n_batch, eps, slope):
    """conv1+BN+LReLU + conv2+BN+LReLU fused; h1 stays in VMEM.

    cols1: (N*P1, 9*Cin)  im2col of the input, rows (n, ho, wo)
    w1   : (9*Cin, C)     flattened in (kh, kw, cin) order
    sel2 : (9, P2, P1)    constant 0/1 per-tap gather matrices (per sample)
    w2   : (9, C, C)      per-tap weight slabs (cin, cout)
    out  : (N*P2, C)      rows (n, ho2, wo2)
    """
    # ---- layer 1: conv-as-matmul + bias + BN + LeakyReLU --------------------
    y1 = jnp.dot(cols1_ref[...], w1_ref[...],
                 preferred_element_type=jnp.float32) + b1_ref[...]
    h1 = _bn_lrelu(y1, g1_ref[...], be1_ref[...], eps, slope)    # (N*P1, C)

    n_taps, p2, p1 = sel2_ref.shape
    cout = w2_ref.shape[2]

    # ---- layer 2: stride-2 3x3 conv as 9 gather-matmul taps, all in VMEM ----
    per_sample = []
    for n in range(n_batch):
        h1_n = h1[n * p1:(n + 1) * p1, :]                        # (P1, C)
        acc = jnp.zeros((p2, cout), jnp.float32)
        for t in range(n_taps):
            tap = jnp.dot(sel2_ref[t], h1_n,
                          preferred_element_type=jnp.float32)    # (P2, C)
            acc = acc + jnp.dot(tap, w2_ref[t],
                                preferred_element_type=jnp.float32)
        per_sample.append(acc)
    y2 = jnp.concatenate(per_sample, axis=0) + b2_ref[...]       # (N*P2, C)
    o_ref[...] = _bn_lrelu(y2, g2_ref[...], be2_ref[...], eps, slope)


def heads_kernel(h_ref, wmu_ref, bmu_ref, wlv_ref, blv_ref, mu_ref, lv_ref):
    # mu / log_var Linear heads: h:(N,F)  w:(F,L)  b:(1,L)
    h = h_ref[...]
    mu_ref[...] = jnp.dot(h, wmu_ref[...],
                          preferred_element_type=jnp.float32) + bmu_ref[...]
    lv_ref[...] = jnp.dot(h, wlv_ref[...],
                          preferred_element_type=jnp.float32) + blv_ref[...]


# ---------------------------------------------------------------------------
# pallas_call wrappers (full-array VMEM blocks, no grid: all operands < 1 MiB)
# ---------------------------------------------------------------------------
def fused_encoder(cols1, prep, n_batch, eps=1e-5, slope=0.2):
    sel2 = prep["sel2"]
    p2 = sel2.shape[1]
    cout = prep["w2"].shape[2]
    kernel = functools.partial(encoder_kernel, n_batch=n_batch,
                               eps=eps, slope=slope)
    return pl.pallas_call(
        kernel,
        out_shape=jax.ShapeDtypeStruct((n_batch * p2, cout), jnp.float32),
        in_specs=[_VMEM_SPEC] * 10,
        out_specs=_VMEM_SPEC,
    )(cols1, prep["w1"], prep["b1"], prep["g1"], prep["be1"],
      sel2, prep["w2"], prep["b2"], prep["g2"], prep["be2"])


def heads(h_flat, prep):
    n = h_flat.shape[0]
    ld = prep["w_mu"].shape[1]
    return pl.pallas_call(
        heads_kernel,
        out_shape=(jax.ShapeDtypeStruct((n, ld), jnp.float32),
                   jax.ShapeDtypeStruct((n, ld), jnp.float32)),
        in_specs=[_VMEM_SPEC] * 5,
        out_specs=(_VMEM_SPEC, _VMEM_SPEC),
    )(h_flat, prep["w_mu"], prep["b_mu"], prep["w_lv"], prep["b_lv"])


# ---------------------------------------------------------------------------
# Glue: channels-last im2col for layer 1 (tiny, XLA fuses pad/slice/stack)
# ---------------------------------------------------------------------------
def im2col_nhwc(x, k=3, stride=2, pad=1):
    # x: (N, H, W, C) -> cols: (N*Ho*Wo, k*k*C); row order = (n, ho, wo),
    # column order = (ki, kj, c) matching the (kh, kw, cin) weight flatten.
    N, H, W, C = x.shape
    Ho = (H + 2 * pad - k) // stride + 1
    Wo = (W + 2 * pad - k) // stride + 1
    xp = jnp.pad(x, ((0, 0), (pad, pad), (pad, pad), (0, 0)))
    patches = []
    for i in range(k):
        for j in range(k):
            patches.append(
                xp[:, i: i + stride * Ho: stride, j: j + stride * Wo: stride, :])
    cols = jnp.stack(patches, axis=3).reshape(N * Ho * Wo, k * k * C)
    return cols, Ho, Wo


# ---------------------------------------------------------------------------
# One-time parameter preparation (all layout work hoisted out of the forward)
# ---------------------------------------------------------------------------
def build_gather_mats(h, w, k=3, stride=2, pad=1):
    # sel[t, p, q] = 1 iff output position p reads input position q for tap t
    # (q out of bounds -> row stays zero, i.e. zero padding).
    ho = (h + 2 * pad - k) // stride + 1
    wo = (w + 2 * pad - k) // stride + 1
    sel = np.zeros((k * k, ho * wo, h * w), dtype=np.float32)
    for ki in range(k):
        for kj in range(k):
            t = ki * k + kj
            for oh in range(ho):
                ih = stride * oh - pad + ki
                if ih < 0 or ih >= h:
                    continue
                for ow in range(wo):
                    iw = stride * ow - pad + kj
                    if iw < 0 or iw >= w:
                        continue
                    sel[t, oh * wo + ow, ih * w + iw] = 1.0
    return jnp.asarray(sel), ho, wo


def init_params(key, in_channels=3, latent_dim=56, image_size=28):
    # Parameters in PyTorch layouts: conv (Cout,Cin,3,3), Linear (out,in).
    channels = [in_channels, 32, 32]
    keys = jax.random.split(key, 8)
    params = {}
    for i in range(len(channels) - 1):
        cin, cout = channels[i], channels[i + 1]
        params[f"conv{i}_w"] = 0.05 * jax.random.normal(
            keys[2 * i], (cout, cin, 3, 3), jnp.float32)
        params[f"conv{i}_b"] = 0.05 * jax.random.normal(
            keys[2 * i + 1], (cout,), jnp.float32)
        params[f"bn{i}_gamma"] = jnp.ones((cout,), jnp.float32)
        params[f"bn{i}_beta"] = jnp.zeros((cout,), jnp.float32)
    feat = image_size // 2 ** (len(channels) - 1)
    fan_in = 32 * feat * feat
    params["mu_w"] = 0.05 * jax.random.normal(keys[4], (latent_dim, fan_in), jnp.float32)
    params["mu_b"] = 0.05 * jax.random.normal(keys[5], (latent_dim,), jnp.float32)
    params["lv_w"] = 0.05 * jax.random.normal(keys[6], (latent_dim, fan_in), jnp.float32)
    params["lv_b"] = 0.05 * jax.random.normal(keys[7], (latent_dim,), jnp.float32)
    return params


def prepare_params(params, image_size=28):
    """One-time (outside jit) conversion to kernel layouts."""
    prep = {}
    for i in range(2):
        w = params[f"conv{i}_w"]                          # (cout, cin, 3, 3)
        cout = w.shape[0]
        wkhwc = jnp.transpose(w, (2, 3, 1, 0))            # (kh, kw, cin, cout)
        if i == 0:
            prep["w1"] = wkhwc.reshape(-1, cout)          # (9*cin, cout)
        else:
            prep["w2"] = wkhwc.reshape(9, -1, cout)       # (9, cin, cout) slabs
        prep[f"b{i + 1}"] = params[f"conv{i}_b"].reshape(1, cout)
        prep[f"g{i + 1}"] = params[f"bn{i}_gamma"].reshape(1, cout)
        prep[f"be{i + 1}"] = params[f"bn{i}_beta"].reshape(1, cout)

    # Gather matrices for the in-kernel layer-2 stride-2 3x3 im2col.
    h1 = image_size // 2
    sel2, h2s, w2s = build_gather_mats(h1, h1)
    prep["sel2"] = sel2                                    # (9, 49, 196)

    # Heads: transpose to (in, out) and permute rows from PyTorch's NCHW
    # flatten order (c, h, w) to the kernel's NHWC flatten order (h, w, c),
    # so the runtime flatten is a plain reshape with no transpose.
    c2 = params["conv1_w"].shape[0]
    spatial = h2s * w2s

    def prep_head(w_pt):                                   # (out, in)
        wt = w_pt.T.reshape(c2, spatial, -1)               # (c, hw, out)
        return jnp.transpose(wt, (1, 0, 2)).reshape(spatial * c2, -1)

    prep["w_mu"] = prep_head(params["mu_w"])
    prep["b_mu"] = params["mu_b"].reshape(1, -1)
    prep["w_lv"] = prep_head(params["lv_w"])
    prep["b_lv"] = params["lv_b"].reshape(1, -1)
    return prep


# ---------------------------------------------------------------------------
# VaeEncoder forward
# ---------------------------------------------------------------------------
def vae_encoder_forward(prep, x):
    # x: (N, C, H, W) float32 (PyTorch layout at the interface)
    n = x.shape[0]
    xh = jnp.transpose(x, (0, 2, 3, 1))                    # NHWC once, up front
    cols1, _, _ = im2col_nhwc(xh, k=3, stride=2, pad=1)    # (N*196, 9*Cin)
    h2 = fused_encoder(cols1, prep, n_batch=n)             # (N*49, 32), 1 call
    h_flat = h2.reshape(n, -1)                             # (N, 1568), (h,w,c) order
    mu, log_var = heads(h_flat, prep)                      # (N, 56) x 2, 1 call
    return mu, log_var


if __name__ == "__main__":
    key = jax.random.PRNGKey(0)
    pkey, xkey = jax.random.split(key)

    in_channels, latent_dim, image_size, batch = 3, 56, 28, 2
    raw_params = init_params(pkey, in_channels, latent_dim, image_size)
    prep = prepare_params(raw_params, image_size)          # one-time layout work
    x = jax.random.normal(
        xkey, (batch, in_channels, image_size, image_size), jnp.float32)

    fwd = jax.jit(vae_encoder_forward)
    mu, log_var = fwd(prep, x)
    jax.block_until_ready((mu, log_var))

    assert mu.shape == (batch, latent_dim)
    assert log_var.shape == (batch, latent_dim)
    assert bool(jnp.all(jnp.isfinite(mu))) and bool(jnp.all(jnp.isfinite(log_var)))
    print("KERNEL_OK")
</pallas_src>

<mosaic_0001>
module attributes {stable_mosaic.version = 11 : i64} {
  func.func @encoder_kernel(%arg0: memref<392x27xf32, #tpu.memory_space<vmem>>, %arg1: memref<27x32xf32, #tpu.memory_space<vmem>>, %arg2: memref<1x32xf32, #tpu.memory_space<vmem>>, %arg3: memref<1x32xf32, #tpu.memory_space<vmem>>, %arg4: memref<1x32xf32, #tpu.memory_space<vmem>>, %arg5: memref<9x49x196xf32, #tpu.memory_space<vmem>>, %arg6: memref<9x32x32xf32, #tpu.memory_space<vmem>>, %arg7: memref<1x32xf32, #tpu.memory_space<vmem>>, %arg8: memref<1x32xf32, #tpu.memory_space<vmem>>, %arg9: memref<1x32xf32, #tpu.memory_space<vmem>>, %arg10: memref<98x32xf32, #tpu.memory_space<vmem>>) attributes {dimension_semantics = [], scalar_prefetch = 0 : i64, scratch_operands = 0 : i64, tpu.core_type = #tpu.core_type<tc>} {
    %c0 = arith.constant 0 : index
    %c0_0 = arith.constant 0 : index
    %0 = vector.load %arg0[%c0, %c0_0] : memref<392x27xf32, #tpu.memory_space<vmem>>, vector<392x27xf32>
    %c0_1 = arith.constant 0 : index
    %c0_2 = arith.constant 0 : index
    %1 = vector.load %arg1[%c0_1, %c0_2] : memref<27x32xf32, #tpu.memory_space<vmem>>, vector<27x32xf32>
    %cst = arith.constant dense<0.000000e+00> : vector<392x32xf32>
    %2 = tpu.matmul %0, %1, %cst {dimension_numbers = #tpu.dot_dimension_numbers<[1], [0], [0], [1], [0, 0, 1, 1], [], []>} : vector<392x27xf32>, vector<27x32xf32>, vector<392x32xf32> -> vector<392x32xf32>
    %c0_3 = arith.constant 0 : index
    %c0_4 = arith.constant 0 : index
    %3 = vector.load %arg2[%c0_3, %c0_4] : memref<1x32xf32, #tpu.memory_space<vmem>>, vector<1x32xf32>
    %4 = vector.broadcast %3 : vector<1x32xf32> to vector<392x32xf32>
    %5 = arith.addf %2, %4 : vector<392x32xf32>
    %c0_5 = arith.constant 0 : index
    %c0_6 = arith.constant 0 : index
    %6 = vector.load %arg3[%c0_5, %c0_6] : memref<1x32xf32, #tpu.memory_space<vmem>>, vector<1x32xf32>
    %c0_7 = arith.constant 0 : index
    %c0_8 = arith.constant 0 : index
    %7 = vector.load %arg4[%c0_7, %c0_8] : memref<1x32xf32, #tpu.memory_space<vmem>>, vector<1x32xf32>
    %cst_9 = arith.constant dense<0.000000e+00> : vector<32xf32>
    %8 = vector.multi_reduction <add>, %5, %cst_9 [0] : vector<392x32xf32> to vector<32xf32>
    %9 = vector.shape_cast %8 : vector<32xf32> to vector<1x32xf32>
    %cst_10 = arith.constant 3.920000e+02 : f32
    %10 = vector.broadcast %cst_10 : f32 to vector<1x32xf32>
    %11 = arith.divf %9, %10 : vector<1x32xf32>
    %12 = arith.mulf %5, %5 : vector<392x32xf32>
    %cst_11 = arith.constant dense<0.000000e+00> : vector<32xf32>
    %13 = vector.multi_reduction <add>, %12, %cst_11 [0] : vector<392x32xf32> to vector<32xf32>
    %14 = vector.shape_cast %13 : vector<32xf32> to vector<1x32xf32>
    %cst_12 = arith.constant 3.920000e+02 : f32
    %15 = vector.broadcast %cst_12 : f32 to vector<1x32xf32>
    %16 = arith.divf %14, %15 : vector<1x32xf32>
    %17 = arith.mulf %11, %11 : vector<1x32xf32>
    %18 = arith.subf %16, %17 : vector<1x32xf32>
    %19 = vector.broadcast %11 : vector<1x32xf32> to vector<392x32xf32>
    %20 = arith.subf %5, %19 : vector<392x32xf32>
    %cst_13 = arith.constant 9.99999974E-6 : f32
    %21 = vector.broadcast %cst_13 : f32 to vector<1x32xf32>
    %22 = arith.addf %18, %21 : vector<1x32xf32>
    %23 = math.rsqrt %22 : vector<1x32xf32>
    %24 = vector.broadcast %23 : vector<1x32xf32> to vector<392x32xf32>
    %25 = arith.mulf %20, %24 : vector<392x32xf32>
    %26 = vector.broadcast %6 : vector<1x32xf32> to vector<392x32xf32>
    %27 = arith.mulf %25, %26 : vector<392x32xf32>
    %28 = vector.broadcast %7 : vector<1x32xf32> to vector<392x32xf32>
    %29 = arith.addf %27, %28 : vector<392x32xf32>
    %cst_14 = arith.constant 2.000000e-01 : f32
    %30 = vector.broadcast %cst_14 : f32 to vector<392x32xf32>
    %31 = arith.mulf %30, %29 : vector<392x32xf32>
    %32 = arith.maximumf %29, %31 : vector<392x32xf32>
    %33 = vector.extract_strided_slice %32 {offsets = [0, 0], sizes = [196, 32], strides = [1, 1]} : vector<392x32xf32> to vector<196x32xf32>
    %cst_15 = arith.constant 0.000000e+00 : f32
    %34 = vector.broadcast %cst_15 : f32 to vector<49x32xf32>
    %c0_16 = arith.constant 0 : index
    %c0_17 = arith.constant 0 : index
    %c0_18 = arith.constant 0 : index
    %35 = vector.load %arg5[%c0_16, %c0_17, %c0_18] : memref<9x49x196xf32, #tpu.memory_space<vmem>>, vector<1x49x196xf32>
    %36 = vector.shape_cast %35 : vector<1x49x196xf32> to vector<49x196xf32>
    %cst_19 = arith.constant dense<0.000000e+00> : vector<49x32xf32>
    %37 = tpu.matmul %36, %33, %cst_19 {dimension_numbers = #tpu.dot_dimension_numbers<[1], [0], [0], [1], [0, 0, 1, 1], [], []>} : vector<49x196xf32>, vector<196x32xf32>, vector<49x32xf32> -> vector<49x32xf32>
    %c0_20 = arith.constant 0 : index
    %c0_21 = arith.constant 0 : index
    %c0_22 = arith.constant 0 : index
    %38 = vector.load %arg6[%c0_20, %c0_21, %c0_22] : memref<9x32x32xf32, #tpu.memory_space<vmem>>, vector<1x32x32xf32>
    %39 = vector.shape_cast %38 : vector<1x32x32xf32> to vector<32x32xf32>
    %cst_23 = arith.constant dense<0.000000e+00> : vector<49x32xf32>
    %40 = tpu.matmul %37, %39, %cst_23 {dimension_numbers = #tpu.dot_dimension_numbers<[1], [0], [0], [1], [0, 0, 1, 1], [], []>} : vector<49x32xf32>, vector<32x32xf32>, vector<49x32xf32> -> vector<49x32xf32>
    %41 = arith.addf %34, %40 : vector<49x32xf32>
    %c1 = arith.constant 1 : index
    %c0_24 = arith.constant 0 : index
    %c0_25 = arith.constant 0 : index
    %42 = vector.load %arg5[%c1, %c0_24, %c0_25] : memref<9x49x196xf32, #tpu.memory_space<vmem>>, vector<1x49x196xf32>
    %43 = vector.shape_cast %42 : vector<1x49x196xf32> to vector<49x196xf32>
    %cst_26 = arith.constant dense<0.000000e+00> : vector<49x32xf32>
    %44 = tpu.matmul %43, %33, %cst_26 {dimension_numbers = #tpu.dot_dimension_numbers<[1], [0], [0], [1], [0, 0, 1, 1], [], []>} : vector<49x196xf32>, vector<196x32xf32>, vector<49x32xf32> -> vector<49x32xf32>
    %c1_27 = arith.constant 1 : index
    %c0_28 = arith.constant 0 : index
    %c0_29 = arith.constant 0 : index
    %45 = vector.load %arg6[%c1_27, %c0_28, %c0_29] : memref<9x32x32xf32, #tpu.memory_space<vmem>>, vector<1x32x32xf32>
    %46 = vector.shape_cast %45 : vector<1x32x32xf32> to vector<32x32xf32>
    %cst_30 = arith.constant dense<0.000000e+00> : vector<49x32xf32>
    %47 = tpu.matmul %44, %46, %cst_30 {dimension_numbers = #tpu.dot_dimension_numbers<[1], [0], [0], [1], [0, 0, 1, 1], [], []>} : vector<49x32xf32>, vector<32x32xf32>, vector<49x32xf32> -> vector<49x32xf32>
    %48 = arith.addf %41, %47 : vector<49x32xf32>
    %c2 = arith.constant 2 : index
    %c0_31 = arith.constant 0 : index
    %c0_32 = arith.constant 0 : index
    %49 = vector.load %arg5[%c2, %c0_31, %c0_32] : memref<9x49x196xf32, #tpu.memory_space<vmem>>, vector<1x49x196xf32>
    %50 = vector.shape_cast %49 : vector<1x49x196xf32> to vector<49x196xf32>
    %cst_33 = arith.constant dense<0.000000e+00> : vector<49x32xf32>
    %51 = tpu.matmul %50, %33, %cst_33 {dimension_numbers = #tpu.dot_dimension_numbers<[1], [0], [0], [1], [0, 0, 1, 1], [], []>} : vector<49x196xf32>, vector<196x32xf32>, vector<49x32xf32> -> vector<49x32xf32>
    %c2_34 = arith.constant 2 : index
    %c0_35 = arith.constant 0 : index
    %c0_36 = arith.constant 0 : index
    %52 = vector.load %arg6[%c2_34, %c0_35, %c0_36] : memref<9x32x32xf32, #tpu.memory_space<vmem>>, vector<1x32x32xf32>
    %53 = vector.shape_cast %52 : vector<1x32x32xf32> to vector<32x32xf32>
    %cst_37 = arith.constant dense<0.000000e+00> : vector<49x32xf32>
    %54 = tpu.matmul %51, %53, %cst_37 {dimension_numbers = #tpu.dot_dimension_numbers<[1], [0], [0], [1], [0, 0, 1, 1], [], []>} : vector<49x32xf32>, vector<32x32xf32>, vector<49x32xf32> -> vector<49x32xf32>
    %55 = arith.addf %48, %54 : vector<49x32xf32>
    %c3 = arith.constant 3 : index
    %c0_38 = arith.constant 0 : index
    %c0_39 = arith.constant 0 : index
    %56 = vector.load %arg5[%c3, %c0_38, %c0_39] : memref<9x49x196xf32, #tpu.memory_space<vmem>>, vector<1x49x196xf32>
    %57 = vector.shape_cast %56 : vector<1x49x196xf32> to vector<49x196xf32>
    %cst_40 = arith.constant dense<0.000000e+00> : vector<49x32xf32>
    %58 = tpu.matmul %57, %33, %cst_40 {dimension_numbers = #tpu.dot_dimension_numbers<[1], [0], [0], [1], [0, 0, 1, 1], [], []>} : vector<49x196xf32>, vector<196x32xf32>, vector<49x32xf32> -> vector<49x32xf32>
    %c3_41 = arith.constant 3 : index
    %c0_42 = arith.constant 0 : index
    %c0_43 = arith.constant 0 : index
    %59 = vector.load %arg6[%c3_41, %c0_42, %c0_43] : memref<9x32x32xf32, #tpu.memory_space<vmem>>, vector<1x32x32xf32>
    %60 = vector.shape_cast %59 : vector<1x32x32xf32> to vector<32x32xf32>
    %cst_44 = arith.constant dense<0.000000e+00> : vector<49x32xf32>
    %61 = tpu.matmul %58, %60, %cst_44 {dimension_numbers = #tpu.dot_dimension_numbers<[1], [0], [0], [1], [0, 0, 1, 1], [], []>} : vector<49x32xf32>, vector<32x32xf32>, vector<49x32xf32> -> vector<49x32xf32>
    %62 = arith.addf %55, %61 : vector<49x32xf32>
    %c4 = arith.constant 4 : index
    %c0_45 = arith.constant 0 : index
    %c0_46 = arith.constant 0 : index
    %63 = vector.load %arg5[%c4, %c0_45, %c0_46] : memref<9x49x196xf32, #tpu.memory_space<vmem>>, vector<1x49x196xf32>
    %64 = vector.shape_cast %63 : vector<1x49x196xf32> to vector<49x196xf32>
    %cst_47 = arith.constant dense<0.000000e+00> : vector<49x32xf32>
    %65 = tpu.matmul %64, %33, %cst_47 {dimension_numbers = #tpu.dot_dimension_numbers<[1], [0], [0], [1], [0, 0, 1, 1], [], []>} : vector<49x196xf32>, vector<196x32xf32>, vector<49x32xf32> -> vector<49x32xf32>
    %c4_48 = arith.constant 4 : index
    %c0_49 = arith.constant 0 : index
    %c0_50 = arith.constant 0 : index
    %66 = vector.load %arg6[%c4_48, %c0_49, %c0_50] : memref<9x32x32xf32, #tpu.memory_space<vmem>>, vector<1x32x32xf32>
    %67 = vector.shape_cast %66 : vector<1x32x32xf32> to vector<32x32xf32>
    %cst_51 = arith.constant dense<0.000000e+00> : vector<49x32xf32>
    %68 = tpu.matmul %65, %67, %cst_51 {dimension_numbers = #tpu.dot_dimension_numbers<[1], [0], [0], [1], [0, 0, 1, 1], [], []>} : vector<49x32xf32>, vector<32x32xf32>, vector<49x32xf32> -> vector<49x32xf32>
    %69 = arith.addf %62, %68 : vector<49x32xf32>
    %c5 = arith.constant 5 : index
    %c0_52 = arith.constant 0 : index
    %c0_53 = arith.constant 0 : index
    %70 = vector.load %arg5[%c5, %c0_52, %c0_53] : memref<9x49x196xf32, #tpu.memory_space<vmem>>, vector<1x49x196xf32>
    %71 = vector.shape_cast %70 : vector<1x49x196xf32> to vector<49x196xf32>
    %cst_54 = arith.constant dense<0.000000e+00> : vector<49x32xf32>
    %72 = tpu.matmul %71, %33, %cst_54 {dimension_numbers = #tpu.dot_dimension_numbers<[1], [0], [0], [1], [0, 0, 1, 1], [], []>} : vector<49x196xf32>, vector<196x32xf32>, vector<49x32xf32> -> vector<49x32xf32>
    %c5_55 = arith.constant 5 : index
    %c0_56 = arith.constant 0 : index
    %c0_57 = arith.constant 0 : index
    %73 = vector.load %arg6[%c5_55, %c0_56, %c0_57] : memref<9x32x32xf32, #tpu.memory_space<vmem>>, vector<1x32x32xf32>
    %74 = vector.shape_cast %73 : vector<1x32x32xf32> to vector<32x32xf32>
    %cst_58 = arith.constant dense<0.000000e+00> : vector<49x32xf32>
    %75 = tpu.matmul %72, %74, %cst_58 {dimension_numbers = #tpu.dot_dimension_numbers<[1], [0], [0], [1], [0, 0, 1, 1], [], []>} : vector<49x32xf32>, vector<32x32xf32>, vector<49x32xf32> -> vector<49x32xf32>
    %76 = arith.addf %69, %75 : vector<49x32xf32>
    %c6 = arith.constant 6 : index
    %c0_59 = arith.constant 0 : index
    %c0_60 = arith.constant 0 : index
    %77 = vector.load %arg5[%c6, %c0_59, %c0_60] : memref<9x49x196xf32, #tpu.memory_space<vmem>>, vector<1x49x196xf32>
    %78 = vector.shape_cast %77 : vector<1x49x196xf32> to vector<49x196xf32>
    %cst_61 = arith.constant dense<0.000000e+00> : vector<49x32xf32>
    %79 = tpu.matmul %78, %33, %cst_61 {dimension_numbers = #tpu.dot_dimension_numbers<[1], [0], [0], [1], [0, 0, 1, 1], [], []>} : vector<49x196xf32>, vector<196x32xf32>, vector<49x32xf32> -> vector<49x32xf32>
    %c6_62 = arith.constant 6 : index
    %c0_63 = arith.constant 0 : index
    %c0_64 = arith.constant 0 : index
    %80 = vector.load %arg6[%c6_62, %c0_63, %c0_64] : memref<9x32x32xf32, #tpu.memory_space<vmem>>, vector<1x32x32xf32>
    %81 = vector.shape_cast %80 : vector<1x32x32xf32> to vector<32x32xf32>
    %cst_65 = arith.constant dense<0.000000e+00> : vector<49x32xf32>
    %82 = tpu.matmul %79, %81, %cst_65 {dimension_numbers = #tpu.dot_dimension_numbers<[1], [0], [0], [1], [0, 0, 1, 1], [], []>} : vector<49x32xf32>, vector<32x32xf32>, vector<49x32xf32> -> vector<49x32xf32>
    %83 = arith.addf %76, %82 : vector<49x32xf32>
    %c7 = arith.constant 7 : index
    %c0_66 = arith.constant 0 : index
    %c0_67 = arith.constant 0 : index
    %84 = vector.load %arg5[%c7, %c0_66, %c0_67] : memref<9x49x196xf32, #tpu.memory_space<vmem>>, vector<1x49x196xf32>
    %85 = vector.shape_cast %84 : vector<1x49x196xf32> to vector<49x196xf32>
    %cst_68 = arith.constant dense<0.000000e+00> : vector<49x32xf32>
    %86 = tpu.matmul %85, %33, %cst_68 {dimension_numbers = #tpu.dot_dimension_numbers<[1], [0], [0], [1], [0, 0, 1, 1], [], []>} : vector<49x196xf32>, vector<196x32xf32>, vector<49x32xf32> -> vector<49x32xf32>
    %c7_69 = arith.constant 7 : index
    %c0_70 = arith.constant 0 : index
    %c0_71 = arith.constant 0 : index
    %87 = vector.load %arg6[%c7_69, %c0_70, %c0_71] : memref<9x32x32xf32, #tpu.memory_space<vmem>>, vector<1x32x32xf32>
    %88 = vector.shape_cast %87 : vector<1x32x32xf32> to vector<32x32xf32>
    %cst_72 = arith.constant dense<0.000000e+00> : vector<49x32xf32>
    %89 = tpu.matmul %86, %88, %cst_72 {dimension_numbers = #tpu.dot_dimension_numbers<[1], [0], [0], [1], [0, 0, 1, 1], [], []>} : vector<49x32xf32>, vector<32x32xf32>, vector<49x32xf32> -> vector<49x32xf32>
    %90 = arith.addf %83, %89 : vector<49x32xf32>
    %c8 = arith.constant 8 : index
    %c0_73 = arith.constant 0 : index
    %c0_74 = arith.constant 0 : index
    %91 = vector.load %arg5[%c8, %c0_73, %c0_74] : memref<9x49x196xf32, #tpu.memory_space<vmem>>, vector<1x49x196xf32>
    %92 = vector.shape_cast %91 : vector<1x49x196xf32> to vector<49x196xf32>
    %cst_75 = arith.constant dense<0.000000e+00> : vector<49x32xf32>
    %93 = tpu.matmul %92, %33, %cst_75 {dimension_numbers = #tpu.dot_dimension_numbers<[1], [0], [0], [1], [0, 0, 1, 1], [], []>} : vector<49x196xf32>, vector<196x32xf32>, vector<49x32xf32> -> vector<49x32xf32>
    %c8_76 = arith.constant 8 : index
    %c0_77 = arith.constant 0 : index
    %c0_78 = arith.constant 0 : index
    %94 = vector.load %arg6[%c8_76, %c0_77, %c0_78] : memref<9x32x32xf32, #tpu.memory_space<vmem>>, vector<1x32x32xf32>
    %95 = vector.shape_cast %94 : vector<1x32x32xf32> to vector<32x32xf32>
    %cst_79 = arith.constant dense<0.000000e+00> : vector<49x32xf32>
    %96 = tpu.matmul %93, %95, %cst_79 {dimension_numbers = #tpu.dot_dimension_numbers<[1], [0], [0], [1], [0, 0, 1, 1], [], []>} : vector<49x32xf32>, vector<32x32xf32>, vector<49x32xf32> -> vector<49x32xf32>
    %97 = arith.addf %90, %96 : vector<49x32xf32>
    %98 = vector.extract_strided_slice %32 {offsets = [196, 0], sizes = [196, 32], strides = [1, 1]} : vector<392x32xf32> to vector<196x32xf32>
    %cst_80 = arith.constant 0.000000e+00 : f32
    %99 = vector.broadcast %cst_80 : f32 to vector<49x32xf32>
    %c0_81 = arith.constant 0 : index
    %c0_82 = arith.constant 0 : index
    %c0_83 = arith.constant 0 : index
    %100 = vector.load %arg5[%c0_81, %c0_82, %c0_83] : memref<9x49x196xf32, #tpu.memory_space<vmem>>, vector<1x49x196xf32>
    %101 = vector.shape_cast %100 : vector<1x49x196xf32> to vector<49x196xf32>
    %cst_84 = arith.constant dense<0.000000e+00> : vector<49x32xf32>
    %102 = tpu.matmul %101, %98, %cst_84 {dimension_numbers = #tpu.dot_dimension_numbers<[1], [0], [0], [1], [0, 0, 1, 1], [], []>} : vector<49x196xf32>, vector<196x32xf32>, vector<49x32xf32> -> vector<49x32xf32>
    %c0_85 = arith.constant 0 : index
    %c0_86 = arith.constant 0 : index
    %c0_87 = arith.constant 0 : index
    %103 = vector.load %arg6[%c0_85, %c0_86, %c0_87] : memref<9x32x32xf32, #tpu.memory_space<vmem>>, vector<1x32x32xf32>
    %104 = vector.shape_cast %103 : vector<1x32x32xf32> to vector<32x32xf32>
    %cst_88 = arith.constant dense<0.000000e+00> : vector<49x32xf32>
    %105 = tpu.matmul %102, %104, %cst_88 {dimension_numbers = #tpu.dot_dimension_numbers<[1], [0], [0], [1], [0, 0, 1, 1], [], []>} : vector<49x32xf32>, vector<32x32xf32>, vector<49x32xf32> -> vector<49x32xf32>
    %106 = arith.addf %99, %105 : vector<49x32xf32>
    %c1_89 = arith.constant 1 : index
    %c0_90 = arith.constant 0 : index
    %c0_91 = arith.constant 0 : index
    %107 = vector.load %arg5[%c1_89, %c0_90, %c0_91] : memref<9x49x196xf32, #tpu.memory_space<vmem>>, vector<1x49x196xf32>
    %108 = vector.shape_cast %107 : vector<1x49x196xf32> to vector<49x196xf32>
    %cst_92 = arith.constant dense<0.000000e+00> : vector<49x32xf32>
    %109 = tpu.matmul %108, %98, %cst_92 {dimension_numbers = #tpu.dot_dimension_numbers<[1], [0], [0], [1], [0, 0, 1, 1], [], []>} : vector<49x196xf32>, vector<196x32xf32>, vector<49x32xf32> -> vector<49x32xf32>
    %c1_93 = arith.constant 1 : index
    %c0_94 = arith.constant 0 : index
    %c0_95 = arith.constant 0 : index
    %110 = vector.load %arg6[%c1_93, %c0_94, %c0_95] : memref<9x32x32xf32, #tpu.memory_space<vmem>>, vector<1x32x32xf32>
    %111 = vector.shape_cast %110 : vector<1x32x32xf32> to vector<32x32xf32>
    %cst_96 = arith.constant dense<0.000000e+00> : vector<49x32xf32>
    %112 = tpu.matmul %109, %111, %cst_96 {dimension_numbers = #tpu.dot_dimension_numbers<[1], [0], [0], [1], [0, 0, 1, 1], [], []>} : vector<49x32xf32>, vector<32x32xf32>, vector<49x32xf32> -> vector<49x32xf32>
    %113 = arith.addf %106, %112 : vector<49x32xf32>
    %c2_97 = arith.constant 2 : index
    %c0_98 = arith.constant 0 : index
    %c0_99 = arith.constant 0 : index
    %114 = vector.load %arg5[%c2_97, %c0_98, %c0_99] : memref<9x49x196xf32, #tpu.memory_space<vmem>>, vector<1x49x196xf32>
    %115 = vector.shape_cast %114 : vector<1x49x196xf32> to vector<49x196xf32>
    %cst_100 = arith.constant dense<0.000000e+00> : vector<49x32xf32>
    %116 = tpu.matmul %115, %98, %cst_100 {dimension_numbers = #tpu.dot_dimension_numbers<[1], [0], [0], [1], [0, 0, 1, 1], [], []>} : vector<49x196xf32>, vector<196x32xf32>, vector<49x32xf32> -> vector<49x32xf32>
    %c2_101 = arith.constant 2 : index
    %c0_102 = arith.constant 0 : index
    %c0_103 = arith.constant 0 : index
    %117 = vector.load %arg6[%c2_101, %c0_102, %c0_103] : memref<9x32x32xf32, #tpu.memory_space<vmem>>, vector<1x32x32xf32>
    %118 = vector.shape_cast %117 : vector<1x32x32xf32> to vector<32x32xf32>
    %cst_104 = arith.constant dense<0.000000e+00> : vector<49x32xf32>
    %119 = tpu.matmul %116, %118, %cst_104 {dimension_numbers = #tpu.dot_dimension_numbers<[1], [0], [0], [1], [0, 0, 1, 1], [], []>} : vector<49x32xf32>, vector<32x32xf32>, vector<49x32xf32> -> vector<49x32xf32>
    %120 = arith.addf %113, %119 : vector<49x32xf32>
    %c3_105 = arith.constant 3 : index
    %c0_106 = arith.constant 0 : index
    %c0_107 = arith.constant 0 : index
    %121 = vector.load %arg5[%c3_105, %c0_106, %c0_107] : memref<9x49x196xf32, #tpu.memory_space<vmem>>, vector<1x49x196xf32>
    %122 = vector.shape_cast %121 : vector<1x49x196xf32> to vector<49x196xf32>
    %cst_108 = arith.constant dense<0.000000e+00> : vector<49x32xf32>
    %123 = tpu.matmul %122, %98, %cst_108 {dimension_numbers = #tpu.dot_dimension_numbers<[1], [0], [0], [1], [0, 0, 1, 1], [], []>} : vector<49x196xf32>, vector<196x32xf32>, vector<49x32xf32> -> vector<49x32xf32>
    %c3_109 = arith.constant 3 : index
    %c0_110 = arith.constant 0 : index
    %c0_111 = arith.constant 0 : index
    %124 = vector.load %arg6[%c3_109, %c0_110, %c0_111] : memref<9x32x32xf32, #tpu.memory_space<vmem>>, vector<1x32x32xf32>
    %125 = vector.shape_cast %124 : vector<1x32x32xf32> to vector<32x32xf32>
    %cst_112 = arith.constant dense<0.000000e+00> : vector<49x32xf32>
    %126 = tpu.matmul %123, %125, %cst_112 {dimension_numbers = #tpu.dot_dimension_numbers<[1], [0], [0], [1], [0, 0, 1, 1], [], []>} : vector<49x32xf32>, vector<32x32xf32>, vector<49x32xf32> -> vector<49x32xf32>
    %127 = arith.addf %120, %126 : vector<49x32xf32>
    %c4_113 = arith.constant 4 : index
    %c0_114 = arith.constant 0 : index
    %c0_115 = arith.constant 0 : index
    %128 = vector.load %arg5[%c4_113, %c0_114, %c0_115] : memref<9x49x196xf32, #tpu.memory_space<vmem>>, vector<1x49x196xf32>
    %129 = vector.shape_cast %128 : vector<1x49x196xf32> to vector<49x196xf32>
    %cst_116 = arith.constant dense<0.000000e+00> : vector<49x32xf32>
    %130 = tpu.matmul %129, %98, %cst_116 {dimension_numbers = #tpu.dot_dimension_numbers<[1], [0], [0], [1], [0, 0, 1, 1], [], []>} : vector<49x196xf32>, vector<196x32xf32>, vector<49x32xf32> -> vector<49x32xf32>
    %c4_117 = arith.constant 4 : index
    %c0_118 = arith.constant 0 : index
    %c0_119 = arith.constant 0 : index
    %131 = vector.load %arg6[%c4_117, %c0_118, %c0_119] : memref<9x32x32xf32, #tpu.memory_space<vmem>>, vector<1x32x32xf32>
    %132 = vector.shape_cast %131 : vector<1x32x32xf32> to vector<32x32xf32>
    %cst_120 = arith.constant dense<0.000000e+00> : vector<49x32xf32>
    %133 = tpu.matmul %130, %132, %cst_120 {dimension_numbers = #tpu.dot_dimension_numbers<[1], [0], [0], [1], [0, 0, 1, 1], [], []>} : vector<49x32xf32>, vector<32x32xf32>, vector<49x32xf32> -> vector<49x32xf32>
    %134 = arith.addf %127, %133 : vector<49x32xf32>
    %c5_121 = arith.constant 5 : index
    %c0_122 = arith.constant 0 : index
    %c0_123 = arith.constant 0 : index
    %135 = vector.load %arg5[%c5_121, %c0_122, %c0_123] : memref<9x49x196xf32, #tpu.memory_space<vmem>>, vector<1x49x196xf32>
    %136 = vector.shape_cast %135 : vector<1x49x196xf32> to vector<49x196xf32>
    %cst_124 = arith.constant dense<0.000000e+00> : vector<49x32xf32>
    %137 = tpu.matmul %136, %98, %cst_124 {dimension_numbers = #tpu.dot_dimension_numbers<[1], [0], [0], [1], [0, 0, 1, 1], [], []>} : vector<49x196xf32>, vector<196x32xf32>, vector<49x32xf32> -> vector<49x32xf32>
    %c5_125 = arith.constant 5 : index
    %c0_126 = arith.constant 0 : index
    %c0_127 = arith.constant 0 : index
    %138 = vector.load %arg6[%c5_125, %c0_126, %c0_127] : memref<9x32x32xf32, #tpu.memory_space<vmem>>, vector<1x32x32xf32>
    %139 = vector.shape_cast %138 : vector<1x32x32xf32> to vector<32x32xf32>
    %cst_128 = arith.constant dense<0.000000e+00> : vector<49x32xf32>
    %140 = tpu.matmul %137, %139, %cst_128 {dimension_numbers = #tpu.dot_dimension_numbers<[1], [0], [0], [1], [0, 0, 1, 1], [], []>} : vector<49x32xf32>, vector<32x32xf32>, vector<49x32xf32> -> vector<49x32xf32>
    %141 = arith.addf %134, %140 : vector<49x32xf32>
    %c6_129 = arith.constant 6 : index
    %c0_130 = arith.constant 0 : index
    %c0_131 = arith.constant 0 : index
    %142 = vector.load %arg5[%c6_129, %c0_130, %c0_131] : memref<9x49x196xf32, #tpu.memory_space<vmem>>, vector<1x49x196xf32>
    %143 = vector.shape_cast %142 : vector<1x49x196xf32> to vector<49x196xf32>
    %cst_132 = arith.constant dense<0.000000e+00> : vector<49x32xf32>
    %144 = tpu.matmul %143, %98, %cst_132 {dimension_numbers = #tpu.dot_dimension_numbers<[1], [0], [0], [1], [0, 0, 1, 1], [], []>} : vector<49x196xf32>, vector<196x32xf32>, vector<49x32xf32> -> vector<49x32xf32>
    %c6_133 = arith.constant 6 : index
    %c0_134 = arith.constant 0 : index
    %c0_135 = arith.constant 0 : index
    %145 = vector.load %arg6[%c6_133, %c0_134, %c0_135] : memref<9x32x32xf32, #tpu.memory_space<vmem>>, vector<1x32x32xf32>
    %146 = vector.shape_cast %145 : vector<1x32x32xf32> to vector<32x32xf32>
    %cst_136 = arith.constant dense<0.000000e+00> : vector<49x32xf32>
    %147 = tpu.matmul %144, %146, %cst_136 {dimension_numbers = #tpu.dot_dimension_numbers<[1], [0], [0], [1], [0, 0, 1, 1], [], []>} : vector<49x32xf32>, vector<32x32xf32>, vector<49x32xf32> -> vector<49x32xf32>
    %148 = arith.addf %141, %147 : vector<49x32xf32>
    %c7_137 = arith.constant 7 : index
    %c0_138 = arith.constant 0 : index
    %c0_139 = arith.constant 0 : index
    %149 = vector.load %arg5[%c7_137, %c0_138, %c0_139] : memref<9x49x196xf32, #tpu.memory_space<vmem>>, vector<1x49x196xf32>
    %150 = vector.shape_cast %149 : vector<1x49x196xf32> to vector<49x196xf32>
    %cst_140 = arith.constant dense<0.000000e+00> : vector<49x32xf32>
    %151 = tpu.matmul %150, %98, %cst_140 {dimension_numbers = #tpu.dot_dimension_numbers<[1], [0], [0], [1], [0, 0, 1, 1], [], []>} : vector<49x196xf32>, vector<196x32xf32>, vector<49x32xf32> -> vector<49x32xf32>
    %c7_141 = arith.constant 7 : index
    %c0_142 = arith.constant 0 : index
    %c0_143 = arith.constant 0 : index
    %152 = vector.load %arg6[%c7_141, %c0_142, %c0_143] : memref<9x32x32xf32, #tpu.memory_space<vmem>>, vector<1x32x32xf32>
    %153 = vector.shape_cast %152 : vector<1x32x32xf32> to vector<32x32xf32>
    %cst_144 = arith.constant dense<0.000000e+00> : vector<49x32xf32>
    %154 = tpu.matmul %151, %153, %cst_144 {dimension_numbers = #tpu.dot_dimension_numbers<[1], [0], [0], [1], [0, 0, 1, 1], [], []>} : vector<49x32xf32>, vector<32x32xf32>, vector<49x32xf32> -> vector<49x32xf32>
    %155 = arith.addf %148, %154 : vector<49x32xf32>
    %c8_145 = arith.constant 8 : index
    %c0_146 = arith.constant 0 : index
    %c0_147 = arith.constant 0 : index
    %156 = vector.load %arg5[%c8_145, %c0_146, %c0_147] : memref<9x49x196xf32, #tpu.memory_space<vmem>>, vector<1x49x196xf32>
    %157 = vector.shape_cast %156 : vector<1x49x196xf32> to vector<49x196xf32>
    %cst_148 = arith.constant dense<0.000000e+00> : vector<49x32xf32>
    %158 = tpu.matmul %157, %98, %cst_148 {dimension_numbers = #tpu.dot_dimension_numbers<[1], [0], [0], [1], [0, 0, 1, 1], [], []>} : vector<49x196xf32>, vector<196x32xf32>, vector<49x32xf32> -> vector<49x32xf32>
    %c8_149 = arith.constant 8 : index
    %c0_150 = arith.constant 0 : index
    %c0_151 = arith.constant 0 : index
    %159 = vector.load %arg6[%c8_149, %c0_150, %c0_151] : memref<9x32x32xf32, #tpu.memory_space<vmem>>, vector<1x32x32xf32>
    %160 = vector.shape_cast %159 : vector<1x32x32xf32> to vector<32x32xf32>
    %cst_152 = arith.constant dense<0.000000e+00> : vector<49x32xf32>
    %161 = tpu.matmul %158, %160, %cst_152 {dimension_numbers = #tpu.dot_dimension_numbers<[1], [0], [0], [1], [0, 0, 1, 1], [], []>} : vector<49x32xf32>, vector<32x32xf32>, vector<49x32xf32> -> vector<49x32xf32>
    %162 = arith.addf %155, %161 : vector<49x32xf32>
    %163 = tpu.concatenate %97, %162 in 0 : vector<49x32xf32>, vector<49x32xf32> -> vector<98x32xf32>
    %c0_153 = arith.constant 0 : index
    %c0_154 = arith.constant 0 : index
    %164 = vector.load %arg7[%c0_153, %c0_154] : memref<1x32xf32, #tpu.memory_space<vmem>>, vector<1x32xf32>
    %165 = vector.broadcast %164 : vector<1x32xf32> to vector<98x32xf32>
    %166 = arith.addf %163, %165 : vector<98x32xf32>
    %c0_155 = arith.constant 0 : index
    %c0_156 = arith.constant 0 : index
    %167 = vector.load %arg8[%c0_155, %c0_156] : memref<1x32xf32, #tpu.memory_space<vmem>>, vector<1x32xf32>
    %c0_157 = arith.constant 0 : index
    %c0_158 = arith.constant 0 : index
    %168 = vector.load %arg9[%c0_157, %c0_158] : memref<1x32xf32, #tpu.memory_space<vmem>>, vector<1x32xf32>
    %cst_159 = arith.constant dense<0.000000e+00> : vector<32xf32>
    %169 = vector.multi_reduction <add>, %166, %cst_159 [0] : vector<98x32xf32> to vector<32xf32>
    %170 = vector.shape_cast %169 : vector<32xf32> to vector<1x32xf32>
    %cst_160 = arith.constant 9.800000e+01 : f32
    %171 = vector.broadcast %cst_160 : f32 to vector<1x32xf32>
    %172 = arith.divf %170, %171 : vector<1x32xf32>
    %173 = arith.mulf %166, %166 : vector<98x32xf32>
    %cst_161 = arith.constant dense<0.000000e+00> : vector<32xf32>
    %174 = vector.multi_reduction <add>, %173, %cst_161 [0] : vector<98x32xf32> to vector<32xf32>
    %175 = vector.shape_cast %174 : vector<32xf32> to vector<1x32xf32>
    %cst_162 = arith.constant 9.800000e+01 : f32
    %176 = vector.broadcast %cst_162 : f32 to vector<1x32xf32>
    %177 = arith.divf %175, %176 : vector<1x32xf32>
    %178 = arith.mulf %172, %172 : vector<1x32xf32>
    %179 = arith.subf %177, %178 : vector<1x32xf32>
    %180 = vector.broadcast %172 : vector<1x32xf32> to vector<98x32xf32>
    %181 = arith.subf %166, %180 : vector<98x32xf32>
    %cst_163 = arith.constant 9.99999974E-6 : f32
    %182 = vector.broadcast %cst_163 : f32 to vector<1x32xf32>
    %183 = arith.addf %179, %182 : vector<1x32xf32>
    %184 = math.rsqrt %183 : vector<1x32xf32>
    %185 = vector.broadcast %184 : vector<1x32xf32> to vector<98x32xf32>
    %186 = arith.mulf %181, %185 : vector<98x32xf32>
    %187 = vector.broadcast %167 : vector<1x32xf32> to vector<98x32xf32>
    %188 = arith.mulf %186, %187 : vector<98x32xf32>
    %189 = vector.broadcast %168 : vector<1x32xf32> to vector<98x32xf32>
    %190 = arith.addf %188, %189 : vector<98x32xf32>
    %cst_164 = arith.constant 2.000000e-01 : f32
    %191 = vector.broadcast %cst_164 : f32 to vector<98x32xf32>
    %192 = arith.mulf %191, %190 : vector<98x32xf32>
    %193 = arith.maximumf %190, %192 : vector<98x32xf32>
    %c0_165 = arith.constant 0 : index
    %c0_166 = arith.constant 0 : index
    %194 = vector.load %arg10[%c0_165, %c0_166] : memref<98x32xf32, #tpu.memory_space<vmem>>, vector<98x32xf32>
    tpu.vector_store %arg10[%c0_165, %c0_166], %193 {strides = array<i32>} : memref<98x32xf32, #tpu.memory_space<vmem>>, vector<98x32xf32>,
    return
  }
}

module attributes {stable_mosaic.version = 11 : i64} {
  func.func @heads_kernel(%arg0: memref<2x1568xf32, #tpu.memory_space<vmem>>, %arg1: memref<1568x56xf32, #tpu.memory_space<vmem>>, %arg2: memref<1x56xf32, #tpu.memory_space<vmem>>, %arg3: memref<1568x56xf32, #tpu.memory_space<vmem>>, %arg4: memref<1x56xf32, #tpu.memory_space<vmem>>, %arg5: memref<2x56xf32, #tpu.memory_space<vmem>>, %arg6: memref<2x56xf32, #tpu.memory_space<vmem>>) attributes {dimension_semantics = [], scalar_prefetch = 0 : i64, scratch_operands = 0 : i64, tpu.core_type = #tpu.core_type<tc>} {
    %c0 = arith.constant 0 : index
    %c0_0 = arith.constant 0 : index
    %0 = vector.load %arg0[%c0, %c0_0] : memref<2x1568xf32, #tpu.memory_space<vmem>>, vector<2x1568xf32>
    %c0_1 = arith.constant 0 : index
    %c0_2 = arith.constant 0 : index
    %1 = vector.load %arg1[%c0_1, %c0_2] : memref<1568x56xf32, #tpu.memory_space<vmem>>, vector<1568x56xf32>
    %cst = arith.constant dense<0.000000e+00> : vector<2x56xf32>
    %2 = tpu.matmul %0, %1, %cst {dimension_numbers = #tpu.dot_dimension_numbers<[1], [0], [0], [1], [0, 0, 1, 1], [], []>} : vector<2x1568xf32>, vector<1568x56xf32>, vector<2x56xf32> -> vector<2x56xf32>
    %c0_3 = arith.constant 0 : index
    %c0_4 = arith.constant 0 : index
    %3 = vector.load %arg2[%c0_3, %c0_4] : memref<1x56xf32, #tpu.memory_space<vmem>>, vector<1x56xf32>
    %4 = vector.broadcast %3 : vector<1x56xf32> to vector<2x56xf32>
    %5 = arith.addf %2, %4 : vector<2x56xf32>
    %c0_5 = arith.constant 0 : index
    %c0_6 = arith.constant 0 : index
    %6 = vector.load %arg5[%c0_5, %c0_6] : memref<2x56xf32, #tpu.memory_space<vmem>>, vector<2x56xf32>
    tpu.vector_store %arg5[%c0_5, %c0_6], %5 {strides = array<i32>} : memref<2x56xf32, #tpu.memory_space<vmem>>, vector<2x56xf32>,
    %c0_7 = arith.constant 0 : index
    %c0_8 = arith.constant 0 : index
    %7 = vector.load %arg3[%c0_7, %c0_8] : memref<1568x56xf32, #tpu.memory_space<vmem>>, vector<1568x56xf32>
    %cst_9 = arith.constant dense<0.000000e+00> : vector<2x56xf32>
    %8 = tpu.matmul %0, %7, %cst_9 {dimension_numbers = #tpu.dot_dimension_numbers<[1], [0], [0], [1], [0, 0, 1, 1], [], []>} : vector<2x1568xf32>, vector<1568x56xf32>, vector<2x56xf32> -> vector<2x56xf32>
    %c0_10 = arith.constant 0 : index
    %c0_11 = arith.constant 0 : index
    %9 = vector.load %arg4[%c0_10, %c0_11] : memref<1x56xf32, #tpu.memory_space<vmem>>, vector<1x56xf32>
    %10 = vector.broadcast %9 : vector<1x56xf32> to vector<2x56xf32>
    %11 = arith.addf %8, %10 : vector<2x56xf32>
    %c0_12 = arith.constant 0 : index
    %c0_13 = arith.constant 0 : index
    %12 = vector.load %arg6[%c0_12, %c0_13] : memref<2x56xf32, #tpu.memory_space<vmem>>, vector<2x56xf32>
    tpu.vector_store %arg6[%c0_12, %c0_13], %11 {strides = array<i32>} : memref<2x56xf32, #tpu.memory_space<vmem>>, vector<2x56xf32>,
    return
  }
}

</mosaic_0001>

<bundles_post_ra>
// kernel: vae_encoder_forward.3
= control target key start
LH: loop header
LB: loop body
LE: loop exit
PB: predicated region body
PF: predicated region fallthrough
CT: control target
= control target key end

     0   :  { %12 = vsyncpa [#allocation3], 0  ;;  %v2031_v30 = vmov 1983009808   ;;  %v239_v32 = vlaneseq  ;;  %vm305_vm0 = vcmask 261120   ;;  %vm2033_vm1 = vmmov 0   ;;  %s3359_s0 = inlined_call_operand.vmem [shape: f32[2,1568], index: 0, kind: input, shape index: {}]   ;;  %s3360_s1 = inlined_call_operand.vmem [shape: f32[1568,56], index: 1, kind: input, shape index: {}]   ;;  %s3361_s2 = inlined_call_operand.vmem [shape: f32[1,56], index: 2, kind: input, shape index: {}]   ;;  %s3362_s3 = inlined_call_operand.vmem [shape: f32[1568,56], index: 3, kind: input, shape index: {}]   ;;  %s3363_s4 = inlined_call_operand.vmem [shape: f32[1,56], index: 4, kind: input, shape index: {}]   ;;  %s3364_s5 = inlined_call_operand.hbm [shape: f32[2,56], index: 5, kind: output, shape index: {0}]   ;;  %s3365_s6 = inlined_call_operand.hbm [shape: f32[2,56], index: 6, kind: output, shape index: {1}]  }
   0x1   :  { %v59_v0 = vld [vmem:[%s3360_s1 + $0xf8] sm:$0xff]  ;;  %v58_v4 = vld [vmem:[%s3360_s1 + $0xf0] sm:$0xff]  ;;  %v57_v8 = vld [vmem:[%s3360_s1 + $0xe8] sm:$0xff]  ;;  %v237_v31 = vunpack.c.l.s4 %v2031_v30 }
   0x2   :  { %v91_v1 = vld [vmem:[%s3360_s1 + $0x1f8] sm:$0xff]  ;;  %1527 = vmatprep.subr.mxu0 %v59_v0  ;;  %v90_v5 = vld [vmem:[%s3360_s1 + $0x1f0] sm:$0xff]  ;;  %v89_v9 = vld [vmem:[%s3360_s1 + $0x1e8] sm:$0xff]  ;;  %v240_v42 = vshrl.u32 %v239_v32, 7 }
   0x3   :  { %v43_v2 = vld [vmem:[%s3360_s1 + $0x78] sm:$0xff]  ;;  %1562 = vmatprep.subr.mxu1 %v91_v1  ;;  %v42_v6 = vld [vmem:[%s3360_s1 + $0x70] sm:$0xff]  ;;  %v41_v10 = vld [vmem:[%s3360_s1 + $0x68] sm:$0xff]  ;;  %v238_v41 = vunpack.c.0.s8 %v237_v31 }
   0x4   :  { %v75_v3 = vld [vmem:[%s3360_s1 + $0x178] sm:$0xff]  ;;  %1528 = vmatpush3.msra.mxu0 %v43_v2  ;;  %v74_v7 = vld [vmem:[%s3360_s1 + $0x170] sm:$0xff]  ;;  %v73_v11 = vld [vmem:[%s3360_s1 + $0x168] sm:$0xff] }
   0x5   :  { %1563 = vmatpush3.msra.mxu1 %v75_v3  ;;  %1529 = vmatprep.subr.mxu0 %v58_v4  ;;  %v56_v12 = vld [vmem:[%s3360_s1 + $0xe0] sm:$0xff]  ;;  %v55_v16 = vld [vmem:[%s3360_s1 + $0xd8] sm:$0xff]  ;;  %v54_v20 = vld [vmem:[%s3360_s1 + $0xd0] sm:$0xff]  ;;  %v2209_v51 = vsub.s32 %v238_v41, %v240_v42 }
   0x6   :  { %1564 = vmatprep.subr.mxu1 %v90_v5  ;;  %1530 = vmatpush3.msra.mxu0 %v42_v6  ;;  %v88_v13 = vld [vmem:[%s3360_s1 + $0x1e0] sm:$0xff]  ;;  %v87_v17 = vld [vmem:[%s3360_s1 + $0x1d8] sm:$0xff]  ;;  %v86_v21 = vld [vmem:[%s3360_s1 + $0x1d0] sm:$0xff] }
   0x7   :  { %1565 = vmatpush3.msra.mxu1 %v74_v7  ;;  %1531 = vmatprep.subr.mxu0 %v57_v8  ;;  %v40_v14 = vld [vmem:[%s3360_s1 + $0x60] sm:$0xff]  ;;  %v39_v18 = vld [vmem:[%s3360_s1 + $0x58] sm:$0xff]  ;;  %v38_v22 = vld [vmem:[%s3360_s1 + $0x50] sm:$0xff] }
   0x8   :  { %1566 = vmatprep.subr.mxu1 %v89_v9  ;;  %v72_v15 = vld [vmem:[%s3360_s1 + $0x160] sm:$0xff]  ;;  %1532 = vmatpush3.msra.mxu0 %v41_v10  ;;  %v71_v19 = vld [vmem:[%s3360_s1 + $0x158] sm:$0xff]  ;;  %v70_v23 = vld [vmem:[%s3360_s1 + $0x150] sm:$0xff] }
   0x9   :  { %1567 = vmatpush3.msra.mxu1 %v73_v11  ;;  %1533 = vmatprep.subr.mxu0 %v56_v12  ;;  %v53_v24 = vld [vmem:[%s3360_s1 + $0xc8] sm:$0xff]  ;;  %v52_v28 = vld [vmem:[%s3360_s1 + $0xc0] sm:$0xff]  ;;  %v51_v35 = vld [vmem:[%s3360_s1 + $0xb8] sm:$0xff] }
   0xa   :  { %1568 = vmatprep.subr.mxu1 %v88_v13  ;;  %1534 = vmatpush3.msra.mxu0 %v40_v14  ;;  %v85_v25 = vld [vmem:[%s3360_s1 + $0x1c8] sm:$0xff]  ;;  %v84_v29 = vld [vmem:[%s3360_s1 + $0x1c0] sm:$0xff]  ;;  %v83_v36 = vld [vmem:[%s3360_s1 + $0x1b8] sm:$0xff] }
   0xb   :  { %1569 = vmatpush3.msra.mxu1 %v72_v15  ;;  %1535 = vmatprep.subr.mxu0 %v55_v16  ;;  %v37_v26 = vld [vmem:[%s3360_s1 + $0x48] sm:$0xff]  ;;  %v36_v33 = vld [vmem:[%s3360_s1 + $0x40] sm:$0xff]  ;;  %v35_v37 = vld [vmem:[%s3360_s1 + $0x38] sm:$0xff] }
   0xc   :  { %1570 = vmatprep.subr.mxu1 %v87_v17  ;;  %1536 = vmatpush3.msra.mxu0 %v39_v18  ;;  %v69_v27 = vld [vmem:[%s3360_s1 + $0x148] sm:$0xff]  ;;  %v68_v34 = vld [vmem:[%s3360_s1 + $0x140] sm:$0xff]  ;;  %v67_v38 = vld [vmem:[%s3360_s1 + $0x138] sm:$0xff] }
   0xd   :  { %1571 = vmatpush3.msra.mxu1 %v71_v19  ;;  %1537 = vmatprep.subr.mxu0 %v54_v20  ;;  %v50_v39 = vld [vmem:[%s3360_s1 + $0xb0] sm:$0xff]  ;;  %v49_v45 = vld [vmem:[%s3360_s1 + $0xa8] sm:$0xff]  ;;  %v48_v49 = vld [vmem:[%s3360_s1 + $0xa0] sm:$0xff] }
   0xe   :  { %1572 = vmatprep.subr.mxu1 %v86_v21  ;;  %1538 = vmatpush3.msra.mxu0 %v38_v22  ;;  %v82_v40 = vld [vmem:[%s3360_s1 + $0x1b0] sm:$0xff]  ;;  %v81_v46 = vld [vmem:[%s3360_s1 + $0x1a8] sm:$0xff]  ;;  %v80_v50 = vld [vmem:[%s3360_s1 + $0x1a0] sm:$0xff] }
   0xf   :  { %1573 = vmatpush3.msra.mxu1 %v70_v23  ;;  %1539 = vmatprep.subr.mxu0 %v53_v24  ;;  %v34_v43 = vld [vmem:[%s3360_s1 + $0x30] sm:$0xff]  ;;  %v33_v47 = vld [vmem:[%s3360_s1 + $0x28] sm:$0xff]  ;;  %v32_v52 = vld [vmem:[%s3360_s1 + $0x20] sm:$0xff] }
  0x10   :  { %1574 = vmatprep.subr.mxu1 %v85_v25  ;;  %1540 = vmatpush3.msra.mxu0 %v37_v26  ;;  %v66_v44 = vld [vmem:[%s3360_s1 + $0x130] sm:$0xff]  ;;  %v65_v48 = vld [vmem:[%s3360_s1 + $0x128] sm:$0xff]  ;;  %v64_v53 = vld [vmem:[%s3360_s1 + $0x120] sm:$0xff] }
  0x11   :  { %1575 = vmatpush3.msra.mxu1 %v69_v27  ;;  %1541 = vmatprep.subr.mxu0 %v52_v28  ;;  %v24_v54 = vld [vmem:[%s3359_s0] sm:$0xff]  ;;  %v47_v55 = vld [vmem:[%s3360_s1 + $0x98] sm:$0xff]  ;;  %v46_v60 = vld [vmem:[%s3360_s1 + $0x90] sm:$0xff] }
  0x12   :  { %1576 = vmatprep.subr.mxu1 %v84_v29  ;;  %1542 = vmatpush3.msra.mxu0 %v36_v33  ;;  %v79_v56 = vld [vmem:[%s3360_s1 + $0x198] sm:$0xff]  ;;  %v235_v57 = vcombine.high %v24_v54, %v24_v54  ;;  %v78_v61 = vld [vmem:[%s3360_s1 + $0x190] sm:$0xff]  ;;  %v2239_v62 = vrot.slane %v24_v54, %v2209_v51  ;;  %v45_v1 = vld [vmem:[%s3360_s1 + $0x88] sm:$0xff] }
  0x13   :  { %1577 = vmatpush3.msra.mxu1 %v68_v34  ;;  %1543 = vmatprep.subr.mxu0 %v51_v35  ;;  %v31_v58 = vld [vmem:[%s3360_s1 + $0x18] sm:$0xff]  ;;  %v30_v63 = vld [vmem:[%s3360_s1 + $0x10] sm:$0xff]  ;;  %v77_v2 = vld [vmem:[%s3360_s1 + $0x188] sm:$0xff] }
  0x14   :  { %1578 = vmatprep.subr.mxu1 %v83_v36  ;;  %1544 = vmatpush3.msra.mxu0 %v35_v37  ;;  %v63_v59 = vld [vmem:[%s3360_s1 + $0x118] sm:$0xff]  ;;  %v62_v0 = vld [vmem:[%s3360_s1 + $0x110] sm:$0xff]  ;;  %v2254_v3 = vrot.slane %v235_v57, %v2209_v51  ;;  %v29_v4 = vld [vmem:[%s3360_s1 + $0x8] sm:$0xff]  ;;  %v2270_v8 = vcombine.high %v2239_v62, %v2239_v62 }
  0x15   :  { %1579 = vmatpush3.msra.mxu1 %v67_v38  ;;  %1545 = vmatprep.subr.mxu0 %v50_v39  ;;  %v61_v5 = vld [vmem:[%s3360_s1 + $0x108] sm:$0xff]  ;;  %v44_v6 = vld [vmem:[%s3360_s1 + $0x80] sm:$0xff]  ;;  %v123_v12 = vld [vmem:[%s3360_s1 + $0x2f8] sm:$0xff] }
  0x16   :  { %1580 = vmatprep.subr.mxu1 %v82_v40  ;;  %1546 = vmatpush3.msra.mxu0 %v34_v43  ;;  %v76_v7 = vld [vmem:[%s3360_s1 + $0x180] sm:$0xff]  ;;  %v2280_v11 = vcombine.high %v2254_v3, %v2254_v3  ;;  %v155_v13 = vld [vmem:[%s3360_s1 + $0x3f8] sm:$0xff]  ;;  %v122_v16 = vld [vmem:[%s3360_s1 + $0x2f0] sm:$0xff] }
  0x17   :  { %1581 = vmatpush3.msra.mxu1 %v66_v44  ;;  %1547 = vmatprep.subr.mxu0 %v49_v45  ;;  %v28_v9 = vld [vmem:[%s3360_s1] sm:$0xff]  ;;  %v107_v14 = vld [vmem:[%s3360_s1 + $0x278] sm:$0xff]  ;;  %v154_v17 = vld [vmem:[%s3360_s1 + $0x3f0] sm:$0xff] }
  0x18   :  { %1582 = vmatprep.subr.mxu1 %v81_v46  ;;  %1548 = vmatpush3.msra.mxu0 %v33_v47  ;;  %v60_v10 = vld [vmem:[%s3360_s1 + $0x100] sm:$0xff]  ;;  %v139_v15 = vld [vmem:[%s3360_s1 + $0x378] sm:$0xff]  ;;  %v106_v18 = vld [vmem:[%s3360_s1 + $0x270] sm:$0xff] }
  0x19   :  { %1583 = vmatpush3.msra.mxu1 %v65_v48  ;;  %1549 = vmatprep.subr.mxu0 %v48_v49  ;;  %v138_v19 = vld [vmem:[%s3360_s1 + $0x370] sm:$0xff]  ;;  %v121_v20 = vld [vmem:[%s3360_s1 + $0x2e8] sm:$0xff]  ;;  %v120_v24 = vld [vmem:[%s3360_s1 + $0x2e0] sm:$0xff] }
  0x1a   :  { %1584 = vmatprep.subr.mxu1 %v80_v50  ;;  %1550 = vmatpush3.msra.mxu0 %v32_v52  ;;  %v153_v21 = vld [vmem:[%s3360_s1 + $0x3e8] sm:$0xff]  ;;  %v152_v25 = vld [vmem:[%s3360_s1 + $0x3e0] sm:$0xff]  ;;  %v119_v28 = vld [vmem:[%s3360_s1 + $0x2d8] sm:$0xff] }
  0x1b   :  { %1585 = vmatpush3.msra.mxu1 %v64_v53  ;;  %1551 = vmatprep.subr.mxu0 %v47_v55  ;;  %v105_v22 = vld [vmem:[%s3360_s1 + $0x268] sm:$0xff]  ;;  %v104_v26 = vld [vmem:[%s3360_s1 + $0x260] sm:$0xff]  ;;  %v151_v29 = vld [vmem:[%s3360_s1 + $0x3d8] sm:$0xff] }
  0x1c   :  { %1586 = vmatprep.subr.mxu1 %v79_v56  ;;  %1552 = vmatpush3.msra.mxu0 %v31_v58  ;;  %v137_v23 = vld [vmem:[%s3360_s1 + $0x368] sm:$0xff]  ;;  %v136_v27 = vld [vmem:[%s3360_s1 + $0x360] sm:$0xff]  ;;  %v103_v30 = vld [vmem:[%s3360_s1 + $0x258] sm:$0xff] }
  0x1d   :  { %1587 = vmatpush3.msra.mxu1 %v63_v59  ;;  %1553 = vmatprep.subr.mxu0 %v46_v60  ;;  %v135_v31 = vld [vmem:[%s3360_s1 + $0x358] sm:$0xff]  ;;  %v118_v32 = vld [vmem:[%s3360_s1 + $0x2d0] sm:$0xff]  ;;  %v117_v36 = vld [vmem:[%s3360_s1 + $0x2c8] sm:$0xff] }
  0x1e   :  { %1588 = vmatprep.subr.mxu1 %v78_v61  ;;  %1554 = vmatpush3.msra.mxu0 %v30_v63  ;;  %v150_v33 = vld [vmem:[%s3360_s1 + $0x3d0] sm:$0xff]  ;;  %v149_v37 = vld [vmem:[%s3360_s1 + $0x3c8] sm:$0xff]  ;;  %v116_v40 = vld [vmem:[%s3360_s1 + $0x2c0] sm:$0xff] }
  0x1f   :  { %1589 = vmatpush3.msra.mxu1 %v62_v0  ;;  %1555 = vmatprep.subr.mxu0 %v45_v1  ;;  %v102_v34 = vld [vmem:[%s3360_s1 + $0x250] sm:$0xff]  ;;  %v101_v38 = vld [vmem:[%s3360_s1 + $0x248] sm:$0xff]  ;;  %v148_v41 = vld [vmem:[%s3360_s1 + $0x3c0] sm:$0xff] }
  0x20   :  { %1590 = vmatprep.subr.mxu1 %v77_v2  ;;  %1556 = vmatpush3.msra.mxu0 %v29_v4  ;;  %v134_v35 = vld [vmem:[%s3360_s1 + $0x350] sm:$0xff]  ;;  %v133_v39 = vld [vmem:[%s3360_s1 + $0x348] sm:$0xff]  ;;  %v100_v42 = vld [vmem:[%s3360_s1 + $0x240] sm:$0xff] }
  0x21   :  { %1591 = vmatpush3.msra.mxu1 %v61_v5  ;;  %1557 = vmatprep.subr.mxu0 %v44_v6  ;;  %v132_v43 = vld [vmem:[%s3360_s1 + $0x340] sm:$0xff]  ;;  %v115_v44 = vld [vmem:[%s3360_s1 + $0x2b8] sm:$0xff]  ;;  %v114_v48 = vld [vmem:[%s3360_s1 + $0x2b0] sm:$0xff] }
  0x22   :  { %1592 = vmatprep.subr.mxu1 %v76_v7  ;;  %1558 = vmatpush3.msra.mxu0 %v28_v9  ;;  %v147_v45 = vld [vmem:[%s3360_s1 + $0x3b8] sm:$0xff]  ;;  %v146_v49 = vld [vmem:[%s3360_s1 + $0x3b0] sm:$0xff]  ;;  %v113_v53 = vld [vmem:[%s3360_s1 + $0x2a8] sm:$0xff] }
  0x23   :  { %372 = vmatprep.mubr.f32.mxu0 %v2270_v8  ;;  %1593 = vmatpush3.msra.mxu1 %v60_v10  ;;  %v99_v46 = vld [vmem:[%s3360_s1 + $0x238] sm:$0xff]  ;;  %v98_v50 = vld [vmem:[%s3360_s1 + $0x230] sm:$0xff]  ;;  %v145_v54 = vld [vmem:[%s3360_s1 + $0x3a8] sm:$0xff] }
  0x24   :  { %373 = vmatmul.mubr.f32.vlgmr.msra.gmra.mxu0 %v2239_v62  ;;  %442 = vmatprep.mubr.f32.mxu1 %v2280_v11  ;;  %v131_v47 = vld [vmem:[%s3360_s1 + $0x338] sm:$0xff]  ;;  %v130_v52 = vld [vmem:[%s3360_s1 + $0x330] sm:$0xff]  ;;  %v97_v55 = vld [vmem:[%s3360_s1 + $0x228] sm:$0xff] }
  0x25   :  { %1597 = vmatprep.subr.mxu0 %v123_v12  ;;  %1632 = vmatprep.subr.mxu1 %v155_v13  ;;  %v129_v56 = vld [vmem:[%s3360_s1 + $0x328] sm:$0xff]  ;;  %v112_v58 = vld [vmem:[%s3360_s1 + $0x2a0] sm:$0xff]  ;;  %v111_v63 = vld [vmem:[%s3360_s1 + $0x298] sm:$0xff] }
  0x26   :  { %443 = vmatmul.mubr.f32.vlgmr.msra.gmra.mxu1 %v2254_v3  ;;  %1598 = vmatpush3.msra.mxu0 %v107_v14  ;;  %v25_v57 = vld [vmem:[%s3359_s0 + $0x8] sm:$0xff]  ;;  %v144_v59 = vld [vmem:[%s3360_s1 + $0x3a0] sm:$0xff]  ;;  %v143_v0 = vld [vmem:[%s3360_s1 + $0x398] sm:$0xff] }
  0x27   :  { %1633 = vmatpush3.msra.mxu1 %v139_v15  ;;  %1599 = vmatprep.subr.mxu0 %v122_v16  ;;  %v96_v60 = vld [vmem:[%s3360_s1 + $0x220] sm:$0xff]  ;;  %v252_v1 = vcombine.high %v25_v57, %v25_v57  ;;  %v95_v2 = vld [vmem:[%s3360_s1 + $0x218] sm:$0xff]  ;;  %v110_v5 = vld [vmem:[%s3360_s1 + $0x290] sm:$0xff]  ;;  %v2452_v7 = vrot.slane %v25_v57, %v2209_v51 }
  0x28   :  { %1634 = vmatprep.subr.mxu1 %v154_v17  ;;  %1600 = vmatpush3.msra.mxu0 %v106_v18  ;;  %v128_v61 = vld [vmem:[%s3360_s1 + $0x320] sm:$0xff]  ;;  %v127_v4 = vld [vmem:[%s3360_s1 + $0x318] sm:$0xff]  ;;  %v142_v6 = vld [vmem:[%s3360_s1 + $0x390] sm:$0xff] }
  0x29   :  { %1635 = vmatpush3.msra.mxu1 %v138_v19  ;;  %1601 = vmatprep.subr.mxu0 %v121_v20  ;;  %v94_v9 = vld [vmem:[%s3360_s1 + $0x210] sm:$0xff]  ;;  %v109_v12 = vld [vmem:[%s3360_s1 + $0x288] sm:$0xff]  ;;  %v2467_v14 = vrot.slane %v252_v1, %v2209_v51  ;;  %v108_v17 = vld [vmem:[%s3360_s1 + $0x280] sm:$0xff]  ;;  %v2483_v19 = vcombine.high %v2452_v7, %v2452_v7 }
  0x2a   :  { %1636 = vmatprep.subr.mxu1 %v153_v21  ;;  %1602 = vmatpush3.msra.mxu0 %v105_v22  ;;  %v126_v10 = vld [vmem:[%s3360_s1 + $0x310] sm:$0xff]  ;;  %v141_v13 = vld [vmem:[%s3360_s1 + $0x388] sm:$0xff]  ;;  %v140_v18 = vld [vmem:[%s3360_s1 + $0x380] sm:$0xff] }
  0x2b   :  { %1637 = vmatpush3.msra.mxu1 %v137_v23  ;;  %1603 = vmatprep.subr.mxu0 %v120_v24  ;;  %v93_v15 = vld [vmem:[%s3360_s1 + $0x208] sm:$0xff]  ;;  %v92_v20 = vld [vmem:[%s3360_s1 + $0x200] sm:$0xff]  ;;  %v2493_v22 = vcombine.high %v2467_v14, %v2467_v14  ;;  %v187_v23 = vld [vmem:[%s3360_s1 + $0x4f8] sm:$0xff] }
  0x2c   :  { %1638 = vmatprep.subr.mxu1 %v152_v25  ;;  %1604 = vmatpush3.msra.mxu0 %v104_v26  ;;  %v125_v16 = vld [vmem:[%s3360_s1 + $0x308] sm:$0xff]  ;;  %v124_v21 = vld [vmem:[%s3360_s1 + $0x300] sm:$0xff]  ;;  %v219_v24 = vld [vmem:[%s3360_s1 + $0x5f8] sm:$0xff] }
  0x2d   :  { %1639 = vmatpush3.msra.mxu1 %v136_v27  ;;  %1605 = vmatprep.subr.mxu0 %v119_v28  ;;  %v171_v25 = vld [vmem:[%s3360_s1 + $0x478] sm:$0xff]  ;;  %v186_v27 = vld [vmem:[%s3360_s1 + $0x4f0] sm:$0xff]  ;;  %v177_v1 = vld [vmem:[%s3360_s1 + $0x4a8] sm:$0xff] }
  0x2e   :  { %1640 = vmatprep.subr.mxu1 %v151_v29  ;;  %1606 = vmatpush3.msra.mxu0 %v103_v30  ;;  %v203_v26 = vld [vmem:[%s3360_s1 + $0x578] sm:$0xff]  ;;  %v218_v28 = vld [vmem:[%s3360_s1 + $0x5f0] sm:$0xff] }
  0x2f   :  { %1641 = vmatpush3.msra.mxu1 %v135_v31  ;;  %1607 = vmatprep.subr.mxu0 %v118_v32  ;;  %v170_v29 = vld [vmem:[%s3360_s1 + $0x470] sm:$0xff]  ;;  %v185_v31 = vld [vmem:[%s3360_s1 + $0x4e8] sm:$0xff]  ;;  %v211_v57 = vld [vmem:[%s3360_s1 + $0x5b8] sm:$0xff] }
  0x30   :  { %1642 = vmatprep.subr.mxu1 %v150_v33  ;;  %1608 = vmatpush3.msra.mxu0 %v102_v34  ;;  %v202_v30 = vld [vmem:[%s3360_s1 + $0x570] sm:$0xff]  ;;  %v217_v32 = vld [vmem:[%s3360_s1 + $0x5e8] sm:$0xff] }
  0x31   :  { %1643 = vmatpush3.msra.mxu1 %v134_v35  ;;  %1609 = vmatprep.subr.mxu0 %v117_v36  ;;  %v169_v33 = vld [vmem:[%s3360_s1 + $0x468] sm:$0xff]  ;;  %v184_v35 = vld [vmem:[%s3360_s1 + $0x4e0] sm:$0xff] }
  0x32   :  { %1644 = vmatprep.subr.mxu1 %v149_v37  ;;  %1610 = vmatpush3.msra.mxu0 %v101_v38  ;;  %v201_v34 = vld [vmem:[%s3360_s1 + $0x568] sm:$0xff]  ;;  %v216_v36 = vld [vmem:[%s3360_s1 + $0x5e0] sm:$0xff] }
  0x33   :  { %1645 = vmatpush3.msra.mxu1 %v133_v39  ;;  %1611 = vmatprep.subr.mxu0 %v116_v40  ;;  %v168_v37 = vld [vmem:[%s3360_s1 + $0x460] sm:$0xff]  ;;  %v183_v39 = vld [vmem:[%s3360_s1 + $0x4d8] sm:$0xff] }
  0x34   :  { %1646 = vmatprep.subr.mxu1 %v148_v41  ;;  %1612 = vmatpush3.msra.mxu0 %v100_v42  ;;  %v200_v38 = vld [vmem:[%s3360_s1 + $0x560] sm:$0xff]  ;;  %v215_v40 = vld [vmem:[%s3360_s1 + $0x5d8] sm:$0xff] }
  0x35   :  { %1647 = vmatpush3.msra.mxu1 %v132_v43  ;;  %1613 = vmatprep.subr.mxu0 %v115_v44  ;;  %v167_v41 = vld [vmem:[%s3360_s1 + $0x458] sm:$0xff]  ;;  %v182_v43 = vld [vmem:[%s3360_s1 + $0x4d0] sm:$0xff] }
  0x36   :  { %1648 = vmatprep.subr.mxu1 %v147_v45  ;;  %1614 = vmatpush3.msra.mxu0 %v99_v46  ;;  %v199_v42 = vld [vmem:[%s3360_s1 + $0x558] sm:$0xff]  ;;  %v214_v44 = vld [vmem:[%s3360_s1 + $0x5d0] sm:$0xff] }
  0x37   :  { %1649 = vmatpush3.msra.mxu1 %v131_v47  ;;  %1615 = vmatprep.subr.mxu0 %v114_v48  ;;  %v166_v45 = vld [vmem:[%s3360_s1 + $0x450] sm:$0xff]  ;;  %v181_v47 = vld [vmem:[%s3360_s1 + $0x4c8] sm:$0xff] }
  0x38   :  { %1650 = vmatprep.subr.mxu1 %v146_v49  ;;  %1616 = vmatpush3.msra.mxu0 %v98_v50  ;;  %v198_v46 = vld [vmem:[%s3360_s1 + $0x550] sm:$0xff]  ;;  %v213_v48 = vld [vmem:[%s3360_s1 + $0x5c8] sm:$0xff] }
  0x39   :  { %1651 = vmatpush3.msra.mxu1 %v130_v52  ;;  %1617 = vmatprep.subr.mxu0 %v113_v53  ;;  %v165_v49 = vld [vmem:[%s3360_s1 + $0x448] sm:$0xff]  ;;  %v180_v52 = vld [vmem:[%s3360_s1 + $0x4c0] sm:$0xff] }
  0x3a   :  { %1652 = vmatprep.subr.mxu1 %v145_v54  ;;  %1618 = vmatpush3.msra.mxu0 %v97_v55  ;;  %v197_v50 = vld [vmem:[%s3360_s1 + $0x548] sm:$0xff]  ;;  %v212_v53 = vld [vmem:[%s3360_s1 + $0x5c0] sm:$0xff] }
  0x3b   :  { %1653 = vmatpush3.msra.mxu1 %v129_v56  ;;  %1619 = vmatprep.subr.mxu0 %v112_v58  ;;  %v164_v54 = vld [vmem:[%s3360_s1 + $0x440] sm:$0xff]  ;;  %v179_v56 = vld [vmem:[%s3360_s1 + $0x4b8] sm:$0xff] }
  0x3c   :  { %1654 = vmatprep.subr.mxu1 %v144_v59  ;;  %1620 = vmatpush3.msra.mxu0 %v96_v60  ;;  %v196_v55 = vld [vmem:[%s3360_s1 + $0x540] sm:$0xff]  ;;  %v163_v58 = vld [vmem:[%s3360_s1 + $0x438] sm:$0xff]  ;;  %v178_v60 = vld [vmem:[%s3360_s1 + $0x4b0] sm:$0xff] }
  0x3d   :  { %1655 = vmatpush3.msra.mxu1 %v128_v61  ;;  %1621 = vmatprep.subr.mxu0 %v111_v63  ;;  %v195_v59 = vld [vmem:[%s3360_s1 + $0x538] sm:$0xff]  ;;  %v210_v61 = vld [vmem:[%s3360_s1 + $0x5b0] sm:$0xff] }
  0x3e   :  { %1656 = vmatprep.subr.mxu1 %v143_v0  ;;  %1622 = vmatpush3.msra.mxu0 %v95_v2  ;;  %v162_v63 = vld [vmem:[%s3360_s1 + $0x430] sm:$0xff]  ;;  %v209_v2 = vld [vmem:[%s3360_s1 + $0x5a8] sm:$0xff] }
  0x3f   :  { %1657 = vmatpush3.msra.mxu1 %v127_v4  ;;  %1623 = vmatprep.subr.mxu0 %v110_v5  ;;  %v194_v0 = vld [vmem:[%s3360_s1 + $0x530] sm:$0xff]  ;;  %v161_v4 = vld [vmem:[%s3360_s1 + $0x428] sm:$0xff] }
  0x40   :  { %1658 = vmatprep.subr.mxu1 %v142_v6  ;;  %1624 = vmatpush3.msra.mxu0 %v94_v9  ;;  %v193_v5 = vld [vmem:[%s3360_s1 + $0x528] sm:$0xff]  ;;  %v26_v6 = vld [vmem:[%s3359_s0 + $0x10] sm:$0xff]  ;;  %v176_v9 = vld [vmem:[%s3360_s1 + $0x4a0] sm:$0xff] }
  0x41   :  { %1659 = vmatpush3.msra.mxu1 %v126_v10  ;;  %1625 = vmatprep.subr.mxu0 %v109_v12  ;;  %v208_v10 = vld [vmem:[%s3360_s1 + $0x5a0] sm:$0xff] }
  0x42   :  { %1660 = vmatprep.subr.mxu1 %v141_v13  ;;  %1626 = vmatpush3.msra.mxu0 %v93_v15  ;;  %v160_v12 = vld [vmem:[%s3360_s1 + $0x420] sm:$0xff]  ;;  %v175_v15 = vld [vmem:[%s3360_s1 + $0x498] sm:$0xff] }
  0x43   :  { %1661 = vmatpush3.msra.mxu1 %v125_v16  ;;  %1627 = vmatprep.subr.mxu0 %v108_v17  ;;  %v192_v13 = vld [vmem:[%s3360_s1 + $0x520] sm:$0xff]  ;;  %v207_v16 = vld [vmem:[%s3360_s1 + $0x598] sm:$0xff]  ;;  %v269_v17 = vcombine.high %v26_v6, %v26_v6 }
  0x44   :  { %1662 = vmatprep.subr.mxu1 %v140_v18  ;;  %1628 = vmatpush3.msra.mxu0 %v92_v20  ;;  %v159_v18 = vld [vmem:[%s3360_s1 + $0x418] sm:$0xff] }
  0x45   :  { %512 = vmatprep.mubr.f32.mxu0 %v2483_v19  ;;  %1663 = vmatpush3.msra.mxu1 %v124_v21  ;;  %v191_v20 = vld [vmem:[%s3360_s1 + $0x518] sm:$0xff]  ;;  %v174_v21 = vld [vmem:[%s3360_s1 + $0x490] sm:$0xff] }
  0x46   :  { %513 = vmatmul.mubr.f32.vlgmr.msra.gmra.mxu0 %v2452_v7  ;;  %582 = vmatprep.mubr.f32.mxu1 %v2493_v22 }
  0x47   :  { %1667 = vmatprep.subr.mxu0 %v187_v23  ;;  %1702 = vmatprep.subr.mxu1 %v219_v24  ;;  %v206_v23 = vld [vmem:[%s3360_s1 + $0x590] sm:$0xff]  ;;  %v2665_v24 = vrot.slane %v26_v6, %v2209_v51  ;;  %v823_v6 = vld [vmem:[%s3362_s3 + $0xb8] sm:$0xff] }
  0x48   :  { %583 = vmatmul.mubr.f32.vlgmr.msra.gmra.mxu1 %v2467_v14  ;;  %1668 = vmatpush3.msra.mxu0 %v171_v25  ;;  %v158_v25 = vld [vmem:[%s3360_s1 + $0x410] sm:$0xff] }
  0x49   :  { %1703 = vmatpush3.msra.mxu1 %v203_v26  ;;  %1669 = vmatprep.subr.mxu0 %v186_v27  ;;  %v190_v26 = vld [vmem:[%s3360_s1 + $0x510] sm:$0xff]  ;;  %v173_v27 = vld [vmem:[%s3360_s1 + $0x488] sm:$0xff] }
  0x4a   :  { %1704 = vmatprep.subr.mxu1 %v218_v28  ;;  %1670 = vmatpush3.msra.mxu0 %v170_v29  ;;  %v205_v28 = vld [vmem:[%s3360_s1 + $0x588] sm:$0xff]  ;;  %v2680_v29 = vrot.slane %v269_v17, %v2209_v51  ;;  %v204_v51 = vld [vmem:[%s3360_s1 + $0x580] sm:$0xff]  ;;  %v842_v17 = vld [vmem:[%s3362_s3 + $0x150] sm:$0xff] }
  0x4b   :  { %1705 = vmatpush3.msra.mxu1 %v202_v30  ;;  %1671 = vmatprep.subr.mxu0 %v185_v31  ;;  %v157_v30 = vld [vmem:[%s3360_s1 + $0x408] sm:$0xff] }
  0x4c   :  { %1706 = vmatprep.subr.mxu1 %v217_v32  ;;  %1672 = vmatpush3.msra.mxu0 %v169_v33  ;;  %v189_v31 = vld [vmem:[%s3360_s1 + $0x508] sm:$0xff]  ;;  %v172_v32 = vld [vmem:[%s3360_s1 + $0x480] sm:$0xff]  ;;  %v2696_v33 = vcombine.high %v2665_v24, %v2665_v24 }
  0x4d   :  { %1707 = vmatpush3.msra.mxu1 %v201_v34  ;;  %1673 = vmatprep.subr.mxu0 %v184_v35  ;;  %v156_v34 = vld [vmem:[%s3360_s1 + $0x400] sm:$0xff] }
  0x4e   :  { %1708 = vmatprep.subr.mxu1 %v216_v36  ;;  %1674 = vmatpush3.msra.mxu0 %v168_v37  ;;  %v188_v35 = vld [vmem:[%s3360_s1 + $0x500] sm:$0xff]  ;;  %v2706_v36 = vcombine.high %v2680_v29, %v2680_v29  ;;  %v831_v37 = vld [vmem:[%s3362_s3 + $0xf8] sm:$0xff] }
  0x4f   :  { %1709 = vmatpush3.msra.mxu1 %v200_v38  ;;  %1675 = vmatprep.subr.mxu0 %v183_v39  ;;  %v223_v38 = vld [vmem:[%s3360_s1 + $0x618] sm:$0xff] }
  0x50   :  { %1710 = vmatprep.subr.mxu1 %v215_v40  ;;  %1676 = vmatpush3.msra.mxu0 %v167_v41  ;;  %v815_v39 = vld [vmem:[%s3362_s3 + $0x78] sm:$0xff]  ;;  %v2032_v40 = vmov 0.0   ;;  %v830_v41 = vld [vmem:[%s3362_s3 + $0xf0] sm:$0xff] }
  0x51   :  { %1711 = vmatpush3.msra.mxu1 %v199_v42  ;;  %1677 = vmatprep.subr.mxu0 %v182_v43  ;;  %v222_v42 = vld [vmem:[%s3360_s1 + $0x610] sm:$0xff] }
  0x52   :  { %1712 = vmatprep.subr.mxu1 %v214_v44  ;;  %1678 = vmatpush3.msra.mxu0 %v166_v45  ;;  %v814_v43 = vld [vmem:[%s3362_s3 + $0x70] sm:$0xff]  ;;  %v829_v44 = vld [vmem:[%s3362_s3 + $0xe8] sm:$0xff] }
  0x53   :  { %1713 = vmatpush3.msra.mxu1 %v198_v46  ;;  %1679 = vmatprep.subr.mxu0 %v181_v47  ;;  %v221_v45 = vld [vmem:[%s3360_s1 + $0x608] sm:$0xff]  ;;  %v828_v47 = vld [vmem:[%s3362_s3 + $0xe0] sm:$0xff] }
  0x54   :  { %1714 = vmatprep.subr.mxu1 %v213_v48  ;;  %1680 = vmatpush3.msra.mxu0 %v165_v49  ;;  %v813_v46 = vld [vmem:[%s3362_s3 + $0x68] sm:$0xff]  ;;  %v220_v48 = vld [vmem:[%s3360_s1 + $0x600] sm:$0xff] }
  0x55   :  { %1715 = vmatpush3.msra.mxu1 %v197_v50  ;;  %1681 = vmatprep.subr.mxu0 %v180_v52  ;;  %v812_v49 = vld [vmem:[%s3362_s3 + $0x60] sm:$0xff]  ;;  %v2754_v50 = vld.sshfl [vmem:[%s3359_s0 + $0x18] sm:$0x3 pattern:$0x76325410] }
  0x56   :  { %1716 = vmatprep.subr.mxu1 %v212_v53  ;;  %1682 = vmatpush3.msra.mxu0 %v164_v54  ;;  %v827_v52 = vld [vmem:[%s3362_s3 + $0xd8] sm:$0xff] }
  0x57   :  { %1717 = vmatpush3.msra.mxu1 %v196_v55  ;;  %1683 = vmatprep.subr.mxu0 %v179_v56  ;;  %v863_v53 = vld [vmem:[%s3362_s3 + $0x1f8] sm:$0xff]  ;;  %v826_v56 = vld [vmem:[%s3362_s3 + $0xd0] sm:$0xff] }
  0x58   :  { %1718 = vmatprep.subr.mxu1 %v211_v57  ;;  %1684 = vmatpush3.msra.mxu0 %v163_v58  ;;  %v811_v54 = vld [vmem:[%s3362_s3 + $0x58] sm:$0xff]  ;;  %v862_v57 = vld [vmem:[%s3362_s3 + $0x1f0] sm:$0xff] }
  0x59   :  { %1719 = vmatpush3.msra.mxu1 %v195_v59  ;;  %1685 = vmatprep.subr.mxu0 %v178_v60  ;;  %v847_v55 = vld [vmem:[%s3362_s3 + $0x178] sm:$0xff]  ;;  %v810_v58 = vld [vmem:[%s3362_s3 + $0x50] sm:$0xff]  ;;  %v825_v60 = vld [vmem:[%s3362_s3 + $0xc8] sm:$0xff] }
  0x5a   :  { %1720 = vmatprep.subr.mxu1 %v210_v61  ;;  %1686 = vmatpush3.msra.mxu0 %v162_v63  ;;  %v846_v59 = vld [vmem:[%s3362_s3 + $0x170] sm:$0xff]  ;;  %v861_v61 = vld [vmem:[%s3362_s3 + $0x1e8] sm:$0xff] }
  0x5b   :  { %1721 = vmatpush3.msra.mxu1 %v194_v0  ;;  %1687 = vmatprep.subr.mxu0 %v177_v1  ;;  %v809_v63 = vld [vmem:[%s3362_s3 + $0x48] sm:$0xff]  ;;  %v824_v1 = vld [vmem:[%s3362_s3 + $0xc0] sm:$0xff] }
  0x5c   :  { %1722 = vmatprep.subr.mxu1 %v209_v2  ;;  %1688 = vmatpush3.msra.mxu0 %v161_v4  ;;  %v845_v0 = vld [vmem:[%s3362_s3 + $0x168] sm:$0xff]  ;;  %v860_v2 = vld [vmem:[%s3362_s3 + $0x1e0] sm:$0xff] }
  0x5d   :  { %1723 = vmatpush3.msra.mxu1 %v193_v5  ;;  %1689 = vmatprep.subr.mxu0 %v176_v9  ;;  %v808_v4 = vld [vmem:[%s3362_s3 + $0x40] sm:$0xff]  ;;  %v859_v9 = vld [vmem:[%s3362_s3 + $0x1d8] sm:$0xff] }
  0x5e   :  { %1724 = vmatprep.subr.mxu1 %v208_v10  ;;  %1690 = vmatpush3.msra.mxu0 %v160_v12  ;;  %v844_v5 = vld [vmem:[%s3362_s3 + $0x160] sm:$0xff]  ;;  %v807_v10 = vld [vmem:[%s3362_s3 + $0x38] sm:$0xff] }
  0x5f   :  { %1725 = vmatpush3.msra.mxu1 %v192_v13  ;;  %1691 = vmatprep.subr.mxu0 %v175_v15  ;;  %v843_v12 = vld [vmem:[%s3362_s3 + $0x158] sm:$0xff]  ;;  %v822_v13 = vld [vmem:[%s3362_s3 + $0xb0] sm:$0xff] }
  0x60   :  { %1726 = vmatprep.subr.mxu1 %v207_v16  ;;  %1692 = vmatpush3.msra.mxu0 %v159_v18  ;;  %v858_v15 = vld [vmem:[%s3362_s3 + $0x1d0] sm:$0xff]  ;;  %v821_v18 = vld [vmem:[%s3362_s3 + $0xa8] sm:$0xff] }
  0x61   :  { %1727 = vmatpush3.msra.mxu1 %v191_v20  ;;  %1693 = vmatprep.subr.mxu0 %v174_v21  ;;  %v806_v16 = vld [vmem:[%s3362_s3 + $0x30] sm:$0xff]  ;;  %v857_v20 = vld [vmem:[%s3362_s3 + $0x1c8] sm:$0xff] }
  0x62   :  { %1728 = vmatprep.subr.mxu1 %v206_v23  ;;  %1694 = vmatpush3.msra.mxu0 %v158_v25  ;;  %v805_v21 = vld [vmem:[%s3362_s3 + $0x28] sm:$0xff]  ;;  %v820_v25 = vld [vmem:[%s3362_s3 + $0xa0] sm:$0xff] }
  0x63   :  { %1729 = vmatpush3.msra.mxu1 %v190_v26  ;;  %1695 = vmatprep.subr.mxu0 %v173_v27  ;;  %v841_v23 = vld [vmem:[%s3362_s3 + $0x148] sm:$0xff]  ;;  %v856_v26 = vld [vmem:[%s3362_s3 + $0x1c0] sm:$0xff] }
  0x64   :  { %1730 = vmatprep.subr.mxu1 %v205_v28  ;;  %1696 = vmatpush3.msra.mxu0 %v157_v30  ;;  %v804_v27 = vld [vmem:[%s3362_s3 + $0x20] sm:$0xff]  ;;  %v819_v30 = vld [vmem:[%s3362_s3 + $0x98] sm:$0xff] }
  0x65   :  { %1731 = vmatpush3.msra.mxu1 %v189_v31  ;;  %1697 = vmatprep.subr.mxu0 %v172_v32  ;;  %v840_v28 = vld [vmem:[%s3362_s3 + $0x140] sm:$0xff]  ;;  %v855_v31 = vld [vmem:[%s3362_s3 + $0x1b8] sm:$0xff] }
  0x66   :  { %1732 = vmatprep.subr.mxu1 %v204_v51  ;;  %1698 = vmatpush3.msra.mxu0 %v156_v34  ;;  %v803_v32 = vld [vmem:[%s3362_s3 + $0x18] sm:$0xff]  ;;  %v818_v34 = vld [vmem:[%s3362_s3 + $0x90] sm:$0xff] }
  0x67   :  { %652 = vmatprep.mubr.f32.mxu0 %v2696_v33  ;;  %1733 = vmatpush3.msra.mxu1 %v188_v35  ;;  %v839_v51 = vld [vmem:[%s3362_s3 + $0x138] sm:$0xff]  ;;  %v854_v35 = vld [vmem:[%s3362_s3 + $0x1b0] sm:$0xff] }
  0x68   :  { %653 = vmatmul.mubr.f32.vlgmr.msra.gmra.mxu0 %v2665_v24  ;;  %722 = vmatprep.mubr.f32.mxu1 %v2706_v36 }
  0x69   :  { %1957 = vmatprep.subr.mxu0 %v2032_v40  ;;  %1742 = vmatprep.subr.mxu1 %v831_v37  ;;  %v802_v37 = vld [vmem:[%s3362_s3 + $0x10] sm:$0xff] }
  0x6a   :  { %723 = vmatmul.mubr.f32.vlgmr.msra.gmra.mxu1 %v2680_v29  ;;  %1958 = vmatpush3.msra.mxu0 %v223_v38  ;;  %v838_v38 = vld [vmem:[%s3362_s3 + $0x130] sm:$0xff] }
  0x6b   :  { %1743 = vmatpush3.msra.mxu1 %v815_v39  ;;  %1959 = vmatprep.subr.mxu0 %v2032_v40  ;;  %v817_v39 = vld [vmem:[%s3362_s3 + $0x88] sm:$0xff] }
  0x6c   :  { %1744 = vmatprep.subr.mxu1 %v830_v41  ;;  %1960 = vmatpush3.msra.mxu0 %v222_v42  ;;  %v853_v41 = vld [vmem:[%s3362_s3 + $0x1a8] sm:$0xff] }
  0x6d   :  { %1745 = vmatpush3.msra.mxu1 %v814_v43  ;;  %1961 = vmatprep.subr.mxu0 %v2032_v40  ;;  %v801_v42 = vld [vmem:[%s3362_s3 + $0x8] sm:$0xff] }
  0x6e   :  { %1746 = vmatprep.subr.mxu1 %v829_v44  ;;  %1962 = vmatpush3.msra.mxu0 %v221_v45  ;;  %v837_v43 = vld [vmem:[%s3362_s3 + $0x128] sm:$0xff]  ;;  %v816_v44 = vld [vmem:[%s3362_s3 + $0x80] sm:$0xff] }
  0x6f   :  { %1747 = vmatpush3.msra.mxu1 %v813_v46  ;;  %1963 = vmatprep.subr.mxu0 %v2032_v40  ;;  %v852_v45 = vld [vmem:[%s3362_s3 + $0x1a0] sm:$0xff] }
  0x70   :  { %1748 = vmatprep.subr.mxu1 %v828_v47  ;;  %1964 = vmatpush3.msra.mxu0 %v220_v48  ;;  %v800_v46 = vld [vmem:[%s3362_s3] sm:$0xff] }
  0x71   :  { %1965 = vmatprep.mubr.msk.f32.mxu0 %vm2033_vm1, %v2032_v40  ;;  %1749 = vmatpush3.msra.mxu1 %v812_v49  ;;  %v836_v47 = vld [vmem:[%s3362_s3 + $0x120] sm:$0xff] }
  0x72   :  { %1966 = vmatmul.mubr.msk.f32.vlgmr.msra.gmra.mxu0 %vm305_vm0, %v2754_v50  ;;  %1750 = vmatprep.subr.mxu1 %v827_v52 }
  0x73   :  { %1777 = vmatprep.subr.mxu0 %v863_v53  ;;  %1751 = vmatpush3.msra.mxu1 %v811_v54 }
  0x74   :  { %1778 = vmatpush3.msra.mxu0 %v847_v55  ;;  %1752 = vmatprep.subr.mxu1 %v826_v56 }
  0x75   :  { %1779 = vmatprep.subr.mxu0 %v862_v57  ;;  %1753 = vmatpush3.msra.mxu1 %v810_v58 }
  0x76   :  { %1780 = vmatpush3.msra.mxu0 %v846_v59  ;;  %1754 = vmatprep.subr.mxu1 %v825_v60 }
  0x77   :  { %1781 = vmatprep.subr.mxu0 %v861_v61  ;;  %1755 = vmatpush3.msra.mxu1 %v809_v63 }
  0x78   :  { %1782 = vmatpush3.msra.mxu0 %v845_v0  ;;  %1756 = vmatprep.subr.mxu1 %v824_v1 }
  0x79   :  { %1783 = vmatprep.subr.mxu0 %v860_v2  ;;  %1757 = vmatpush3.msra.mxu1 %v808_v4 }
  0x7a   :  { %1784 = vmatpush3.msra.mxu0 %v844_v5  ;;  %1758 = vmatprep.subr.mxu1 %v823_v6 }
  0x7b   :  { %1785 = vmatprep.subr.mxu0 %v859_v9  ;;  %1759 = vmatpush3.msra.mxu1 %v807_v10 }
  0x7c   :  { %1786 = vmatpush3.msra.mxu0 %v843_v12  ;;  %1760 = vmatprep.subr.mxu1 %v822_v13 }
  0x7d   :  { %1787 = vmatprep.subr.mxu0 %v858_v15  ;;  %1761 = vmatpush3.msra.mxu1 %v806_v16 }
  0x7e   :  { %1788 = vmatpush3.msra.mxu0 %v842_v17  ;;  %1762 = vmatprep.subr.mxu1 %v821_v18 }
  0x7f   :  { %1789 = vmatprep.subr.mxu0 %v857_v20  ;;  %1763 = vmatpush3.msra.mxu1 %v805_v21 }
  0x80   :  { %1790 = vmatpush3.msra.mxu0 %v841_v23  ;;  %1764 = vmatprep.subr.mxu1 %v820_v25 }
  0x81   :  { %1791 = vmatprep.subr.mxu0 %v856_v26  ;;  %1765 = vmatpush3.msra.mxu1 %v804_v27 }
  0x82   :  { %1792 = vmatpush3.msra.mxu0 %v840_v28  ;;  %1766 = vmatprep.subr.mxu1 %v819_v30 }
  0x83   :  { %1793 = vmatprep.subr.mxu0 %v855_v31  ;;  %1767 = vmatpush3.msra.mxu1 %v803_v32 }
  0x84   :  { %1794 = vmatpush3.msra.mxu0 %v839_v51  ;;  %1768 = vmatprep.subr.mxu1 %v818_v34 }
  0x85   :  { %1795 = vmatprep.subr.mxu0 %v854_v35  ;;  %1769 = vmatpush3.msra.mxu1 %v802_v37 }
  0x86   :  { %1796 = vmatpush3.msra.mxu0 %v838_v38  ;;  %1770 = vmatprep.subr.mxu1 %v817_v39 }
  0x87   :  { %1797 = vmatprep.subr.mxu0 %v853_v41 }
  0x88   :  { %13 = vsyncpa [#allocation5], 0  ;;  %1771 = vmatpush3.msra.mxu1 %v801_v42  ;;  %1798 = vmatpush3.msra.mxu0 %v837_v43  ;;  %v851_v48 = vld [vmem:[%s3362_s3 + $0x198] sm:$0xff]  ;;  %v850_v54 = vld [vmem:[%s3362_s3 + $0x190] sm:$0xff]  ;;  %vm798_vm2 = vcmask 451584  }
  0x89   :  { %1772 = vmatprep.subr.mxu1 %v816_v44  ;;  %1799 = vmatprep.subr.mxu0 %v852_v45  ;;  %v895_v49 = vld [vmem:[%s3362_s3 + $0x2f8] sm:$0xff]  ;;  %v894_v55 = vld [vmem:[%s3362_s3 + $0x2f0] sm:$0xff]  ;;  %v849_v57 = vld [vmem:[%s3362_s3 + $0x188] sm:$0xff] }
  0x8a   :  { %1773 = vmatpush3.msra.mxu1 %v800_v46  ;;  %1800 = vmatpush3.msra.mxu0 %v836_v47  ;;  %v835_v52 = vld [vmem:[%s3362_s3 + $0x118] sm:$0xff]  ;;  %v834_v56 = vld [vmem:[%s3362_s3 + $0x110] sm:$0xff]  ;;  %v893_v58 = vld [vmem:[%s3362_s3 + $0x2e8] sm:$0xff] }
  0x8b   :  { %v879_v53 = vld [vmem:[%s3362_s3 + $0x278] sm:$0xff]  ;;  %1067 = vmatprep.mubr.f32.mxu1 %v2270_v8  ;;  %1801 = vmatprep.subr.mxu0 %v851_v48  ;;  %v878_v8 = vld [vmem:[%s3362_s3 + $0x270] sm:$0xff]  ;;  %v877_v59 = vld [vmem:[%s3362_s3 + $0x268] sm:$0xff] }
  0x8c   :  { %1812 = vmatprep.subr.mxu1 %v895_v49  ;;  %1068 = vmatmul.mubr.f32.vlgmr.msra.gmra.mxu1 %v2239_v62  ;;  %v833_v62 = vld [vmem:[%s3362_s3 + $0x108] sm:$0xff]  ;;  %v848_v60 = vld [vmem:[%s3362_s3 + $0x180] sm:$0xff]  ;;  %v891_v1 = vld [vmem:[%s3362_s3 + $0x2d8] sm:$0xff] }
  0x8d   :  { %1802 = vmatpush3.msra.mxu0 %v835_v52  ;;  %1813 = vmatpush3.msra.mxu1 %v879_v53  ;;  %v892_v61 = vld [vmem:[%s3362_s3 + $0x2e0] sm:$0xff]  ;;  %v927_v2 = vld [vmem:[%s3362_s3 + $0x3f8] sm:$0xff]  ;;  %v890_v6 = vld [vmem:[%s3362_s3 + $0x2d0] sm:$0xff] }
  0x8e   :  { %1803 = vmatprep.subr.mxu0 %v850_v54  ;;  %1814 = vmatprep.subr.mxu1 %v894_v55  ;;  %v832_v63 = vld [vmem:[%s3362_s3 + $0x100] sm:$0xff]  ;;  %v875_v4 = vld [vmem:[%s3362_s3 + $0x258] sm:$0xff]  ;;  %v926_v9 = vld [vmem:[%s3362_s3 + $0x3f0] sm:$0xff] }
  0x8f   :  { %1804 = vmatpush3.msra.mxu0 %v834_v56  ;;  %1815 = vmatpush3.msra.mxu1 %v878_v8  ;;  %v876_v0 = vld [vmem:[%s3362_s3 + $0x260] sm:$0xff]  ;;  %v911_v5 = vld [vmem:[%s3362_s3 + $0x378] sm:$0xff]  ;;  %v910_v10 = vld [vmem:[%s3362_s3 + $0x370] sm:$0xff] }
  0x90   :  { %1805 = vmatprep.subr.mxu0 %v849_v57  ;;  %1816 = vmatprep.subr.mxu1 %v893_v58  ;;  %v925_v12 = vld [vmem:[%s3362_s3 + $0x3e8] sm:$0xff]  ;;  %v888_v16 = vld [vmem:[%s3362_s3 + $0x2c0] sm:$0xff]  ;;  %v887_v21 = vld [vmem:[%s3362_s3 + $0x2b8] sm:$0xff] }
  0x91   :  { %1806 = vmatpush3.msra.mxu0 %v833_v62  ;;  %1817 = vmatpush3.msra.mxu1 %v877_v59  ;;  %v873_v13 = vld [vmem:[%s3362_s3 + $0x248] sm:$0xff]  ;;  %v924_v17 = vld [vmem:[%s3362_s3 + $0x3e0] sm:$0xff]  ;;  %v923_v23 = vld [vmem:[%s3362_s3 + $0x3d8] sm:$0xff] }
  0x92   :  { %1807 = vmatprep.subr.mxu0 %v848_v60  ;;  %1818 = vmatprep.subr.mxu1 %v892_v61  ;;  %v909_v15 = vld [vmem:[%s3362_s3 + $0x368] sm:$0xff]  ;;  %v872_v18 = vld [vmem:[%s3362_s3 + $0x240] sm:$0xff]  ;;  %v871_v25 = vld [vmem:[%s3362_s3 + $0x238] sm:$0xff] }
  0x93   :  { %1808 = vmatpush3.msra.mxu0 %v832_v63  ;;  %1137 = vmatprep.mubr.f32.mxu0 %v2280_v11  ;;  %v874_v11 = vld [vmem:[%s3362_s3 + $0x250] sm:$0xff]  ;;  %v908_v20 = vld [vmem:[%s3362_s3 + $0x360] sm:$0xff]  ;;  %v907_v26 = vld [vmem:[%s3362_s3 + $0x358] sm:$0xff] }
  0x94   :  { %1819 = vmatpush3.msra.mxu1 %v876_v0  ;;  %1138 = vmatmul.mubr.f32.vlgmr.msra.gmra.mxu0 %v2254_v3  ;;  %v889_v3 = vld [vmem:[%s3362_s3 + $0x2c8] sm:$0xff]  ;;  %v886_v27 = vld [vmem:[%s3362_s3 + $0x2b0] sm:$0xff]  ;;  %v884_v37 = vld [vmem:[%s3362_s3 + $0x2a0] sm:$0xff] }
  0x95   :  { %1820 = vmatprep.subr.mxu1 %v891_v1  ;;  %1847 = vmatprep.subr.mxu0 %v927_v2  ;;  %v922_v28 = vld [vmem:[%s3362_s3 + $0x3d0] sm:$0xff]  ;;  %v885_v32 = vld [vmem:[%s3362_s3 + $0x2a8] sm:$0xff]  ;;  %v920_v38 = vld [vmem:[%s3362_s3 + $0x3c0] sm:$0xff] }
  0x96   :  { %1821 = vmatpush3.msra.mxu1 %v875_v4  ;;  %1848 = vmatpush3.msra.mxu0 %v911_v5  ;;  %v870_v30 = vld [vmem:[%s3362_s3 + $0x230] sm:$0xff]  ;;  %v921_v51 = vld [vmem:[%s3362_s3 + $0x3c8] sm:$0xff]  ;;  %v868_v39 = vld [vmem:[%s3362_s3 + $0x220] sm:$0xff] }
  0x97   :  { %1822 = vmatprep.subr.mxu1 %v890_v6  ;;  %1849 = vmatprep.subr.mxu0 %v926_v9  ;;  %v906_v31 = vld [vmem:[%s3362_s3 + $0x350] sm:$0xff]  ;;  %v869_v34 = vld [vmem:[%s3362_s3 + $0x228] sm:$0xff]  ;;  %v904_v41 = vld [vmem:[%s3362_s3 + $0x340] sm:$0xff] }
  0x98   :  { %1823 = vmatpush3.msra.mxu1 %v874_v11  ;;  %1850 = vmatpush3.msra.mxu0 %v910_v10  ;;  %v905_v35 = vld [vmem:[%s3362_s3 + $0x348] sm:$0xff]  ;;  %v883_v42 = vld [vmem:[%s3362_s3 + $0x298] sm:$0xff]  ;;  %v882_v46 = vld [vmem:[%s3362_s3 + $0x290] sm:$0xff] }
  0x99   :  { %1824 = vmatprep.subr.mxu1 %v889_v3  ;;  %1851 = vmatprep.subr.mxu0 %v925_v12  ;;  %v919_v43 = vld [vmem:[%s3362_s3 + $0x3b8] sm:$0xff]  ;;  %v918_v47 = vld [vmem:[%s3362_s3 + $0x3b0] sm:$0xff]  ;;  %v881_v52 = vld [vmem:[%s3362_s3 + $0x288] sm:$0xff] }
  0x9a   :  { %1825 = vmatpush3.msra.mxu1 %v873_v13  ;;  %1852 = vmatpush3.msra.mxu0 %v909_v15  ;;  %v867_v44 = vld [vmem:[%s3362_s3 + $0x218] sm:$0xff]  ;;  %v866_v48 = vld [vmem:[%s3362_s3 + $0x210] sm:$0xff]  ;;  %v917_v53 = vld [vmem:[%s3362_s3 + $0x3a8] sm:$0xff] }
  0x9b   :  { %1826 = vmatprep.subr.mxu1 %v888_v16  ;;  %1853 = vmatprep.subr.mxu0 %v924_v17  ;;  %v903_v45 = vld [vmem:[%s3362_s3 + $0x338] sm:$0xff]  ;;  %v902_v49 = vld [vmem:[%s3362_s3 + $0x330] sm:$0xff]  ;;  %v865_v54 = vld [vmem:[%s3362_s3 + $0x208] sm:$0xff] }
  0x9c   :  { %1827 = vmatpush3.msra.mxu1 %v872_v18  ;;  %1854 = vmatpush3.msra.mxu0 %v908_v20  ;;  %v901_v55 = vld [vmem:[%s3362_s3 + $0x328] sm:$0xff]  ;;  %v880_v56 = vld [vmem:[%s3362_s3 + $0x280] sm:$0xff]  ;;  %v915_v62 = vld [vmem:[%s3362_s3 + $0x398] sm:$0xff] }
  0x9d   :  { %1828 = vmatprep.subr.mxu1 %v887_v21  ;;  %1855 = vmatprep.subr.mxu0 %v923_v23  ;;  %v916_v8 = vld [vmem:[%s3362_s3 + $0x3a0] sm:$0xff]  ;;  %v959_v59 = vld [vmem:[%s3362_s3 + $0x4f8] sm:$0xff]  ;;  %v914_v63 = vld [vmem:[%s3362_s3 + $0x390] sm:$0xff] }
  0x9e   :  { %1829 = vmatpush3.msra.mxu1 %v871_v25  ;;  %1856 = vmatpush3.msra.mxu0 %v907_v26  ;;  %v864_v57 = vld [vmem:[%s3362_s3 + $0x200] sm:$0xff]  ;;  %v899_v60 = vld [vmem:[%s3362_s3 + $0x318] sm:$0xff]  ;;  %v958_v0 = vld [vmem:[%s3362_s3 + $0x4f0] sm:$0xff] }
  0x9f   :  { %1830 = vmatprep.subr.mxu1 %v886_v27  ;;  %1857 = vmatprep.subr.mxu0 %v922_v28  ;;  %v900_v58 = vld [vmem:[%s3362_s3 + $0x320] sm:$0xff]  ;;  %v943_v61 = vld [vmem:[%s3362_s3 + $0x478] sm:$0xff]  ;;  %v942_v1 = vld [vmem:[%s3362_s3 + $0x470] sm:$0xff] }
  0xa0   :  { %1831 = vmatpush3.msra.mxu1 %v870_v30  ;;  %1858 = vmatpush3.msra.mxu0 %v906_v31  ;;  %v957_v2 = vld [vmem:[%s3362_s3 + $0x4e8] sm:$0xff]  ;;  %v912_v6 = vld [vmem:[%s3362_s3 + $0x380] sm:$0xff]  ;;  %v955_v3 = vld [vmem:[%s3362_s3 + $0x4d8] sm:$0xff] }
  0xa1   :  { %1832 = vmatprep.subr.mxu1 %v885_v32  ;;  %1859 = vmatprep.subr.mxu0 %v921_v51  ;;  %v897_v4 = vld [vmem:[%s3362_s3 + $0x308] sm:$0xff]  ;;  %v956_v9 = vld [vmem:[%s3362_s3 + $0x4e0] sm:$0xff]  ;;  %v991_v12 = vld [vmem:[%s3362_s3 + $0x5f8] sm:$0xff] }
  0xa2   :  { %1833 = vmatpush3.msra.mxu1 %v869_v34  ;;  %1860 = vmatpush3.msra.mxu0 %v905_v35  ;;  %v941_v5 = vld [vmem:[%s3362_s3 + $0x468] sm:$0xff]  ;;  %v896_v11 = vld [vmem:[%s3362_s3 + $0x300] sm:$0xff]  ;;  %v939_v13 = vld [vmem:[%s3362_s3 + $0x458] sm:$0xff] }
  0xa3   :  { %1834 = vmatprep.subr.mxu1 %v884_v37  ;;  %1861 = vmatprep.subr.mxu0 %v920_v38  ;;  %v940_v10 = vld [vmem:[%s3362_s3 + $0x460] sm:$0xff]  ;;  %v975_v15 = vld [vmem:[%s3362_s3 + $0x578] sm:$0xff]  ;;  %v954_v16 = vld [vmem:[%s3362_s3 + $0x4d0] sm:$0xff] }
  0xa4   :  { %1835 = vmatpush3.msra.mxu1 %v868_v39  ;;  %1862 = vmatpush3.msra.mxu0 %v904_v41  ;;  %v990_v17 = vld [vmem:[%s3362_s3 + $0x5f0] sm:$0xff]  ;;  %v989_v20 = vld [vmem:[%s3362_s3 + $0x5e8] sm:$0xff]  ;;  %v952_v25 = vld [vmem:[%s3362_s3 + $0x4c0] sm:$0xff] }
  0xa5   :  { %1836 = vmatprep.subr.mxu1 %v883_v42  ;;  %1863 = vmatprep.subr.mxu0 %v919_v43  ;;  %v974_v18 = vld [vmem:[%s3362_s3 + $0x570] sm:$0xff]  ;;  %v937_v21 = vld [vmem:[%s3362_s3 + $0x448] sm:$0xff]  ;;  %v988_v26 = vld [vmem:[%s3362_s3 + $0x5e0] sm:$0xff] }
  0xa6   :  { %1837 = vmatpush3.msra.mxu1 %v867_v44  ;;  %1864 = vmatpush3.msra.mxu0 %v903_v45  ;;  %v973_v23 = vld [vmem:[%s3362_s3 + $0x568] sm:$0xff]  ;;  %v936_v27 = vld [vmem:[%s3362_s3 + $0x440] sm:$0xff]  ;;  %v951_v30 = vld [vmem:[%s3362_s3 + $0x4b8] sm:$0xff] }
  0xa7   :  { %1838 = vmatprep.subr.mxu1 %v882_v46  ;;  %1865 = vmatprep.subr.mxu0 %v918_v47  ;;  %v972_v28 = vld [vmem:[%s3362_s3 + $0x560] sm:$0xff]  ;;  %v987_v31 = vld [vmem:[%s3362_s3 + $0x5d8] sm:$0xff]  ;;  %v950_v34 = vld [vmem:[%s3362_s3 + $0x4b0] sm:$0xff] }
  0xa8   :  { %1839 = vmatpush3.msra.mxu1 %v866_v48  ;;  %1866 = vmatpush3.msra.mxu0 %v902_v49  ;;  %v935_v32 = vld [vmem:[%s3362_s3 + $0x438] sm:$0xff]  ;;  %v986_v35 = vld [vmem:[%s3362_s3 + $0x5d0] sm:$0xff]  ;;  %v949_v39 = vld [vmem:[%s3362_s3 + $0x4a8] sm:$0xff] }
  0xa9   :  { %1840 = vmatprep.subr.mxu1 %v881_v52  ;;  %1867 = vmatprep.subr.mxu0 %v917_v53  ;;  %v971_v51 = vld [vmem:[%s3362_s3 + $0x558] sm:$0xff]  ;;  %v934_v37 = vld [vmem:[%s3362_s3 + $0x430] sm:$0xff]  ;;  %v985_v41 = vld [vmem:[%s3362_s3 + $0x5c8] sm:$0xff] }
  0xaa   :  { %1841 = vmatpush3.msra.mxu1 %v865_v54  ;;  %1868 = vmatpush3.msra.mxu0 %v901_v55  ;;  %v970_v38 = vld [vmem:[%s3362_s3 + $0x550] sm:$0xff]  ;;  %v933_v42 = vld [vmem:[%s3362_s3 + $0x428] sm:$0xff]  ;;  %v948_v44 = vld [vmem:[%s3362_s3 + $0x4a0] sm:$0xff] }
  0xab   :  { %1842 = vmatprep.subr.mxu1 %v880_v56  ;;  %1869 = vmatprep.subr.mxu0 %v916_v8  ;;  %v969_v43 = vld [vmem:[%s3362_s3 + $0x548] sm:$0xff]  ;;  %v984_v45 = vld [vmem:[%s3362_s3 + $0x5c0] sm:$0xff]  ;;  %v947_v48 = vld [vmem:[%s3362_s3 + $0x498] sm:$0xff] }
  0xac   :  { %1843 = vmatpush3.msra.mxu1 %v864_v57  ;;  %1207 = vmatprep.mubr.f32.mxu1 %v2483_v19  ;;  %v898_v19 = vld [vmem:[%s3362_s3 + $0x310] sm:$0xff]  ;;  %v932_v46 = vld [vmem:[%s3362_s3 + $0x420] sm:$0xff]  ;;  %v983_v49 = vld [vmem:[%s3362_s3 + $0x5b8] sm:$0xff] }
  0xad   :  { %1870 = vmatpush3.msra.mxu0 %v900_v58  ;;  %1208 = vmatmul.mubr.f32.vlgmr.msra.gmra.mxu1 %v2452_v7  ;;  %v913_v7 = vld [vmem:[%s3362_s3 + $0x388] sm:$0xff]  ;;  %v968_v47 = vld [vmem:[%s3362_s3 + $0x540] sm:$0xff]  ;;  %v931_v52 = vld [vmem:[%s3362_s3 + $0x418] sm:$0xff] }
  0xae   :  { %1871 = vmatprep.subr.mxu0 %v915_v62  ;;  %1882 = vmatprep.subr.mxu1 %v959_v59  ;;  %v967_v53 = vld [vmem:[%s3362_s3 + $0x538] sm:$0xff]  ;;  %v946_v54 = vld [vmem:[%s3362_s3 + $0x490] sm:$0xff]  ;;  %v945_v57 = vld [vmem:[%s3362_s3 + $0x488] sm:$0xff] }
  0xaf   :  { %1872 = vmatpush3.msra.mxu0 %v899_v60  ;;  %1883 = vmatpush3.msra.mxu1 %v943_v61  ;;  %v982_v55 = vld [vmem:[%s3362_s3 + $0x5b0] sm:$0xff]  ;;  %v981_v58 = vld [vmem:[%s3362_s3 + $0x5a8] sm:$0xff]  ;;  %v944_v60 = vld [vmem:[%s3362_s3 + $0x480] sm:$0xff] }
  0xb0   :  { %1873 = vmatprep.subr.mxu0 %v914_v63  ;;  %1884 = vmatprep.subr.mxu1 %v958_v0  ;;  %v930_v56 = vld [vmem:[%s3362_s3 + $0x410] sm:$0xff]  ;;  %v929_v62 = vld [vmem:[%s3362_s3 + $0x408] sm:$0xff]  ;;  %v980_v61 = vld [vmem:[%s3362_s3 + $0x5a0] sm:$0xff] }
  0xb1   :  { %1874 = vmatpush3.msra.mxu0 %v898_v19  ;;  %1885 = vmatpush3.msra.mxu1 %v942_v1  ;;  %v966_v8 = vld [vmem:[%s3362_s3 + $0x530] sm:$0xff]  ;;  %v965_v59 = vld [vmem:[%s3362_s3 + $0x528] sm:$0xff]  ;;  %v928_v63 = vld [vmem:[%s3362_s3 + $0x400] sm:$0xff] }
  0xb2   :  { %1875 = vmatprep.subr.mxu0 %v913_v7  ;;  %1886 = vmatprep.subr.mxu1 %v957_v2  ;;  %v964_v0 = vld [vmem:[%s3362_s3 + $0x520] sm:$0xff]  ;;  %v979_v19 = vld [vmem:[%s3362_s3 + $0x598] sm:$0xff]  ;;  %v978_v2 = vld [vmem:[%s3362_s3 + $0x590] sm:$0xff] }
  0xb3   :  { %1876 = vmatpush3.msra.mxu0 %v897_v4  ;;  %1887 = vmatpush3.msra.mxu1 %v941_v5  ;;  %v963_v1 = vld [vmem:[%s3362_s3 + $0x518] sm:$0xff]  ;;  %v977_v4 = vld [vmem:[%s3362_s3 + $0x588] sm:$0xff] }
  0xb4   :  { %1877 = vmatprep.subr.mxu0 %v912_v6  ;;  %1888 = vmatprep.subr.mxu1 %v956_v9  ;;  %v995_v7 = vld [vmem:[%s3362_s3 + $0x618] sm:$0xff]  ;;  %v961_v5 = vld [vmem:[%s3362_s3 + $0x508] sm:$0xff]  ;;  %v976_v6 = vld [vmem:[%s3362_s3 + $0x580] sm:$0xff] }
  0xb5   :  { %1878 = vmatpush3.msra.mxu0 %v896_v11  ;;  %1277 = vmatprep.mubr.f32.mxu0 %v2493_v22  ;;  %v938_v22 = vld [vmem:[%s3362_s3 + $0x450] sm:$0xff]  ;;  %v993_v9 = vld [vmem:[%s3362_s3 + $0x608] sm:$0xff]  ;;  %v960_v11 = vld [vmem:[%s3362_s3 + $0x500] sm:$0xff] }
  0xb6   :  { %1889 = vmatpush3.msra.mxu1 %v940_v10  ;;  %1278 = vmatmul.mubr.f32.vlgmr.msra.gmra.mxu0 %v2467_v14  ;;  %v953_v14 = vld [vmem:[%s3362_s3 + $0x4c8] sm:$0xff]  ;;  %v992_v10 = vld [vmem:[%s3362_s3 + $0x600] sm:$0xff] }
  0xb7   :  { %1890 = vmatprep.subr.mxu1 %v955_v3  ;;  %1917 = vmatprep.subr.mxu0 %v991_v12 }
  0xb8   :  { %1891 = vmatpush3.msra.mxu1 %v939_v13  ;;  %1918 = vmatpush3.msra.mxu0 %v975_v15 }
  0xb9   :  { %1892 = vmatprep.subr.mxu1 %v954_v16  ;;  %1919 = vmatprep.subr.mxu0 %v990_v17  ;;  %v1522_v16 = vld [vmem:[%s3361_s2] ss:$0 sm:$0xff]  ;;  %s2034_s2 = smov [#allocation2]  }
  0xba   :  { %1893 = vmatpush3.msra.mxu1 %v938_v22  ;;  %1920 = vmatpush3.msra.mxu0 %v974_v18  ;;  %s1500_s16 = sshll.u32 %s2034_s2, 4  ;;  %s1501_s16 = int_to_ptr.vmem [resolvable:$true] %s1500_s16 }
  0xbb   :  { %1894 = vmatprep.subr.mxu1 %v953_v14  ;;  %1921 = vmatprep.subr.mxu0 %v989_v20  ;;  %s1987_s17 = scalar_lea.vmem %s1501_s16, 32  ;;  %p1992_p1 = scmp.lt.s32.totalorder %s1501_s16, %s1501_s16 }
  0xbc   :  { %1895 = vmatpush3.msra.mxu1 %v937_v21  ;;  %1922 = vmatpush3.msra.mxu0 %v973_v23  ;;  %p1988_p0 = scmp.ne.s32.totalorder %s1501_s16, %s1987_s17  ;;  %p1993_p2 = scmp.lt.s32.totalorder %s1987_s17, %s1987_s17 }
  0xbd   :  { %1896 = vmatprep.subr.mxu1 %v952_v25  ;;  %1923 = vmatprep.subr.mxu0 %v988_v26 }
  0xbe   :  { %1897 = vmatpush3.msra.mxu1 %v936_v27  ;;  %1924 = vmatpush3.msra.mxu0 %v972_v28  ;;  %p1994_p3 = por %p1993_p2, %p1992_p1 }
  0xbf   :  { %1898 = vmatprep.subr.mxu1 %v951_v30  ;;  %1925 = vmatprep.subr.mxu0 %v987_v31 }
  0xc0   :  { %1899 = vmatpush3.msra.mxu1 %v935_v32  ;;  %1926 = vmatpush3.msra.mxu0 %v971_v51  ;;  %p1995_p4 = pnand %p1994_p3, %p1988_p0 }
  0xc1   :  { %1900 = vmatprep.subr.mxu1 %v950_v34  ;;  %1927 = vmatprep.subr.mxu0 %v986_v35 }
  0xc2   :  { %1901 = vmatpush3.msra.mxu1 %v934_v37  ;;  %1928 = vmatpush3.msra.mxu0 %v970_v38 }
  0xc3   :  { %1902 = vmatprep.subr.mxu1 %v949_v39  ;;  %1929 = vmatprep.subr.mxu0 %v985_v41 }
  0xc4   :  { %1903 = vmatpush3.msra.mxu1 %v933_v42  ;;  %1930 = vmatpush3.msra.mxu0 %v969_v43 }
  0xc5   :  { %1904 = vmatprep.subr.mxu1 %v948_v44  ;;  %1931 = vmatprep.subr.mxu0 %v984_v45 }
  0xc6   :  { %1905 = vmatpush3.msra.mxu1 %v932_v46  ;;  %1932 = vmatpush3.msra.mxu0 %v968_v47 }
  0xc7   :  { %1906 = vmatprep.subr.mxu1 %v947_v48  ;;  %1933 = vmatprep.subr.mxu0 %v983_v49 }
  0xc8   :  { %1907 = vmatpush3.msra.mxu1 %v931_v52  ;;  %1934 = vmatpush3.msra.mxu0 %v967_v53 }
  0xc9   :  { %1908 = vmatprep.subr.mxu1 %v946_v54  ;;  %1935 = vmatprep.subr.mxu0 %v982_v55 }
  0xca   :  { %1909 = vmatpush3.msra.mxu1 %v930_v56  ;;  %1936 = vmatpush3.msra.mxu0 %v966_v8 }
  0xcb   :  { %1910 = vmatprep.subr.mxu1 %v945_v57  ;;  %1937 = vmatprep.subr.mxu0 %v981_v58 }
  0xcc   :  { %1911 = vmatpush3.msra.mxu1 %v929_v62  ;;  %1938 = vmatpush3.msra.mxu0 %v965_v59 }
  0xcd   :  { %1912 = vmatprep.subr.mxu1 %v944_v60  ;;  %1939 = vmatprep.subr.mxu0 %v980_v61 }
  0xce   :  { %1913 = vmatpush3.msra.mxu1 %v928_v63  ;;  %1347 = vmatprep.mubr.f32.mxu1 %v2696_v33  ;;  %v962_v33 = vld [vmem:[%s3362_s3 + $0x510] sm:$0xff] }
  0xcf   :  { %1940 = vmatpush3.msra.mxu0 %v964_v0  ;;  %1348 = vmatmul.mubr.f32.vlgmr.msra.gmra.mxu1 %v2665_v24  ;;  %v994_v24 = vld [vmem:[%s3362_s3 + $0x610] sm:$0xff] }
  0xd0   :  { %1941 = vmatprep.subr.mxu0 %v979_v19  ;;  %1968 = vmatprep.subr.mxu1 %v2032_v40 }
  0xd1   :  { %1942 = vmatpush3.msra.mxu0 %v963_v1  ;;  %1969 = vmatpush3.msra.mxu1 %v995_v7 }
  0xd2   :  { %1943 = vmatprep.subr.mxu0 %v978_v2  ;;  %1970 = vmatprep.subr.mxu1 %v2032_v40 }
  0xd3   :  { %1944 = vmatpush3.msra.mxu0 %v962_v33  ;;  %1417 = vmatprep.mubr.f32.mxu0 %v2706_v36 }
  0xd4   :  { %1945 = vmatprep.subr.mxu0 %v977_v4  ;;  %1971 = vmatpush3.msra.mxu1 %v994_v24 }
  0xd5   :  { %1946 = vmatpush3.msra.mxu0 %v961_v5  ;;  %1972 = vmatprep.subr.mxu1 %v2032_v40 }
  0xd6   :  { %1947 = vmatprep.subr.mxu0 %v976_v6  ;;  %1973 = vmatpush3.msra.mxu1 %v993_v9 }
  0xd7   :  { %1948 = vmatpush3.msra.mxu0 %v960_v11  ;;  %1974 = vmatprep.subr.mxu1 %v2032_v40 }
  0xd8   :  { %1418 = vmatmul.mubr.f32.vlgmr.msra.gmra.mxu0 %v2680_v29  ;;  %1975 = vmatpush3.msra.mxu1 %v992_v10 }
  0xd9   :  { %1976 = vmatprep.mubr.msk.f32.mxu1 %vm2033_vm1, %v2032_v40 }
  0xda   :  { %1977 = vmatmul.mubr.msk.f32.vlgmr.msra.gmra.mxu1 %vm305_vm0, %v2754_v50 }
  0xe4   :  { %v1559_v36 = vpop.f32.mrf.mxu0 }
  0xe6   :  { %v1560_v3 = vpop.f32.mrf.mxu0  ;;  %v1594_v12 = vpop.f32.mrf.mxu1 }
  0xe7   :  { %v1561_v15 = vadd.f32 %v1560_v3, %v1559_v36 }
  0xe8   :  { %v1595_v17 = vpop.f32.mrf.mxu1 }
  0xe9   :  { %v375_v29 = vadd.f32 %v1561_v15, %v1522_v16  ;;  %v1596_v14 = vadd.f32 %v1595_v17, %v1594_v12 }
  0xeb   :  { %v445_v40 = vadd.f32 %v1596_v14, %v375_v29 }
 0x106   :  { %v1629_v13 = vpop.f32.mrf.mxu0 }
 0x108   :  { %v1630_v22 = vpop.f32.mrf.mxu0  ;;  %v1664_v18 = vpop.f32.mrf.mxu1 }
 0x109   :  { %v1631_v20 = vadd.f32 %v1630_v22, %v1629_v13 }
 0x10a   :  { %v1665_v21 = vpop.f32.mrf.mxu1 }
 0x10b   :  { %v515_v23 = vadd.f32 %v1631_v20, %v445_v40  ;;  %v1666_v25 = vadd.f32 %v1665_v21, %v1664_v18 }
 0x10d   :  { %v585_v28 = vadd.f32 %v1666_v25, %v515_v23 }
 0x128   :  { %v1699_v50 = vpop.f32.mrf.mxu0 }
 0x12a   :  { %v1700_v26 = vpop.f32.mrf.mxu0  ;;  %v1734_v27 = vpop.f32.mrf.mxu1 }
 0x12b   :  { %v1701_v30 = vadd.f32 %v1700_v26, %v1699_v50 }
 0x12c   :  { %v1735_v31 = vpop.f32.mrf.mxu1 }
 0x12d   :  { %v655_v32 = vadd.f32 %v1701_v30, %v585_v28  ;;  %v1736_v51 = vadd.f32 %v1735_v31, %v1734_v27 }
 0x12f   :  { %v725_v34 = vadd.f32 %v1736_v51, %v655_v32 }
 0x132   :  { %v794_v35 = vpop.f32.mrf.mxu0 }
 0x133   :  { %v795_v37 = vadd.f32 %v794_v35, %v725_v34 }
 0x134   :  { %v1967_v38 = vpop.f32.mrf.mxu0 }
 0x135   :  { %799 = vst.msk [vmem:[#allocation2] sm:$0x3] %vm798_vm2, %v795_v37 }
 0x136   :  { %1998 = shalt.err (!%p1995_p4)
}
 0x137   :  { %1503 = dma.vmem_to_hbm [thread:$0]  %s1501_s16, 32, %s3364_s5, [#allocation3]   ;;  %v1525_v46 = vld [vmem:[%s3363_s4] ss:$0 sm:$0xff] }
 0x138   :  { %s2035_s4 = smov [#allocation4]  }
 0x139   :  { %s1510_s5 = sshll.u32 %s2035_s4, 4  ;;  %s1511_s5 = int_to_ptr.vmem [resolvable:$true] %s1510_s5 }
 0x13a   :  { %s2007_s22 = scalar_lea.vmem %s1511_s5, 32  ;;  %p2012_p6 = scmp.lt.s32.totalorder %s1511_s5, %s1511_s5 }
 0x13b   :  { %p2008_p5 = scmp.ne.s32.totalorder %s1511_s5, %s2007_s22  ;;  %p2013_p7 = scmp.lt.s32.totalorder %s2007_s22, %s2007_s22 }
 0x13d   :  { %p2014_p8 = por %p2013_p7, %p2012_p6 }
 0x13f   :  { %p2015_p9 = pnand %p2014_p8, %p2008_p5 }
 0x14c   :  { %v1774_v39 = vpop.f32.mrf.mxu1 }
 0x14e   :  { %v1775_v41 = vpop.f32.mrf.mxu1 }
 0x14f   :  { %v1776_v45 = vadd.f32 %v1775_v41, %v1774_v39 }
 0x151   :  { %v1070_v52 = vadd.f32 %v1776_v45, %v1525_v46 }
 0x154   :  { %v1809_v42 = vpop.f32.mrf.mxu0 }
 0x156   :  { %v1810_v44 = vpop.f32.mrf.mxu0 }
 0x157   :  { %v1811_v53 = vadd.f32 %v1810_v44, %v1809_v42 }
 0x159   :  { %v1140_v8 = vadd.f32 %v1811_v53, %v1070_v52 }
 0x16d   :  { %v1844_v43 = vpop.f32.mrf.mxu1 }
 0x16f   :  { %v1845_v47 = vpop.f32.mrf.mxu1 }
 0x170   :  { %v1846_v55 = vadd.f32 %v1845_v47, %v1844_v43 }
 0x172   :  { %v1210_v58 = vadd.f32 %v1846_v55, %v1140_v8 }
 0x176   :  { %v1879_v48 = vpop.f32.mrf.mxu0 }
 0x178   :  { %v1880_v54 = vpop.f32.mrf.mxu0 }
 0x179   :  { %v1881_v57 = vadd.f32 %v1880_v54, %v1879_v48 }
 0x17b   :  { %v1280_v60 = vadd.f32 %v1881_v57, %v1210_v58 }
 0x18f   :  { %v1914_v49 = vpop.f32.mrf.mxu1 }
 0x191   :  { %v1915_v56 = vpop.f32.mrf.mxu1 }
 0x192   :  { %v1916_v62 = vadd.f32 %v1915_v56, %v1914_v49 }
 0x194   :  { %v1350_v0 = vadd.f32 %v1916_v62, %v1280_v60 }
 0x198   :  { %v1949_v59 = vpop.f32.mrf.mxu0 }
 0x19a   :  { %v1950_v61 = vpop.f32.mrf.mxu0  ;;  %v1489_v63 = vpop.f32.mrf.mxu1 }
 0x19b   :  { %v1951_v19 = vadd.f32 %v1950_v61, %v1949_v59 }
 0x19c   :  { %v1978_v1 = vpop.f32.mrf.mxu1 }
 0x19d   :  { %v1420_v7 = vadd.f32 %v1951_v19, %v1350_v0 }
 0x19f   :  { %v1490_v2 = vadd.f32 %v1489_v63, %v1420_v7 }
 0x1a1   :  { %1493 = vst.msk [vmem:[#allocation4] sm:$0x3] %vm798_vm2, %v1490_v2 }
 0x1a2   :  { %2018 = shalt.err (!%p2015_p9)
}
 0x1a3   :  { %1513 = dma.vmem_to_hbm [thread:$0]  %s1511_s5, 32, %s3365_s6, [#allocation5]  }
 0x1a4   :  { %2027 = dma.done.wait [#allocation3], 32  }
 0x1a5   :  { %2028 = vsyncadd [#allocation3], 4294967264 }
 0x1a6   :  { %2029 = dma.done.wait [#allocation5], 32  }
 0x1a7   :  { %2030 = vsyncadd [#allocation5], 4294967264 }
 0x1a8   :  { %1520 = vsyncpa [#allocation3], 1 }
 0x1a9   :  { %1521 = vsyncpa [#allocation5], 1 }

// kernel: vae_encoder_forward.2
= control target key start
LH: loop header
LB: loop body
LE: loop exit
PB: predicated region body
PF: predicated region fallthrough
CT: control target
= control target key end

     0   :  { %vm243_vm0 = vcmask 1042432   ;;  %v11913_v0 = vmov 0.0   ;;  %vm7484_vm1 = vmmov 0   ;;  %vm95_vm2 = vcmask 220160   ;;  %s11902_s1 = inlined_call_operand.vmem [shape: f32[27,32], index: 1, kind: input, shape index: {}]   ;;  %s11903_s0 = inlined_call_operand.vmem [shape: f32[392,27], index: 0, kind: input, shape index: {}]   ;;  %s11904_s2 = inlined_call_operand.vmem [shape: f32[1,32], index: 2, kind: input, shape index: {}]   ;;  %s11905_s5 = inlined_call_operand.vmem [shape: f32[9,49,196], index: 5, kind: input, shape index: {}]   ;;  %s11906_s3 = inlined_call_operand.vmem [shape: f32[1,32], index: 3, kind: input, shape index: {}]   ;;  %s11907_s4 = inlined_call_operand.vmem [shape: f32[1,32], index: 4, kind: input, shape index: {}]   ;;  %s11908_s6 = inlined_call_operand.vmem [shape: f32[9,32,32], index: 6, kind: input, shape index: {}]   ;;  %s11909_s7 = inlined_call_operand.vmem [shape: f32[1,32], index: 7, kind: input, shape index: {}]   ;;  %s11910_s8 = inlined_call_operand.vmem [shape: f32[1,32], index: 8, kind: input, shape index: {}]   ;;  %s11911_s9 = inlined_call_operand.vmem [shape: f32[1,32], index: 9, kind: input, shape index: {}]   ;;  %s11912_s10 = inlined_call_operand.vmem [shape: f32[98,32], index: 10, kind: output, shape index: {}]  }
   0x1   :  { %6637 = vmatprep.subr.mxu0 %v11913_v0  ;;  %v87_v1 = vld [vmem:[%s11902_s1 + $0x18] sm:$0x7]  ;;  %v86_v2 = vld [vmem:[%s11902_s1 + $0x10] sm:$0xff]  ;;  %6645 = vmatprep.mubr.msk.f32.mxu0 %vm7484_vm1, %v11913_v0  ;;  %v85_v3 = vld [vmem:[%s11902_s1 + $0x8] sm:$0xff]  ;;  %vm559_vm3 = vcmask 261120   ;;  %vm1142_vm4 = vcmask 556032  }
   0x2   :  { %6638 = vmatpush3.msk.msra.mxu0 %vm243_vm0, %v87_v1  ;;  %1168 = vmatprep.subr.mxu1 %v11913_v0  ;;  %v84_v4 = vld [vmem:[%s11902_s1] sm:$0xff]  ;;  %v36_v6 = vld [vmem:[%s11903_s0 + $0x8] sm:$0xff]  ;;  %v37_v7 = vld [vmem:[%s11903_s0 + $0x10] sm:$0xff]  ;;  %vm1164_vm5 = vcmask 1043456   ;;  %vm5682_vm6 = vcmask 1040384   ;;  %vm5749_vm7 = vcmask 254976  }
   0x3   :  { %6639 = vmatprep.subr.mxu0 %v11913_v0  ;;  %v35_v5 = vld [vmem:[%s11903_s0] sm:$0xff]  ;;  %v38_v8 = vld [vmem:[%s11903_s0 + $0x18] sm:$0xff]  ;;  %v40_v10 = vld [vmem:[%s11903_s0 + $0x28] sm:$0xff] }
   0x4   :  { %6640 = vmatpush3.msra.mxu0 %v86_v2  ;;  %v39_v9 = vld [vmem:[%s11903_s0 + $0x20] sm:$0xff]  ;;  %v41_v11 = vld [vmem:[%s11903_s0 + $0x30] sm:$0xff]  ;;  %v42_v12 = vld [vmem:[%s11903_s0 + $0x38] sm:$0xff] }
   0x5   :  { %6641 = vmatprep.subr.mxu0 %v11913_v0  ;;  %v43_v13 = vld [vmem:[%s11903_s0 + $0x40] sm:$0xff]  ;;  %v44_v14 = vld [vmem:[%s11903_s0 + $0x48] sm:$0xff]  ;;  %v45_v15 = vld [vmem:[%s11903_s0 + $0x50] sm:$0xff] }
   0x6   :  { %6642 = vmatpush3.msra.mxu0 %v85_v3  ;;  %v46_v16 = vld [vmem:[%s11903_s0 + $0x58] sm:$0xff]  ;;  %v47_v17 = vld [vmem:[%s11903_s0 + $0x60] sm:$0xff]  ;;  %v48_v18 = vld [vmem:[%s11903_s0 + $0x68] sm:$0xff] }
   0x7   :  { %6643 = vmatprep.subr.mxu0 %v11913_v0  ;;  %v49_v19 = vld [vmem:[%s11903_s0 + $0x70] sm:$0xff]  ;;  %v50_v20 = vld [vmem:[%s11903_s0 + $0x78] sm:$0xff]  ;;  %v51_v21 = vld [vmem:[%s11903_s0 + $0x80] sm:$0xff] }
   0x8   :  { %6644 = vmatpush3.msra.mxu0 %v84_v4  ;;  %v52_v22 = vld [vmem:[%s11903_s0 + $0x88] sm:$0xff]  ;;  %v53_v23 = vld [vmem:[%s11903_s0 + $0x90] sm:$0xff]  ;;  %v54_v24 = vld [vmem:[%s11903_s0 + $0x98] sm:$0xff] }
   0x9   :  { %6646 = vmatmul.mubr.msk.f32.vlgmr.msra.gmra.mxu0 %vm95_vm2, %v35_v5  ;;  %1691 = vmatprep.subr.mxu0 %v11913_v0  ;;  %v55_v25 = vld [vmem:[%s11903_s0 + $0xa0] sm:$0xff]  ;;  %v56_v26 = vld [vmem:[%s11903_s0 + $0xa8] sm:$0xff]  ;;  %v57_v27 = vld [vmem:[%s11903_s0 + $0xb0] sm:$0xff] }
   0xa   :  { %6648 = vmatprep.mubr.msk.f32.mxu0 %vm7484_vm1, %v11913_v0  ;;  %v58_v28 = vld [vmem:[%s11903_s0 + $0xb8] sm:$0xff]  ;;  %v59_v29 = vld [vmem:[%s11903_s0 + $0xc0] sm:$0xff]  ;;  %v60_v30 = vld [vmem:[%s11903_s0 + $0xc8] sm:$0xff] }
   0xb   :  { %v61_v31 = vld [vmem:[%s11903_s0 + $0xd0] sm:$0xff]  ;;  %v62_v32 = vld [vmem:[%s11903_s0 + $0xd8] sm:$0xff]  ;;  %v63_v33 = vld [vmem:[%s11903_s0 + $0xe0] sm:$0xff] }
   0xc   :  { %v64_v34 = vld [vmem:[%s11903_s0 + $0xe8] sm:$0xff]  ;;  %v65_v35 = vld [vmem:[%s11903_s0 + $0xf0] sm:$0xff]  ;;  %v66_v36 = vld [vmem:[%s11903_s0 + $0xf8] sm:$0xff] }
   0xd   :  { %6649 = vmatmul.mubr.msk.f32.gmra.mxu0 %vm95_vm2, %v36_v6  ;;  %v67_v37 = vld [vmem:[%s11903_s0 + $0x100] sm:$0xff]  ;;  %v68_v38 = vld [vmem:[%s11903_s0 + $0x108] sm:$0xff]  ;;  %v69_v39 = vld [vmem:[%s11903_s0 + $0x110] sm:$0xff] }
   0xe   :  { %6651 = vmatprep.mubr.msk.f32.mxu0 %vm7484_vm1, %v11913_v0  ;;  %v70_v40 = vld [vmem:[%s11903_s0 + $0x118] sm:$0xff]  ;;  %v71_v41 = vld [vmem:[%s11903_s0 + $0x120] sm:$0xff]  ;;  %v72_v42 = vld [vmem:[%s11903_s0 + $0x128] sm:$0xff] }
   0xf   :  { %v73_v43 = vld [vmem:[%s11903_s0 + $0x130] sm:$0xff]  ;;  %v74_v44 = vld [vmem:[%s11903_s0 + $0x138] sm:$0xff]  ;;  %v75_v45 = vld [vmem:[%s11903_s0 + $0x140] sm:$0xff] }
  0x10   :  { %v76_v46 = vld [vmem:[%s11903_s0 + $0x148] sm:$0xff]  ;;  %v77_v47 = vld [vmem:[%s11903_s0 + $0x150] sm:$0xff]  ;;  %v78_v48 = vld [vmem:[%s11903_s0 + $0x158] sm:$0xff] }
  0x11   :  { %6652 = vmatmul.mubr.msk.f32.gmra.mxu0 %vm95_vm2, %v37_v7  ;;  %v79_v49 = vld [vmem:[%s11903_s0 + $0x160] sm:$0xff]  ;;  %v80_v50 = vld [vmem:[%s11903_s0 + $0x168] sm:$0xff]  ;;  %v81_v51 = vld [vmem:[%s11903_s0 + $0x170] sm:$0xff] }
  0x12   :  { %6654 = vmatprep.mubr.msk.f32.mxu0 %vm7484_vm1, %v11913_v0  ;;  %v82_v52 = vld [vmem:[%s11903_s0 + $0x178] sm:$0xff]  ;;  %v83_v53 = vld [vmem:[%s11903_s0 + $0x180] sm:$0xff] }
  0x15   :  { %6655 = vmatmul.mubr.msk.f32.gmra.mxu0 %vm95_vm2, %v38_v8 }
  0x16   :  { %6657 = vmatprep.mubr.msk.f32.mxu0 %vm7484_vm1, %v11913_v0 }
  0x19   :  { %6658 = vmatmul.mubr.msk.f32.gmra.mxu0 %vm95_vm2, %v39_v9 }
  0x1a   :  { %6660 = vmatprep.mubr.msk.f32.mxu0 %vm7484_vm1, %v11913_v0 }
  0x1d   :  { %6661 = vmatmul.mubr.msk.f32.gmra.mxu0 %vm95_vm2, %v40_v10 }
  0x1e   :  { %6663 = vmatprep.mubr.msk.f32.mxu0 %vm7484_vm1, %v11913_v0 }
  0x21   :  { %6664 = vmatmul.mubr.msk.f32.gmra.mxu0 %vm95_vm2, %v41_v11 }
  0x22   :  { %6666 = vmatprep.mubr.msk.f32.mxu0 %vm7484_vm1, %v11913_v0 }
  0x25   :  { %6667 = vmatmul.mubr.msk.f32.gmra.mxu0 %vm95_vm2, %v42_v12 }
  0x26   :  { %6669 = vmatprep.mubr.msk.f32.mxu0 %vm7484_vm1, %v11913_v0 }
  0x29   :  { %6670 = vmatmul.mubr.msk.f32.gmra.mxu0 %vm95_vm2, %v43_v13 }
  0x2a   :  { %6672 = vmatprep.mubr.msk.f32.mxu0 %vm7484_vm1, %v11913_v0 }
  0x2d   :  { %6673 = vmatmul.mubr.msk.f32.gmra.mxu0 %vm95_vm2, %v44_v14 }
  0x2e   :  { %6675 = vmatprep.mubr.msk.f32.mxu0 %vm7484_vm1, %v11913_v0 }
  0x31   :  { %6676 = vmatmul.mubr.msk.f32.gmra.mxu0 %vm95_vm2, %v45_v15 }
  0x32   :  { %6678 = vmatprep.mubr.msk.f32.mxu0 %vm7484_vm1, %v11913_v0 }
  0x35   :  { %6679 = vmatmul.mubr.msk.f32.gmra.mxu0 %vm95_vm2, %v46_v16 }
  0x36   :  { %6681 = vmatprep.mubr.msk.f32.mxu0 %vm7484_vm1, %v11913_v0 }
  0x39   :  { %6682 = vmatmul.mubr.msk.f32.gmra.mxu0 %vm95_vm2, %v47_v17 }
  0x3a   :  { %6684 = vmatprep.mubr.msk.f32.mxu0 %vm7484_vm1, %v11913_v0 }
  0x3d   :  { %6685 = vmatmul.mubr.msk.f32.gmra.mxu0 %vm95_vm2, %v48_v18 }
  0x3e   :  { %6687 = vmatprep.mubr.msk.f32.mxu0 %vm7484_vm1, %v11913_v0 }
  0x41   :  { %6688 = vmatmul.mubr.msk.f32.gmra.mxu0 %vm95_vm2, %v49_v19 }
  0x42   :  { %6690 = vmatprep.mubr.msk.f32.mxu0 %vm7484_vm1, %v11913_v0 }
  0x45   :  { %6691 = vmatmul.mubr.msk.f32.gmra.mxu0 %vm95_vm2, %v50_v20 }
  0x46   :  { %6693 = vmatprep.mubr.msk.f32.mxu0 %vm7484_vm1, %v11913_v0 }
  0x49   :  { %6694 = vmatmul.mubr.msk.f32.gmra.mxu0 %vm95_vm2, %v51_v21 }
  0x4a   :  { %6696 = vmatprep.mubr.msk.f32.mxu0 %vm7484_vm1, %v11913_v0 }
  0x4d   :  { %6697 = vmatmul.mubr.msk.f32.gmra.mxu0 %vm95_vm2, %v52_v22 }
  0x4e   :  { %6699 = vmatprep.mubr.msk.f32.mxu0 %vm7484_vm1, %v11913_v0 }
  0x51   :  { %6700 = vmatmul.mubr.msk.f32.gmra.mxu0 %vm95_vm2, %v53_v23 }
  0x52   :  { %6702 = vmatprep.mubr.msk.f32.mxu0 %vm7484_vm1, %v11913_v0 }
  0x55   :  { %6703 = vmatmul.mubr.msk.f32.gmra.mxu0 %vm95_vm2, %v54_v24 }
  0x56   :  { %6705 = vmatprep.mubr.msk.f32.mxu0 %vm7484_vm1, %v11913_v0 }
  0x59   :  { %6706 = vmatmul.mubr.msk.f32.gmra.mxu0 %vm95_vm2, %v55_v25 }
  0x5a   :  { %6708 = vmatprep.mubr.msk.f32.mxu0 %vm7484_vm1, %v11913_v0 }
  0x5d   :  { %6709 = vmatmul.mubr.msk.f32.gmra.mxu0 %vm95_vm2, %v56_v26 }
  0x5e   :  { %6711 = vmatprep.mubr.msk.f32.mxu0 %vm7484_vm1, %v11913_v0 }
  0x61   :  { %6712 = vmatmul.mubr.msk.f32.gmra.mxu0 %vm95_vm2, %v57_v27 }
  0x62   :  { %6714 = vmatprep.mubr.msk.f32.mxu0 %vm7484_vm1, %v11913_v0 }
  0x65   :  { %6715 = vmatmul.mubr.msk.f32.gmra.mxu0 %vm95_vm2, %v58_v28 }
  0x66   :  { %6717 = vmatprep.mubr.msk.f32.mxu0 %vm7484_vm1, %v11913_v0 }
  0x69   :  { %6718 = vmatmul.mubr.msk.f32.gmra.mxu0 %vm95_vm2, %v59_v29 }
  0x6a   :  { %6720 = vmatprep.mubr.msk.f32.mxu0 %vm7484_vm1, %v11913_v0 }
  0x6d   :  { %6721 = vmatmul.mubr.msk.f32.gmra.mxu0 %vm95_vm2, %v60_v30 }
  0x6e   :  { %6723 = vmatprep.mubr.msk.f32.mxu0 %vm7484_vm1, %v11913_v0 }
  0x71   :  { %6724 = vmatmul.mubr.msk.f32.gmra.mxu0 %vm95_vm2, %v61_v31 }
  0x72   :  { %6726 = vmatprep.mubr.msk.f32.mxu0 %vm7484_vm1, %v11913_v0 }
  0x75   :  { %6727 = vmatmul.mubr.msk.f32.gmra.mxu0 %vm95_vm2, %v62_v32 }
  0x76   :  { %6729 = vmatprep.mubr.msk.f32.mxu0 %vm7484_vm1, %v11913_v0 }
  0x79   :  { %6730 = vmatmul.mubr.msk.f32.gmra.mxu0 %vm95_vm2, %v63_v33 }
  0x7a   :  { %6732 = vmatprep.mubr.msk.f32.mxu0 %vm7484_vm1, %v11913_v0 }
  0x7d   :  { %6733 = vmatmul.mubr.msk.f32.gmra.mxu0 %vm95_vm2, %v64_v34 }
  0x7e   :  { %6735 = vmatprep.mubr.msk.f32.mxu0 %vm7484_vm1, %v11913_v0 }
  0x81   :  { %6736 = vmatmul.mubr.msk.f32.gmra.mxu0 %vm95_vm2, %v65_v35 }
  0x82   :  { %6738 = vmatprep.mubr.msk.f32.mxu0 %vm7484_vm1, %v11913_v0 }
  0x85   :  { %6739 = vmatmul.mubr.msk.f32.gmra.mxu0 %vm95_vm2, %v66_v36 }
  0x86   :  { %6741 = vmatprep.mubr.msk.f32.mxu0 %vm7484_vm1, %v11913_v0 }
  0x89   :  { %6742 = vmatmul.mubr.msk.f32.gmra.mxu0 %vm95_vm2, %v67_v37  ;;  %v7887_v37 = vld [vmem:[%s11904_s2] ss:$0 sm:$0xff] }
  0x8a   :  { %6744 = vmatprep.mubr.msk.f32.mxu0 %vm7484_vm1, %v11913_v0 }
  0x8d   :  { %6745 = vmatmul.mubr.msk.f32.gmra.mxu0 %vm95_vm2, %v68_v38 }
  0x8e   :  { %6747 = vmatprep.mubr.msk.f32.mxu0 %vm7484_vm1, %v11913_v0 }
  0x91   :  { %6748 = vmatmul.mubr.msk.f32.gmra.mxu0 %vm95_vm2, %v69_v39 }
  0x92   :  { %6750 = vmatprep.mubr.msk.f32.mxu0 %vm7484_vm1, %v11913_v0 }
  0x95   :  { %6751 = vmatmul.mubr.msk.f32.gmra.mxu0 %vm95_vm2, %v70_v40 }
  0x96   :  { %6753 = vmatprep.mubr.msk.f32.mxu0 %vm7484_vm1, %v11913_v0 }
  0x99   :  { %6754 = vmatmul.mubr.msk.f32.gmra.mxu0 %vm95_vm2, %v71_v41 }
  0x9a   :  { %6756 = vmatprep.mubr.msk.f32.mxu0 %vm7484_vm1, %v11913_v0 }
  0x9d   :  { %6757 = vmatmul.mubr.msk.f32.gmra.mxu0 %vm95_vm2, %v72_v42 }
  0x9e   :  { %6759 = vmatprep.mubr.msk.f32.mxu0 %vm7484_vm1, %v11913_v0 }
  0xa1   :  { %6760 = vmatmul.mubr.msk.f32.gmra.mxu0 %vm95_vm2, %v73_v43 }
  0xa2   :  { %6762 = vmatprep.mubr.msk.f32.mxu0 %vm7484_vm1, %v11913_v0 }
  0xa5   :  { %6763 = vmatmul.mubr.msk.f32.gmra.mxu0 %vm95_vm2, %v74_v44 }
  0xa6   :  { %6765 = vmatprep.mubr.msk.f32.mxu0 %vm7484_vm1, %v11913_v0 }
  0xa9   :  { %6766 = vmatmul.mubr.msk.f32.gmra.mxu0 %vm95_vm2, %v75_v45 }
  0xaa   :  { %6768 = vmatprep.mubr.msk.f32.mxu0 %vm7484_vm1, %v11913_v0 }
  0xad   :  { %6769 = vmatmul.mubr.msk.f32.gmra.mxu0 %vm95_vm2, %v76_v46 }
  0xae   :  { %6771 = vmatprep.mubr.msk.f32.mxu0 %vm7484_vm1, %v11913_v0 }
  0xb1   :  { %6772 = vmatmul.mubr.msk.f32.gmra.mxu0 %vm95_vm2, %v77_v47 }
  0xb2   :  { %6774 = vmatprep.mubr.msk.f32.mxu0 %vm7484_vm1, %v11913_v0 }
  0xb5   :  { %6775 = vmatmul.mubr.msk.f32.gmra.mxu0 %vm95_vm2, %v78_v48 }
  0xb6   :  { %6777 = vmatprep.mubr.msk.f32.mxu0 %vm7484_vm1, %v11913_v0 }
  0xb9   :  { %6778 = vmatmul.mubr.msk.f32.gmra.mxu0 %vm95_vm2, %v79_v49 }
  0xba   :  { %6780 = vmatprep.mubr.msk.f32.mxu0 %vm7484_vm1, %v11913_v0 }
  0xbd   :  { %6781 = vmatmul.mubr.msk.f32.gmra.mxu0 %vm95_vm2, %v80_v50 }
  0xbe   :  { %6783 = vmatprep.mubr.msk.f32.mxu0 %vm7484_vm1, %v11913_v0 }
  0xc1   :  { %6784 = vmatmul.mubr.msk.f32.gmra.mxu0 %vm95_vm2, %v81_v51 }
  0xc2   :  { %6786 = vmatprep.mubr.msk.f32.mxu0 %vm7484_vm1, %v11913_v0 }
  0xc5   :  { %6787 = vmatmul.mubr.msk.f32.gmra.mxu0 %vm95_vm2, %v82_v52 }
  0xc6   :  { %6789 = vmatprep.mubr.msk.f32.mxu0 %vm7484_vm1, %v11913_v0 }
  0xc9   :  { %v313_v54 = vpop.f32.mrf.mxu0  ;;  %6790 = vmatmul.mubr.msk.f32.gmra.mxu0 %vm95_vm2, %v83_v53 }
  0xca   :  { %v7895_v40 = vadd.f32 %v7887_v37, %v313_v54 }
  0xcb   :  { %v6647_v55 = vpop.f32.mrf.mxu0 }
  0xcc   :  { %v665_v46 = vmul.f32 %v7895_v40, %v7895_v40  ;;  %v560_v51 = vsel %vm559_vm3, %v7895_v40, 0.0 }
  0xcd   :  { %v318_v56 = vpop.f32.mrf.mxu0 }
  0xce   :  { %v7892_v39 = vadd.f32 %v7887_v37, %v318_v56 }
  0xcf   :  { %v6650_v57 = vpop.f32.mrf.mxu0 }
  0xd0   :  { %v666_v44 = vmul.f32 %v7892_v39, %v7892_v39  ;;  %v561_v48 = vsel %vm559_vm3, %v7892_v39, 0.0  ;;  %v714_v57 = vsel %vm559_vm3, %v665_v46, 0.0 }
  0xd1   :  { %v323_v58 = vpop.f32.mrf.mxu0 }
  0xd2   :  { %v7898_v42 = vadd.f32 %v7887_v37, %v323_v58  ;;  %v715_v53 = vsel %vm559_vm3, %v666_v44, 0.0  ;;  %v562_v58 = vadd.f32 %v561_v48, %v560_v51 }
  0xd3   :  { %v6653_v59 = vpop.f32.mrf.mxu0 }
  0xd4   :  { %v667_v49 = vmul.f32 %v7898_v42, %v7898_v42  ;;  %v563_v54 = vsel %vm559_vm3, %v7898_v42, 0.0 }
  0xd5   :  { %v328_v60 = vpop.f32.mrf.mxu0 }
  0xd6   :  { %v7905_v45 = vadd.f32 %v7887_v37, %v328_v60  ;;  %v717_v60 = vsel %vm559_vm3, %v667_v49, 0.0 }
  0xd7   :  { %v6656_v61 = vpop.f32.mrf.mxu0 }
  0xd8   :  { %v668_v55 = vmul.f32 %v7905_v45, %v7905_v45  ;;  %v565_v61 = vsel %vm559_vm3, %v7905_v45, 0.0 }
  0xd9   :  { %v333_v62 = vpop.f32.mrf.mxu0 }
  0xda   :  { %v7914_v50 = vadd.f32 %v7887_v37, %v333_v62 }
  0xdb   :  { %v6659_v63 = vpop.f32.mrf.mxu0 }
  0xdc   :  { %v669_v62 = vmul.f32 %v7914_v50, %v7914_v50 }
  0xdd   :  { %v338_v1 = vpop.f32.mrf.mxu0 }
  0xde   :  { %v7926_v56 = vadd.f32 %v7887_v37, %v338_v1  ;;  %v719_v1 = vsel %vm559_vm3, %v668_v55, 0.0 }
  0xdf   :  { %v6662_v2 = vpop.f32.mrf.mxu0 }
  0xe0   :  { %v716_v2 = vadd.f32 %v715_v53, %v714_v57 }
  0xe1   :  { %v343_v3 = vpop.f32.mrf.mxu0 }
  0xe2   :  { %v7935_v63 = vadd.f32 %v7887_v37, %v343_v3 }
  0xe3   :  { %v6665_v4 = vpop.f32.mrf.mxu0 }
  0xe4   :  { %v564_v4 = vadd.f32 %v563_v54, %v562_v58 }
  0xe5   :  { %v7852_v5 = vpop.f32.mrf.mxu0 }
  0xe7   :  { %v6668_v6 = vpop.f32.mrf.mxu0 }
  0xe9   :  { %v7854_v7 = vpop.f32.mrf.mxu0 }
  0xeb   :  { %v6671_v8 = vpop.f32.mrf.mxu0 }
  0xec   :  { %v567_v8 = vsel %vm559_vm3, %v7914_v50, 0.0 }
  0xed   :  { %v7856_v9 = vpop.f32.mrf.mxu0 }
  0xef   :  { %v6674_v10 = vpop.f32.mrf.mxu0 }
  0xf0   :  { %v670_v10 = vmul.f32 %v7926_v56, %v7926_v56 }
  0xf1   :  { %v7858_v11 = vpop.f32.mrf.mxu0 }
  0xf2   :  { %v7975_v49 = vadd.f32 %v7887_v37, %v7858_v11 }
  0xf3   :  { %v6677_v12 = vpop.f32.mrf.mxu0 }
  0xf4   :  { %v7946_v12 = vadd.f32 %v7887_v37, %v7852_v5  ;;  %v723_v5 = vsel %vm559_vm3, %v670_v10, 0.0 }
  0xf5   :  { %v7860_v13 = vpop.f32.mrf.mxu0 }
  0xf6   :  { %11949 = vst [vmem:[#allocation2_spill] sm:$0xff] %v7946_v12  ;;  %v7986_v58 = vadd.f32 %v7887_v37, %v7860_v13 }
  0xf7   :  { %v6680_v14 = vpop.f32.mrf.mxu0 }
  0xf8   :  { %v718_v14 = vadd.f32 %v717_v60, %v716_v2  ;;  %v675_v2 = vmul.f32 %v7975_v49, %v7975_v49 }
  0xf9   :  { %v7862_v15 = vpop.f32.mrf.mxu0 }
  0xfb   :  { %v6683_v16 = vpop.f32.mrf.mxu0 }
  0xfc   :  { %v566_v16 = vadd.f32 %v565_v61, %v564_v4  ;;  %v7995_v4 = vadd.f32 %v7887_v37, %v7862_v15 }
  0xfd   :  { %v7864_v17 = vpop.f32.mrf.mxu0 }
  0xff   :  { %v6686_v18 = vpop.f32.mrf.mxu0 }
 0x100   :  { %v721_v18 = vsel %vm559_vm3, %v669_v62, 0.0 }
 0x101   :  { %v7866_v19 = vpop.f32.mrf.mxu0 }
 0x103   :  { %v6689_v20 = vpop.f32.mrf.mxu0 }
 0x104   :  { %v569_v20 = vsel %vm559_vm3, %v7926_v56, 0.0 }
 0x105   :  { %v7868_v21 = vpop.f32.mrf.mxu0 }
 0x107   :  { %v6692_v22 = vpop.f32.mrf.mxu0 }
 0x108   :  { %v671_v22 = vmul.f32 %v7935_v63, %v7935_v63 }
 0x109   :  { %v7870_v23 = vpop.f32.mrf.mxu0 }
 0x10a   :  { %v725_v46 = vsel %vm559_vm3, %v671_v22, 0.0  ;;  %v733_v22 = vsel %vm559_vm3, %v675_v2, 0.0 }
 0x10b   :  { %v6695_v24 = vpop.f32.mrf.mxu0 }
 0x10c   :  { %v7955_v24 = vadd.f32 %v7887_v37, %v7854_v7 }
 0x10d   :  { %v7872_v25 = vpop.f32.mrf.mxu0 }
 0x10e   :  { %v673_v48 = vmul.f32 %v7955_v24, %v7955_v24  ;;  %v575_v55 = vsel %vm559_vm3, %v7955_v24, 0.0 }
 0x10f   :  { %v6698_v26 = vpop.f32.mrf.mxu0 }
 0x110   :  { %v720_v26 = vadd.f32 %v719_v1, %v718_v14  ;;  %v729_v61 = vsel %vm559_vm3, %v673_v48, 0.0  ;;  %v579_v14 = vsel %vm559_vm3, %v7975_v49, 0.0 }
 0x111   :  { %v7874_v27 = vpop.f32.mrf.mxu0 }
 0x113   :  { %v6701_v28 = vpop.f32.mrf.mxu0 }
 0x114   :  { %v568_v28 = vadd.f32 %v567_v8, %v566_v16  ;;  %v676_v16 = vmul.f32 %v7986_v58, %v7986_v58 }
 0x115   :  { %v7876_v29 = vpop.f32.mrf.mxu0 }
 0x116   :  { %v570_v44 = vadd.f32 %v569_v20, %v568_v28  ;;  %v677_v28 = vmul.f32 %v7995_v4, %v7995_v4 }
 0x117   :  { %v6704_v30 = vpop.f32.mrf.mxu0 }
 0x119   :  { %v7878_v31 = vpop.f32.mrf.mxu0 }
 0x11b   :  { %v6707_v32 = vpop.f32.mrf.mxu0 }
 0x11c   :  { %v571_v32 = vsel %vm559_vm3, %v7935_v63, 0.0 }
 0x11d   :  { %v7880_v33 = vpop.f32.mrf.mxu0  ;;  %v572_v53 = vadd.f32 %v571_v32, %v570_v44  ;;  %v583_v44 = vsel %vm559_vm3, %v7995_v4, 0.0 }
 0x11f   :  { %v6710_v34 = vpop.f32.mrf.mxu0 }
 0x120   :  { %v672_v34 = vmul.f32 %v7946_v12, %v7946_v12 }
 0x121   :  { %v7882_v35 = vpop.f32.mrf.mxu0 }
 0x123   :  { %v6713_v36 = vpop.f32.mrf.mxu0 }
 0x124   :  { %v7966_v36 = vadd.f32 %v7887_v37, %v7856_v9  ;;  %v727_v9 = vsel %vm559_vm3, %v672_v34, 0.0 }
 0x125   :  { %v7889_v38 = vpop.f32.mrf.mxu0 }
 0x126   :  { %v674_v57 = vmul.f32 %v7966_v36, %v7966_v36  ;;  %v577_v62 = vsel %vm559_vm3, %v7966_v36, 0.0 }
 0x127   :  { %v6716_v41 = vpop.f32.mrf.mxu0 }
 0x128   :  { %v722_v41 = vadd.f32 %v721_v18, %v720_v26  ;;  %v731_v13 = vsel %vm559_vm3, %v674_v57, 0.0  ;;  %v581_v26 = vsel %vm559_vm3, %v7986_v58, 0.0 }
 0x129   :  { %v7900_v43 = vpop.f32.mrf.mxu0 }
 0x12a   :  { %v724_v51 = vadd.f32 %v723_v5, %v722_v41  ;;  %v8015_v5 = vadd.f32 %v7887_v37, %v7866_v19 }
 0x12b   :  { %v6719_v47 = vpop.f32.mrf.mxu0 }
 0x12c   :  { %v573_v47 = vsel %vm559_vm3, %v7946_v12, 0.0 }
 0x12d   :  { %v7918_v52 = vpop.f32.mrf.mxu0  ;;  %v574_v60 = vadd.f32 %v573_v47, %v572_v53 }
 0x12f   :  { %v6722_v59 = vpop.f32.mrf.mxu0  ;;  %v576_v8 = vadd.f32 %v575_v55, %v574_v60  ;;  %v8035_v55 = vadd.f32 %v7887_v37, %v7870_v23 }
 0x130   :  { %v726_v59 = vadd.f32 %v725_v46, %v724_v51  ;;  %v8026_v46 = vadd.f32 %v7887_v37, %v7868_v21  ;;  %v737_v51 = vsel %vm559_vm3, %v677_v28, 0.0  ;;  %v8066_v28 = vadd.f32 %v7887_v37, %v7876_v29 }
 0x131   :  { %v7937_v6 = vpop.f32.mrf.mxu0  ;;  %v578_v20 = vadd.f32 %v577_v62, %v576_v8  ;;  %v8046_v62 = vadd.f32 %v7887_v37, %v7872_v25 }
 0x132   :  { %v728_v1 = vadd.f32 %v727_v9, %v726_v59  ;;  %11950 = vst [vmem:[#allocation3_spill] sm:$0xff] %v8026_v46  ;;  %v679_v9 = vmul.f32 %v8015_v5, %v8015_v5  ;;  %11952 = vst [vmem:[#allocation5_spill] sm:$0xff] %v8066_v28 }
 0x133   :  { %v6725_v3 = vpop.f32.mrf.mxu0  ;;  %v580_v34 = vadd.f32 %v579_v14, %v578_v20  ;;  %v681_v14 = vmul.f32 %v8035_v55, %v8035_v55 }
 0x134   :  { %v8006_v3 = vadd.f32 %v7887_v37, %v7864_v17  ;;  %v730_v18 = vadd.f32 %v729_v61, %v728_v1  ;;  %v735_v17 = vsel %vm559_vm3, %v676_v16, 0.0  ;;  %v680_v61 = vmul.f32 %v8026_v46, %v8026_v46 }
 0x135   :  { %v7957_v30 = vpop.f32.mrf.mxu0  ;;  %v582_v48 = vadd.f32 %v581_v26, %v580_v34  ;;  %v741_v8 = vsel %vm559_vm3, %v679_v9, 0.0  ;;  %v8055_v16 = vadd.f32 %v7887_v37, %v7874_v27  ;;  %v682_v26 = vmul.f32 %v8046_v62, %v8046_v62 }
 0x136   :  { %v732_v32 = vadd.f32 %v731_v13, %v730_v18  ;;  %v585_v53 = vsel %vm559_vm3, %v8006_v3, 0.0  ;;  %v589_v13 = vsel %vm559_vm3, %v8026_v46, 0.0  ;;  %v743_v25 = vsel %vm559_vm3, %v680_v61, 0.0 }
 0x137   :  { %v6728_v7 = vpop.f32.mrf.mxu0  ;;  %v584_v59 = vadd.f32 %v583_v44, %v582_v48  ;;  %11951 = vst [vmem:[#allocation4_spill] sm:$0xff] %v8055_v16  ;;  %v593_v44 = vsel %vm559_vm3, %v8046_v62, 0.0  ;;  %v747_v29 = vsel %vm559_vm3, %v682_v26, 0.0  ;;  %v684_v9 = vmul.f32 %v8066_v28, %v8066_v28 }
 0x138   :  { %v678_v7 = vmul.f32 %v8006_v3, %v8006_v3  ;;  %v734_v47 = vadd.f32 %v733_v22, %v732_v32  ;;  %v591_v22 = vsel %vm559_vm3, %v8035_v55, 0.0  ;;  %v597_v61 = vsel %vm559_vm3, %v8066_v28, 0.0 }
 0x139   :  { %v7977_v54 = vpop.f32.mrf.mxu0  ;;  %v586_v1 = vadd.f32 %v585_v53, %v584_v59  ;;  %v595_v53 = vsel %vm559_vm3, %v8055_v16, 0.0 }
 0x13a   :  { %v736_v57 = vadd.f32 %v735_v17, %v734_v47  ;;  %v739_v21 = vsel %vm559_vm3, %v678_v7, 0.0  ;;  %v745_v17 = vsel %vm559_vm3, %v681_v14, 0.0  ;;  %v683_v7 = vmul.f32 %v8055_v16, %v8055_v16 }
 0x13b   :  { %v6731_v11 = vpop.f32.mrf.mxu0  ;;  %v8075_v47 = vadd.f32 %v7887_v37, %v7878_v31 }
 0x13c   :  { %v587_v11 = vsel %vm559_vm3, %v8015_v5, 0.0  ;;  %v738_v2 = vadd.f32 %v737_v51, %v736_v57  ;;  %v8086_v57 = vadd.f32 %v7887_v37, %v7880_v33  ;;  %v751_v33 = vsel %vm559_vm3, %v684_v9, 0.0 }
 0x13d   :  { %v7997_v10 = vpop.f32.mrf.mxu0  ;;  %v588_v20 = vadd.f32 %v587_v11, %v586_v1  ;;  %11953 = vst [vmem:[#allocation6_spill] sm:$0xff] %v8075_v47  ;;  %v749_v11 = vsel %vm559_vm3, %v683_v7, 0.0  ;;  %v8095_v1 = vadd.f32 %v7887_v37, %v7882_v35  ;;  %v599_v14 = vsel %vm559_vm3, %v8075_v47, 0.0 }
 0x13e   :  { %v740_v18 = vadd.f32 %v739_v21, %v738_v2  ;;  %11954 = vst [vmem:[#allocation7_spill] sm:$0xff] %v8086_v57  ;;  %v685_v2 = vmul.f32 %v8075_v47, %v8075_v47 }
 0x13f   :  { %v6734_v15 = vpop.f32.mrf.mxu0  ;;  %v590_v34 = vadd.f32 %v589_v13, %v588_v20  ;;  %11955 = vst [vmem:[#allocation8_spill] sm:$0xff] %v8095_v1  ;;  %v8106_v20 = vadd.f32 %v7887_v37, %v7889_v38 }
 0x140   :  { %v742_v32 = vadd.f32 %v741_v8, %v740_v18  ;;  %v686_v18 = vmul.f32 %v8086_v57, %v8086_v57  ;;  %v753_v26 = vsel %vm559_vm3, %v685_v2, 0.0 }
 0x141   :  { %v8017_v41 = vpop.f32.mrf.mxu0  ;;  %11956 = vst [vmem:[#allocation9_spill] sm:$0xff] %v8106_v20 }
 0x142   :  { %v744_v48 = vadd.f32 %v743_v25, %v742_v32  ;;  %v601_v32 = vsel %vm559_vm3, %v8086_v57, 0.0  ;;  %v755_v38 = vsel %vm559_vm3, %v686_v18, 0.0 }
 0x143   :  { %v6737_v19 = vpop.f32.mrf.mxu0 }
 0x144   :  { %v592_v19 = vadd.f32 %v591_v22, %v590_v34  ;;  %v746_v59 = vadd.f32 %v745_v17, %v744_v48  ;;  %v687_v34 = vmul.f32 %v8095_v1, %v8095_v1  ;;  %v603_v48 = vsel %vm559_vm3, %v8095_v1, 0.0 }
 0x145   :  { %v8037_v60 = vpop.f32.mrf.mxu0 }
 0x146   :  { %v594_v21 = vadd.f32 %v593_v44, %v592_v19  ;;  %v688_v19 = vmul.f32 %v8106_v20, %v8106_v20 }
 0x147   :  { %v6740_v23 = vpop.f32.mrf.mxu0 }
 0x148   :  { %v748_v23 = vadd.f32 %v747_v29, %v746_v59  ;;  %v596_v8 = vadd.f32 %v595_v53, %v594_v21  ;;  %v8126_v29 = vadd.f32 %v7887_v37, %v7918_v52  ;;  %v757_v59 = vsel %vm559_vm3, %v687_v34, 0.0 }
 0x149   :  { %v8057_v15 = vpop.f32.mrf.mxu0  ;;  %v605_v21 = vsel %vm559_vm3, %v8106_v20, 0.0  ;;  %v759_v52 = vsel %vm559_vm3, %v688_v19, 0.0  ;;  %v8164_v19 = vadd.f32 %v7887_v37, %v7997_v10 }
 0x14a   :  { %v750_v25 = vadd.f32 %v749_v11, %v748_v23  ;;  %v598_v22 = vadd.f32 %v597_v61, %v596_v8  ;;  %v8135_v11 = vadd.f32 %v7887_v37, %v7937_v6 }
 0x14b   :  { %v6743_v27 = vpop.f32.mrf.mxu0 }
 0x14c   :  { %v8115_v27 = vadd.f32 %v7887_v37, %v7900_v43  ;;  %v752_v17 = vadd.f32 %v751_v33, %v750_v25  ;;  %v600_v44 = vadd.f32 %v599_v14, %v598_v22  ;;  %v690_v33 = vmul.f32 %v8126_v29, %v8126_v29 }
 0x14d   :  { %v8077_v51 = vpop.f32.mrf.mxu0  ;;  %v8146_v14 = vadd.f32 %v7887_v37, %v7957_v30 }
 0x14e   :  { %11957 = vst [vmem:[#allocation10_spill] sm:$0xff] %v8115_v27  ;;  %v754_v53 = vadd.f32 %v753_v26, %v752_v17  ;;  %v602_v9 = vadd.f32 %v601_v32, %v600_v44  ;;  %v607_v8 = vsel %vm559_vm3, %v8115_v27, 0.0  ;;  %v691_v26 = vmul.f32 %v8135_v11, %v8135_v11 }
 0x14f   :  { %v6746_v31 = vpop.f32.mrf.mxu0  ;;  %v8155_v32 = vadd.f32 %v7887_v37, %v7977_v54  ;;  %v763_v30 = vsel %vm559_vm3, %v690_v33, 0.0  ;;  %v694_v33 = vmul.f32 %v8164_v19, %v8164_v19 }
 0x150   :  { %v689_v31 = vmul.f32 %v8115_v27, %v8115_v27  ;;  %v756_v61 = vadd.f32 %v755_v38, %v754_v53  ;;  %v604_v2 = vadd.f32 %v603_v48, %v602_v9  ;;  %v611_v38 = vsel %vm559_vm3, %v8135_v11, 0.0 }
 0x151   :  { %v8097_v13 = vpop.f32.mrf.mxu0  ;;  %v692_v48 = vmul.f32 %v8146_v14, %v8146_v14  ;;  %v765_v54 = vsel %vm559_vm3, %v691_v26, 0.0 }
 0x152   :  { %v758_v18 = vadd.f32 %v757_v59, %v756_v61  ;;  %v606_v25 = vadd.f32 %v605_v21, %v604_v2  ;;  %v761_v22 = vsel %vm559_vm3, %v689_v31, 0.0  ;;  %v613_v59 = vsel %vm559_vm3, %v8146_v14, 0.0 }
 0x153   :  { %v6749_v35 = vpop.f32.mrf.mxu0  ;;  %v693_v21 = vmul.f32 %v8155_v32, %v8155_v32  ;;  %v8173_v31 = vadd.f32 %v7887_v37, %v8017_v41  ;;  %v767_v10 = vsel %vm559_vm3, %v692_v48, 0.0 }
 0x154   :  { %v609_v35 = vsel %vm559_vm3, %v8126_v29, 0.0  ;;  %v760_v34 = vadd.f32 %v759_v52, %v758_v18  ;;  %v608_v17 = vadd.f32 %v607_v8, %v606_v25  ;;  %v615_v8 = vsel %vm559_vm3, %v8155_v32, 0.0 }
 0x155   :  { %v8117_v7 = vpop.f32.mrf.mxu0  ;;  %v8182_v18 = vadd.f32 %v7887_v37, %v8037_v60  ;;  %v769_v41 = vsel %vm559_vm3, %v693_v21, 0.0  ;;  %v695_v26 = vmul.f32 %v8173_v31, %v8173_v31  ;;  %v771_v60 = vsel %vm559_vm3, %v694_v33, 0.0 }
 0x156   :  { %v762_v53 = vadd.f32 %v761_v22, %v760_v34  ;;  %v610_v9 = vadd.f32 %v609_v35, %v608_v17  ;;  %v617_v35 = vsel %vm559_vm3, %v8164_v19, 0.0  ;;  %v8191_v34 = vadd.f32 %v7887_v37, %v8057_v15 }
 0x157   :  { %v6752_v43 = vpop.f32.mrf.mxu0  ;;  %v619_v48 = vsel %vm559_vm3, %v8173_v31, 0.0  ;;  %v773_v15 = vsel %vm559_vm3, %v695_v26, 0.0  ;;  %v621_v21 = vsel %vm559_vm3, %v8182_v18, 0.0 }
 0x158   :  { %v764_v61 = vadd.f32 %v763_v30, %v762_v53  ;;  %v612_v2 = vadd.f32 %v611_v38, %v610_v9  ;;  %v696_v53 = vmul.f32 %v8182_v18, %v8182_v18  ;;  %v8200_v9 = vadd.f32 %v7887_v37, %v8077_v51 }
 0x159   :  { %v8137_v23 = vpop.f32.mrf.mxu0 }
 0x15a   :  { %v766_v25 = vadd.f32 %v765_v54, %v764_v61  ;;  %v697_v61 = vmul.f32 %v8191_v34, %v8191_v34  ;;  %v775_v51 = vsel %vm559_vm3, %v696_v53, 0.0 }
 0x15b   :  { %v6755_v6 = vpop.f32.mrf.mxu0 }
 0x15c   :  { %v614_v6 = vadd.f32 %v613_v59, %v612_v2  ;;  %v768_v17 = vadd.f32 %v767_v10, %v766_v25  ;;  %v8209_v2 = vadd.f32 %v7887_v37, %v8097_v13  ;;  %v623_v25 = vsel %vm559_vm3, %v8191_v34, 0.0 }
 0x15d   :  { %v498_v44 = vpop.f32.mrf.mxu0  ;;  %v777_v13 = vsel %vm559_vm3, %v697_v61, 0.0 }
 0x15e   :  { %v616_v30 = vadd.f32 %v615_v8, %v614_v6  ;;  %v698_v6 = vmul.f32 %v8200_v9, %v8200_v9 }
 0x15f   :  { %v6758_v43 = vpop.f32.mrf.mxu0 }
 0x160   :  { %v770_v43 = vadd.f32 %v769_v41, %v768_v17  ;;  %v618_v54 = vadd.f32 %v617_v35, %v616_v30  ;;  %v625_v17 = vsel %vm559_vm3, %v8200_v9, 0.0  ;;  %v699_v30 = vmul.f32 %v8209_v2, %v8209_v2 }
 0x161   :  { %v503_v52 = vpop.f32.mrf.mxu0 }
 0x162   :  { %v772_v10 = vadd.f32 %v771_v60, %v770_v43  ;;  %v620_v8 = vadd.f32 %v619_v48, %v618_v54  ;;  %v8227_v60 = vadd.f32 %v7887_v37, %v8137_v23  ;;  %v627_v54 = vsel %vm559_vm3, %v8209_v2, 0.0 }
 0x163   :  { %v6761_v22 = vpop.f32.mrf.mxu0  ;;  %v781_v23 = vsel %vm559_vm3, %v699_v30, 0.0 }
 0x164   :  { %v8218_v22 = vadd.f32 %v7887_v37, %v8117_v7  ;;  %v774_v41 = vadd.f32 %v773_v15, %v772_v10  ;;  %v622_v35 = vadd.f32 %v621_v21, %v620_v8  ;;  %v779_v7 = vsel %vm559_vm3, %v698_v6, 0.0 }
 0x165   :  { %v508_v38 = vpop.f32.mrf.mxu0  ;;  %v8235_v15 = vadd.f32 %v7887_v37, %v498_v44 }
 0x166   :  { %v776_v48 = vadd.f32 %v775_v51, %v774_v41  ;;  %v624_v53 = vadd.f32 %v623_v25, %v622_v35  ;;  %v629_v8 = vsel %vm559_vm3, %v8218_v22, 0.0  ;;  %v701_v51 = vmul.f32 %v8227_v60, %v8227_v60 }
 0x167   :  { %v6764_v59 = vpop.f32.mrf.mxu0  ;;  %v8243_v25 = vadd.f32 %v7887_v37, %v503_v52 }
 0x168   :  { %v700_v59 = vmul.f32 %v8218_v22, %v8218_v22  ;;  %v778_v21 = vadd.f32 %v777_v13, %v776_v48  ;;  %v626_v61 = vadd.f32 %v625_v17, %v624_v53  ;;  %v702_v13 = vmul.f32 %v8235_v15, %v8235_v15 }
 0x169   :  { %v513_v33 = vpop.f32.mrf.mxu0  ;;  %v8251_v17 = vadd.f32 %v7887_v37, %v508_v38  ;;  %v785_v52 = vsel %vm559_vm3, %v701_v51, 0.0 }
 0x16a   :  { %v780_v6 = vadd.f32 %v779_v7, %v778_v21  ;;  %v628_v41 = vadd.f32 %v627_v54, %v626_v61  ;;  %v783_v44 = vsel %vm559_vm3, %v700_v59, 0.0  ;;  %v633_v7 = vsel %vm559_vm3, %v8235_v15, 0.0 }
 0x16b   :  { %v6767_v26 = vpop.f32.mrf.mxu0  ;;  %v703_v54 = vmul.f32 %v8243_v25, %v8243_v25  ;;  %v8259_v59 = vadd.f32 %v7887_v37, %v513_v33  ;;  %v787_v38 = vsel %vm559_vm3, %v702_v13, 0.0 }
 0x16c   :  { %v631_v26 = vsel %vm559_vm3, %v8227_v60, 0.0  ;;  %v782_v30 = vadd.f32 %v781_v23, %v780_v6  ;;  %v630_v48 = vadd.f32 %v629_v8, %v628_v41  ;;  %v635_v23 = vsel %vm559_vm3, %v8243_v25, 0.0 }
 0x16d   :  { %v518_v43 = vpop.f32.mrf.mxu0  ;;  %v704_v8 = vmul.f32 %v8251_v17, %v8251_v17  ;;  %v789_v33 = vsel %vm559_vm3, %v703_v54, 0.0 }
 0x16e   :  { %v784_v21 = vadd.f32 %v783_v44, %v782_v30  ;;  %v632_v61 = vadd.f32 %v631_v26, %v630_v48  ;;  %v8267_v51 = vadd.f32 %v7887_v37, %v518_v43  ;;  %v637_v44 = vsel %vm559_vm3, %v8251_v17, 0.0 }
 0x16f   :  { %v6770_v10 = vpop.f32.mrf.mxu0  ;;  %v705_v26 = vmul.f32 %v8259_v59, %v8259_v59  ;;  %v791_v43 = vsel %vm559_vm3, %v704_v8, 0.0 }
 0x170   :  { %v786_v6 = vadd.f32 %v785_v52, %v784_v21  ;;  %v634_v41 = vadd.f32 %v633_v7, %v632_v61  ;;  %v639_v52 = vsel %vm559_vm3, %v8259_v59, 0.0  ;;  %v706_v7 = vmul.f32 %v8267_v51, %v8267_v51 }
 0x171   :  { %v523_v35 = vpop.f32.mrf.mxu0 }
 0x172   :  { %v8275_v13 = vadd.f32 %v7887_v37, %v523_v35  ;;  %v788_v30 = vadd.f32 %v787_v38, %v786_v6  ;;  %v636_v48 = vadd.f32 %v635_v23, %v634_v41  ;;  %v793_v35 = vsel %vm559_vm3, %v705_v26, 0.0 }
 0x173   :  { %v6773_v53 = vpop.f32.mrf.mxu0  ;;  %v641_v38 = vsel %vm559_vm3, %v8267_v51, 0.0 }
 0x174   :  { %v790_v21 = vadd.f32 %v789_v33, %v788_v30  ;;  %v638_v61 = vadd.f32 %v637_v44, %v636_v48  ;;  %v707_v23 = vmul.f32 %v8275_v13, %v8275_v13  ;;  %v643_v33 = vsel %vm559_vm3, %v8275_v13, 0.0 }
 0x175   :  { %v528_v10 = vpop.f32.mrf.mxu0 }
 0x176   :  { %v8283_v54 = vadd.f32 %v7887_v37, %v528_v10  ;;  %v792_v6 = vadd.f32 %v791_v43, %v790_v21  ;;  %v640_v41 = vadd.f32 %v639_v52, %v638_v61  ;;  %v795_v10 = vsel %vm559_vm3, %v706_v7, 0.0 }
 0x177   :  { %v6776_v53 = vpop.f32.mrf.mxu0 }
 0x178   :  { %v708_v44 = vmul.f32 %v8283_v54, %v8283_v54  ;;  %v794_v30 = vadd.f32 %v793_v35, %v792_v6  ;;  %v642_v48 = vadd.f32 %v641_v38, %v640_v41  ;;  %v645_v43 = vsel %vm559_vm3, %v8283_v54, 0.0 }
 0x179   :  { %v533_v0 = vpop.f32.mrf.mxu0 }
 0x17a   :  { %v8291_v8 = vadd.f32 %v7887_v37, %v533_v0  ;;  %v797_v0 = vsel %vm559_vm3, %v707_v23, 0.0  ;;  %v796_v7 = vadd.f32 %v795_v10, %v794_v30  ;;  %v644_v21 = vadd.f32 %v643_v33, %v642_v48 }
 0x17b   :  { %v6779_v53 = vpop.f32.mrf.mxu0  ;;  %v799_v28 = vsel %vm559_vm3, %v708_v44, 0.0 }
 0x17c   :  { %v709_v52 = vmul.f32 %v8291_v8, %v8291_v8  ;;  %v798_v23 = vadd.f32 %v797_v0, %v796_v7  ;;  %v646_v6 = vadd.f32 %v645_v43, %v644_v21 }
 0x17d   :  { %v538_v16 = vpop.f32.mrf.mxu0 }
 0x17e   :  { %v8299_v26 = vadd.f32 %v7887_v37, %v538_v16  ;;  %v647_v16 = vsel %vm559_vm3, %v8291_v8, 0.0  ;;  %v800_v44 = vadd.f32 %v799_v28, %v798_v23 }
 0x17f   :  { %v6782_v53 = vpop.f32.mrf.mxu0  ;;  %v648_v30 = vadd.f32 %v647_v16, %v646_v6 }
 0x180   :  { %v710_v35 = vmul.f32 %v8299_v26, %v8299_v26  ;;  %v801_v53 = vsel %vm559_vm3, %v709_v52, 0.0  ;;  %v649_v10 = vsel %vm559_vm3, %v8299_v26, 0.0 }
 0x181   :  { %v543_v61 = vpop.f32.mrf.mxu0  ;;  %v802_v43 = vadd.f32 %v801_v53, %v800_v44  ;;  %v650_v7 = vadd.f32 %v649_v10, %v648_v30 }
 0x182   :  { %v8312_v38 = vadd.f32 %v7887_v37, %v543_v61  ;;  %v803_v47 = vsel %vm559_vm3, %v710_v35, 0.0 }
 0x183   :  { %v6785_v41 = vpop.f32.mrf.mxu0  ;;  %v804_v16 = vadd.f32 %v803_v47, %v802_v43 }
 0x184   :  { %v711_v33 = vmul.f32 %v8312_v38, %v8312_v38  ;;  %v651_v61 = vsel %vm559_vm3, %v8312_v38, 0.0 }
 0x185   :  { %v548_v48 = vpop.f32.mrf.mxu0  ;;  %v652_v23 = vadd.f32 %v651_v61, %v650_v7 }
 0x186   :  { %v8323_v0 = vadd.f32 %v7887_v37, %v548_v48  ;;  %v805_v21 = vsel %vm559_vm3, %v711_v33, 0.0 }
 0x187   :  { %v6788_v52 = vpop.f32.mrf.mxu0  ;;  %v806_v48 = vadd.f32 %v805_v21, %v804_v16 }
 0x188   :  { %v653_v41 = vsel %vm559_vm3, %v8323_v0, 0.0  ;;  %v712_v28 = vmul.f32 %v8323_v0, %v8323_v0 }
 0x189   :  { %v553_v35 = vpop.f32.mrf.mxu0  ;;  %v654_v1 = vadd.f32 %v653_v41, %v652_v23 }
 0x18a   :  { %v807_v6 = vsel %vm559_vm3, %v712_v28, 0.0  ;;  %v554_v57 = vadd.f32 %v7887_v37, %v553_v35 }
 0x18b   :  { %v6791_v53 = vpop.f32.mrf.mxu0  ;;  %v808_v33 = vadd.f32 %v807_v6, %v806_v48 }
 0x18c   :  { %v655_v10 = vsel %vm559_vm3, %v554_v57, 0.0  ;;  %v713_v44 = vmul.f32 %v554_v57, %v554_v57  ;;  %v1129_v53 = vld [vmem:[%s11905_s5 + $0x8] sm:$0xff] }
 0x18d   :  { %v656_v30 = vadd.f32 %v655_v10, %v654_v1  ;;  %5970 = vmatprep.mubr.msk.f32.mxu1 %vm1142_vm4, %v1129_v53 }
 0x18e   :  { %v809_v52 = vsel %vm559_vm3, %v713_v44, 0.0 }
 0x18f   :  { %v657_v27 = vrot.slane %v656_v30, 4  ;;  %v810_v20 = vadd.f32 %v809_v52, %v808_v33 }
 0x191   :  { %v658_v12 = vadd.f32 %v657_v27, %v656_v30  ;;  %v811_v47 = vrot.slane %v810_v20, 4 }
 0x193   :  { %v659_v61 = vrot.slane %v658_v12, 2  ;;  %v812_v43 = vadd.f32 %v811_v47, %v810_v20 }
 0x195   :  { %v660_v7 = vadd.f32 %v659_v61, %v658_v12  ;;  %v813_v28 = vrot.slane %v812_v43, 2 }
 0x197   :  { %v661_v46 = vrot.slane %v660_v7, 1  ;;  %v814_v37 = vadd.f32 %v813_v28, %v812_v43 }
 0x199   :  { %v662_v21 = vadd.f32 %v661_v46, %v660_v7  ;;  %v815_v41 = vrot.slane %v814_v37, 1 }
 0x19b   :  { %v8334_v16 = vmul.f32 0.0025510204, %v662_v21  ;;  %v816_v23 = vadd.f32 %v815_v41, %v814_v37 }
 0x19d   :  { %v817_v35 = vmul.f32 0.0025510204, %v816_v23  ;;  %v818_v1 = vmul.f32 %v8334_v16, %v8334_v16  ;;  %v868_v6 = vsub.f32 %v554_v57, %v8334_v16  ;;  %v859_v12 = vsub.f32 %v8251_v17, %v8334_v16 }
 0x19e   :  { %v860_v20 = vsub.f32 %v8259_v59, %v8334_v16  ;;  %v861_v46 = vsub.f32 %v8267_v51, %v8334_v16  ;;  %v862_v10 = vsub.f32 %v8275_v13, %v8334_v16  ;;  %v863_v57 = vsub.f32 %v8283_v54, %v8334_v16  ;;  %v8366_v13 = vld [vmem:[%s11906_s3] ss:$0 sm:$0xff] }
 0x19f   :  { %v819_v48 = vsub.f32 %v817_v35, %v818_v1  ;;  %v864_v44 = vsub.f32 %v8291_v8, %v8334_v16  ;;  %v865_v17 = vsub.f32 %v8299_v26, %v8334_v16  ;;  %v866_v59 = vsub.f32 %v8312_v38, %v8334_v16  ;;  %11958 = vst [vmem:[#allocation11_spill] sm:$0xff] %v8366_v13  ;;  %v8372_v8 = vld [vmem:[%s11907_s4] ss:$0 sm:$0xff] }
 0x1a0   :  { %v867_v51 = vsub.f32 %v8323_v0, %v8334_v16  ;;  %11959 = vst [vmem:[#allocation12_spill] sm:$0xff] %v8372_v8  ;;  %v836_v38 = vsub.f32 %v8035_v55, %v8334_v16  ;;  %v837_v0 = vsub.f32 %v8046_v62, %v8334_v16  ;;  %v845_v30 = vsub.f32 %v8126_v29, %v8334_v16 }
 0x1a1   :  { %v869_v27 = vadd.f32 1e-05, %v819_v48  ;;  %v846_v52 = vsub.f32 %v8135_v11, %v8334_v16  ;;  %v847_v47 = vsub.f32 %v8146_v14, %v8334_v16  ;;  %v848_v43 = vsub.f32 %v8155_v32, %v8334_v16 }
 0x1a2   :  { %v849_v55 = vsub.f32 %v8164_v19, %v8334_v16  ;;  %v850_v29 = vsub.f32 %v8173_v31, %v8334_v16  ;;  %v851_v11 = vsub.f32 %v8182_v18, %v8334_v16  ;;  %v852_v14 = vsub.f32 %v8191_v34, %v8334_v16 }
 0x1a3   :  { %7316 = vrsqrt.f32 %v869_v27  ;;  %v853_v32 = vsub.f32 %v8200_v9, %v8334_v16  ;;  %v854_v19 = vsub.f32 %v8209_v2, %v8334_v16  ;;  %v855_v28 = vsub.f32 %v8218_v22, %v8334_v16 }
 0x1a4   :  { %v856_v31 = vsub.f32 %v8227_v60, %v8334_v16  ;;  %v857_v18 = vsub.f32 %v8235_v15, %v8334_v16  ;;  %v858_v9 = vsub.f32 %v8243_v25, %v8334_v16 }
 0x1b0   :  { %v8361_v33 = vpop.eup %7316 }
 0x1b1   :  { %v919_v54 = vmul.f32 %v8361_v33, %v868_v6  ;;  %v8393_v62 = vmul.f32 %v8361_v33, %v836_v38  ;;  %v8402_v7 = vmul.f32 %v8361_v33, %v837_v0  ;;  %v896_v34 = vmul.f32 %v8361_v33, %v845_v30 }
 0x1b2   :  { %v897_v37 = vmul.f32 %v8361_v33, %v846_v52  ;;  %v898_v21 = vmul.f32 %v8361_v33, %v847_v47  ;;  %v899_v2 = vmul.f32 %v8361_v33, %v848_v43  ;;  %v900_v41 = vmul.f32 %v8361_v33, %v849_v55 }
 0x1b3   :  { %v974_v26 = vmul.f32 %v8366_v13, %v919_v54  ;;  %11961 = vst [vmem:[#allocation14_spill] sm:$0xff] %v8393_v62  ;;  %11962 = vst [vmem:[#allocation15_spill] sm:$0xff] %v8402_v7  ;;  %v901_v22 = vmul.f32 %v8361_v33, %v850_v29  ;;  %v902_v60 = vmul.f32 %v8361_v33, %v851_v11 }
 0x1b4   :  { %v903_v23 = vmul.f32 %v8361_v33, %v852_v14  ;;  %v904_v15 = vmul.f32 %v8361_v33, %v853_v32  ;;  %v905_v35 = vmul.f32 %v8361_v33, %v854_v19  ;;  %v906_v1 = vmul.f32 %v8361_v33, %v855_v28 }
 0x1b5   :  { %v8386_v61 = vadd.f32 %v8372_v8, %v974_v26  ;;  %v907_v6 = vmul.f32 %v8361_v33, %v856_v31  ;;  %v908_v25 = vmul.f32 %v8361_v33, %v857_v18  ;;  %v909_v48 = vmul.f32 %v8361_v33, %v858_v9 }
 0x1b6   :  { %v910_v27 = vmul.f32 %v8361_v33, %v859_v12  ;;  %v911_v53 = vmul.f32 %v8361_v33, %v860_v20  ;;  %v912_v54 = vmul.f32 %v8361_v33, %v861_v46  ;;  %v913_v26 = vmul.f32 %v8361_v33, %v862_v10 }
 0x1b7   :  { %11960 = vst [vmem:[#allocation13_spill] sm:$0xff] %v8386_v61  ;;  %v914_v38 = vmul.f32 %v8361_v33, %v863_v57  ;;  %v915_v0 = vmul.f32 %v8361_v33, %v864_v44  ;;  %v916_v30 = vmul.f32 %v8361_v33, %v865_v17  ;;  %v917_v52 = vmul.f32 %v8361_v33, %v866_v59 }
 0x1b8   :  { %v918_v47 = vmul.f32 %v8361_v33, %v867_v51  ;;  %v951_v43 = vmul.f32 %v8366_v13, %v896_v34  ;;  %v952_v12 = vmul.f32 %v8366_v13, %v897_v37  ;;  %v953_v20 = vmul.f32 %v8366_v13, %v898_v21 }
 0x1b9   :  { %v954_v46 = vmul.f32 %v8366_v13, %v899_v2  ;;  %v955_v10 = vmul.f32 %v8366_v13, %v900_v41  ;;  %v956_v57 = vmul.f32 %v8366_v13, %v901_v22  ;;  %v957_v44 = vmul.f32 %v8366_v13, %v902_v60 }
 0x1ba   :  { %v958_v17 = vmul.f32 %v8366_v13, %v903_v23  ;;  %v959_v59 = vmul.f32 %v8366_v13, %v904_v15  ;;  %v960_v51 = vmul.f32 %v8366_v13, %v905_v35  ;;  %v961_v55 = vmul.f32 %v8366_v13, %v906_v1 }
 0x1bb   :  { %v962_v29 = vmul.f32 %v8366_v13, %v907_v6  ;;  %v963_v11 = vmul.f32 %v8366_v13, %v908_v25  ;;  %v964_v14 = vmul.f32 %v8366_v13, %v909_v48  ;;  %v965_v32 = vmul.f32 %v8366_v13, %v910_v27  ;;  %v11963_v25 = vld [vmem:[#allocation3_spill] sm:$0xff] }
 0x1bc   :  { %v966_v19 = vmul.f32 %v8366_v13, %v911_v53  ;;  %v967_v28 = vmul.f32 %v8366_v13, %v912_v54  ;;  %v968_v31 = vmul.f32 %v8366_v13, %v913_v26  ;;  %v969_v18 = vmul.f32 %v8366_v13, %v914_v38 }
 0x1bd   :  { %v970_v34 = vmul.f32 %v8366_v13, %v915_v0  ;;  %v971_v37 = vmul.f32 %v8366_v13, %v916_v30  ;;  %v820_v21 = vsub.f32 %v7895_v40, %v8334_v16  ;;  %v826_v9 = vsub.f32 %v7935_v63, %v8334_v16 }
 0x1be   :  { %v972_v2 = vmul.f32 %v8366_v13, %v917_v52  ;;  %v973_v41 = vmul.f32 %v8366_v13, %v918_v47  ;;  %v821_v22 = vsub.f32 %v7892_v39, %v8334_v16  ;;  %v822_v60 = vsub.f32 %v7898_v42, %v8334_v16 }
 0x1bf   :  { %v823_v23 = vsub.f32 %v7905_v45, %v8334_v16  ;;  %v824_v15 = vsub.f32 %v7914_v50, %v8334_v16  ;;  %v825_v35 = vsub.f32 %v7926_v56, %v8334_v16  ;;  %v828_v63 = vsub.f32 %v7955_v24, %v8334_v16 }
 0x1c0   :  { %v829_v1 = vsub.f32 %v7966_v36, %v8334_v16  ;;  %v877_v6 = vmul.f32 %v8361_v33, %v826_v9  ;;  %v830_v42 = vsub.f32 %v7975_v49, %v8334_v16  ;;  %v831_v45 = vsub.f32 %v7986_v58, %v8334_v16 }
 0x1c1   :  { %v832_v50 = vsub.f32 %v7995_v4, %v8334_v16  ;;  %v833_v56 = vsub.f32 %v8006_v3, %v8334_v16  ;;  %v834_v24 = vsub.f32 %v8015_v5, %v8334_v16  ;;  %v835_v36 = vsub.f32 %v11963_v25, %v8334_v16 }
 0x1c2   :  { %v879_v48 = vmul.f32 %v8361_v33, %v828_v63  ;;  %v880_v27 = vmul.f32 %v8361_v33, %v829_v1  ;;  %v881_v49 = vmul.f32 %v8361_v33, %v830_v42  ;;  %v882_v58 = vmul.f32 %v8361_v33, %v831_v45 }
 0x1c3   :  { %v883_v53 = vmul.f32 %v8361_v33, %v832_v50  ;;  %v884_v4 = vmul.f32 %v8361_v33, %v833_v56  ;;  %v885_v3 = vmul.f32 %v8361_v33, %v834_v24  ;;  %v886_v54 = vmul.f32 %v8361_v33, %v835_v36  ;;  %v11966_v56 = vld [vmem:[#allocation10_spill] sm:$0xff] }
 0x1c4   :  { %v932_v5 = vmul.f32 %v8366_v13, %v877_v6  ;;  %v8503_v26 = vadd.f32 %v8372_v8, %v951_v43  ;;  %v8506_v38 = vadd.f32 %v8372_v8, %v952_v12  ;;  %v8509_v0 = vadd.f32 %v8372_v8, %v953_v20 }
 0x1c5   :  { %v8512_v30 = vadd.f32 %v8372_v8, %v954_v46  ;;  %v8515_v52 = vadd.f32 %v8372_v8, %v955_v10  ;;  %v8518_v47 = vadd.f32 %v8372_v8, %v956_v57  ;;  %v8521_v9 = vadd.f32 %v8372_v8, %v957_v44 }
 0x1c6   :  { %v8524_v43 = vadd.f32 %v8372_v8, %v958_v17  ;;  %v8527_v12 = vadd.f32 %v8372_v8, %v959_v59  ;;  %v8530_v20 = vadd.f32 %v8372_v8, %v960_v51  ;;  %v8533_v46 = vadd.f32 %v8372_v8, %v961_v55 }
 0x1c7   :  { %v8536_v10 = vadd.f32 %v8372_v8, %v962_v29  ;;  %v8539_v57 = vadd.f32 %v8372_v8, %v963_v11  ;;  %v8542_v44 = vadd.f32 %v8372_v8, %v964_v14  ;;  %v8545_v17 = vadd.f32 %v8372_v8, %v965_v32 }
 0x1c8   :  { %v8548_v59 = vadd.f32 %v8372_v8, %v966_v19  ;;  %v8551_v51 = vadd.f32 %v8372_v8, %v967_v28  ;;  %v8554_v55 = vadd.f32 %v8372_v8, %v968_v31  ;;  %v8557_v29 = vadd.f32 %v8372_v8, %v969_v18  ;;  %v11964_v31 = vld [vmem:[#allocation2_spill] sm:$0xff] }
 0x1c9   :  { %v8560_v11 = vadd.f32 %v8372_v8, %v970_v34  ;;  %v8563_v14 = vadd.f32 %v8372_v8, %v971_v37  ;;  %v934_v32 = vmul.f32 %v8366_v13, %v879_v48  ;;  %v935_v19 = vmul.f32 %v8366_v13, %v880_v27 }
 0x1ca   :  { %v8568_v63 = vadd.f32 %v8372_v8, %v972_v2  ;;  %v8571_v28 = vadd.f32 %v8372_v8, %v973_v41  ;;  %v827_v18 = vsub.f32 %v11964_v31, %v8334_v16  ;;  %v936_v1 = vmul.f32 %v8366_v13, %v881_v49 }
 0x1cb   :  { %v937_v34 = vmul.f32 %v8366_v13, %v882_v58  ;;  %v938_v37 = vmul.f32 %v8366_v13, %v883_v53  ;;  %v875_v6 = vmul.f32 %v8361_v33, %v824_v15  ;;  %v939_v42 = vmul.f32 %v8366_v13, %v884_v4 }
 0x1cc   :  { %v940_v45 = vmul.f32 %v8366_v13, %v885_v3  ;;  %v941_v2 = vmul.f32 %v8366_v13, %v886_v54  ;;  %v873_v25 = vmul.f32 %v8361_v33, %v822_v60  ;;  %v876_v36 = vmul.f32 %v8361_v33, %v825_v35 }
 0x1cd   :  { %v878_v48 = vmul.f32 %v8361_v33, %v827_v18  ;;  %v8590_v15 = vadd.f32 %v8372_v8, %v932_v5  ;;  %v989_v27 = vadd.f32 %v8372_v8, %v934_v32  ;;  %v990_v49 = vadd.f32 %v8372_v8, %v935_v19 }
 0x1ce   :  { %v874_v58 = vmul.f32 %v8361_v33, %v823_v23  ;;  %v991_v53 = vadd.f32 %v8372_v8, %v936_v1  ;;  %v992_v4 = vadd.f32 %v8372_v8, %v937_v34  ;;  %v993_v3 = vadd.f32 %v8372_v8, %v938_v37 }
 0x1cf   :  { %11967 = vst [vmem:[#allocation3_spill] sm:$0xff] %v8590_v15  ;;  %v930_v60 = vmul.f32 %v8366_v13, %v875_v6  ;;  %v994_v35 = vadd.f32 %v8372_v8, %v939_v42  ;;  %v995_v54 = vadd.f32 %v8372_v8, %v940_v45  ;;  %v996_v5 = vadd.f32 %v8372_v8, %v941_v2 }
 0x1d0   :  { %v8606_v32 = vmul.f32 %v8361_v33, %v820_v21  ;;  %v8612_v23 = vmul.f32 %v8361_v33, %v821_v22  ;;  %v8615_v19 = vmul.f32 %v8366_v13, %v873_v25  ;;  %v931_v31 = vmul.f32 %v8366_v13, %v876_v36 }
 0x1d1   :  { %v933_v18 = vmul.f32 %v8366_v13, %v878_v48  ;;  %v8620_v1 = vmul.f32 0.2, %v8590_v15  ;;  %v1038_v40 = vmul.f32 0.2, %v989_v27  ;;  %v1039_v34 = vmul.f32 0.2, %v990_v49 }
 0x1d2   :  { %11968 = vst [vmem:[#allocation2_spill] sm:$0xff] %v8606_v32  ;;  %11969 = vst [vmem:[#allocation10_spill] sm:$0xff] %v8612_v23  ;;  %v8623_v21 = vmul.f32 %v8366_v13, %v874_v58  ;;  %v1040_v37 = vmul.f32 0.2, %v991_v53  ;;  %v1041_v39 = vmul.f32 0.2, %v992_v4  ;;  %v8626_v22 = vadd.f32 %v8372_v8, %v930_v60 }
 0x1d3   :  { %11970 = vst [vmem:[#allocation16_spill] sm:$0xff] %v8615_v19  ;;  %11971 = vst [vmem:[#allocation17_spill] sm:$0xff] %v8620_v1  ;;  %v1042_v6 = vmul.f32 0.2, %v993_v3  ;;  %v1043_v42 = vmul.f32 0.2, %v994_v35  ;;  %v8629_v25 = vadd.f32 %v8372_v8, %v931_v31  ;;  %v8641_v50 = vadd.f32 %v8372_v8, %v933_v18 }
 0x1d4   :  { %11972 = vst [vmem:[#allocation18_spill] sm:$0xff] %v8623_v21  ;;  %11973 = vst [vmem:[#allocation19_spill] sm:$0xff] %v8626_v22  ;;  %v1044_v45 = vmul.f32 0.2, %v995_v54  ;;  %v1045_v2 = vmul.f32 0.2, %v996_v5  ;;  %v8661_v18 = vmax.f32 %v989_v27, %v1038_v40  ;;  %v8672_v19 = vmax.f32 %v990_v49, %v1039_v34 }
 0x1d5   :  { %11974 = vst [vmem:[#allocation20_spill] sm:$0xff] %v8629_v25  ;;  %v8632_v36 = vmul.f32 0.2, %v8503_v26  ;;  %v8635_v48 = vmul.f32 0.2, %v8506_v38  ;;  %v8683_v40 = vmax.f32 %v991_v53, %v1040_v37  ;;  %v8691_v8 = vmax.f32 %v992_v4, %v1041_v39 }
 0x1d6   :  { %v8638_v58 = vmul.f32 0.2, %v8509_v0  ;;  %v8644_v60 = vmul.f32 0.2, %v8512_v30  ;;  %v8647_v24 = vmul.f32 0.2, %v8515_v52  ;;  %v8693_v49 = vmax.f32 %v996_v5, %v1045_v2 }
 0x1d7   :  { %v8650_v31 = vmul.f32 0.2, %v8518_v47  ;;  %v8653_v61 = vmul.f32 0.2, %v8521_v9  ;;  %v8656_v62 = vmul.f32 0.2, %v8524_v43  ;;  %v8704_v53 = vmax.f32 %v993_v3, %v1042_v6 }
 0x1d8   :  { %v8659_v7 = vmul.f32 0.2, %v8527_v12  ;;  %11975 = vst [vmem:[#allocation21_spill] sm:$0xff] %v8661_v18  ;;  %v8664_v15 = vmul.f32 0.2, %v8530_v20  ;;  %v8715_v5 = vmax.f32 %v994_v35, %v1043_v42  ;;  %1169 = vmatpush1.msra.mxu1 %v8693_v49  ;;  %v8718_v39 = vmax.f32 %v995_v54, %v1044_v45  ;;  %1692 = vmatpush1.msra.mxu0 %v8693_v49 }
 0x1d9   :  { %v8667_v1 = vmul.f32 0.2, %v8533_v46  ;;  %v8670_v22 = vmul.f32 0.2, %v8536_v10  ;;  %v8675_v32 = vmul.f32 0.2, %v8539_v57  ;;  %v1104_v2 = vmax.f32 %v8503_v26, %v8632_v36 }
 0x1da   :  { %v8678_v41 = vmul.f32 0.2, %v8542_v44  ;;  %v8681_v27 = vmul.f32 0.2, %v8545_v17  ;;  %v8686_v18 = vmul.f32 0.2, %v8548_v59  ;;  %v1105_v3 = vmax.f32 %v8506_v38, %v8635_v48 }
 0x1db   :  { %v8689_v25 = vmul.f32 0.2, %v8551_v51  ;;  %v8696_v34 = vmul.f32 0.2, %v8554_v55  ;;  %v8699_v21 = vmul.f32 0.2, %v8557_v29  ;;  %v1106_v6 = vmax.f32 %v8509_v0, %v8638_v58 }
 0x1dc   :  { %v8702_v13 = vmul.f32 0.2, %v8560_v11  ;;  %v8707_v37 = vmul.f32 0.2, %v8563_v14  ;;  %v8710_v23 = vmul.f32 0.2, %v8568_v63  ;;  %v1107_v35 = vmax.f32 %v8512_v30, %v8644_v60 }
 0x1dd   :  { %v8713_v4 = vmul.f32 0.2, %v8571_v28  ;;  %v1108_v42 = vmax.f32 %v8515_v52, %v8647_v24  ;;  %v1109_v54 = vmax.f32 %v8518_v47, %v8650_v31  ;;  %v1110_v26 = vmax.f32 %v8521_v9, %v8653_v61 }
 0x1de   :  { %v11976_v45 = vmov 0.0   ;;  %v1111_v38 = vmax.f32 %v8524_v43, %v8656_v62  ;;  %v1112_v0 = vmax.f32 %v8527_v12, %v8659_v7  ;;  %v1113_v30 = vmax.f32 %v8530_v20, %v8664_v15 }
 0x1df   :  { %1170 = vmatprep.subr.mxu1 %v11976_v45  ;;  %v1114_v52 = vmax.f32 %v8533_v46, %v8667_v1  ;;  %1693 = vmatprep.subr.mxu0 %v11976_v45  ;;  %v1115_v47 = vmax.f32 %v8536_v10, %v8670_v22  ;;  %v1116_v61 = vmax.f32 %v8539_v57, %v8675_v32  ;;  %v8764_v46 = vmul.f32 0.2, %v8641_v50 }
 0x1e0   :  { %v1117_v62 = vmax.f32 %v8542_v44, %v8678_v41  ;;  %v1118_v7 = vmax.f32 %v8545_v17, %v8681_v27  ;;  %1171 = vmatpush1.msra.mxu1 %v8718_v39  ;;  %v1119_v9 = vmax.f32 %v8548_v59, %v8686_v18  ;;  %v1120_v43 = vmax.f32 %v8551_v51, %v8689_v25 }
 0x1e1   :  { %v1121_v12 = vmax.f32 %v8554_v55, %v8696_v34  ;;  %v1122_v20 = vmax.f32 %v8557_v29, %v8699_v21  ;;  %1694 = vmatpush1.msra.mxu0 %v8718_v39  ;;  %v1123_v10 = vmax.f32 %v8560_v11, %v8702_v13  ;;  %v1124_v57 = vmax.f32 %v8563_v14, %v8707_v37 }
 0x1e2   :  { %v1125_v44 = vmax.f32 %v8568_v63, %v8710_v23  ;;  %1172 = vmatprep.subr.mxu1 %v11976_v45  ;;  %1695 = vmatprep.subr.mxu0 %v11976_v45  ;;  %v1126_v17 = vmax.f32 %v8571_v28, %v8713_v4  ;;  %v8776_v59 = vrot.slane %v1104_v2, 4  ;;  %v3565_v51 = vrot.slane %v1105_v3, 4 }
 0x1e3   :  { %v3567_v55 = vrot.slane %v1106_v6, 4  ;;  %1173 = vmatpush1.msra.mxu1 %v8715_v5  ;;  %1696 = vmatpush1.msra.mxu0 %v8715_v5  ;;  %v3569_v13 = vrot.slane %v1107_v35, 4  ;;  %v3571_v29 = vrot.slane %v1108_v42, 4  ;;  %v3573_v11 = vrot.slane %v1109_v54, 4 }
 0x1e4   :  { %11977 = vst [vmem:[#allocation22_spill] sm:$0xff] %v8776_v59  ;;  %v3575_v14 = vrot.slane %v1110_v26, 4  ;;  %1174 = vmatprep.subr.mxu1 %v11976_v45  ;;  %1697 = vmatprep.subr.mxu0 %v11976_v45  ;;  %v3577_v63 = vrot.slane %v1111_v38, 4  ;;  %v3579_v41 = vrot.slane %v1112_v0, 4  ;;  %v3581_v24 = vrot.slane %v1113_v30, 4 }
 0x1e5   :  { %v3583_v28 = vrot.slane %v1114_v52, 4  ;;  %1175 = vmatpush1.msra.mxu1 %v8704_v53  ;;  %1698 = vmatpush1.msra.mxu0 %v8704_v53  ;;  %v3585_v15 = vrot.slane %v1115_v47, 4  ;;  %v3587_v32 = vrot.slane %v1116_v61, 4  ;;  %v3589_v23 = vrot.slane %v1117_v62, 4 }
 0x1e6   :  { %v3591_v1 = vrot.slane %v1118_v7, 4  ;;  %1176 = vmatprep.subr.mxu1 %v11976_v45  ;;  %1699 = vmatprep.subr.mxu0 %v11976_v45  ;;  %v3593_v21 = vrot.slane %v1119_v9, 4  ;;  %v3595_v22 = vrot.slane %v1120_v43, 4  ;;  %v3597_v25 = vrot.slane %v1121_v12, 4 }
 0x1e7   :  { %v3599_v36 = vrot.slane %v1122_v20, 4  ;;  %1177 = vmatpush1.msra.mxu1 %v8691_v8  ;;  %1700 = vmatpush1.msra.mxu0 %v8691_v8  ;;  %v3601_v48 = vrot.slane %v1123_v10, 4  ;;  %v3603_v58 = vrot.slane %v1124_v57, 4  ;;  %v3605_v60 = vrot.slane %v1125_v44, 4  ;;  %v11992_v10 = vld [vmem:[#allocation10_spill] sm:$0xff]  ;;  %v11993_v57 = vld [vmem:[#allocation11_spill] sm:$0xff] }
 0x1e8   :  { %v8788_v31 = vrot.slane %v1126_v17, 4  ;;  %1178 = vmatprep.subr.mxu1 %v11976_v45  ;;  %1701 = vmatprep.subr.mxu0 %v11976_v45  ;;  %v8794_v18 = vsel %vm1164_vm5, %v8776_v59, %v3565_v51  ;;  %v8797_v27 = vsel %vm1164_vm5, %v3565_v51, %v3567_v55  ;;  %v8800_v34 = vsel %vm1164_vm5, %v3567_v55, %v3569_v13  ;;  %v11994_v17 = vld [vmem:[#allocation18_spill] sm:$0xff]  ;;  %v11995_v51 = vld [vmem:[#allocation12_spill] sm:$0xff] }
 0x1e9   :  { %11979 = vst [vmem:[#allocation24_spill] sm:$0xff] %v8794_v18  ;;  %11980 = vst [vmem:[#allocation25_spill] sm:$0xff] %v8797_v27  ;;  %v8803_v37 = vsel %vm1164_vm5, %v3569_v13, %v3571_v29  ;;  %1179 = vmatpush1.msra.mxu1 %v8683_v40  ;;  %v8807_v4 = vsel %vm1164_vm5, %v3571_v29, %v3573_v11  ;;  %v8810_v2 = vsel %vm1164_vm5, %v3573_v11, %v3575_v14  ;;  %v11997_v11 = vld [vmem:[#allocation21_spill] sm:$0xff] }
 0x1ea   :  { %11978 = vst [vmem:[#allocation23_spill] sm:$0xff] %v8788_v31  ;;  %11981 = vst [vmem:[#allocation26_spill] sm:$0xff] %v8800_v34  ;;  %v8813_v3 = vsel %vm1164_vm5, %v3575_v14, %v3577_v63  ;;  %v8816_v6 = vsel %vm1164_vm5, %v3577_v63, %v3579_v41  ;;  %1702 = vmatpush1.msra.mxu0 %v8683_v40  ;;  %v8820_v35 = vsel %vm1164_vm5, %v3579_v41, %v3581_v24  ;;  %v11998_v14 = vld [vmem:[#allocation8_spill] sm:$0xff]  ;;  %v11999_v41 = vld [vmem:[#allocation9_spill] sm:$0xff] }
 0x1eb   :  { %11982 = vst [vmem:[#allocation27_spill] sm:$0xff] %v8803_v37  ;;  %11983 = vst [vmem:[#allocation28_spill] sm:$0xff] %v8807_v4  ;;  %v8823_v42 = vsel %vm1164_vm5, %v3581_v24, %v3583_v28  ;;  %v8826_v54 = vsel %vm1164_vm5, %v3583_v28, %v3585_v15  ;;  %v8829_v26 = vsel %vm1164_vm5, %v3585_v15, %v3587_v32  ;;  %1180 = vmatprep.subr.mxu1 %v11976_v45  ;;  %v12001_v15 = vld [vmem:[#allocation2_spill] sm:$0xff] }
 0x1ec   :  { %v8833_v38 = vsel %vm1164_vm5, %v3587_v32, %v3589_v23  ;;  %v8836_v0 = vsel %vm1164_vm5, %v3589_v23, %v3591_v1  ;;  %v8839_v30 = vsel %vm1164_vm5, %v3591_v1, %v3593_v21  ;;  %v8842_v52 = vsel %vm1164_vm5, %v3593_v21, %v3595_v22  ;;  %1703 = vmatprep.subr.mxu0 %v11976_v45  ;;  %v12003_v23 = vld [vmem:[#allocation19_spill] sm:$0xff]  ;;  %v12004_v21 = vld [vmem:[#allocation17_spill] sm:$0xff] }
 0x1ed   :  { %11984 = vst [vmem:[#allocation29_spill] sm:$0xff] %v8842_v52  ;;  %v8846_v47 = vsel %vm1164_vm5, %v3595_v22, %v3597_v25  ;;  %v8849_v61 = vsel %vm1164_vm5, %v3597_v25, %v3599_v36  ;;  %v8852_v62 = vsel %vm1164_vm5, %v3599_v36, %v3601_v48  ;;  %v8855_v7 = vsel %vm1164_vm5, %v3601_v48, %v3603_v58  ;;  %v12005_v22 = vld [vmem:[#allocation3_spill] sm:$0xff] }
 0x1ee   :  { %11985 = vst [vmem:[#allocation30_spill] sm:$0xff] %v8846_v47  ;;  %11986 = vst [vmem:[#allocation31_spill] sm:$0xff] %v8849_v61  ;;  %1181 = vmatpush1.msra.mxu1 %v8672_v19  ;;  %v11989_v9 = vsub.f32 %v11966_v56, %v8334_v16  ;;  %v8863_v12 = vsel %vm1164_vm5, %v3603_v58, %v3605_v60  ;;  %v8867_v20 = vsel %vm1164_vm5, %v3605_v60, %v8788_v31  ;;  %v11996_v56 = vld [vmem:[#allocation20_spill] sm:$0xff]  ;;  %v12006_v36 = vld [vmem:[#allocation7_spill] sm:$0xff] }
 0x1ef   :  { %11987 = vst [vmem:[#allocation32_spill] sm:$0xff] %v8852_v62  ;;  %11988 = vst [vmem:[#allocation33_spill] sm:$0xff] %v8855_v7  ;;  %1704 = vmatpush1.msra.mxu0 %v8672_v19  ;;  %1182 = vmatprep.subr.mxu1 %v11976_v45  ;;  %v927_v44 = vmul.f32 %v11993_v57, %v11992_v10  ;;  %v984_v55 = vadd.f32 %v11995_v51, %v11994_v17  ;;  %v1035_v13 = vmul.f32 0.2, %v11996_v56 }
 0x1f0   :  { %v895_v43 = vmul.f32 %v8361_v33, %v11989_v9  ;;  %11990 = vst [vmem:[#allocation34_spill] sm:$0xff] %v8863_v12  ;;  %11991 = vst [vmem:[#allocation35_spill] sm:$0xff] %v8867_v20  ;;  %v8878_v29 = vmax.f32 %v8641_v50, %v8764_v46  ;;  %1705 = vmatprep.subr.mxu0 %v11976_v45  ;;  %1183 = vmatpush1.msra.mxu1 %v11997_v11  ;;  %v12002_v46 = vld [vmem:[#allocation16_spill] sm:$0xff]  ;;  %v1034_v1 = vmul.f32 0.2, %v12003_v23 }
 0x1f1   :  { %v842_v63 = vsub.f32 %v11998_v14, %v8334_v16  ;;  %v12000_v24 = vsub.f32 %v11999_v41, %v8334_v16  ;;  %1706 = vmatpush1.msra.mxu0 %v11997_v11  ;;  %1184 = vmatprep.subr.mxu1 %v11976_v45  ;;  %v926_v50 = vmul.f32 %v11993_v57, %v12001_v15  ;;  %v1033_v10 = vmul.f32 0.2, %v984_v55  ;;  %v12007_v14 = vld [vmem:[#allocation6_spill] sm:$0xff] }
 0x1f2   :  { %v983_v32 = vadd.f32 %v11995_v51, %v12002_v46  ;;  %v8897_v25 = vmax.f32 %v12005_v22, %v12004_v21  ;;  %1707 = vmatprep.subr.mxu0 %v11976_v45  ;;  %1185 = vmatpush1.msra.mxu1 %v8878_v29  ;;  %v841_v48 = vsub.f32 %v12006_v36, %v8334_v16 }
 0x1f3   :  { %v894_v28 = vmul.f32 %v8361_v33, %v12000_v24  ;;  %v893_v58 = vmul.f32 %v8361_v33, %v842_v63  ;;  %1708 = vmatpush1.msra.mxu0 %v8878_v29  ;;  %1186 = vmatprep.subr.mxu1 %v11976_v45  ;;  %v950_v60 = vmul.f32 %v11993_v57, %v895_v43 }
 0x1f4   :  { %v982_v9 = vadd.f32 %v11995_v51, %v927_v44  ;;  %v8909_v17 = vmax.f32 %v11996_v56, %v1035_v13  ;;  %1709 = vmatprep.subr.mxu0 %v11976_v45  ;;  %1187 = vmatpush1.msra.mxu1 %v8897_v25  ;;  %v840_v41 = vsub.f32 %v12007_v14, %v8334_v16  ;;  %v1032_v24 = vmul.f32 0.2, %v983_v32  ;;  %v12008_v13 = vld [vmem:[#allocation5_spill] sm:$0xff] }
 0x1f5   :  { %v892_v63 = vmul.f32 %v8361_v33, %v841_v48  ;;  %1710 = vmatpush1.msra.mxu0 %v8897_v25  ;;  %1188 = vmatprep.subr.mxu1 %v11976_v45  ;;  %v949_v43 = vmul.f32 %v11993_v57, %v894_v28  ;;  %v981_v44 = vadd.f32 %v11995_v51, %v926_v50 }
 0x1f6   :  { %v8921_v56 = vmax.f32 %v12003_v23, %v1034_v1  ;;  %1711 = vmatprep.subr.mxu0 %v11976_v45  ;;  %1189 = vmatpush1.msra.mxu1 %v8909_v17  ;;  %v839_v15 = vsub.f32 %v12008_v13, %v8334_v16  ;;  %v891_v46 = vmul.f32 %v8361_v33, %v840_v41  ;;  %v1031_v21 = vmul.f32 0.2, %v982_v9  ;;  %v12009_v1 = vld [vmem:[#allocation4_spill] sm:$0xff] }
 0x1f7   :  { %1712 = vmatpush1.msra.mxu0 %v8909_v17  ;;  %1190 = vmatprep.subr.mxu1 %v11976_v45  ;;  %v948_v28 = vmul.f32 %v11993_v57, %v893_v58  ;;  %v1005_v50 = vadd.f32 %v11995_v51, %v950_v60  ;;  %v8932_v23 = vmax.f32 %v984_v55, %v1033_v10  ;;  %v1030_v60 = vmul.f32 0.2, %v981_v44 }
 0x1f8   :  { %1713 = vmatprep.subr.mxu0 %v11976_v45  ;;  %1191 = vmatpush1.msra.mxu1 %v8921_v56  ;;  %v838_v22 = vsub.f32 %v12009_v1, %v8334_v16  ;;  %v890_v36 = vmul.f32 %v8361_v33, %v839_v15  ;;  %v947_v48 = vmul.f32 %v11993_v57, %v892_v63 }
 0x1f9   :  { %1714 = vmatpush1.msra.mxu0 %v8921_v56  ;;  %1192 = vmatprep.subr.mxu1 %v11976_v45  ;;  %v1004_v58 = vadd.f32 %v11995_v51, %v949_v43  ;;  %v8943_v55 = vmax.f32 %v983_v32, %v1032_v24  ;;  %v946_v16 = vmul.f32 %v11993_v57, %v891_v46  ;;  %v1054_v41 = vmul.f32 0.2, %v1005_v50 }
 0x1fa   :  { %1715 = vmatprep.subr.mxu0 %v11976_v45  ;;  %1193 = vmatpush1.msra.mxu1 %v8932_v23  ;;  %v889_v10 = vmul.f32 %v8361_v33, %v838_v22  ;;  %v1003_v14 = vadd.f32 %v11995_v51, %v948_v28  ;;  %v8952_v63 = vmax.f32 %v982_v9, %v1031_v21 }
 0x1fb   :  { %1716 = vmatpush1.msra.mxu0 %v8932_v23  ;;  %1194 = vmatprep.subr.mxu1 %v11976_v45  ;;  %v945_v33 = vmul.f32 %v11993_v57, %v890_v36  ;;  %v1002_v32 = vadd.f32 %v11995_v51, %v947_v48  ;;  %v1053_v43 = vmul.f32 0.2, %v1004_v58  ;;  %v8960_v24 = vmax.f32 %v981_v44, %v1030_v60  ;;  %v12010_v44 = vld [vmem:[#allocation15_spill] sm:$0xff] }
 0x1fc   :  { %1717 = vmatprep.subr.mxu0 %v11976_v45  ;;  %1195 = vmatpush1.msra.mxu1 %v8943_v55  ;;  %v944_v9 = vmul.f32 %v11993_v57, %v889_v10  ;;  %v1001_v13 = vadd.f32 %v11995_v51, %v946_v16  ;;  %v1052_v15 = vmul.f32 0.2, %v1003_v14  ;;  %v8968_v46 = vmax.f32 %v1005_v50, %v1054_v41  ;;  %v12011_v50 = vld [vmem:[#allocation14_spill] sm:$0xff] }
 0x1fd   :  { %1718 = vmatpush1.msra.mxu0 %v8943_v55  ;;  %1196 = vmatprep.subr.mxu1 %v11976_v45  ;;  %v943_v28 = vmul.f32 %v11993_v57, %v12010_v44  ;;  %v1000_v21 = vadd.f32 %v11995_v51, %v945_v33  ;;  %v1051_v1 = vmul.f32 0.2, %v1002_v32  ;;  %v8977_v22 = vmax.f32 %v1004_v58, %v1053_v43  ;;  %v1128_v44 = vld [vmem:[%s11905_s5] sm:$0xff] }
 0x1fe   :  { %1719 = vmatprep.subr.mxu0 %v11976_v45  ;;  %1197 = vmatpush1.msra.mxu1 %v8952_v63  ;;  %v942_v36 = vmul.f32 %v11993_v57, %v12011_v50  ;;  %v999_v48 = vadd.f32 %v11995_v51, %v944_v9  ;;  %v1050_v60 = vmul.f32 0.2, %v1001_v13  ;;  %v8988_v10 = vmax.f32 %v1003_v14, %v1052_v15  ;;  %v6020_v50 = vld [vmem:[%s11905_s5 + $0xf8] sm:$0xff] }
 0x1ff   :  { %1720 = vmatpush1.msra.mxu0 %v8952_v63  ;;  %1198 = vmatprep.subr.mxu1 %v11976_v45  ;;  %v998_v58 = vadd.f32 %v11995_v51, %v943_v28  ;;  %v1049_v16 = vmul.f32 0.2, %v1000_v21  ;;  %v8995_v41 = vmax.f32 %v1002_v32, %v1051_v1  ;;  %v6018_v28 = vld [vmem:[%s11905_s5 + $0xe8] sm:$0xff]  ;;  %v6017_v1 = vld [vmem:[%s11905_s5 + $0xe0] sm:$0xff] }
 0x200   :  { %1721 = vmatprep.subr.mxu0 %v11976_v45  ;;  %1199 = vmatpush1.msra.mxu1 %v8960_v24  ;;  %v997_v57 = vadd.f32 %v11995_v51, %v942_v36  ;;  %v1048_v14 = vmul.f32 0.2, %v999_v48  ;;  %v9002_v33 = vmax.f32 %v1001_v13, %v1050_v60  ;;  %v1130_v36 = vld [vmem:[%s11905_s5 + $0x10] sm:$0xff] }
 0x201   :  { %1722 = vmatpush1.msra.mxu0 %v8960_v24  ;;  %1214 = vmatprep.subr.mxu1 %v11976_v45  ;;  %v1047_v32 = vmul.f32 0.2, %v998_v58  ;;  %v9008_v43 = vmax.f32 %v1000_v21, %v1049_v16  ;;  %v1131_v21 = vld [vmem:[%s11905_s5 + $0x18] sm:$0xff]  ;;  %v6019_v60 = vld [vmem:[%s11905_s5 + $0xf0] sm:$0xff]  ;;  %v1132_v16 = vld [vmem:[%s11905_s5 + $0x20] sm:$0xff] }
 0x202   :  { %1737 = vmatprep.subr.mxu0 %v11976_v45  ;;  %5969 = vmatpush2.msk.msra.mxu1 %vm1164_vm5, %v8968_v46  ;;  %v1046_v51 = vmul.f32 0.2, %v997_v57  ;;  %v9014_v9 = vmax.f32 %v999_v48, %v1048_v14  ;;  %v1133_v48 = vld [vmem:[%s11905_s5 + $0x28] sm:$0xff]  ;;  %v6021_v14 = vld [vmem:[%s11905_s5 + $0x100] sm:$0xff] }
 0x203   :  { %6031 = vmatpush2.msk.msra.mxu0 %vm1164_vm5, %v8968_v46  ;;  %1216 = vmatprep.subr.mxu1 %v11976_v45  ;;  %v9020_v13 = vmax.f32 %v998_v58, %v1047_v32  ;;  %v6022_v58 = vld [vmem:[%s11905_s5 + $0x108] sm:$0xff]  ;;  %v6024_v32 = vld [vmem:[%s11905_s5 + $0x118] sm:$0xff] }
 0x204   :  { %1739 = vmatprep.subr.mxu0 %v11976_v45  ;;  %1217 = vmatpush2.msra.mxu1 %v8977_v22  ;;  %v9026_v15 = vmax.f32 %v997_v57, %v1046_v51  ;;  %v1135_v57 = vld [vmem:[%s11905_s5 + $0x38] sm:$0xff]  ;;  %v1134_v51 = vld [vmem:[%s11905_s5 + $0x30] sm:$0xff] }
 0x205   :  { %1740 = vmatpush2.msra.mxu0 %v8977_v22  ;;  %1218 = vmatprep.subr.mxu1 %v11976_v45 }
 0x206   :  { %1741 = vmatprep.subr.mxu0 %v11976_v45  ;;  %1219 = vmatpush2.msra.mxu1 %v8988_v10 }
 0x207   :  { %1742 = vmatpush2.msra.mxu0 %v8988_v10  ;;  %1220 = vmatprep.subr.mxu1 %v11976_v45 }
 0x208   :  { %1743 = vmatprep.subr.mxu0 %v11976_v45  ;;  %1221 = vmatpush2.msra.mxu1 %v8995_v41 }
 0x209   :  { %1744 = vmatpush2.msra.mxu0 %v8995_v41  ;;  %1222 = vmatprep.subr.mxu1 %v11976_v45 }
 0x20a   :  { %1745 = vmatprep.subr.mxu0 %v11976_v45  ;;  %1223 = vmatpush2.msra.mxu1 %v9002_v33 }
 0x20b   :  { %1746 = vmatpush2.msra.mxu0 %v9002_v33  ;;  %1224 = vmatprep.subr.mxu1 %v11976_v45 }
 0x20c   :  { %1747 = vmatprep.subr.mxu0 %v11976_v45  ;;  %1225 = vmatpush2.msra.mxu1 %v9008_v43 }
 0x20d   :  { %1748 = vmatpush2.msra.mxu0 %v9008_v43  ;;  %1226 = vmatprep.subr.mxu1 %v11976_v45 }
 0x20e   :  { %1749 = vmatprep.subr.mxu0 %v11976_v45  ;;  %1227 = vmatpush2.msra.mxu1 %v9014_v9 }
 0x20f   :  { %1750 = vmatpush2.msra.mxu0 %v9014_v9  ;;  %1228 = vmatprep.subr.mxu1 %v11976_v45 }
 0x210   :  { %1751 = vmatprep.subr.mxu0 %v11976_v45  ;;  %1229 = vmatpush2.msra.mxu1 %v9020_v13 }
 0x211   :  { %1752 = vmatpush2.msra.mxu0 %v9020_v13  ;;  %1230 = vmatprep.subr.mxu1 %v11976_v45 }
 0x212   :  { %1753 = vmatprep.subr.mxu0 %v11976_v45  ;;  %1231 = vmatpush2.msra.mxu1 %v9026_v15 }
 0x213   :  { %1754 = vmatpush2.msra.mxu0 %v9026_v15  ;;  %1308 = vmatprep.subr.mxu1 %v11976_v45 }
 0x214   :  { %1233 = vmatmul.mubr.f32.vlgmr.msra.gmra.mxu1 %v1128_v44  ;;  %6032 = vmatprep.mubr.msk.f32.mxu0 %vm1142_vm4, %v6018_v28  ;;  %v1137_v44 = vld [vmem:[%s11905_s5 + $0x48] sm:$0xff]  ;;  %v6023_v28 = vld [vmem:[%s11905_s5 + $0x110] sm:$0xff] }
 0x215   :  { %1309 = vmatpush1.msra.mxu1 %v8693_v49  ;;  %5971 = vmatprep.mubr.msk.f32.mxu1 %vm1142_vm4, %v1131_v21  ;;  %v6026_v21 = vld [vmem:[%s11905_s5 + $0x128] sm:$0xff] }
 0x216   :  { %1310 = vmatprep.subr.mxu1 %v11976_v45  ;;  %1756 = vmatmul.mubr.f32.vlgmr.msra.gmra.mxu0 %v6017_v1  ;;  %v1136_v1 = vld [vmem:[%s11905_s5 + $0x40] sm:$0xff] }
 0x217   :  { %1311 = vmatpush1.msra.mxu1 %v8718_v39  ;;  %6033 = vmatprep.mubr.msk.f32.mxu0 %vm1142_vm4, %v6020_v50  ;;  %v1139_v50 = vld [vmem:[%s11905_s5 + $0x58] sm:$0xff] }
 0x218   :  { %1312 = vmatprep.subr.mxu1 %v11976_v45  ;;  %1238 = vmatmul.mubr.f32.gmra.mxu1 %v1130_v36  ;;  %v6025_v36 = vld [vmem:[%s11905_s5 + $0x120] sm:$0xff] }
 0x219   :  { %1313 = vmatpush1.msra.mxu1 %v8715_v5  ;;  %5972 = vmatprep.mubr.msk.f32.mxu1 %vm1142_vm4, %v1133_v48  ;;  %v6028_v48 = vld [vmem:[%s11905_s5 + $0x138] sm:$0xff] }
 0x21a   :  { %1314 = vmatprep.subr.mxu1 %v11976_v45  ;;  %1761 = vmatmul.mubr.f32.gmra.mxu0 %v6019_v60  ;;  %v1138_v60 = vld [vmem:[%s11905_s5 + $0x50] sm:$0xff] }
 0x21b   :  { %1315 = vmatpush1.msra.mxu1 %v8704_v53  ;;  %6034 = vmatprep.mubr.msk.f32.mxu0 %vm1142_vm4, %v6022_v58  ;;  %v1141_v58 = vld [vmem:[%s11905_s5 + $0x68] sm:$0x1] }
 0x21c   :  { %1316 = vmatprep.subr.mxu1 %v11976_v45  ;;  %1243 = vmatmul.mubr.f32.gmra.mxu1 %v1132_v16  ;;  %v6027_v16 = vld [vmem:[%s11905_s5 + $0x130] sm:$0xff] }
 0x21d   :  { %1317 = vmatpush1.msra.mxu1 %v8691_v8  ;;  %5973 = vmatprep.mubr.msk.f32.mxu1 %vm1142_vm4, %v1135_v57  ;;  %v6030_v57 = vld [vmem:[%s11905_s5 + $0x148] sm:$0x1] }
 0x21e   :  { %1318 = vmatprep.subr.mxu1 %v11976_v45  ;;  %1766 = vmatmul.mubr.f32.gmra.mxu0 %v6021_v14  ;;  %v1140_v14 = vld [vmem:[%s11905_s5 + $0x60] sm:$0x1] }
 0x21f   :  { %1319 = vmatpush1.msra.mxu1 %v8683_v40  ;;  %6035 = vmatprep.mubr.msk.f32.mxu0 %vm1142_vm4, %v6024_v32  ;;  %v5978_v32 = vld [vmem:[%s11905_s5 + $0x78] sm:$0xff] }
 0x220   :  { %1320 = vmatprep.subr.mxu1 %v11976_v45  ;;  %1248 = vmatmul.mubr.f32.gmra.mxu1 %v1134_v51  ;;  %v6029_v51 = vld [vmem:[%s11905_s5 + $0x140] sm:$0x1] }
 0x221   :  { %1321 = vmatpush1.msra.mxu1 %v8672_v19  ;;  %5974 = vmatprep.mubr.msk.f32.mxu1 %vm1142_vm4, %v1137_v44  ;;  %v5977_v44 = vld [vmem:[%s11905_s5 + $0x70] sm:$0xff] }
 0x222   :  { %1322 = vmatprep.subr.mxu1 %v11976_v45  ;;  %1771 = vmatmul.mubr.f32.gmra.mxu0 %v6023_v28  ;;  %v5980_v28 = vld [vmem:[%s11905_s5 + $0x88] sm:$0xff] }
 0x223   :  { %1323 = vmatpush1.msra.mxu1 %v11997_v11  ;;  %6036 = vmatprep.mubr.msk.f32.mxu0 %vm1142_vm4, %v6026_v21  ;;  %v5979_v21 = vld [vmem:[%s11905_s5 + $0x80] sm:$0xff] }
 0x224   :  { %1324 = vmatprep.subr.mxu1 %v11976_v45  ;;  %1253 = vmatmul.mubr.f32.gmra.mxu1 %v1136_v1  ;;  %v5982_v1 = vld [vmem:[%s11905_s5 + $0x98] sm:$0xff] }
 0x225   :  { %1325 = vmatpush1.msra.mxu1 %v8878_v29  ;;  %5975 = vmatprep.mubr.msk.f32.mxu1 %vm1142_vm4, %v1139_v50  ;;  %v5981_v50 = vld [vmem:[%s11905_s5 + $0x90] sm:$0xff] }
 0x226   :  { %1326 = vmatprep.subr.mxu1 %v11976_v45  ;;  %1776 = vmatmul.mubr.f32.gmra.mxu0 %v6025_v36  ;;  %v5984_v36 = vld [vmem:[%s11905_s5 + $0xa8] sm:$0xff] }
 0x227   :  { %1327 = vmatpush1.msra.mxu1 %v8897_v25  ;;  %6037 = vmatprep.mubr.msk.f32.mxu0 %vm1142_vm4, %v6028_v48  ;;  %v5983_v48 = vld [vmem:[%s11905_s5 + $0xa0] sm:$0xff] }
 0x228   :  { %1328 = vmatprep.subr.mxu1 %v11976_v45  ;;  %1258 = vmatmul.mubr.f32.gmra.mxu1 %v1138_v60  ;;  %v5986_v60 = vld [vmem:[%s11905_s5 + $0xb8] sm:$0xff] }
 0x229   :  { %1329 = vmatpush1.msra.mxu1 %v8909_v17  ;;  %5976 = vmatprep.mubr.msk.f32.mxu1 %vm1142_vm4, %v1141_v58  ;;  %v5985_v58 = vld [vmem:[%s11905_s5 + $0xb0] sm:$0xff] }
 0x22a   :  { %1330 = vmatprep.subr.mxu1 %v11976_v45  ;;  %1781 = vmatmul.mubr.f32.gmra.mxu0 %v6027_v16  ;;  %v5988_v16 = vld [vmem:[%s11905_s5 + $0xc8] sm:$0xff] }
 0x22b   :  { %1331 = vmatpush1.msra.mxu1 %v8921_v56  ;;  %6038 = vmatprep.mubr.msk.f32.mxu0 %vm1142_vm4, %v6030_v57  ;;  %v5987_v57 = vld [vmem:[%s11905_s5 + $0xc0] sm:$0xff] }
 0x22c   :  { %1332 = vmatprep.subr.mxu1 %v11976_v45  ;;  %1263 = vmatmul.mubr.f32.gmra.mxu1 %v1140_v14  ;;  %v5990_v14 = vld [vmem:[%s11905_s5 + $0xd8] sm:$0x1] }
 0x22d   :  { %1333 = vmatpush1.msra.mxu1 %v8932_v23  ;;  %5992 = vmatprep.mubr.msk.f32.mxu1 %vm1142_vm4, %v5978_v32  ;;  %v5989_v32 = vld [vmem:[%s11905_s5 + $0xd0] sm:$0x1] }
 0x22e   :  { %1334 = vmatprep.subr.mxu1 %v11976_v45  ;;  %1786 = vmatmul.mubr.f32.gmra.mxu0 %v6029_v51  ;;  %v6002_v51 = vld [vmem:[%s11908_s6 + $0x38] sm:$0xff] }
 0x22f   :  { %1335 = vmatpush1.msra.mxu1 %v8943_v55  ;;  %6879 = vmatprep.subr.mxu0 %v11976_v45 }
 0x230   :  { %1336 = vmatprep.subr.mxu1 %v11976_v45  ;;  %6887 = vmatprep.mubr.msk.f32.mxu0 %vm7484_vm1, %v11976_v45 }
 0x231   :  { %1337 = vmatpush1.msra.mxu1 %v8952_v63 }
 0x232   :  { %1338 = vmatprep.subr.mxu1 %v11976_v45 }
 0x233   :  { %1339 = vmatpush1.msra.mxu1 %v8960_v24 }
 0x234   :  { %1354 = vmatprep.subr.mxu1 %v11976_v45 }
 0x235   :  { %5991 = vmatpush2.msk.msra.mxu1 %vm1164_vm5, %v8968_v46 }
 0x236   :  { %1356 = vmatprep.subr.mxu1 %v11976_v45 }
 0x237   :  { %1357 = vmatpush2.msra.mxu1 %v8977_v22 }
 0x238   :  { %1358 = vmatprep.subr.mxu1 %v11976_v45 }
 0x239   :  { %1359 = vmatpush2.msra.mxu1 %v8988_v10 }
 0x23a   :  { %1360 = vmatprep.subr.mxu1 %v11976_v45 }
 0x23b   :  { %1361 = vmatpush2.msra.mxu1 %v8995_v41 }
 0x23c   :  { %1362 = vmatprep.subr.mxu1 %v11976_v45 }
 0x23d   :  { %1363 = vmatpush2.msra.mxu1 %v9002_v33 }
 0x23e   :  { %1364 = vmatprep.subr.mxu1 %v11976_v45 }
 0x23f   :  { %1365 = vmatpush2.msra.mxu1 %v9008_v43 }
 0x240   :  { %1366 = vmatprep.subr.mxu1 %v11976_v45 }
 0x241   :  { %1367 = vmatpush2.msra.mxu1 %v9014_v9 }
 0x242   :  { %1368 = vmatprep.subr.mxu1 %v11976_v45 }
 0x243   :  { %1369 = vmatpush2.msra.mxu1 %v9020_v13 }
 0x244   :  { %1370 = vmatprep.subr.mxu1 %v11976_v45 }
 0x245   :  { %1371 = vmatpush2.msra.mxu1 %v9026_v15 }
 0x246   :  { %1373 = vmatmul.mubr.f32.vlgmr.msra.gmra.mxu1 %v5977_v44  ;;  %6792 = vmatprep.subr.mxu1 %v11976_v45  ;;  %v6001_v44 = vld [vmem:[%s11908_s6 + $0x30] sm:$0xff] }
 0x247   :  { %5993 = vmatprep.mubr.msk.f32.mxu1 %vm1142_vm4, %v5980_v28  ;;  %6793 = vmatpush3.msra.mxu1 %v6002_v51  ;;  %v6000_v28 = vld [vmem:[%s11908_s6 + $0x28] sm:$0xff] }
 0x248   :  { %6794 = vmatprep.subr.mxu1 %v11976_v45 }
 0x249   :  { %6795 = vmatpush3.msra.mxu1 %v6001_v44 }
 0x24a   :  { %1378 = vmatmul.mubr.f32.gmra.mxu1 %v5979_v21  ;;  %6796 = vmatprep.subr.mxu1 %v11976_v45  ;;  %v5999_v21 = vld [vmem:[%s11908_s6 + $0x20] sm:$0xff] }
 0x24b   :  { %5994 = vmatprep.mubr.msk.f32.mxu1 %vm1142_vm4, %v5982_v1  ;;  %6797 = vmatpush3.msra.mxu1 %v6000_v28 }
 0x24c   :  { %6798 = vmatprep.subr.mxu1 %v11976_v45 }
 0x24d   :  { %6799 = vmatpush3.msra.mxu1 %v5999_v21 }
 0x24e   :  { %1383 = vmatmul.mubr.f32.gmra.mxu1 %v5981_v50  ;;  %6821 = vmatprep.subr.mxu1 %v11976_v45 }
 0x24f   :  { %5995 = vmatprep.mubr.msk.f32.mxu1 %vm1142_vm4, %v5984_v36 }
 0x252   :  { %1388 = vmatmul.mubr.f32.gmra.mxu1 %v5983_v48 }
 0x253   :  { %5996 = vmatprep.mubr.msk.f32.mxu1 %vm1142_vm4, %v5986_v60 }
 0x256   :  { %1393 = vmatmul.mubr.f32.gmra.mxu1 %v5985_v58 }
 0x257   :  { %5997 = vmatprep.mubr.msk.f32.mxu1 %vm1142_vm4, %v5988_v16 }
 0x25a   :  { %1398 = vmatmul.mubr.f32.gmra.mxu1 %v5987_v57 }
 0x25b   :  { %5998 = vmatprep.mubr.msk.f32.mxu1 %vm1142_vm4, %v5990_v14 }
 0x25e   :  { %1403 = vmatmul.mubr.f32.gmra.mxu1 %v5989_v32 }
 0x25f   :  { %6800 = vmatprep.mubr.msk.f32.mxu1 %vm7484_vm1, %v11976_v45 }
 0x2d4   :  { %v9251_v1 = vpop.f32.mrf.mxu1 }
 0x2d6   :  { %v1236_v50 = vpop.f32.mrf.mxu1  ;;  %v9253_v36 = vpop.f32.mrf.mxu0 }
 0x2d8   :  { %v9255_v48 = vpop.f32.mrf.mxu1  ;;  %v1759_v60 = vpop.f32.mrf.mxu0 }
 0x2da   :  { %v1241_v58 = vpop.f32.mrf.mxu1  ;;  %v9257_v16 = vpop.f32.mrf.mxu0 }
 0x2dc   :  { %v9259_v57 = vpop.f32.mrf.mxu1  ;;  %v1764_v14 = vpop.f32.mrf.mxu0 }
 0x2de   :  { %v1246_v32 = vpop.f32.mrf.mxu1  ;;  %v9261_v51 = vpop.f32.mrf.mxu0 }
 0x2e0   :  { %v9263_v44 = vpop.f32.mrf.mxu1  ;;  %v1769_v28 = vpop.f32.mrf.mxu0 }
 0x2e2   :  { %v1251_v21 = vpop.f32.mrf.mxu1  ;;  %v9265_v52 = vpop.f32.mrf.mxu0 }
 0x2e4   :  { %v9267_v50 = vpop.f32.mrf.mxu1  ;;  %v1774_v47 = vpop.f32.mrf.mxu0 }
 0x2e5   :  { %v1271_v47 = vld [vmem:[%s11908_s6 + $0x18] sm:$0xff] }
 0x2e6   :  { %v1256_v61 = vpop.f32.mrf.mxu1  ;;  %v9269_v60 = vpop.f32.mrf.mxu0 }
 0x2e8   :  { %v9271_v58 = vpop.f32.mrf.mxu1  ;;  %v1779_v62 = vpop.f32.mrf.mxu0 }
 0x2e9   :  { %v1270_v62 = vld [vmem:[%s11908_s6 + $0x10] sm:$0xff] }
 0x2ea   :  { %v1261_v7 = vpop.f32.mrf.mxu1  ;;  %v9273_v14 = vpop.f32.mrf.mxu0 }
 0x2ec   :  { %v9275_v32 = vpop.f32.mrf.mxu1  ;;  %v1784_v12 = vpop.f32.mrf.mxu0 }
 0x2ed   :  { %v1269_v12 = vld [vmem:[%s11908_s6 + $0x8] sm:$0xff] }
 0x2ee   :  { %v1266_v20 = vpop.f32.mrf.mxu1  ;;  %v9277_v28 = vpop.f32.mrf.mxu0 }
 0x2f0   :  { %v1789_v21 = vpop.f32.mrf.mxu0 }
 0x2f1   :  { %v1268_v21 = vld [vmem:[%s11908_s6] sm:$0xff] }
 0x306   :  { %v1374_v61 = vpop.f32.mrf.mxu1 }
 0x307   :  { %6801 = vmatmul.mubr.msk.f32.vlgmr.msra.gmra.mxu1 %vm559_vm3, %v1374_v61 }
 0x308   :  { %v1376_v7 = vpop.f32.mrf.mxu1  ;;  %6803 = vmatprep.mubr.msk.f32.mxu1 %vm7484_vm1, %v11976_v45  ;;  %6822 = vmatpush3.msra.mxu1 %v1271_v47 }
 0x309   :  { %6823 = vmatprep.subr.mxu1 %v11976_v45 }
 0x30a   :  { %v1379_v20 = vpop.f32.mrf.mxu1  ;;  %6824 = vmatpush3.msra.mxu1 %v1270_v62 }
 0x30b   :  { %6804 = vmatmul.mubr.msk.f32.gmra.mxu1 %vm559_vm3, %v1379_v20  ;;  %6825 = vmatprep.subr.mxu1 %v11976_v45 }
 0x30c   :  { %v1381_v61 = vpop.f32.mrf.mxu1  ;;  %6806 = vmatprep.mubr.msk.f32.mxu1 %vm7484_vm1, %v11976_v45  ;;  %6826 = vmatpush3.msra.mxu1 %v1269_v12 }
 0x30d   :  { %6827 = vmatprep.subr.mxu1 %v11976_v45 }
 0x30e   :  { %v1384_v47 = vpop.f32.mrf.mxu1  ;;  %6828 = vmatpush3.msra.mxu1 %v1268_v21 }
 0x30f   :  { %6807 = vmatmul.mubr.msk.f32.gmra.mxu1 %vm559_vm3, %v1384_v47  ;;  %6850 = vmatprep.subr.mxu1 %v11976_v45 }
 0x310   :  { %v1386_v62 = vpop.f32.mrf.mxu1  ;;  %6809 = vmatprep.mubr.msk.f32.mxu1 %vm7484_vm1, %v11976_v45 }
 0x312   :  { %v1389_v7 = vpop.f32.mrf.mxu1 }
 0x313   :  { %6810 = vmatmul.mubr.msk.f32.gmra.mxu1 %vm559_vm3, %v1389_v7 }
 0x314   :  { %v1391_v20 = vpop.f32.mrf.mxu1  ;;  %6812 = vmatprep.mubr.msk.f32.mxu1 %vm7484_vm1, %v11976_v45 }
 0x315   :  { %v6042_v20 = vld [vmem:[%s11908_s6 + $0x58] sm:$0xff] }
 0x316   :  { %v1394_v12 = vpop.f32.mrf.mxu1 }
 0x317   :  { %6813 = vmatmul.mubr.msk.f32.gmra.mxu1 %vm559_vm3, %v1394_v12  ;;  %v6041_v12 = vld [vmem:[%s11908_s6 + $0x50] sm:$0xff] }
 0x318   :  { %v1396_v61 = vpop.f32.mrf.mxu1  ;;  %6815 = vmatprep.mubr.msk.f32.mxu1 %vm7484_vm1, %v11976_v45 }
 0x319   :  { %v6040_v61 = vld [vmem:[%s11908_s6 + $0x48] sm:$0xff] }
 0x31a   :  { %v1399_v21 = vpop.f32.mrf.mxu1 }
 0x31b   :  { %6816 = vmatmul.mubr.msk.f32.gmra.mxu1 %vm559_vm3, %v1399_v21  ;;  %v6062_v21 = vld [vmem:[%s11905_s5 + $0x1b0] sm:$0x1] }
 0x31c   :  { %v1401_v47 = vpop.f32.mrf.mxu1  ;;  %6818 = vmatprep.mubr.msk.f32.mxu1 %vm7484_vm1, %v11976_v45 }
 0x31d   :  { %v6075_v47 = vld [vmem:[%s11908_s6 + $0x78] sm:$0xff] }
 0x31e   :  { %v1404_v62 = vpop.f32.mrf.mxu1  ;;  %6880 = vmatpush3.msra.mxu0 %v6075_v47 }
 0x31f   :  { %6819 = vmatmul.mubr.msk.f32.gmra.mxu1 %vm559_vm3, %v1404_v62  ;;  %v6074_v62 = vld [vmem:[%s11908_s6 + $0x70] sm:$0xff]  ;;  %6881 = vmatprep.subr.mxu0 %v11976_v45 }
 0x320   :  { %6829 = vmatprep.mubr.msk.f32.mxu1 %vm7484_vm1, %v11976_v45  ;;  %v1406_v7 = vpop.f32.mrf.mxu1  ;;  %6882 = vmatpush3.msra.mxu0 %v6074_v62 }
 0x321   :  { %v6073_v7 = vld [vmem:[%s11908_s6 + $0x68] sm:$0xff]  ;;  %6883 = vmatprep.subr.mxu0 %v11976_v45 }
 0x322   :  { %6884 = vmatpush3.msra.mxu0 %v6073_v7 }
 0x323   :  { %6830 = vmatmul.mubr.msk.f32.vlgmr.msra.gmra.mxu1 %vm559_vm3, %v9251_v1  ;;  %v6039_v1 = vld [vmem:[%s11908_s6 + $0x40] sm:$0xff]  ;;  %6885 = vmatprep.subr.mxu0 %v11976_v45 }
 0x324   :  { %6832 = vmatprep.mubr.msk.f32.mxu1 %vm7484_vm1, %v11976_v45  ;;  %6851 = vmatpush3.msra.mxu1 %v6042_v20  ;;  %v6072_v20 = vld [vmem:[%s11908_s6 + $0x60] sm:$0xff] }
 0x325   :  { %6852 = vmatprep.subr.mxu1 %v11976_v45  ;;  %6886 = vmatpush3.msra.mxu0 %v6072_v20 }
 0x326   :  { %6853 = vmatpush3.msra.mxu1 %v6041_v12  ;;  %2229 = vmatprep.subr.mxu0 %v11976_v45 }
 0x327   :  { %6833 = vmatmul.mubr.msk.f32.gmra.mxu1 %vm559_vm3, %v9255_v48  ;;  %6854 = vmatprep.subr.mxu1 %v11976_v45  ;;  %v6053_v48 = vld [vmem:[%s11905_s5 + $0x168] sm:$0xff] }
 0x328   :  { %6835 = vmatprep.mubr.msk.f32.mxu1 %vm7484_vm1, %v11976_v45  ;;  %6855 = vmatpush3.msra.mxu1 %v6040_v61 }
 0x329   :  { %6856 = vmatprep.subr.mxu1 %v11976_v45 }
 0x32a   :  { %6857 = vmatpush3.msra.mxu1 %v6039_v1 }
 0x32b   :  { %6836 = vmatmul.mubr.msk.f32.gmra.mxu1 %vm559_vm3, %v9259_v57  ;;  %1960 = vmatprep.subr.mxu1 %v11976_v45  ;;  %v6055_v57 = vld [vmem:[%s11905_s5 + $0x178] sm:$0xff] }
 0x32c   :  { %6838 = vmatprep.mubr.msk.f32.mxu1 %vm7484_vm1, %v11976_v45 }
 0x32f   :  { %6839 = vmatmul.mubr.msk.f32.gmra.mxu1 %vm559_vm3, %v9263_v44  ;;  %v6057_v44 = vld [vmem:[%s11905_s5 + $0x188] sm:$0xff] }
 0x330   :  { %6841 = vmatprep.mubr.msk.f32.mxu1 %vm7484_vm1, %v11976_v45 }
 0x333   :  { %6842 = vmatmul.mubr.msk.f32.gmra.mxu1 %vm559_vm3, %v9267_v50  ;;  %v6056_v50 = vld [vmem:[%s11905_s5 + $0x180] sm:$0xff] }
 0x334   :  { %6844 = vmatprep.mubr.msk.f32.mxu1 %vm7484_vm1, %v11976_v45 }
 0x337   :  { %6845 = vmatmul.mubr.msk.f32.gmra.mxu1 %vm559_vm3, %v9271_v58  ;;  %v6058_v58 = vld [vmem:[%s11905_s5 + $0x190] sm:$0xff] }
 0x338   :  { %6847 = vmatprep.mubr.msk.f32.mxu1 %vm7484_vm1, %v11976_v45 }
 0x33b   :  { %6848 = vmatmul.mubr.msk.f32.gmra.mxu1 %vm559_vm3, %v9275_v32  ;;  %v6060_v32 = vld [vmem:[%s11905_s5 + $0x1a0] sm:$0xff] }
 0x33c   :  { %6858 = vmatprep.mubr.msk.f32.mxu1 %vm7484_vm1, %v11976_v45 }
 0x33f   :  { %6859 = vmatmul.mubr.msk.f32.vlgmr.msra.gmra.mxu1 %vm559_vm3, %v9253_v36  ;;  %v6050_v36 = vld [vmem:[%s11905_s5 + $0x150] sm:$0xff] }
 0x340   :  { %1961 = vmatpush1.msra.mxu1 %v8693_v49  ;;  %6861 = vmatprep.mubr.msk.f32.mxu1 %vm7484_vm1, %v11976_v45 }
 0x341   :  { %1962 = vmatprep.subr.mxu1 %v11976_v45 }
 0x342   :  { %1963 = vmatpush1.msra.mxu1 %v8718_v39 }
 0x343   :  { %1964 = vmatprep.subr.mxu1 %v11976_v45  ;;  %6862 = vmatmul.mubr.msk.f32.gmra.mxu1 %vm559_vm3, %v9257_v16  ;;  %v6052_v16 = vld [vmem:[%s11905_s5 + $0x160] sm:$0xff] }
 0x344   :  { %1965 = vmatpush1.msra.mxu1 %v8715_v5  ;;  %6864 = vmatprep.mubr.msk.f32.mxu1 %vm7484_vm1, %v11976_v45 }
 0x345   :  { %1966 = vmatprep.subr.mxu1 %v11976_v45 }
 0x346   :  { %1967 = vmatpush1.msra.mxu1 %v8704_v53 }
 0x347   :  { %1968 = vmatprep.subr.mxu1 %v11976_v45  ;;  %6865 = vmatmul.mubr.msk.f32.gmra.mxu1 %vm559_vm3, %v9261_v51  ;;  %v6054_v51 = vld [vmem:[%s11905_s5 + $0x170] sm:$0xff] }
 0x348   :  { %1969 = vmatpush1.msra.mxu1 %v8691_v8  ;;  %6867 = vmatprep.mubr.msk.f32.mxu1 %vm7484_vm1, %v11976_v45 }
 0x349   :  { %1970 = vmatprep.subr.mxu1 %v11976_v45 }
 0x34a   :  { %1971 = vmatpush1.msra.mxu1 %v8683_v40 }
 0x34b   :  { %1972 = vmatprep.subr.mxu1 %v11976_v45  ;;  %6868 = vmatmul.mubr.msk.f32.gmra.mxu1 %vm559_vm3, %v9265_v52  ;;  %v6051_v52 = vld [vmem:[%s11905_s5 + $0x158] sm:$0xff] }
 0x34c   :  { %1973 = vmatpush1.msra.mxu1 %v8672_v19  ;;  %6870 = vmatprep.mubr.msk.f32.mxu1 %vm7484_vm1, %v11976_v45 }
 0x34d   :  { %1974 = vmatprep.subr.mxu1 %v11976_v45 }
 0x34e   :  { %1975 = vmatpush1.msra.mxu1 %v11997_v11 }
 0x34f   :  { %1976 = vmatprep.subr.mxu1 %v11976_v45  ;;  %6871 = vmatmul.mubr.msk.f32.gmra.mxu1 %vm559_vm3, %v9269_v60  ;;  %v6059_v60 = vld [vmem:[%s11905_s5 + $0x198] sm:$0xff] }
 0x350   :  { %1977 = vmatpush1.msra.mxu1 %v8878_v29  ;;  %6873 = vmatprep.mubr.msk.f32.mxu1 %vm7484_vm1, %v11976_v45 }
 0x351   :  { %1978 = vmatprep.subr.mxu1 %v11976_v45 }
 0x352   :  { %1979 = vmatpush1.msra.mxu1 %v8897_v25 }
 0x353   :  { %1980 = vmatprep.subr.mxu1 %v11976_v45  ;;  %6874 = vmatmul.mubr.msk.f32.gmra.mxu1 %vm559_vm3, %v9273_v14  ;;  %v6061_v14 = vld [vmem:[%s11905_s5 + $0x1a8] sm:$0xff] }
 0x354   :  { %1981 = vmatpush1.msra.mxu1 %v8909_v17  ;;  %6876 = vmatprep.mubr.msk.f32.mxu1 %vm7484_vm1, %v11976_v45 }
 0x355   :  { %1982 = vmatprep.subr.mxu1 %v11976_v45 }
 0x356   :  { %1983 = vmatpush1.msra.mxu1 %v8921_v56 }
 0x357   :  { %1984 = vmatprep.subr.mxu1 %v11976_v45  ;;  %6877 = vmatmul.mubr.msk.f32.gmra.mxu1 %vm559_vm3, %v9277_v28  ;;  %v6063_v28 = vld [vmem:[%s11905_s5 + $0x1b8] sm:$0x1] }
 0x358   :  { %1985 = vmatpush1.msra.mxu1 %v8932_v23  ;;  %6065 = vmatprep.mubr.msk.f32.mxu1 %vm1142_vm4, %v6051_v52 }
 0x359   :  { %1986 = vmatprep.subr.mxu1 %v11976_v45 }
 0x35a   :  { %1987 = vmatpush1.msra.mxu1 %v8943_v55 }
 0x35b   :  { %1988 = vmatprep.subr.mxu1 %v11976_v45 }
 0x35c   :  { %1989 = vmatpush1.msra.mxu1 %v8952_v63 }
 0x35d   :  { %1990 = vmatprep.subr.mxu1 %v11976_v45 }
 0x35e   :  { %1991 = vmatpush1.msra.mxu1 %v8960_v24 }
 0x35f   :  { %2006 = vmatprep.subr.mxu1 %v11976_v45 }
 0x360   :  { %6064 = vmatpush2.msk.msra.mxu1 %vm1164_vm5, %v8968_v46 }
 0x361   :  { %2008 = vmatprep.subr.mxu1 %v11976_v45 }
 0x362   :  { %2009 = vmatpush2.msra.mxu1 %v8977_v22 }
 0x363   :  { %2010 = vmatprep.subr.mxu1 %v11976_v45 }
 0x364   :  { %2011 = vmatpush2.msra.mxu1 %v8988_v10 }
 0x365   :  { %2012 = vmatprep.subr.mxu1 %v11976_v45 }
 0x366   :  { %2013 = vmatpush2.msra.mxu1 %v8995_v41 }
 0x367   :  { %2014 = vmatprep.subr.mxu1 %v11976_v45 }
 0x368   :  { %2015 = vmatpush2.msra.mxu1 %v9002_v33 }
 0x369   :  { %2016 = vmatprep.subr.mxu1 %v11976_v45 }
 0x36a   :  { %2017 = vmatpush2.msra.mxu1 %v9008_v43 }
 0x36b   :  { %2018 = vmatprep.subr.mxu1 %v11976_v45 }
 0x36c   :  { %2019 = vmatpush2.msra.mxu1 %v9014_v9 }
 0x36d   :  { %2020 = vmatprep.subr.mxu1 %v11976_v45 }
 0x36e   :  { %2021 = vmatpush2.msra.mxu1 %v9020_v13 }
 0x36f   :  { %2022 = vmatprep.subr.mxu1 %v11976_v45 }
 0x370   :  { %2023 = vmatpush2.msra.mxu1 %v9026_v15 }
 0x371   :  { %2025 = vmatmul.mubr.f32.vlgmr.msra.gmra.mxu1 %v6050_v36  ;;  %6908 = vmatprep.subr.mxu1 %v11976_v45 }
 0x372   :  { %6066 = vmatprep.mubr.msk.f32.mxu1 %vm1142_vm4, %v6053_v48 }
 0x375   :  { %2030 = vmatmul.mubr.f32.gmra.mxu1 %v6052_v16 }
 0x376   :  { %6067 = vmatprep.mubr.msk.f32.mxu1 %vm1142_vm4, %v6055_v57 }
 0x379   :  { %2035 = vmatmul.mubr.f32.gmra.mxu1 %v6054_v51 }
 0x37a   :  { %6068 = vmatprep.mubr.msk.f32.mxu1 %vm1142_vm4, %v6057_v44 }
 0x37d   :  { %2040 = vmatmul.mubr.f32.gmra.mxu1 %v6056_v50 }
 0x37e   :  { %6069 = vmatprep.mubr.msk.f32.mxu1 %vm1142_vm4, %v6059_v60 }
 0x381   :  { %2045 = vmatmul.mubr.f32.gmra.mxu1 %v6058_v58 }
 0x382   :  { %6070 = vmatprep.mubr.msk.f32.mxu1 %vm1142_vm4, %v6061_v14 }
 0x385   :  { %2050 = vmatmul.mubr.f32.gmra.mxu1 %v6060_v32 }
 0x386   :  { %6071 = vmatprep.mubr.msk.f32.mxu1 %vm1142_vm4, %v6063_v28 }
 0x389   :  { %2055 = vmatmul.mubr.f32.gmra.mxu1 %v6062_v21 }
 0x38a   :  { %6916 = vmatprep.mubr.msk.f32.mxu1 %vm7484_vm1, %v11976_v45 }
 0x3c7   :  { %v1500_v12 = vpop.f32.mrf.mxu1 }
 0x3c9   :  { %v6802_v61 = vpop.f32.mrf.mxu1 }
 0x3cb   :  { %v1505_v1 = vpop.f32.mrf.mxu1 }
 0x3cd   :  { %v6805_v52 = vpop.f32.mrf.mxu1 }
 0x3cf   :  { %v1510_v36 = vpop.f32.mrf.mxu1 }
 0x3d1   :  { %v6808_v48 = vpop.f32.mrf.mxu1 }
 0x3d3   :  { %v1515_v16 = vpop.f32.mrf.mxu1 }
 0x3d5   :  { %v6811_v57 = vpop.f32.mrf.mxu1 }
 0x3d7   :  { %v1520_v51 = vpop.f32.mrf.mxu1 }
 0x3d9   :  { %v6814_v44 = vpop.f32.mrf.mxu1 }
 0x3db   :  { %v1525_v50 = vpop.f32.mrf.mxu1 }
 0x3dd   :  { %v6817_v60 = vpop.f32.mrf.mxu1 }
 0x3df   :  { %v1530_v58 = vpop.f32.mrf.mxu1 }
 0x3e1   :  { %v6820_v14 = vpop.f32.mrf.mxu1 }
 0x3e3   :  { %v1621_v32 = vpop.f32.mrf.mxu1 }
 0x3e4   :  { %v1622_v28 = vadd.f32 %v1621_v32, %v1500_v12 }
 0x3e5   :  { %v6831_v21 = vpop.f32.mrf.mxu1 }
 0x3e7   :  { %v1626_v47 = vpop.f32.mrf.mxu1 }
 0x3e8   :  { %v1627_v62 = vadd.f32 %v1626_v47, %v1505_v1 }
 0x3e9   :  { %v6834_v7 = vpop.f32.mrf.mxu1 }
 0x3eb   :  { %v1631_v20 = vpop.f32.mrf.mxu1 }
 0x3ec   :  { %v1632_v61 = vadd.f32 %v1631_v20, %v1510_v36 }
 0x3ed   :  { %v6837_v31 = vpop.f32.mrf.mxu1 }
 0x3ef   :  { %v1636_v52 = vpop.f32.mrf.mxu1 }
 0x3f0   :  { %v1637_v59 = vadd.f32 %v1636_v52, %v1515_v16 }
 0x3f1   :  { %v6840_v48 = vpop.f32.mrf.mxu1 }
 0x3f3   :  { %v1641_v18 = vpop.f32.mrf.mxu1 }
 0x3f4   :  { %v1642_v57 = vadd.f32 %v1641_v18, %v1520_v51 }
 0x3f5   :  { %v6843_v27 = vpop.f32.mrf.mxu1 }
 0x3f7   :  { %v1646_v44 = vpop.f32.mrf.mxu1 }
 0x3f8   :  { %v1647_v34 = vadd.f32 %v1646_v44, %v1525_v50 }
 0x3f9   :  { %v6846_v60 = vpop.f32.mrf.mxu1 }
 0x3fb   :  { %v1651_v37 = vpop.f32.mrf.mxu1 }
 0x3fc   :  { %v1652_v14 = vadd.f32 %v1651_v37, %v1530_v58 }
 0x3fd   :  { %v6849_v4 = vpop.f32.mrf.mxu1 }
 0x3ff   :  { %v1883_v12 = vpop.f32.mrf.mxu1 }
 0x400   :  { %v9504_v32 = vadd.f32 %v1883_v12, %v1622_v28 }
 0x401   :  { %v6860_v1 = vpop.f32.mrf.mxu1 }
 0x403   :  { %v1888_v21 = vpop.f32.mrf.mxu1 }
 0x404   :  { %v9506_v47 = vadd.f32 %v1888_v21, %v1627_v62 }
 0x405   :  { %v6863_v31 = vpop.f32.mrf.mxu1 }
 0x407   :  { %v1893_v36 = vpop.f32.mrf.mxu1 }
 0x408   :  { %v9508_v16 = vadd.f32 %v1893_v36, %v1632_v61 }
 0x409   :  { %v6866_v7 = vpop.f32.mrf.mxu1 }
 0x40a   :  { %v6084_v7 = vld [vmem:[%s11905_s5 + $0x1c8] sm:$0xff] }
 0x40b   :  { %v1898_v18 = vpop.f32.mrf.mxu1 }
 0x40c   :  { %v9510_v27 = vadd.f32 %v1898_v18, %v1637_v59 }
 0x40d   :  { %v6869_v51 = vpop.f32.mrf.mxu1 }
 0x40f   :  { %v1903_v50 = vpop.f32.mrf.mxu1 }
 0x410   :  { %v9512_v20 = vadd.f32 %v1903_v50, %v1642_v57  ;;  %v6083_v50 = vld [vmem:[%s11905_s5 + $0x1c0] sm:$0xff] }
 0x411   :  { %v6872_v37 = vpop.f32.mrf.mxu1 }
 0x412   :  { %v6086_v37 = vld [vmem:[%s11905_s5 + $0x1d8] sm:$0xff] }
 0x413   :  { %v1908_v4 = vpop.f32.mrf.mxu1 }
 0x414   :  { %v9514_v58 = vadd.f32 %v1908_v4, %v1647_v34  ;;  %v6085_v4 = vld [vmem:[%s11905_s5 + $0x1d0] sm:$0xff] }
 0x415   :  { %v6875_v28 = vpop.f32.mrf.mxu1 }
 0x416   :  { %v6088_v28 = vld [vmem:[%s11905_s5 + $0x1e8] sm:$0xff] }
 0x417   :  { %v1913_v52 = vpop.f32.mrf.mxu1 }
 0x418   :  { %v9516_v62 = vadd.f32 %v1913_v52, %v1652_v14  ;;  %v6087_v52 = vld [vmem:[%s11905_s5 + $0x1e0] sm:$0xff] }
 0x419   :  { %v6878_v48 = vpop.f32.mrf.mxu1 }
 0x41a   :  { %v6090_v48 = vld [vmem:[%s11905_s5 + $0x1f8] sm:$0xff] }
 0x431   :  { %v2026_v44 = vpop.f32.mrf.mxu1 }
 0x432   :  { %6888 = vmatmul.mubr.msk.f32.vlgmr.msra.gmra.mxu0 %vm559_vm3, %v2026_v44  ;;  %v6089_v44 = vld [vmem:[%s11905_s5 + $0x1f0] sm:$0xff] }
 0x433   :  { %2230 = vmatpush1.msra.mxu0 %v8693_v49  ;;  %v2028_v59 = vpop.f32.mrf.mxu1  ;;  %6890 = vmatprep.mubr.msk.f32.mxu0 %vm7484_vm1, %v11976_v45 }
 0x434   :  { %2231 = vmatprep.subr.mxu0 %v11976_v45  ;;  %v6092_v59 = vld [vmem:[%s11905_s5 + $0x208] sm:$0xff] }
 0x435   :  { %2232 = vmatpush1.msra.mxu0 %v8718_v39  ;;  %v2031_v34 = vpop.f32.mrf.mxu1 }
 0x436   :  { %2233 = vmatprep.subr.mxu0 %v11976_v45  ;;  %6891 = vmatmul.mubr.msk.f32.gmra.mxu0 %vm559_vm3, %v2031_v34  ;;  %v6091_v34 = vld [vmem:[%s11905_s5 + $0x200] sm:$0xff] }
 0x437   :  { %2234 = vmatpush1.msra.mxu0 %v8715_v5  ;;  %v2033_v61 = vpop.f32.mrf.mxu1  ;;  %6893 = vmatprep.mubr.msk.f32.mxu0 %vm7484_vm1, %v11976_v45 }
 0x438   :  { %2235 = vmatprep.subr.mxu0 %v11976_v45  ;;  %v6094_v61 = vld [vmem:[%s11905_s5 + $0x218] sm:$0xff] }
 0x439   :  { %2236 = vmatpush1.msra.mxu0 %v8704_v53  ;;  %v2036_v57 = vpop.f32.mrf.mxu1 }
 0x43a   :  { %2237 = vmatprep.subr.mxu0 %v11976_v45  ;;  %6894 = vmatmul.mubr.msk.f32.gmra.mxu0 %vm559_vm3, %v2036_v57  ;;  %v6093_v57 = vld [vmem:[%s11905_s5 + $0x210] sm:$0xff] }
 0x43b   :  { %2238 = vmatpush1.msra.mxu0 %v8691_v8  ;;  %v2038_v60 = vpop.f32.mrf.mxu1  ;;  %6896 = vmatprep.mubr.msk.f32.mxu0 %vm7484_vm1, %v11976_v45 }
 0x43c   :  { %2239 = vmatprep.subr.mxu0 %v11976_v45  ;;  %v6096_v60 = vld [vmem:[%s11905_s5 + $0x228] sm:$0x1] }
 0x43d   :  { %2240 = vmatpush1.msra.mxu0 %v8683_v40  ;;  %v2041_v14 = vpop.f32.mrf.mxu1 }
 0x43e   :  { %2241 = vmatprep.subr.mxu0 %v11976_v45  ;;  %6897 = vmatmul.mubr.msk.f32.gmra.mxu0 %vm559_vm3, %v2041_v14  ;;  %v6095_v14 = vld [vmem:[%s11905_s5 + $0x220] sm:$0x1] }
 0x43f   :  { %2242 = vmatpush1.msra.mxu0 %v8672_v19  ;;  %v2043_v12 = vpop.f32.mrf.mxu1  ;;  %6899 = vmatprep.mubr.msk.f32.mxu0 %vm7484_vm1, %v11976_v45 }
 0x440   :  { %2243 = vmatprep.subr.mxu0 %v11976_v45  ;;  %v6108_v12 = vld [vmem:[%s11908_s6 + $0x98] sm:$0xff] }
 0x441   :  { %2244 = vmatpush1.msra.mxu0 %v11997_v11  ;;  %v2046_v1 = vpop.f32.mrf.mxu1  ;;  %6909 = vmatpush3.msra.mxu1 %v6108_v12 }
 0x442   :  { %2245 = vmatprep.subr.mxu0 %v11976_v45  ;;  %6900 = vmatmul.mubr.msk.f32.gmra.mxu0 %vm559_vm3, %v2046_v1  ;;  %v6107_v1 = vld [vmem:[%s11908_s6 + $0x90] sm:$0xff] }
 0x443   :  { %2246 = vmatpush1.msra.mxu0 %v8878_v29  ;;  %v2048_v21 = vpop.f32.mrf.mxu1  ;;  %6902 = vmatprep.mubr.msk.f32.mxu0 %vm7484_vm1, %v11976_v45 }
 0x444   :  { %2247 = vmatprep.subr.mxu0 %v11976_v45  ;;  %6910 = vmatprep.subr.mxu1 %v11976_v45  ;;  %v6106_v21 = vld [vmem:[%s11908_s6 + $0x88] sm:$0xff] }
 0x445   :  { %2248 = vmatpush1.msra.mxu0 %v8897_v25  ;;  %v2051_v31 = vpop.f32.mrf.mxu1  ;;  %6911 = vmatpush3.msra.mxu1 %v6107_v1 }
 0x446   :  { %2249 = vmatprep.subr.mxu0 %v11976_v45  ;;  %6903 = vmatmul.mubr.msk.f32.gmra.mxu0 %vm559_vm3, %v2051_v31  ;;  %v6105_v31 = vld [vmem:[%s11908_s6 + $0x80] sm:$0xff] }
 0x447   :  { %2250 = vmatpush1.msra.mxu0 %v8909_v17  ;;  %v2053_v36 = vpop.f32.mrf.mxu1  ;;  %6905 = vmatprep.mubr.msk.f32.mxu0 %vm7484_vm1, %v11976_v45 }
 0x448   :  { %2251 = vmatprep.subr.mxu0 %v11976_v45  ;;  %6912 = vmatprep.subr.mxu1 %v11976_v45 }
 0x449   :  { %2252 = vmatpush1.msra.mxu0 %v8921_v56  ;;  %v2056_v18 = vpop.f32.mrf.mxu1  ;;  %6913 = vmatpush3.msra.mxu1 %v6106_v21 }
 0x44a   :  { %2253 = vmatprep.subr.mxu0 %v11976_v45  ;;  %6906 = vmatmul.mubr.msk.f32.gmra.mxu0 %vm559_vm3, %v2056_v18 }
 0x44b   :  { %2254 = vmatpush1.msra.mxu0 %v8932_v23  ;;  %6098 = vmatprep.mubr.msk.f32.mxu0 %vm1142_vm4, %v6084_v7  ;;  %v2058_v51 = vpop.f32.mrf.mxu1 }
 0x44c   :  { %2255 = vmatprep.subr.mxu0 %v11976_v45  ;;  %6914 = vmatprep.subr.mxu1 %v11976_v45 }
 0x44d   :  { %2256 = vmatpush1.msra.mxu0 %v8943_v55  ;;  %6915 = vmatpush3.msra.mxu1 %v6105_v31 }
 0x44e   :  { %2257 = vmatprep.subr.mxu0 %v11976_v45  ;;  %2498 = vmatprep.subr.mxu1 %v11976_v45 }
 0x44f   :  { %2258 = vmatpush1.msra.mxu0 %v8952_v63 }
 0x450   :  { %2259 = vmatprep.subr.mxu0 %v11976_v45 }
 0x451   :  { %2260 = vmatpush1.msra.mxu0 %v8960_v24 }
 0x452   :  { %2275 = vmatprep.subr.mxu0 %v11976_v45 }
 0x453   :  { %6097 = vmatpush2.msk.msra.mxu0 %vm1164_vm5, %v8968_v46 }
 0x454   :  { %2277 = vmatprep.subr.mxu0 %v11976_v45 }
 0x455   :  { %2278 = vmatpush2.msra.mxu0 %v8977_v22 }
 0x456   :  { %2279 = vmatprep.subr.mxu0 %v11976_v45 }
 0x457   :  { %2280 = vmatpush2.msra.mxu0 %v8988_v10 }
 0x458   :  { %2281 = vmatprep.subr.mxu0 %v11976_v45 }
 0x459   :  { %2282 = vmatpush2.msra.mxu0 %v8995_v41 }
 0x45a   :  { %2283 = vmatprep.subr.mxu0 %v11976_v45 }
 0x45b   :  { %2284 = vmatpush2.msra.mxu0 %v9002_v33 }
 0x45c   :  { %2285 = vmatprep.subr.mxu0 %v11976_v45 }
 0x45d   :  { %2286 = vmatpush2.msra.mxu0 %v9008_v43 }
 0x45e   :  { %2287 = vmatprep.subr.mxu0 %v11976_v45 }
 0x45f   :  { %2288 = vmatpush2.msra.mxu0 %v9014_v9 }
 0x460   :  { %2289 = vmatprep.subr.mxu0 %v11976_v45 }
 0x461   :  { %2290 = vmatpush2.msra.mxu0 %v9020_v13 }
 0x462   :  { %2291 = vmatprep.subr.mxu0 %v11976_v45 }
 0x463   :  { %2292 = vmatpush2.msra.mxu0 %v9026_v15 }
 0x464   :  { %2294 = vmatmul.mubr.f32.vlgmr.msra.gmra.mxu0 %v6083_v50  ;;  %6937 = vmatprep.subr.mxu0 %v11976_v45 }
 0x465   :  { %6099 = vmatprep.mubr.msk.f32.mxu0 %vm1142_vm4, %v6086_v37 }
 0x468   :  { %2299 = vmatmul.mubr.f32.gmra.mxu0 %v6085_v4 }
 0x469   :  { %6100 = vmatprep.mubr.msk.f32.mxu0 %vm1142_vm4, %v6088_v28 }
 0x46c   :  { %2304 = vmatmul.mubr.f32.gmra.mxu0 %v6087_v52 }
 0x46d   :  { %6101 = vmatprep.mubr.msk.f32.mxu0 %vm1142_vm4, %v6090_v48 }
 0x470   :  { %2309 = vmatmul.mubr.f32.gmra.mxu0 %v6089_v44 }
 0x471   :  { %6102 = vmatprep.mubr.msk.f32.mxu0 %vm1142_vm4, %v6092_v59 }
 0x474   :  { %2314 = vmatmul.mubr.f32.gmra.mxu0 %v6091_v34 }
 0x475   :  { %6103 = vmatprep.mubr.msk.f32.mxu0 %vm1142_vm4, %v6094_v61 }
 0x478   :  { %2319 = vmatmul.mubr.f32.gmra.mxu0 %v6093_v57 }
 0x479   :  { %6104 = vmatprep.mubr.msk.f32.mxu0 %vm1142_vm4, %v6096_v60 }
 0x47c   :  { %2324 = vmatmul.mubr.f32.gmra.mxu0 %v6095_v14 }
 0x47d   :  { %6945 = vmatprep.mubr.msk.f32.mxu0 %vm7484_vm1, %v11976_v45 }
 0x4f2   :  { %v2152_v36 = vpop.f32.mrf.mxu0 }
 0x4f3   :  { %v9656_v7 = vadd.f32 %v2152_v36, %v9504_v32 }
 0x4f4   :  { %v6889_v18 = vpop.f32.mrf.mxu0 }
 0x4f6   :  { %v2157_v51 = vpop.f32.mrf.mxu0 }
 0x4f7   :  { %v9659_v50 = vadd.f32 %v2157_v51, %v9506_v47 }
 0x4f8   :  { %v6892_v37 = vpop.f32.mrf.mxu0 }
 0x4fa   :  { %v2162_v4 = vpop.f32.mrf.mxu0 }
 0x4fb   :  { %v9662_v28 = vadd.f32 %v2162_v4, %v9508_v16 }
 0x4fc   :  { %v6895_v52 = vpop.f32.mrf.mxu0 }
 0x4fd   :  { %v6117_v52 = vld [vmem:[%s11905_s5 + $0x238] sm:$0xff] }
 0x4fe   :  { %v2167_v48 = vpop.f32.mrf.mxu0 }
 0x4ff   :  { %v9665_v44 = vadd.f32 %v2167_v48, %v9510_v27 }
 0x500   :  { %v6898_v59 = vpop.f32.mrf.mxu0 }
 0x502   :  { %v2172_v34 = vpop.f32.mrf.mxu0 }
 0x503   :  { %v9668_v32 = vadd.f32 %v2172_v34, %v9512_v20  ;;  %v6116_v34 = vld [vmem:[%s11905_s5 + $0x230] sm:$0xff] }
 0x504   :  { %v6901_v61 = vpop.f32.mrf.mxu0 }
 0x505   :  { %v6119_v61 = vld [vmem:[%s11905_s5 + $0x248] sm:$0xff] }
 0x506   :  { %v2177_v57 = vpop.f32.mrf.mxu0 }
 0x507   :  { %v9671_v47 = vadd.f32 %v2177_v57, %v9514_v58  ;;  %v6118_v57 = vld [vmem:[%s11905_s5 + $0x240] sm:$0xff] }
 0x508   :  { %v6904_v60 = vpop.f32.mrf.mxu0 }
 0x509   :  { %v6121_v60 = vld [vmem:[%s11905_s5 + $0x258] sm:$0xff] }
 0x50a   :  { %v2182_v14 = vpop.f32.mrf.mxu0 }
 0x50b   :  { %v9674_v16 = vadd.f32 %v2182_v14, %v9516_v62  ;;  %v6120_v14 = vld [vmem:[%s11905_s5 + $0x250] sm:$0xff] }
 0x50c   :  { %v6907_v12 = vpop.f32.mrf.mxu0 }
 0x50d   :  { %v6123_v12 = vld [vmem:[%s11905_s5 + $0x268] sm:$0xff] }
 0x524   :  { %v2295_v1 = vpop.f32.mrf.mxu0 }
 0x525   :  { %6917 = vmatmul.mubr.msk.f32.vlgmr.msra.gmra.mxu1 %vm559_vm3, %v2295_v1  ;;  %v6122_v1 = vld [vmem:[%s11905_s5 + $0x260] sm:$0xff] }
 0x526   :  { %2499 = vmatpush1.msra.mxu1 %v8693_v49  ;;  %v2297_v27 = vpop.f32.mrf.mxu0  ;;  %6919 = vmatprep.mubr.msk.f32.mxu1 %vm7484_vm1, %v11976_v45 }
 0x527   :  { %2500 = vmatprep.subr.mxu1 %v11976_v45  ;;  %v6125_v27 = vld [vmem:[%s11905_s5 + $0x278] sm:$0xff] }
 0x528   :  { %2501 = vmatpush1.msra.mxu1 %v8718_v39  ;;  %v2300_v20 = vpop.f32.mrf.mxu0 }
 0x529   :  { %2502 = vmatprep.subr.mxu1 %v11976_v45  ;;  %6920 = vmatmul.mubr.msk.f32.gmra.mxu1 %vm559_vm3, %v2300_v20  ;;  %v6124_v20 = vld [vmem:[%s11905_s5 + $0x270] sm:$0xff] }
 0x52a   :  { %2503 = vmatpush1.msra.mxu1 %v8715_v5  ;;  %v2302_v58 = vpop.f32.mrf.mxu0  ;;  %6922 = vmatprep.mubr.msk.f32.mxu1 %vm7484_vm1, %v11976_v45 }
 0x52b   :  { %2504 = vmatprep.subr.mxu1 %v11976_v45  ;;  %v6127_v58 = vld [vmem:[%s11905_s5 + $0x288] sm:$0xff] }
 0x52c   :  { %2505 = vmatpush1.msra.mxu1 %v8704_v53  ;;  %v2305_v62 = vpop.f32.mrf.mxu0 }
 0x52d   :  { %2506 = vmatprep.subr.mxu1 %v11976_v45  ;;  %6923 = vmatmul.mubr.msk.f32.gmra.mxu1 %vm559_vm3, %v2305_v62  ;;  %v6126_v62 = vld [vmem:[%s11905_s5 + $0x280] sm:$0xff] }
 0x52e   :  { %2507 = vmatpush1.msra.mxu1 %v8691_v8  ;;  %v2307_v21 = vpop.f32.mrf.mxu0  ;;  %6925 = vmatprep.mubr.msk.f32.mxu1 %vm7484_vm1, %v11976_v45 }
 0x52f   :  { %2508 = vmatprep.subr.mxu1 %v11976_v45  ;;  %v6129_v21 = vld [vmem:[%s11905_s5 + $0x298] sm:$0x1] }
 0x530   :  { %2509 = vmatpush1.msra.mxu1 %v8683_v40  ;;  %v2310_v31 = vpop.f32.mrf.mxu0 }
 0x531   :  { %2510 = vmatprep.subr.mxu1 %v11976_v45  ;;  %6926 = vmatmul.mubr.msk.f32.gmra.mxu1 %vm559_vm3, %v2310_v31  ;;  %v6128_v31 = vld [vmem:[%s11905_s5 + $0x290] sm:$0x1] }
 0x532   :  { %2511 = vmatpush1.msra.mxu1 %v8672_v19  ;;  %v2312_v36 = vpop.f32.mrf.mxu0  ;;  %6928 = vmatprep.mubr.msk.f32.mxu1 %vm7484_vm1, %v11976_v45 }
 0x533   :  { %2512 = vmatprep.subr.mxu1 %v11976_v45  ;;  %v6141_v36 = vld [vmem:[%s11908_s6 + $0xb8] sm:$0xff] }
 0x534   :  { %2513 = vmatpush1.msra.mxu1 %v11997_v11  ;;  %v2315_v18 = vpop.f32.mrf.mxu0  ;;  %6938 = vmatpush3.msra.mxu0 %v6141_v36 }
 0x535   :  { %2514 = vmatprep.subr.mxu1 %v11976_v45  ;;  %6929 = vmatmul.mubr.msk.f32.gmra.mxu1 %vm559_vm3, %v2315_v18  ;;  %v6140_v18 = vld [vmem:[%s11908_s6 + $0xb0] sm:$0xff] }
 0x536   :  { %2515 = vmatpush1.msra.mxu1 %v8878_v29  ;;  %v2317_v51 = vpop.f32.mrf.mxu0  ;;  %6931 = vmatprep.mubr.msk.f32.mxu1 %vm7484_vm1, %v11976_v45 }
 0x537   :  { %2516 = vmatprep.subr.mxu1 %v11976_v45  ;;  %6939 = vmatprep.subr.mxu0 %v11976_v45  ;;  %v6139_v51 = vld [vmem:[%s11908_s6 + $0xa8] sm:$0xff] }
 0x538   :  { %2517 = vmatpush1.msra.mxu1 %v8897_v25  ;;  %v2320_v37 = vpop.f32.mrf.mxu0  ;;  %6940 = vmatpush3.msra.mxu0 %v6140_v18 }
 0x539   :  { %2518 = vmatprep.subr.mxu1 %v11976_v45  ;;  %6932 = vmatmul.mubr.msk.f32.gmra.mxu1 %vm559_vm3, %v2320_v37  ;;  %v6138_v37 = vld [vmem:[%s11908_s6 + $0xa0] sm:$0xff] }
 0x53a   :  { %2519 = vmatpush1.msra.mxu1 %v8909_v17  ;;  %v2322_v4 = vpop.f32.mrf.mxu0  ;;  %6934 = vmatprep.mubr.msk.f32.mxu1 %vm7484_vm1, %v11976_v45 }
 0x53b   :  { %2520 = vmatprep.subr.mxu1 %v11976_v45  ;;  %6941 = vmatprep.subr.mxu0 %v11976_v45 }
 0x53c   :  { %2521 = vmatpush1.msra.mxu1 %v8921_v56  ;;  %v2325_v48 = vpop.f32.mrf.mxu0  ;;  %6942 = vmatpush3.msra.mxu0 %v6139_v51 }
 0x53d   :  { %2522 = vmatprep.subr.mxu1 %v11976_v45  ;;  %6935 = vmatmul.mubr.msk.f32.gmra.mxu1 %vm559_vm3, %v2325_v48 }
 0x53e   :  { %2523 = vmatpush1.msra.mxu1 %v8932_v23  ;;  %6131 = vmatprep.mubr.msk.f32.mxu1 %vm1142_vm4, %v6117_v52  ;;  %v2327_v59 = vpop.f32.mrf.mxu0 }
 0x53f   :  { %2524 = vmatprep.subr.mxu1 %v11976_v45  ;;  %6943 = vmatprep.subr.mxu0 %v11976_v45 }
 0x540   :  { %2525 = vmatpush1.msra.mxu1 %v8943_v55  ;;  %6944 = vmatpush3.msra.mxu0 %v6138_v37 }
 0x541   :  { %2526 = vmatprep.subr.mxu1 %v11976_v45  ;;  %2767 = vmatprep.subr.mxu0 %v11976_v45 }
 0x542   :  { %2527 = vmatpush1.msra.mxu1 %v8952_v63 }
 0x543   :  { %2528 = vmatprep.subr.mxu1 %v11976_v45 }
 0x544   :  { %2529 = vmatpush1.msra.mxu1 %v8960_v24 }
 0x545   :  { %2544 = vmatprep.subr.mxu1 %v11976_v45 }
 0x546   :  { %6130 = vmatpush2.msk.msra.mxu1 %vm1164_vm5, %v8968_v46 }
 0x547   :  { %2546 = vmatprep.subr.mxu1 %v11976_v45 }
 0x548   :  { %2547 = vmatpush2.msra.mxu1 %v8977_v22 }
 0x549   :  { %2548 = vmatprep.subr.mxu1 %v11976_v45 }
 0x54a   :  { %2549 = vmatpush2.msra.mxu1 %v8988_v10 }
 0x54b   :  { %2550 = vmatprep.subr.mxu1 %v11976_v45 }
 0x54c   :  { %2551 = vmatpush2.msra.mxu1 %v8995_v41 }
 0x54d   :  { %2552 = vmatprep.subr.mxu1 %v11976_v45 }
 0x54e   :  { %2553 = vmatpush2.msra.mxu1 %v9002_v33 }
 0x54f   :  { %2554 = vmatprep.subr.mxu1 %v11976_v45 }
 0x550   :  { %2555 = vmatpush2.msra.mxu1 %v9008_v43 }
 0x551   :  { %2556 = vmatprep.subr.mxu1 %v11976_v45 }
 0x552   :  { %2557 = vmatpush2.msra.mxu1 %v9014_v9 }
 0x553   :  { %2558 = vmatprep.subr.mxu1 %v11976_v45 }
 0x554   :  { %2559 = vmatpush2.msra.mxu1 %v9020_v13 }
 0x555   :  { %2560 = vmatprep.subr.mxu1 %v11976_v45 }
 0x556   :  { %2561 = vmatpush2.msra.mxu1 %v9026_v15 }
 0x557   :  { %2563 = vmatmul.mubr.f32.vlgmr.msra.gmra.mxu1 %v6116_v34  ;;  %6966 = vmatprep.subr.mxu1 %v11976_v45 }
 0x558   :  { %6132 = vmatprep.mubr.msk.f32.mxu1 %vm1142_vm4, %v6119_v61 }
 0x55b   :  { %2568 = vmatmul.mubr.f32.gmra.mxu1 %v6118_v57 }
 0x55c   :  { %6133 = vmatprep.mubr.msk.f32.mxu1 %vm1142_vm4, %v6121_v60 }
 0x55f   :  { %2573 = vmatmul.mubr.f32.gmra.mxu1 %v6120_v14 }
 0x560   :  { %6134 = vmatprep.mubr.msk.f32.mxu1 %vm1142_vm4, %v6123_v12 }
 0x563   :  { %2578 = vmatmul.mubr.f32.gmra.mxu1 %v6122_v1 }
 0x564   :  { %6135 = vmatprep.mubr.msk.f32.mxu1 %vm1142_vm4, %v6125_v27 }
 0x567   :  { %2583 = vmatmul.mubr.f32.gmra.mxu1 %v6124_v20 }
 0x568   :  { %6136 = vmatprep.mubr.msk.f32.mxu1 %vm1142_vm4, %v6127_v58 }
 0x56b   :  { %2588 = vmatmul.mubr.f32.gmra.mxu1 %v6126_v62 }
 0x56c   :  { %6137 = vmatprep.mubr.msk.f32.mxu1 %vm1142_vm4, %v6129_v21 }
 0x56f   :  { %2593 = vmatmul.mubr.f32.gmra.mxu1 %v6128_v31 }
 0x570   :  { %6974 = vmatprep.mubr.msk.f32.mxu1 %vm7484_vm1, %v11976_v45 }
 0x5e5   :  { %v2421_v4 = vpop.f32.mrf.mxu1 }
 0x5e6   :  { %v9814_v52 = vadd.f32 %v2421_v4, %v9656_v7 }
 0x5e7   :  { %v6918_v48 = vpop.f32.mrf.mxu1 }
 0x5e9   :  { %v2426_v59 = vpop.f32.mrf.mxu1 }
 0x5ea   :  { %v9817_v34 = vadd.f32 %v2426_v59, %v9659_v50 }
 0x5eb   :  { %v6921_v61 = vpop.f32.mrf.mxu1 }
 0x5ed   :  { %v2431_v57 = vpop.f32.mrf.mxu1 }
 0x5ee   :  { %v9820_v60 = vadd.f32 %v2431_v57, %v9662_v28 }
 0x5ef   :  { %v6924_v14 = vpop.f32.mrf.mxu1 }
 0x5f0   :  { %v6150_v14 = vld [vmem:[%s11905_s5 + $0x2a8] sm:$0xff] }
 0x5f1   :  { %v2436_v12 = vpop.f32.mrf.mxu1 }
 0x5f2   :  { %v9823_v1 = vadd.f32 %v2436_v12, %v9665_v44 }
 0x5f3   :  { %v6927_v27 = vpop.f32.mrf.mxu1 }
 0x5f5   :  { %v2441_v20 = vpop.f32.mrf.mxu1 }
 0x5f6   :  { %v9826_v7 = vadd.f32 %v2441_v20, %v9668_v32  ;;  %v6149_v20 = vld [vmem:[%s11905_s5 + $0x2a0] sm:$0xff] }
 0x5f7   :  { %v6930_v58 = vpop.f32.mrf.mxu1 }
 0x5f8   :  { %v6152_v58 = vld [vmem:[%s11905_s5 + $0x2b8] sm:$0xff] }
 0x5f9   :  { %v2446_v62 = vpop.f32.mrf.mxu1 }
 0x5fa   :  { %v9829_v50 = vadd.f32 %v2446_v62, %v9671_v47  ;;  %v6151_v62 = vld [vmem:[%s11905_s5 + $0x2b0] sm:$0xff] }
 0x5fb   :  { %v6933_v21 = vpop.f32.mrf.mxu1 }
 0x5fc   :  { %v6154_v21 = vld [vmem:[%s11905_s5 + $0x2c8] sm:$0xff] }
 0x5fd   :  { %v2451_v31 = vpop.f32.mrf.mxu1 }
 0x5fe   :  { %v9832_v28 = vadd.f32 %v2451_v31, %v9674_v16  ;;  %v6153_v31 = vld [vmem:[%s11905_s5 + $0x2c0] sm:$0xff] }
 0x5ff   :  { %v6936_v36 = vpop.f32.mrf.mxu1 }
 0x600   :  { %v6156_v36 = vld [vmem:[%s11905_s5 + $0x2d8] sm:$0xff] }
 0x617   :  { %v2564_v18 = vpop.f32.mrf.mxu1 }
 0x618   :  { %6946 = vmatmul.mubr.msk.f32.vlgmr.msra.gmra.mxu0 %vm559_vm3, %v2564_v18  ;;  %v6155_v18 = vld [vmem:[%s11905_s5 + $0x2d0] sm:$0xff] }
 0x619   :  { %2768 = vmatpush1.msra.mxu0 %v8693_v49  ;;  %v2566_v44 = vpop.f32.mrf.mxu1  ;;  %6948 = vmatprep.mubr.msk.f32.mxu0 %vm7484_vm1, %v11976_v45 }
 0x61a   :  { %2769 = vmatprep.subr.mxu0 %v11976_v45  ;;  %v6158_v44 = vld [vmem:[%s11905_s5 + $0x2e8] sm:$0xff] }
 0x61b   :  { %2770 = vmatpush1.msra.mxu0 %v8718_v39  ;;  %v2569_v32 = vpop.f32.mrf.mxu1 }
 0x61c   :  { %2771 = vmatprep.subr.mxu0 %v11976_v45  ;;  %6949 = vmatmul.mubr.msk.f32.gmra.mxu0 %vm559_vm3, %v2569_v32  ;;  %v6157_v32 = vld [vmem:[%s11905_s5 + $0x2e0] sm:$0xff] }
 0x61d   :  { %2772 = vmatpush1.msra.mxu0 %v8715_v5  ;;  %v2571_v47 = vpop.f32.mrf.mxu1  ;;  %6951 = vmatprep.mubr.msk.f32.mxu0 %vm7484_vm1, %v11976_v45 }
 0x61e   :  { %2773 = vmatprep.subr.mxu0 %v11976_v45  ;;  %v6160_v47 = vld [vmem:[%s11905_s5 + $0x2f8] sm:$0xff] }
 0x61f   :  { %2774 = vmatpush1.msra.mxu0 %v8704_v53  ;;  %v2574_v16 = vpop.f32.mrf.mxu1 }
 0x620   :  { %2775 = vmatprep.subr.mxu0 %v11976_v45  ;;  %6952 = vmatmul.mubr.msk.f32.gmra.mxu0 %vm559_vm3, %v2574_v16  ;;  %v6159_v16 = vld [vmem:[%s11905_s5 + $0x2f0] sm:$0xff] }
 0x621   :  { %2776 = vmatpush1.msra.mxu0 %v8691_v8  ;;  %v2576_v51 = vpop.f32.mrf.mxu1  ;;  %6954 = vmatprep.mubr.msk.f32.mxu0 %vm7484_vm1, %v11976_v45 }
 0x622   :  { %2777 = vmatprep.subr.mxu0 %v11976_v45  ;;  %v6162_v51 = vld [vmem:[%s11905_s5 + $0x308] sm:$0x1] }
 0x623   :  { %2778 = vmatpush1.msra.mxu0 %v8683_v40  ;;  %v2579_v37 = vpop.f32.mrf.mxu1 }
 0x624   :  { %2779 = vmatprep.subr.mxu0 %v11976_v45  ;;  %6955 = vmatmul.mubr.msk.f32.gmra.mxu0 %vm559_vm3, %v2579_v37  ;;  %v6161_v37 = vld [vmem:[%s11905_s5 + $0x300] sm:$0x1] }
 0x625   :  { %2780 = vmatpush1.msra.mxu0 %v8672_v19  ;;  %v2581_v4 = vpop.f32.mrf.mxu1  ;;  %6957 = vmatprep.mubr.msk.f32.mxu0 %vm7484_vm1, %v11976_v45 }
 0x626   :  { %2781 = vmatprep.subr.mxu0 %v11976_v45  ;;  %v6174_v4 = vld [vmem:[%s11908_s6 + $0xd8] sm:$0xff] }
 0x627   :  { %2782 = vmatpush1.msra.mxu0 %v11997_v11  ;;  %v2584_v48 = vpop.f32.mrf.mxu1  ;;  %6967 = vmatpush3.msra.mxu1 %v6174_v4 }
 0x628   :  { %2783 = vmatprep.subr.mxu0 %v11976_v45  ;;  %6958 = vmatmul.mubr.msk.f32.gmra.mxu0 %vm559_vm3, %v2584_v48  ;;  %v6173_v48 = vld [vmem:[%s11908_s6 + $0xd0] sm:$0xff] }
 0x629   :  { %2784 = vmatpush1.msra.mxu0 %v8878_v29  ;;  %v2586_v59 = vpop.f32.mrf.mxu1  ;;  %6960 = vmatprep.mubr.msk.f32.mxu0 %vm7484_vm1, %v11976_v45 }
 0x62a   :  { %2785 = vmatprep.subr.mxu0 %v11976_v45  ;;  %6968 = vmatprep.subr.mxu1 %v11976_v45  ;;  %v6172_v59 = vld [vmem:[%s11908_s6 + $0xc8] sm:$0xff] }
 0x62b   :  { %2786 = vmatpush1.msra.mxu0 %v8897_v25  ;;  %v2589_v61 = vpop.f32.mrf.mxu1  ;;  %6969 = vmatpush3.msra.mxu1 %v6173_v48 }
 0x62c   :  { %2787 = vmatprep.subr.mxu0 %v11976_v45  ;;  %6961 = vmatmul.mubr.msk.f32.gmra.mxu0 %vm559_vm3, %v2589_v61  ;;  %v6171_v61 = vld [vmem:[%s11908_s6 + $0xc0] sm:$0xff] }
 0x62d   :  { %2788 = vmatpush1.msra.mxu0 %v8909_v17  ;;  %v2591_v57 = vpop.f32.mrf.mxu1  ;;  %6963 = vmatprep.mubr.msk.f32.mxu0 %vm7484_vm1, %v11976_v45 }
 0x62e   :  { %2789 = vmatprep.subr.mxu0 %v11976_v45  ;;  %6970 = vmatprep.subr.mxu1 %v11976_v45 }
 0x62f   :  { %2790 = vmatpush1.msra.mxu0 %v8921_v56  ;;  %v2594_v12 = vpop.f32.mrf.mxu1  ;;  %6971 = vmatpush3.msra.mxu1 %v6172_v59 }
 0x630   :  { %2791 = vmatprep.subr.mxu0 %v11976_v45  ;;  %6964 = vmatmul.mubr.msk.f32.gmra.mxu0 %vm559_vm3, %v2594_v12 }
 0x631   :  { %2792 = vmatpush1.msra.mxu0 %v8932_v23  ;;  %6164 = vmatprep.mubr.msk.f32.mxu0 %vm1142_vm4, %v6150_v14  ;;  %v2596_v27 = vpop.f32.mrf.mxu1 }
 0x632   :  { %2793 = vmatprep.subr.mxu0 %v11976_v45  ;;  %6972 = vmatprep.subr.mxu1 %v11976_v45 }
 0x633   :  { %2794 = vmatpush1.msra.mxu0 %v8943_v55  ;;  %6973 = vmatpush3.msra.mxu1 %v6171_v61 }
 0x634   :  { %2795 = vmatprep.subr.mxu0 %v11976_v45  ;;  %3036 = vmatprep.subr.mxu1 %v11976_v45 }
 0x635   :  { %2796 = vmatpush1.msra.mxu0 %v8952_v63 }
 0x636   :  { %2797 = vmatprep.subr.mxu0 %v11976_v45 }
 0x637   :  { %2798 = vmatpush1.msra.mxu0 %v8960_v24 }
 0x638   :  { %2813 = vmatprep.subr.mxu0 %v11976_v45 }
 0x639   :  { %6163 = vmatpush2.msk.msra.mxu0 %vm1164_vm5, %v8968_v46 }
 0x63a   :  { %2815 = vmatprep.subr.mxu0 %v11976_v45 }
 0x63b   :  { %2816 = vmatpush2.msra.mxu0 %v8977_v22 }
 0x63c   :  { %2817 = vmatprep.subr.mxu0 %v11976_v45 }
 0x63d   :  { %2818 = vmatpush2.msra.mxu0 %v8988_v10 }
 0x63e   :  { %2819 = vmatprep.subr.mxu0 %v11976_v45 }
 0x63f   :  { %2820 = vmatpush2.msra.mxu0 %v8995_v41 }
 0x640   :  { %2821 = vmatprep.subr.mxu0 %v11976_v45 }
 0x641   :  { %2822 = vmatpush2.msra.mxu0 %v9002_v33 }
 0x642   :  { %2823 = vmatprep.subr.mxu0 %v11976_v45 }
 0x643   :  { %2824 = vmatpush2.msra.mxu0 %v9008_v43 }
 0x644   :  { %2825 = vmatprep.subr.mxu0 %v11976_v45 }
 0x645   :  { %2826 = vmatpush2.msra.mxu0 %v9014_v9 }
 0x646   :  { %2827 = vmatprep.subr.mxu0 %v11976_v45 }
 0x647   :  { %2828 = vmatpush2.msra.mxu0 %v9020_v13 }
 0x648   :  { %2829 = vmatprep.subr.mxu0 %v11976_v45 }
 0x649   :  { %2830 = vmatpush2.msra.mxu0 %v9026_v15 }
 0x64a   :  { %2832 = vmatmul.mubr.f32.vlgmr.msra.gmra.mxu0 %v6149_v20  ;;  %6995 = vmatprep.subr.mxu0 %v11976_v45 }
 0x64b   :  { %6165 = vmatprep.mubr.msk.f32.mxu0 %vm1142_vm4, %v6152_v58 }
 0x64e   :  { %2837 = vmatmul.mubr.f32.gmra.mxu0 %v6151_v62 }
 0x64f   :  { %6166 = vmatprep.mubr.msk.f32.mxu0 %vm1142_vm4, %v6154_v21 }
 0x652   :  { %2842 = vmatmul.mubr.f32.gmra.mxu0 %v6153_v31 }
 0x653   :  { %6167 = vmatprep.mubr.msk.f32.mxu0 %vm1142_vm4, %v6156_v36 }
 0x656   :  { %2847 = vmatmul.mubr.f32.gmra.mxu0 %v6155_v18 }
 0x657   :  { %6168 = vmatprep.mubr.msk.f32.mxu0 %vm1142_vm4, %v6158_v44 }
 0x65a   :  { %2852 = vmatmul.mubr.f32.gmra.mxu0 %v6157_v32 }
 0x65b   :  { %6169 = vmatprep.mubr.msk.f32.mxu0 %vm1142_vm4, %v6160_v47 }
 0x65e   :  { %2857 = vmatmul.mubr.f32.gmra.mxu0 %v6159_v16 }
 0x65f   :  { %6170 = vmatprep.mubr.msk.f32.mxu0 %vm1142_vm4, %v6162_v51 }
 0x662   :  { %2862 = vmatmul.mubr.f32.gmra.mxu0 %v6161_v37 }
 0x663   :  { %7003 = vmatprep.mubr.msk.f32.mxu0 %vm7484_vm1, %v11976_v45 }
 0x6d8   :  { %v2690_v57 = vpop.f32.mrf.mxu0 }
 0x6d9   :  { %v9972_v14 = vadd.f32 %v2690_v57, %v9814_v52 }
 0x6da   :  { %v6947_v12 = vpop.f32.mrf.mxu0 }
 0x6dc   :  { %v2695_v27 = vpop.f32.mrf.mxu0 }
 0x6dd   :  { %v9975_v20 = vadd.f32 %v2695_v27, %v9817_v34 }
 0x6de   :  { %v6950_v58 = vpop.f32.mrf.mxu0 }
 0x6e0   :  { %v2700_v62 = vpop.f32.mrf.mxu0 }
 0x6e1   :  { %v9978_v21 = vadd.f32 %v2700_v62, %v9820_v60 }
 0x6e2   :  { %v6953_v31 = vpop.f32.mrf.mxu0 }
 0x6e3   :  { %v6183_v31 = vld [vmem:[%s11905_s5 + $0x318] sm:$0xff] }
 0x6e4   :  { %v2705_v36 = vpop.f32.mrf.mxu0 }
 0x6e5   :  { %v9981_v18 = vadd.f32 %v2705_v36, %v9823_v1 }
 0x6e6   :  { %v6956_v44 = vpop.f32.mrf.mxu0 }
 0x6e8   :  { %v2710_v32 = vpop.f32.mrf.mxu0 }
 0x6e9   :  { %v9984_v52 = vadd.f32 %v2710_v32, %v9826_v7  ;;  %v6182_v32 = vld [vmem:[%s11905_s5 + $0x310] sm:$0xff] }
 0x6ea   :  { %v6959_v47 = vpop.f32.mrf.mxu0 }
 0x6eb   :  { %v6185_v47 = vld [vmem:[%s11905_s5 + $0x328] sm:$0xff] }
 0x6ec   :  { %v2715_v16 = vpop.f32.mrf.mxu0 }
 0x6ed   :  { %v9987_v34 = vadd.f32 %v2715_v16, %v9829_v50  ;;  %v6184_v16 = vld [vmem:[%s11905_s5 + $0x320] sm:$0xff] }
 0x6ee   :  { %v6962_v51 = vpop.f32.mrf.mxu0 }
 0x6ef   :  { %v6187_v51 = vld [vmem:[%s11905_s5 + $0x338] sm:$0xff] }
 0x6f0   :  { %v2720_v37 = vpop.f32.mrf.mxu0 }
 0x6f1   :  { %v9990_v60 = vadd.f32 %v2720_v37, %v9832_v28  ;;  %v6186_v37 = vld [vmem:[%s11905_s5 + $0x330] sm:$0xff] }
 0x6f2   :  { %v6965_v4 = vpop.f32.mrf.mxu0 }
 0x6f3   :  { %v6189_v4 = vld [vmem:[%s11905_s5 + $0x348] sm:$0xff] }
 0x70a   :  { %v2833_v48 = vpop.f32.mrf.mxu0 }
 0x70b   :  { %6975 = vmatmul.mubr.msk.f32.vlgmr.msra.gmra.mxu1 %vm559_vm3, %v2833_v48  ;;  %v6188_v48 = vld [vmem:[%s11905_s5 + $0x340] sm:$0xff] }
 0x70c   :  { %3037 = vmatpush1.msra.mxu1 %v8693_v49  ;;  %v2835_v1 = vpop.f32.mrf.mxu0  ;;  %6977 = vmatprep.mubr.msk.f32.mxu1 %vm7484_vm1, %v11976_v45 }
 0x70d   :  { %3038 = vmatprep.subr.mxu1 %v11976_v45  ;;  %v6191_v1 = vld [vmem:[%s11905_s5 + $0x358] sm:$0xff] }
 0x70e   :  { %3039 = vmatpush1.msra.mxu1 %v8718_v39  ;;  %v2838_v7 = vpop.f32.mrf.mxu0 }
 0x70f   :  { %3040 = vmatprep.subr.mxu1 %v11976_v45  ;;  %6978 = vmatmul.mubr.msk.f32.gmra.mxu1 %vm559_vm3, %v2838_v7  ;;  %v6190_v7 = vld [vmem:[%s11905_s5 + $0x350] sm:$0xff] }
 0x710   :  { %3041 = vmatpush1.msra.mxu1 %v8715_v5  ;;  %v2840_v50 = vpop.f32.mrf.mxu0  ;;  %6980 = vmatprep.mubr.msk.f32.mxu1 %vm7484_vm1, %v11976_v45 }
 0x711   :  { %3042 = vmatprep.subr.mxu1 %v11976_v45  ;;  %v6193_v50 = vld [vmem:[%s11905_s5 + $0x368] sm:$0xff] }
 0x712   :  { %3043 = vmatpush1.msra.mxu1 %v8704_v53  ;;  %v2843_v28 = vpop.f32.mrf.mxu0 }
 0x713   :  { %3044 = vmatprep.subr.mxu1 %v11976_v45  ;;  %6981 = vmatmul.mubr.msk.f32.gmra.mxu1 %vm559_vm3, %v2843_v28  ;;  %v6192_v28 = vld [vmem:[%s11905_s5 + $0x360] sm:$0xff] }
 0x714   :  { %3045 = vmatpush1.msra.mxu1 %v8691_v8  ;;  %v2845_v59 = vpop.f32.mrf.mxu0  ;;  %6983 = vmatprep.mubr.msk.f32.mxu1 %vm7484_vm1, %v11976_v45 }
 0x715   :  { %3046 = vmatprep.subr.mxu1 %v11976_v45  ;;  %v6195_v59 = vld [vmem:[%s11905_s5 + $0x378] sm:$0x1] }
 0x716   :  { %3047 = vmatpush1.msra.mxu1 %v8683_v40  ;;  %v2848_v61 = vpop.f32.mrf.mxu0 }
 0x717   :  { %3048 = vmatprep.subr.mxu1 %v11976_v45  ;;  %6984 = vmatmul.mubr.msk.f32.gmra.mxu1 %vm559_vm3, %v2848_v61  ;;  %v6194_v61 = vld [vmem:[%s11905_s5 + $0x370] sm:$0x1] }
 0x718   :  { %3049 = vmatpush1.msra.mxu1 %v8672_v19  ;;  %v2850_v57 = vpop.f32.mrf.mxu0  ;;  %6986 = vmatprep.mubr.msk.f32.mxu1 %vm7484_vm1, %v11976_v45 }
 0x719   :  { %3050 = vmatprep.subr.mxu1 %v11976_v45  ;;  %v6207_v57 = vld [vmem:[%s11908_s6 + $0xf8] sm:$0xff] }
 0x71a   :  { %3051 = vmatpush1.msra.mxu1 %v11997_v11  ;;  %v2853_v12 = vpop.f32.mrf.mxu0  ;;  %6996 = vmatpush3.msra.mxu0 %v6207_v57 }
 0x71b   :  { %3052 = vmatprep.subr.mxu1 %v11976_v45  ;;  %6987 = vmatmul.mubr.msk.f32.gmra.mxu1 %vm559_vm3, %v2853_v12  ;;  %v6206_v12 = vld [vmem:[%s11908_s6 + $0xf0] sm:$0xff] }
 0x71c   :  { %3053 = vmatpush1.msra.mxu1 %v8878_v29  ;;  %v2855_v27 = vpop.f32.mrf.mxu0  ;;  %6989 = vmatprep.mubr.msk.f32.mxu1 %vm7484_vm1, %v11976_v45 }
 0x71d   :  { %3054 = vmatprep.subr.mxu1 %v11976_v45  ;;  %6997 = vmatprep.subr.mxu0 %v11976_v45  ;;  %v6205_v27 = vld [vmem:[%s11908_s6 + $0xe8] sm:$0xff] }
 0x71e   :  { %3055 = vmatpush1.msra.mxu1 %v8897_v25  ;;  %v2858_v58 = vpop.f32.mrf.mxu0  ;;  %6998 = vmatpush3.msra.mxu0 %v6206_v12 }
 0x71f   :  { %3056 = vmatprep.subr.mxu1 %v11976_v45  ;;  %6990 = vmatmul.mubr.msk.f32.gmra.mxu1 %vm559_vm3, %v2858_v58  ;;  %v6204_v58 = vld [vmem:[%s11908_s6 + $0xe0] sm:$0xff] }
 0x720   :  { %3057 = vmatpush1.msra.mxu1 %v8909_v17  ;;  %v2860_v62 = vpop.f32.mrf.mxu0  ;;  %6992 = vmatprep.mubr.msk.f32.mxu1 %vm7484_vm1, %v11976_v45 }
 0x721   :  { %3058 = vmatprep.subr.mxu1 %v11976_v45  ;;  %6999 = vmatprep.subr.mxu0 %v11976_v45 }
 0x722   :  { %3059 = vmatpush1.msra.mxu1 %v8921_v56  ;;  %v2863_v36 = vpop.f32.mrf.mxu0  ;;  %7000 = vmatpush3.msra.mxu0 %v6205_v27  ;;  %v12013_v27 = vld [vmem:[#allocation13_spill] sm:$0xff] }
 0x723   :  { %3060 = vmatprep.subr.mxu1 %v11976_v45  ;;  %6993 = vmatmul.mubr.msk.f32.gmra.mxu1 %vm559_vm3, %v2863_v36 }
 0x724   :  { %3061 = vmatpush1.msra.mxu1 %v8932_v23  ;;  %6197 = vmatprep.mubr.msk.f32.mxu1 %vm1142_vm4, %v6183_v31  ;;  %v2865_v44 = vpop.f32.mrf.mxu0 }
 0x725   :  { %3062 = vmatprep.subr.mxu1 %v11976_v45  ;;  %7001 = vmatprep.subr.mxu0 %v11976_v45 }
 0x726   :  { %3063 = vmatpush1.msra.mxu1 %v8943_v55  ;;  %7002 = vmatpush3.msra.mxu0 %v6204_v58  ;;  %v1078_v58 = vmul.f32 0.2, %v12013_v27 }
 0x727   :  { %3064 = vmatprep.subr.mxu1 %v11976_v45  ;;  %3305 = vmatprep.subr.mxu0 %v11976_v45 }
 0x728   :  { %3065 = vmatpush1.msra.mxu1 %v8952_v63 }
 0x729   :  { %3066 = vmatprep.subr.mxu1 %v11976_v45 }
 0x72a   :  { %3067 = vmatpush1.msra.mxu1 %v8960_v24 }
 0x72b   :  { %3082 = vmatprep.subr.mxu1 %v11976_v45 }
 0x72c   :  { %6196 = vmatpush2.msk.msra.mxu1 %vm1164_vm5, %v8968_v46 }
 0x72d   :  { %3084 = vmatprep.subr.mxu1 %v11976_v45 }
 0x72e   :  { %3085 = vmatpush2.msra.mxu1 %v8977_v22 }
 0x72f   :  { %3086 = vmatprep.subr.mxu1 %v11976_v45 }
 0x730   :  { %3087 = vmatpush2.msra.mxu1 %v8988_v10 }
 0x731   :  { %3088 = vmatprep.subr.mxu1 %v11976_v45 }
 0x732   :  { %3089 = vmatpush2.msra.mxu1 %v8995_v41 }
 0x733   :  { %3090 = vmatprep.subr.mxu1 %v11976_v45 }
 0x734   :  { %3091 = vmatpush2.msra.mxu1 %v9002_v33 }
 0x735   :  { %3092 = vmatprep.subr.mxu1 %v11976_v45 }
 0x736   :  { %3093 = vmatpush2.msra.mxu1 %v9008_v43 }
 0x737   :  { %3094 = vmatprep.subr.mxu1 %v11976_v45 }
 0x738   :  { %3095 = vmatpush2.msra.mxu1 %v9014_v9 }
 0x739   :  { %3096 = vmatprep.subr.mxu1 %v11976_v45 }
 0x73a   :  { %3097 = vmatpush2.msra.mxu1 %v9020_v13 }
 0x73b   :  { %3098 = vmatprep.subr.mxu1 %v11976_v45 }
 0x73c   :  { %3099 = vmatpush2.msra.mxu1 %v9026_v15 }
 0x73d   :  { %3101 = vmatmul.mubr.f32.vlgmr.msra.gmra.mxu1 %v6182_v32  ;;  %7024 = vmatprep.subr.mxu1 %v11976_v45 }
 0x73e   :  { %6198 = vmatprep.mubr.msk.f32.mxu1 %vm1142_vm4, %v6185_v47 }
 0x741   :  { %3106 = vmatmul.mubr.f32.gmra.mxu1 %v6184_v16 }
 0x742   :  { %6199 = vmatprep.mubr.msk.f32.mxu1 %vm1142_vm4, %v6187_v51 }
 0x745   :  { %3111 = vmatmul.mubr.f32.gmra.mxu1 %v6186_v37 }
 0x746   :  { %6200 = vmatprep.mubr.msk.f32.mxu1 %vm1142_vm4, %v6189_v4 }
 0x749   :  { %3116 = vmatmul.mubr.f32.gmra.mxu1 %v6188_v48 }
 0x74a   :  { %6201 = vmatprep.mubr.msk.f32.mxu1 %vm1142_vm4, %v6191_v1 }
 0x74d   :  { %3121 = vmatmul.mubr.f32.gmra.mxu1 %v6190_v7 }
 0x74e   :  { %6202 = vmatprep.mubr.msk.f32.mxu1 %vm1142_vm4, %v6193_v50 }
 0x751   :  { %3126 = vmatmul.mubr.f32.gmra.mxu1 %v6192_v28 }
 0x752   :  { %6203 = vmatprep.mubr.msk.f32.mxu1 %vm1142_vm4, %v6195_v59 }
 0x755   :  { %3131 = vmatmul.mubr.f32.gmra.mxu1 %v6194_v61 }
 0x756   :  { %7032 = vmatprep.mubr.msk.f32.mxu1 %vm7484_vm1, %v11976_v45 }
 0x7cb   :  { %v2959_v62 = vpop.f32.mrf.mxu1 }
 0x7cc   :  { %v10130_v31 = vadd.f32 %v2959_v62, %v9972_v14  ;;  %v12014_v62 = vld [vmem:[#allocation27_spill] sm:$0xff] }
 0x7cd   :  { %v6976_v36 = vpop.f32.mrf.mxu1 }
 0x7ce   :  { %v12015_v36 = vld [vmem:[#allocation26_spill] sm:$0xff] }
 0x7cf   :  { %v2964_v44 = vpop.f32.mrf.mxu1 }
 0x7d0   :  { %v10133_v32 = vadd.f32 %v2964_v44, %v9975_v20  ;;  %v7320_v44 = vld [vmem:[%s11905_s5 + $0x78] sm:$0xff] }
 0x7d1   :  { %v6979_v47 = vpop.f32.mrf.mxu1 }
 0x7d2   :  { %v1127_v47 = vmax.f32 %v12013_v27, %v1078_v58 }
 0x7d3   :  { %v2969_v16 = vpop.f32.mrf.mxu1 }
 0x7d4   :  { %v10136_v51 = vadd.f32 %v2969_v16, %v9978_v21  ;;  %v3562_v16 = vrot.slane %v8968_v46, 4 }
 0x7d5   :  { %v6982_v37 = vpop.f32.mrf.mxu1 }
 0x7d6   :  { %v12016_v37 = vld [vmem:[#allocation25_spill] sm:$0xff] }
 0x7d7   :  { %v2974_v4 = vpop.f32.mrf.mxu1 }
 0x7d8   :  { %v10139_v48 = vadd.f32 %v2974_v4, %v9981_v18  ;;  %v12017_v4 = vld [vmem:[#allocation24_spill] sm:$0xff] }
 0x7d9   :  { %v6985_v1 = vpop.f32.mrf.mxu1 }
 0x7da   :  { %v10305_v1 = vrot.slane %v1127_v47, 4 }
 0x7db   :  { %v2979_v7 = vpop.f32.mrf.mxu1 }
 0x7dc   :  { %v10142_v14 = vadd.f32 %v2979_v7, %v9984_v52  ;;  %v12018_v7 = vld [vmem:[#allocation22_spill] sm:$0xff] }
 0x7dd   :  { %v6988_v50 = vpop.f32.mrf.mxu1 }
 0x7de   :  { %v10309_v50 = vsel %vm1164_vm5, %v3562_v16, %v12018_v7 }
 0x7df   :  { %v2984_v28 = vpop.f32.mrf.mxu1 }
 0x7e0   :  { %v10145_v20 = vadd.f32 %v2984_v28, %v9987_v34 }
 0x7e1   :  { %v6991_v59 = vpop.f32.mrf.mxu1 }
 0x7e2   :  { %v12020_v59 = vld [vmem:[#allocation35_spill] sm:$0xff] }
 0x7e3   :  { %v2989_v61 = vpop.f32.mrf.mxu1 }
 0x7e4   :  { %v10148_v21 = vadd.f32 %v2989_v61, %v9990_v60  ;;  %v6227_v60 = vld [vmem:[%s11905_s5 + $0x3e0] sm:$0x1] }
 0x7e5   :  { %v6994_v57 = vpop.f32.mrf.mxu1  ;;  %v12021_v61 = vld [vmem:[#allocation34_spill] sm:$0xff] }
 0x7e6   :  { %v6240_v57 = vld [vmem:[%s11908_s6 + $0x118] sm:$0xff] }
 0x7e7   :  { %7025 = vmatpush3.msra.mxu1 %v6240_v57 }
 0x7e8   :  { %7026 = vmatprep.subr.mxu1 %v11976_v45 }
 0x7fd   :  { %v3102_v12 = vpop.f32.mrf.mxu1 }
 0x7fe   :  { %7004 = vmatmul.mubr.msk.f32.vlgmr.msra.gmra.mxu0 %vm559_vm3, %v3102_v12  ;;  %v6239_v12 = vld [vmem:[%s11908_s6 + $0x110] sm:$0xff] }
 0x7ff   :  { %3306 = vmatpush1.msra.mxu0 %v8693_v49  ;;  %v3104_v18 = vpop.f32.mrf.mxu1  ;;  %7006 = vmatprep.mubr.msk.f32.mxu0 %vm7484_vm1, %v11976_v45 }
 0x800   :  { %3307 = vmatprep.subr.mxu0 %v11976_v45  ;;  %v12022_v18 = vld [vmem:[#allocation33_spill] sm:$0xff]  ;;  %7027 = vmatpush3.msra.mxu1 %v6239_v12 }
 0x801   :  { %3308 = vmatpush1.msra.mxu0 %v8718_v39  ;;  %v3107_v52 = vpop.f32.mrf.mxu1  ;;  %7028 = vmatprep.subr.mxu1 %v11976_v45 }
 0x802   :  { %3309 = vmatprep.subr.mxu0 %v11976_v45  ;;  %7007 = vmatmul.mubr.msk.f32.gmra.mxu0 %vm559_vm3, %v3107_v52  ;;  %v6238_v52 = vld [vmem:[%s11908_s6 + $0x108] sm:$0xff] }
 0x803   :  { %3310 = vmatpush1.msra.mxu0 %v8715_v5  ;;  %v3109_v34 = vpop.f32.mrf.mxu1  ;;  %7009 = vmatprep.mubr.msk.f32.mxu0 %vm7484_vm1, %v11976_v45 }
 0x804   :  { %3311 = vmatprep.subr.mxu0 %v11976_v45  ;;  %v12023_v34 = vld [vmem:[#allocation32_spill] sm:$0xff]  ;;  %7029 = vmatpush3.msra.mxu1 %v6238_v52 }
 0x805   :  { %3312 = vmatpush1.msra.mxu0 %v8704_v53  ;;  %v3112_v49 = vpop.f32.mrf.mxu1  ;;  %7030 = vmatprep.subr.mxu1 %v11976_v45 }
 0x806   :  { %3313 = vmatprep.subr.mxu0 %v11976_v45  ;;  %7010 = vmatmul.mubr.msk.f32.gmra.mxu0 %vm559_vm3, %v3112_v49  ;;  %v6237_v49 = vld [vmem:[%s11908_s6 + $0x100] sm:$0xff] }
 0x807   :  { %3314 = vmatpush1.msra.mxu0 %v8691_v8  ;;  %v3114_v39 = vpop.f32.mrf.mxu1  ;;  %7012 = vmatprep.mubr.msk.f32.mxu0 %vm7484_vm1, %v11976_v45 }
 0x808   :  { %3315 = vmatprep.subr.mxu0 %v11976_v45  ;;  %v12024_v39 = vld [vmem:[#allocation31_spill] sm:$0xff]  ;;  %7031 = vmatpush3.msra.mxu1 %v6237_v49 }
 0x809   :  { %3316 = vmatpush1.msra.mxu0 %v8683_v40  ;;  %v3117_v5 = vpop.f32.mrf.mxu1  ;;  %3637 = vmatprep.subr.mxu1 %v11976_v45 }
 0x80a   :  { %3317 = vmatprep.subr.mxu0 %v11976_v45  ;;  %7013 = vmatmul.mubr.msk.f32.gmra.mxu0 %vm559_vm3, %v3117_v5  ;;  %v12025_v5 = vld [vmem:[#allocation30_spill] sm:$0xff] }
 0x80b   :  { %3318 = vmatpush1.msra.mxu0 %v8672_v19  ;;  %v3119_v53 = vpop.f32.mrf.mxu1  ;;  %7015 = vmatprep.mubr.msk.f32.mxu0 %vm7484_vm1, %v11976_v45 }
 0x80c   :  { %3319 = vmatprep.subr.mxu0 %v11976_v45  ;;  %v12026_v53 = vld [vmem:[#allocation29_spill] sm:$0xff] }
 0x80d   :  { %3320 = vmatpush1.msra.mxu0 %v11997_v11  ;;  %v3122_v8 = vpop.f32.mrf.mxu1 }
 0x80e   :  { %3321 = vmatprep.subr.mxu0 %v11976_v45  ;;  %7016 = vmatmul.mubr.msk.f32.gmra.mxu0 %vm559_vm3, %v3122_v8  ;;  %v7321_v8 = vld [vmem:[%s11905_s5 + $0x70] sm:$0xff] }
 0x80f   :  { %3322 = vmatpush1.msra.mxu0 %v8878_v29  ;;  %v3124_v40 = vpop.f32.mrf.mxu1  ;;  %7018 = vmatprep.mubr.msk.f32.mxu0 %vm7484_vm1, %v11976_v45  ;;  %v6216_v29 = vld [vmem:[%s11905_s5 + $0x388] sm:$0xff] }
 0x810   :  { %3323 = vmatprep.subr.mxu0 %v11976_v45  ;;  %v7322_v40 = vld [vmem:[%s11905_s5 + $0x88] sm:$0xff] }
 0x811   :  { %3324 = vmatpush1.msra.mxu0 %v8897_v25  ;;  %v3127_v19 = vpop.f32.mrf.mxu1 }
 0x812   :  { %3325 = vmatprep.subr.mxu0 %v11976_v45  ;;  %7019 = vmatmul.mubr.msk.f32.gmra.mxu0 %vm559_vm3, %v3127_v19  ;;  %v7323_v19 = vld [vmem:[%s11908_s6 + $0x18] sm:$0xff] }
 0x813   :  { %3326 = vmatpush1.msra.mxu0 %v8909_v17  ;;  %v3129_v11 = vpop.f32.mrf.mxu1  ;;  %7021 = vmatprep.mubr.msk.f32.mxu0 %vm7484_vm1, %v11976_v45 }
 0x814   :  { %3327 = vmatprep.subr.mxu0 %v11976_v45  ;;  %v7324_v11 = vld [vmem:[%s11908_s6 + $0x10] sm:$0xff] }
 0x815   :  { %3328 = vmatpush1.msra.mxu0 %v8921_v56  ;;  %v3132_v25 = vpop.f32.mrf.mxu1  ;;  %v6215_v56 = vld [vmem:[%s11905_s5 + $0x380] sm:$0xff] }
 0x816   :  { %3329 = vmatprep.subr.mxu0 %v11976_v45  ;;  %7022 = vmatmul.mubr.msk.f32.gmra.mxu0 %vm559_vm3, %v3132_v25  ;;  %v7326_v25 = vld [vmem:[%s11905_s5 + $0x98] sm:$0xff] }
 0x817   :  { %3330 = vmatpush1.msra.mxu0 %v8932_v23  ;;  %6230 = vmatprep.mubr.msk.f32.mxu0 %vm1142_vm4, %v6216_v29  ;;  %v3134_v17 = vpop.f32.mrf.mxu1  ;;  %v6218_v23 = vld [vmem:[%s11905_s5 + $0x398] sm:$0xff]  ;;  %v7325_v29 = vld [vmem:[%s11905_s5 + $0x80] sm:$0xff] }
 0x818   :  { %3331 = vmatprep.subr.mxu0 %v11976_v45  ;;  %v7327_v17 = vld [vmem:[%s11908_s6 + $0x8] sm:$0xff] }
 0x819   :  { %3332 = vmatpush1.msra.mxu0 %v8943_v55  ;;  %v6217_v55 = vld [vmem:[%s11905_s5 + $0x390] sm:$0xff] }
 0x81a   :  { %3333 = vmatprep.subr.mxu0 %v11976_v45 }
 0x81b   :  { %3334 = vmatpush1.msra.mxu0 %v8952_v63  ;;  %v6220_v63 = vld [vmem:[%s11905_s5 + $0x3a8] sm:$0xff] }
 0x81c   :  { %3335 = vmatprep.subr.mxu0 %v11976_v45 }
 0x81d   :  { %3336 = vmatpush1.msra.mxu0 %v8960_v24  ;;  %v6219_v24 = vld [vmem:[%s11905_s5 + $0x3a0] sm:$0xff] }
 0x81e   :  { %3351 = vmatprep.subr.mxu0 %v11976_v45 }
 0x81f   :  { %6229 = vmatpush2.msk.msra.mxu0 %vm1164_vm5, %v8968_v46  ;;  %v12019_v46 = vld [vmem:[#allocation23_spill] sm:$0xff] }
 0x820   :  { %3353 = vmatprep.subr.mxu0 %v11976_v45  ;;  %v10320_v28 = vsel %vm1164_vm5, %v12019_v46, %v10305_v1 }
 0x821   :  { %3354 = vmatpush2.msra.mxu0 %v8977_v22  ;;  %v6222_v22 = vld [vmem:[%s11905_s5 + $0x3b8] sm:$0xff] }
 0x822   :  { %3355 = vmatprep.subr.mxu0 %v11976_v45 }
 0x823   :  { %3356 = vmatpush2.msra.mxu0 %v8988_v10  ;;  %v6221_v10 = vld [vmem:[%s11905_s5 + $0x3b0] sm:$0xff] }
 0x824   :  { %3357 = vmatprep.subr.mxu0 %v11976_v45 }
 0x825   :  { %3358 = vmatpush2.msra.mxu0 %v8995_v41  ;;  %v6224_v41 = vld [vmem:[%s11905_s5 + $0x3c8] sm:$0xff] }
 0x826   :  { %3359 = vmatprep.subr.mxu0 %v11976_v45 }
 0x827   :  { %3360 = vmatpush2.msra.mxu0 %v9002_v33  ;;  %v6223_v33 = vld [vmem:[%s11905_s5 + $0x3c0] sm:$0xff] }
 0x828   :  { %3361 = vmatprep.subr.mxu0 %v11976_v45 }
 0x829   :  { %3362 = vmatpush2.msra.mxu0 %v9008_v43  ;;  %v6226_v43 = vld [vmem:[%s11905_s5 + $0x3d8] sm:$0xff] }
 0x82a   :  { %3363 = vmatprep.subr.mxu0 %v11976_v45 }
 0x82b   :  { %3364 = vmatpush2.msra.mxu0 %v9014_v9  ;;  %v6225_v9 = vld [vmem:[%s11905_s5 + $0x3d0] sm:$0xff] }
 0x82c   :  { %3365 = vmatprep.subr.mxu0 %v11976_v45 }
 0x82d   :  { %3366 = vmatpush2.msra.mxu0 %v9020_v13  ;;  %v6228_v13 = vld [vmem:[%s11905_s5 + $0x3e8] sm:$0x1] }
 0x82e   :  { %3367 = vmatprep.subr.mxu0 %v11976_v45 }
 0x82f   :  { %3368 = vmatpush2.msra.mxu0 %v9026_v15  ;;  %v12012_v15 = vld [vmem:[#allocation28_spill] sm:$0xff] }
 0x830   :  { %3370 = vmatmul.mubr.f32.vlgmr.msra.gmra.mxu0 %v6215_v56  ;;  %3737 = vmatprep.subr.mxu0 %v11976_v45  ;;  %v7328_v56 = vld [vmem:[%s11908_s6] sm:$0xff] }
 0x831   :  { %3738 = vmatpush1.msra.mxu0 %v8839_v30  ;;  %6231 = vmatprep.mubr.msk.f32.mxu0 %vm1142_vm4, %v6218_v23  ;;  %v7329_v23 = vld [vmem:[%s11905_s5 + $0x90] sm:$0xff] }
 0x832   :  { %3739 = vmatprep.subr.mxu0 %v11976_v45 }
 0x833   :  { %3740 = vmatpush1.msra.mxu0 %v8836_v0 }
 0x834   :  { %3375 = vmatmul.mubr.f32.gmra.mxu0 %v6217_v55  ;;  %3741 = vmatprep.subr.mxu0 %v11976_v45  ;;  %v7330_v55 = vld [vmem:[%s11905_s5 + $0xa8] sm:$0xff] }
 0x835   :  { %3742 = vmatpush1.msra.mxu0 %v8833_v38  ;;  %6232 = vmatprep.mubr.msk.f32.mxu0 %vm1142_vm4, %v6220_v63  ;;  %v7331_v63 = vld [vmem:[%s11905_s5 + $0xa0] sm:$0xff] }
 0x836   :  { %3743 = vmatprep.subr.mxu0 %v11976_v45 }
 0x837   :  { %3744 = vmatpush1.msra.mxu0 %v8829_v26 }
 0x838   :  { %3380 = vmatmul.mubr.f32.gmra.mxu0 %v6219_v24  ;;  %3745 = vmatprep.subr.mxu0 %v11976_v45  ;;  %v7332_v24 = vld [vmem:[%s11905_s5 + $0xb8] sm:$0xff] }
 0x839   :  { %3746 = vmatpush1.msra.mxu0 %v8826_v54  ;;  %6233 = vmatprep.mubr.msk.f32.mxu0 %vm1142_vm4, %v6222_v22  ;;  %v7333_v22 = vld [vmem:[%s11905_s5 + $0xb0] sm:$0xff] }
 0x83a   :  { %3747 = vmatprep.subr.mxu0 %v11976_v45 }
 0x83b   :  { %3748 = vmatpush1.msra.mxu0 %v8823_v42 }
 0x83c   :  { %3385 = vmatmul.mubr.f32.gmra.mxu0 %v6221_v10  ;;  %3749 = vmatprep.subr.mxu0 %v11976_v45  ;;  %v7334_v10 = vld [vmem:[%s11905_s5 + $0xc8] sm:$0xff] }
 0x83d   :  { %3750 = vmatpush1.msra.mxu0 %v8820_v35  ;;  %6234 = vmatprep.mubr.msk.f32.mxu0 %vm1142_vm4, %v6224_v41  ;;  %v7335_v41 = vld [vmem:[%s11905_s5 + $0xc0] sm:$0xff] }
 0x83e   :  { %3751 = vmatprep.subr.mxu0 %v11976_v45 }
 0x83f   :  { %3752 = vmatpush1.msra.mxu0 %v8816_v6 }
 0x840   :  { %3390 = vmatmul.mubr.f32.gmra.mxu0 %v6223_v33  ;;  %3753 = vmatprep.subr.mxu0 %v11976_v45  ;;  %v7336_v33 = vld [vmem:[%s11905_s5 + $0xd8] sm:$0x1] }
 0x841   :  { %3754 = vmatpush1.msra.mxu0 %v8813_v3  ;;  %6235 = vmatprep.mubr.msk.f32.mxu0 %vm1142_vm4, %v6226_v43  ;;  %v7337_v43 = vld [vmem:[%s11905_s5 + $0xd0] sm:$0x1] }
 0x842   :  { %3755 = vmatprep.subr.mxu0 %v11976_v45 }
 0x843   :  { %3756 = vmatpush1.msra.mxu0 %v8810_v2 }
 0x844   :  { %3395 = vmatmul.mubr.f32.gmra.mxu0 %v6225_v9  ;;  %3757 = vmatprep.subr.mxu0 %v11976_v45 }
 0x845   :  { %3758 = vmatpush1.msra.mxu0 %v12012_v15  ;;  %6236 = vmatprep.mubr.msk.f32.mxu0 %vm1142_vm4, %v6228_v13 }
 0x846   :  { %3759 = vmatprep.subr.mxu0 %v11976_v45 }
 0x847   :  { %3760 = vmatpush1.msra.mxu0 %v12014_v62 }
 0x848   :  { %3400 = vmatmul.mubr.f32.gmra.mxu0 %v6227_v60  ;;  %3761 = vmatprep.subr.mxu0 %v11976_v45 }
 0x849   :  { %3762 = vmatpush1.msra.mxu0 %v12015_v36  ;;  %6257 = vmatprep.mubr.msk.f32.mxu0 %vm1142_vm4, %v7320_v44 }
 0x84a   :  { %3763 = vmatprep.subr.mxu0 %v11976_v45 }
 0x84b   :  { %3764 = vmatpush1.msra.mxu0 %v12016_v37 }
 0x84c   :  { %3765 = vmatprep.subr.mxu0 %v11976_v45 }
 0x84d   :  { %3766 = vmatpush1.msra.mxu0 %v12017_v4 }
 0x84e   :  { %3767 = vmatprep.subr.mxu0 %v11976_v45 }
 0x84f   :  { %3768 = vmatpush1.msra.mxu0 %v10309_v50 }
 0x850   :  { %3783 = vmatprep.subr.mxu0 %v11976_v45 }
 0x851   :  { %6256 = vmatpush2.msk.msra.mxu0 %vm1164_vm5, %v10305_v1 }
 0x852   :  { %3785 = vmatprep.subr.mxu0 %v11976_v45 }
 0x853   :  { %3786 = vmatpush2.msra.mxu0 %v10320_v28 }
 0x854   :  { %3787 = vmatprep.subr.mxu0 %v11976_v45 }
 0x855   :  { %3788 = vmatpush2.msra.mxu0 %v12020_v59 }
 0x856   :  { %3789 = vmatprep.subr.mxu0 %v11976_v45 }
 0x857   :  { %3790 = vmatpush2.msra.mxu0 %v12021_v61 }
 0x858   :  { %3791 = vmatprep.subr.mxu0 %v11976_v45 }
 0x859   :  { %3792 = vmatpush2.msra.mxu0 %v12022_v18 }
 0x85a   :  { %3793 = vmatprep.subr.mxu0 %v11976_v45 }
 0x85b   :  { %3794 = vmatpush2.msra.mxu0 %v12023_v34 }
 0x85c   :  { %3795 = vmatprep.subr.mxu0 %v11976_v45 }
 0x85d   :  { %3796 = vmatpush2.msra.mxu0 %v12024_v39 }
 0x85e   :  { %3797 = vmatprep.subr.mxu0 %v11976_v45 }
 0x85f   :  { %3798 = vmatpush2.msra.mxu0 %v12025_v5 }
 0x860   :  { %3799 = vmatprep.subr.mxu0 %v11976_v45 }
 0x861   :  { %3800 = vmatpush2.msra.mxu0 %v12026_v53 }
 0x862   :  { %3802 = vmatmul.mubr.f32.vlgmr.msra.gmra.mxu0 %v7321_v8  ;;  %7082 = vmatprep.subr.mxu0 %v11976_v45 }
 0x863   :  { %6258 = vmatprep.mubr.msk.f32.mxu0 %vm1142_vm4, %v7322_v40  ;;  %7083 = vmatpush3.msra.mxu0 %v7323_v19 }
 0x864   :  { %7084 = vmatprep.subr.mxu0 %v11976_v45 }
 0x865   :  { %7085 = vmatpush3.msra.mxu0 %v7324_v11 }
 0x866   :  { %3807 = vmatmul.mubr.f32.gmra.mxu0 %v7325_v29  ;;  %7086 = vmatprep.subr.mxu0 %v11976_v45 }
 0x867   :  { %6259 = vmatprep.mubr.msk.f32.mxu0 %vm1142_vm4, %v7326_v25  ;;  %7087 = vmatpush3.msra.mxu0 %v7327_v17 }
 0x868   :  { %7088 = vmatprep.subr.mxu0 %v11976_v45 }
 0x869   :  { %7089 = vmatpush3.msra.mxu0 %v7328_v56 }
 0x86a   :  { %3812 = vmatmul.mubr.f32.gmra.mxu0 %v7329_v23  ;;  %7111 = vmatprep.subr.mxu0 %v11976_v45 }
 0x86b   :  { %6260 = vmatprep.mubr.msk.f32.mxu0 %vm1142_vm4, %v7330_v55 }
 0x86e   :  { %3817 = vmatmul.mubr.f32.gmra.mxu0 %v7331_v63 }
 0x86f   :  { %6261 = vmatprep.mubr.msk.f32.mxu0 %vm1142_vm4, %v7332_v24 }
 0x872   :  { %3822 = vmatmul.mubr.f32.gmra.mxu0 %v7333_v22 }
 0x873   :  { %6262 = vmatprep.mubr.msk.f32.mxu0 %vm1142_vm4, %v7334_v10  ;;  %v7338_v10 = vld [vmem:[%s11905_s5 + $0x8] sm:$0xff] }
 0x876   :  { %3827 = vmatmul.mubr.f32.gmra.mxu0 %v7335_v41 }
 0x877   :  { %6263 = vmatprep.mubr.msk.f32.mxu0 %vm1142_vm4, %v7336_v33 }
 0x87a   :  { %3832 = vmatmul.mubr.f32.gmra.mxu0 %v7337_v43  ;;  %v7339_v43 = vld [vmem:[%s11905_s5] sm:$0xff] }
 0x87b   :  { %7090 = vmatprep.mubr.msk.f32.mxu0 %vm7484_vm1, %v11976_v45 }
 0x8be   :  { %v3228_v9 = vpop.f32.mrf.mxu0 }
 0x8bf   :  { %v10418_v13 = vadd.f32 %v3228_v9, %v10130_v31  ;;  %v7340_v9 = vld [vmem:[%s11905_s5 + $0x18] sm:$0xff] }
 0x8c0   :  { %v7005_v60 = vpop.f32.mrf.mxu0 }
 0x8c1   :  { %v7341_v60 = vld [vmem:[%s11908_s6 + $0x38] sm:$0xff] }
 0x8c2   :  { %v3233_v27 = vpop.f32.mrf.mxu0 }
 0x8c3   :  { %v10421_v58 = vadd.f32 %v3233_v27, %v10133_v32 }
 0x8c4   :  { %v7008_v44 = vpop.f32.mrf.mxu0 }
 0x8c5   :  { %v7342_v44 = vld [vmem:[%s11908_s6 + $0x30] sm:$0xff] }
 0x8c6   :  { %v3238_v47 = vpop.f32.mrf.mxu0 }
 0x8c7   :  { %v10424_v16 = vadd.f32 %v3238_v47, %v10136_v51 }
 0x8c8   :  { %v7011_v7 = vpop.f32.mrf.mxu0 }
 0x8c9   :  { %v7343_v7 = vld [vmem:[%s11905_s5 + $0x10] sm:$0xff] }
 0x8ca   :  { %v3243_v46 = vpop.f32.mrf.mxu0 }
 0x8cb   :  { %v10427_v57 = vadd.f32 %v3243_v46, %v10139_v48  ;;  %v7344_v46 = vld [vmem:[%s11905_s5 + $0x28] sm:$0xff] }
 0x8cc   :  { %v7014_v12 = vpop.f32.mrf.mxu0 }
 0x8cd   :  { %v7345_v12 = vld [vmem:[%s11908_s6 + $0x28] sm:$0xff] }
 0x8ce   :  { %v3248_v52 = vpop.f32.mrf.mxu0 }
 0x8cf   :  { %v10430_v31 = vadd.f32 %v3248_v52, %v10142_v14 }
 0x8d0   :  { %v7017_v49 = vpop.f32.mrf.mxu0 }
 0x8d1   :  { %v7346_v49 = vld [vmem:[%s11908_s6 + $0x20] sm:$0xff] }
 0x8d2   :  { %v3253_v8 = vpop.f32.mrf.mxu0 }
 0x8d3   :  { %v10433_v32 = vadd.f32 %v3253_v8, %v10145_v20 }
 0x8d4   :  { %v7020_v40 = vpop.f32.mrf.mxu0 }
 0x8d5   :  { %v7347_v40 = vld [vmem:[%s11905_s5 + $0x20] sm:$0xff] }
 0x8d6   :  { %v3258_v19 = vpop.f32.mrf.mxu0 }
 0x8d7   :  { %v10436_v51 = vadd.f32 %v3258_v19, %v10148_v21  ;;  %v7348_v19 = vld [vmem:[%s11905_s5 + $0x38] sm:$0xff] }
 0x8d8   :  { %v7023_v11 = vpop.f32.mrf.mxu0 }
 0x8f0   :  { %v3371_v29 = vpop.f32.mrf.mxu0 }
 0x8f1   :  { %7033 = vmatmul.mubr.msk.f32.vlgmr.msra.gmra.mxu1 %vm559_vm3, %v3371_v29 }
 0x8f2   :  { %3638 = vmatpush1.msra.mxu1 %v8839_v30  ;;  %v3373_v48 = vpop.f32.mrf.mxu0  ;;  %7035 = vmatprep.mubr.msk.f32.mxu1 %vm7484_vm1, %v11976_v45 }
 0x8f3   :  { %3639 = vmatprep.subr.mxu1 %v11976_v45  ;;  %v7349_v48 = vld [vmem:[%s11905_s5 + $0x30] sm:$0xff] }
 0x8f4   :  { %3640 = vmatpush1.msra.mxu1 %v8836_v0  ;;  %v3376_v14 = vpop.f32.mrf.mxu0 }
 0x8f5   :  { %3641 = vmatprep.subr.mxu1 %v11976_v45  ;;  %7036 = vmatmul.mubr.msk.f32.gmra.mxu1 %vm559_vm3, %v3376_v14  ;;  %v7350_v14 = vld [vmem:[%s11905_s5 + $0x48] sm:$0xff] }
 0x8f6   :  { %3642 = vmatpush1.msra.mxu1 %v8833_v38  ;;  %v3378_v20 = vpop.f32.mrf.mxu0  ;;  %7038 = vmatprep.mubr.msk.f32.mxu1 %vm7484_vm1, %v11976_v45 }
 0x8f7   :  { %3643 = vmatprep.subr.mxu1 %v11976_v45 }
 0x8f8   :  { %3644 = vmatpush1.msra.mxu1 %v8829_v26  ;;  %v3381_v21 = vpop.f32.mrf.mxu0 }
 0x8f9   :  { %3645 = vmatprep.subr.mxu1 %v11976_v45  ;;  %7039 = vmatmul.mubr.msk.f32.gmra.mxu1 %vm559_vm3, %v3381_v21 }
 0x8fa   :  { %3646 = vmatpush1.msra.mxu1 %v8826_v54  ;;  %v3383_v25 = vpop.f32.mrf.mxu0  ;;  %7041 = vmatprep.mubr.msk.f32.mxu1 %vm7484_vm1, %v11976_v45 }
 0x8fb   :  { %3647 = vmatprep.subr.mxu1 %v11976_v45  ;;  %v7351_v25 = vld [vmem:[%s11905_s5 + $0x40] sm:$0xff] }
 0x8fc   :  { %3648 = vmatpush1.msra.mxu1 %v8823_v42  ;;  %v3386_v17 = vpop.f32.mrf.mxu0 }
 0x8fd   :  { %3649 = vmatprep.subr.mxu1 %v11976_v45  ;;  %7042 = vmatmul.mubr.msk.f32.gmra.mxu1 %vm559_vm3, %v3386_v17  ;;  %v7352_v17 = vld [vmem:[%s11905_s5 + $0x58] sm:$0xff] }
 0x8fe   :  { %3650 = vmatpush1.msra.mxu1 %v8820_v35  ;;  %v3388_v56 = vpop.f32.mrf.mxu0  ;;  %7044 = vmatprep.mubr.msk.f32.mxu1 %vm7484_vm1, %v11976_v45 }
 0x8ff   :  { %3651 = vmatprep.subr.mxu1 %v11976_v45 }
 0x900   :  { %3652 = vmatpush1.msra.mxu1 %v8816_v6  ;;  %v3391_v23 = vpop.f32.mrf.mxu0 }
 0x901   :  { %3653 = vmatprep.subr.mxu1 %v11976_v45  ;;  %7045 = vmatmul.mubr.msk.f32.gmra.mxu1 %vm559_vm3, %v3391_v23 }
 0x902   :  { %3654 = vmatpush1.msra.mxu1 %v8813_v3  ;;  %v3393_v55 = vpop.f32.mrf.mxu0  ;;  %7047 = vmatprep.mubr.msk.f32.mxu1 %vm7484_vm1, %v11976_v45 }
 0x903   :  { %3655 = vmatprep.subr.mxu1 %v11976_v45  ;;  %v7353_v55 = vld [vmem:[%s11905_s5 + $0x50] sm:$0xff] }
 0x904   :  { %3656 = vmatpush1.msra.mxu1 %v8810_v2  ;;  %v3396_v63 = vpop.f32.mrf.mxu0 }
 0x905   :  { %3657 = vmatprep.subr.mxu1 %v11976_v45  ;;  %7048 = vmatmul.mubr.msk.f32.gmra.mxu1 %vm559_vm3, %v3396_v63  ;;  %v7354_v63 = vld [vmem:[%s11905_s5 + $0x68] sm:$0x1] }
 0x906   :  { %3658 = vmatpush1.msra.mxu1 %v12012_v15  ;;  %v3398_v24 = vpop.f32.mrf.mxu0  ;;  %7050 = vmatprep.mubr.msk.f32.mxu1 %vm7484_vm1, %v11976_v45 }
 0x907   :  { %3659 = vmatprep.subr.mxu1 %v11976_v45 }
 0x908   :  { %3660 = vmatpush1.msra.mxu1 %v12014_v62  ;;  %v3401_v22 = vpop.f32.mrf.mxu0 }
 0x909   :  { %3661 = vmatprep.subr.mxu1 %v11976_v45  ;;  %7051 = vmatmul.mubr.msk.f32.gmra.mxu1 %vm559_vm3, %v3401_v22 }
 0x90a   :  { %3662 = vmatpush1.msra.mxu1 %v12015_v36  ;;  %6249 = vmatprep.mubr.msk.f32.mxu1 %vm1142_vm4, %v7338_v10  ;;  %v3403_v41 = vpop.f32.mrf.mxu0  ;;  %v7355_v10 = vld [vmem:[%s11905_s5 + $0x60] sm:$0x1] }
 0x90b   :  { %3663 = vmatprep.subr.mxu1 %v11976_v45 }
 0x90c   :  { %3664 = vmatpush1.msra.mxu1 %v12016_v37 }
 0x90d   :  { %3665 = vmatprep.subr.mxu1 %v11976_v45 }
 0x90e   :  { %3666 = vmatpush1.msra.mxu1 %v12017_v4 }
 0x90f   :  { %3667 = vmatprep.subr.mxu1 %v11976_v45 }
 0x910   :  { %3668 = vmatpush1.msra.mxu1 %v10309_v50 }
 0x911   :  { %3683 = vmatprep.subr.mxu1 %v11976_v45 }
 0x912   :  { %6248 = vmatpush2.msk.msra.mxu1 %vm1164_vm5, %v10305_v1 }
 0x913   :  { %3685 = vmatprep.subr.mxu1 %v11976_v45 }
 0x914   :  { %3686 = vmatpush2.msra.mxu1 %v10320_v28 }
 0x915   :  { %3687 = vmatprep.subr.mxu1 %v11976_v45 }
 0x916   :  { %3688 = vmatpush2.msra.mxu1 %v12020_v59 }
 0x917   :  { %3689 = vmatprep.subr.mxu1 %v11976_v45 }
 0x918   :  { %3690 = vmatpush2.msra.mxu1 %v12021_v61 }
 0x919   :  { %3691 = vmatprep.subr.mxu1 %v11976_v45 }
 0x91a   :  { %3692 = vmatpush2.msra.mxu1 %v12022_v18 }
 0x91b   :  { %3693 = vmatprep.subr.mxu1 %v11976_v45 }
 0x91c   :  { %3694 = vmatpush2.msra.mxu1 %v12023_v34 }
 0x91d   :  { %3695 = vmatprep.subr.mxu1 %v11976_v45 }
 0x91e   :  { %3696 = vmatpush2.msra.mxu1 %v12024_v39 }
 0x91f   :  { %3697 = vmatprep.subr.mxu1 %v11976_v45 }
 0x920   :  { %3698 = vmatpush2.msra.mxu1 %v12025_v5 }
 0x921   :  { %3699 = vmatprep.subr.mxu1 %v11976_v45 }
 0x922   :  { %3700 = vmatpush2.msra.mxu1 %v12026_v53  ;;  %v3803_v33 = vpop.f32.mrf.mxu0 }
 0x923   :  { %3702 = vmatmul.mubr.f32.vlgmr.msra.gmra.mxu1 %v7339_v43  ;;  %7053 = vmatprep.subr.mxu1 %v11976_v45  ;;  %v7357_v43 = vld [vmem:[%s11905_s5 + $0xe0] sm:$0xff] }
 0x924   :  { %6250 = vmatprep.mubr.msk.f32.mxu1 %vm1142_vm4, %v7340_v9  ;;  %7054 = vmatpush3.msra.mxu1 %v7341_v60  ;;  %v3805_v27 = vpop.f32.mrf.mxu0  ;;  %v7358_v9 = vld [vmem:[%s11905_s5 + $0xf8] sm:$0xff] }
 0x925   :  { %7055 = vmatprep.subr.mxu1 %v11976_v45  ;;  %v7359_v60 = vld [vmem:[%s11908_s6 + $0x78] sm:$0xff]  ;;  %v7360_v27 = vld [vmem:[%s11908_s6 + $0x70] sm:$0xff] }
 0x926   :  { %7056 = vmatpush3.msra.mxu1 %v7342_v44  ;;  %v3808_v47 = vpop.f32.mrf.mxu0  ;;  %v7361_v44 = vld [vmem:[%s11905_s5 + $0xf0] sm:$0xff] }
 0x927   :  { %3707 = vmatmul.mubr.f32.gmra.mxu1 %v7343_v7  ;;  %7057 = vmatprep.subr.mxu1 %v11976_v45  ;;  %v7363_v7 = vld [vmem:[%s11908_s6 + $0x68] sm:$0xff] }
 0x928   :  { %6251 = vmatprep.mubr.msk.f32.mxu1 %vm1142_vm4, %v7344_v46  ;;  %7058 = vmatpush3.msra.mxu1 %v7345_v12  ;;  %v3810_v52 = vpop.f32.mrf.mxu0  ;;  %v7364_v46 = vld [vmem:[%s11908_s6 + $0x60] sm:$0xff] }
 0x929   :  { %7059 = vmatprep.subr.mxu1 %v11976_v45  ;;  %v7365_v12 = vld [vmem:[%s11905_s5 + $0x100] sm:$0xff]  ;;  %v7366_v52 = vld [vmem:[%s11905_s5 + $0x118] sm:$0xff] }
 0x92a   :  { %7060 = vmatpush3.msra.mxu1 %v7346_v49  ;;  %v3813_v8 = vpop.f32.mrf.mxu0  ;;  %v7367_v49 = vld [vmem:[%s11905_s5 + $0x110] sm:$0xff] }
 0x92b   :  { %3712 = vmatmul.mubr.f32.gmra.mxu1 %v7347_v40  ;;  %4079 = vmatprep.subr.mxu1 %v11976_v45  ;;  %v7369_v40 = vld [vmem:[%s11905_s5 + $0x120] sm:$0xff] }
 0x92c   :  { %6252 = vmatprep.mubr.msk.f32.mxu1 %vm1142_vm4, %v7348_v19  ;;  %v3815_v11 = vpop.f32.mrf.mxu0  ;;  %v7370_v19 = vld [vmem:[%s11905_s5 + $0x138] sm:$0xff] }
 0x92d   :  { %v7371_v11 = vld [vmem:[%s11905_s5 + $0x130] sm:$0xff] }
 0x92e   :  { %v3818_v29 = vpop.f32.mrf.mxu0 }
 0x92f   :  { %3717 = vmatmul.mubr.f32.gmra.mxu1 %v7349_v48  ;;  %v7373_v48 = vld [vmem:[%s11905_s5 + $0x140] sm:$0x1] }
 0x930   :  { %6253 = vmatprep.mubr.msk.f32.mxu1 %vm1142_vm4, %v7350_v14  ;;  %v3820_v20 = vpop.f32.mrf.mxu0 }
 0x931   :  { %v6383_v20 = vld [vmem:[%s11909_s7] ss:$0 sm:$0xff] }
 0x932   :  { %v3823_v21 = vpop.f32.mrf.mxu0 }
 0x933   :  { %3722 = vmatmul.mubr.f32.gmra.mxu1 %v7351_v25 }
 0x934   :  { %6254 = vmatprep.mubr.msk.f32.mxu1 %vm1142_vm4, %v7352_v17  ;;  %v3825_v56 = vpop.f32.mrf.mxu0 }
 0x936   :  { %v3828_v23 = vpop.f32.mrf.mxu0 }
 0x937   :  { %3727 = vmatmul.mubr.f32.gmra.mxu1 %v7353_v55 }
 0x938   :  { %6255 = vmatprep.mubr.msk.f32.mxu1 %vm1142_vm4, %v7354_v63  ;;  %v3830_v24 = vpop.f32.mrf.mxu0 }
 0x93a   :  { %v3833_v22 = vpop.f32.mrf.mxu0 }
 0x93b   :  { %3732 = vmatmul.mubr.f32.gmra.mxu1 %v7355_v10 }
 0x93c   :  { %7061 = vmatprep.mubr.msk.f32.mxu1 %vm7484_vm1, %v11976_v45  ;;  %v3835_v41 = vpop.f32.mrf.mxu0 }
 0x93f   :  { %7062 = vmatmul.mubr.msk.f32.vlgmr.msra.gmra.mxu1 %vm559_vm3, %v3803_v33  ;;  %v7356_v33 = vld [vmem:[%s11905_s5 + $0xe8] sm:$0xff] }
 0x940   :  { %4080 = vmatpush1.msra.mxu1 %v8839_v30  ;;  %7064 = vmatprep.mubr.msk.f32.mxu1 %vm7484_vm1, %v11976_v45 }
 0x941   :  { %4081 = vmatprep.subr.mxu1 %v11976_v45 }
 0x942   :  { %4082 = vmatpush1.msra.mxu1 %v8836_v0 }
 0x943   :  { %4083 = vmatprep.subr.mxu1 %v11976_v45  ;;  %7065 = vmatmul.mubr.msk.f32.gmra.mxu1 %vm559_vm3, %v3808_v47  ;;  %v7362_v47 = vld [vmem:[%s11905_s5 + $0x108] sm:$0xff] }
 0x944   :  { %4084 = vmatpush1.msra.mxu1 %v8833_v38  ;;  %7067 = vmatprep.mubr.msk.f32.mxu1 %vm7484_vm1, %v11976_v45 }
 0x945   :  { %4085 = vmatprep.subr.mxu1 %v11976_v45 }
 0x946   :  { %4086 = vmatpush1.msra.mxu1 %v8829_v26 }
 0x947   :  { %4087 = vmatprep.subr.mxu1 %v11976_v45  ;;  %7068 = vmatmul.mubr.msk.f32.gmra.mxu1 %vm559_vm3, %v3813_v8  ;;  %v7368_v8 = vld [vmem:[%s11905_s5 + $0x128] sm:$0xff] }
 0x948   :  { %4088 = vmatpush1.msra.mxu1 %v8826_v54  ;;  %7070 = vmatprep.mubr.msk.f32.mxu1 %vm7484_vm1, %v11976_v45 }
 0x949   :  { %4089 = vmatprep.subr.mxu1 %v11976_v45 }
 0x94a   :  { %4090 = vmatpush1.msra.mxu1 %v8823_v42 }
 0x94b   :  { %4091 = vmatprep.subr.mxu1 %v11976_v45  ;;  %7071 = vmatmul.mubr.msk.f32.gmra.mxu1 %vm559_vm3, %v3818_v29  ;;  %v7372_v29 = vld [vmem:[%s11905_s5 + $0x148] sm:$0x1] }
 0x94c   :  { %4092 = vmatpush1.msra.mxu1 %v8820_v35  ;;  %7073 = vmatprep.mubr.msk.f32.mxu1 %vm7484_vm1, %v11976_v45 }
 0x94d   :  { %4093 = vmatprep.subr.mxu1 %v11976_v45 }
 0x94e   :  { %4094 = vmatpush1.msra.mxu1 %v8816_v6 }
 0x94f   :  { %4095 = vmatprep.subr.mxu1 %v11976_v45  ;;  %7074 = vmatmul.mubr.msk.f32.gmra.mxu1 %vm559_vm3, %v3823_v21 }
 0x950   :  { %4096 = vmatpush1.msra.mxu1 %v8813_v3  ;;  %7076 = vmatprep.mubr.msk.f32.mxu1 %vm7484_vm1, %v11976_v45 }
 0x951   :  { %4097 = vmatprep.subr.mxu1 %v11976_v45 }
 0x952   :  { %4098 = vmatpush1.msra.mxu1 %v8810_v2 }
 0x953   :  { %4099 = vmatprep.subr.mxu1 %v11976_v45  ;;  %7077 = vmatmul.mubr.msk.f32.gmra.mxu1 %vm559_vm3, %v3828_v23 }
 0x954   :  { %4100 = vmatpush1.msra.mxu1 %v12012_v15  ;;  %7079 = vmatprep.mubr.msk.f32.mxu1 %vm7484_vm1, %v11976_v45 }
 0x955   :  { %4101 = vmatprep.subr.mxu1 %v11976_v45 }
 0x956   :  { %4102 = vmatpush1.msra.mxu1 %v12014_v62 }
 0x957   :  { %4103 = vmatprep.subr.mxu1 %v11976_v45  ;;  %7080 = vmatmul.mubr.msk.f32.gmra.mxu1 %vm559_vm3, %v3833_v22 }
 0x958   :  { %4104 = vmatpush1.msra.mxu1 %v12015_v36  ;;  %6279 = vmatprep.mubr.msk.f32.mxu1 %vm1142_vm4, %v7356_v33 }
 0x959   :  { %4105 = vmatprep.subr.mxu1 %v11976_v45 }
 0x95a   :  { %4106 = vmatpush1.msra.mxu1 %v12016_v37 }
 0x95b   :  { %4107 = vmatprep.subr.mxu1 %v11976_v45 }
 0x95c   :  { %4108 = vmatpush1.msra.mxu1 %v12017_v4 }
 0x95d   :  { %4109 = vmatprep.subr.mxu1 %v11976_v45 }
 0x95e   :  { %4110 = vmatpush1.msra.mxu1 %v10309_v50 }
 0x95f   :  { %4125 = vmatprep.subr.mxu1 %v11976_v45 }
 0x960   :  { %6278 = vmatpush2.msk.msra.mxu1 %vm1164_vm5, %v10305_v1 }
 0x961   :  { %4127 = vmatprep.subr.mxu1 %v11976_v45 }
 0x962   :  { %4128 = vmatpush2.msra.mxu1 %v10320_v28 }
 0x963   :  { %4129 = vmatprep.subr.mxu1 %v11976_v45 }
 0x964   :  { %4130 = vmatpush2.msra.mxu1 %v12020_v59 }
 0x965   :  { %4131 = vmatprep.subr.mxu1 %v11976_v45 }
 0x966   :  { %4132 = vmatpush2.msra.mxu1 %v12021_v61 }
 0x967   :  { %4133 = vmatprep.subr.mxu1 %v11976_v45 }
 0x968   :  { %4134 = vmatpush2.msra.mxu1 %v12022_v18 }
 0x969   :  { %4135 = vmatprep.subr.mxu1 %v11976_v45 }
 0x96a   :  { %4136 = vmatpush2.msra.mxu1 %v12023_v34 }
 0x96b   :  { %4137 = vmatprep.subr.mxu1 %v11976_v45 }
 0x96c   :  { %4138 = vmatpush2.msra.mxu1 %v12024_v39 }
 0x96d   :  { %4139 = vmatprep.subr.mxu1 %v11976_v45 }
 0x96e   :  { %4140 = vmatpush2.msra.mxu1 %v12025_v5 }
 0x96f   :  { %4141 = vmatprep.subr.mxu1 %v11976_v45 }
 0x970   :  { %4142 = vmatpush2.msra.mxu1 %v12026_v53 }
 0x971   :  { %4144 = vmatmul.mubr.f32.vlgmr.msra.gmra.mxu1 %v7357_v43  ;;  %7140 = vmatprep.subr.mxu1 %v11976_v45 }
 0x972   :  { %6280 = vmatprep.mubr.msk.f32.mxu1 %vm1142_vm4, %v7358_v9  ;;  %7141 = vmatpush3.msra.mxu1 %v7359_v60 }
 0x973   :  { %7142 = vmatprep.subr.mxu1 %v11976_v45 }
 0x974   :  { %7143 = vmatpush3.msra.mxu1 %v7360_v27 }
 0x975   :  { %4149 = vmatmul.mubr.f32.gmra.mxu1 %v7361_v44  ;;  %7144 = vmatprep.subr.mxu1 %v11976_v45 }
 0x976   :  { %6281 = vmatprep.mubr.msk.f32.mxu1 %vm1142_vm4, %v7362_v47  ;;  %7145 = vmatpush3.msra.mxu1 %v7363_v7 }
 0x977   :  { %7146 = vmatprep.subr.mxu1 %v11976_v45 }
 0x978   :  { %7147 = vmatpush3.msra.mxu1 %v7364_v46 }
 0x979   :  { %4154 = vmatmul.mubr.f32.gmra.mxu1 %v7365_v12  ;;  %4535 = vmatprep.subr.mxu1 %v11976_v45 }
 0x97a   :  { %6282 = vmatprep.mubr.msk.f32.mxu1 %vm1142_vm4, %v7366_v52 }
 0x97d   :  { %4159 = vmatmul.mubr.f32.gmra.mxu1 %v7367_v49 }
 0x97e   :  { %6283 = vmatprep.mubr.msk.f32.mxu1 %vm1142_vm4, %v7368_v8 }
 0x981   :  { %4164 = vmatmul.mubr.f32.gmra.mxu1 %v7369_v40 }
 0x982   :  { %6284 = vmatprep.mubr.msk.f32.mxu1 %vm1142_vm4, %v7370_v19 }
 0x985   :  { %4169 = vmatmul.mubr.f32.gmra.mxu1 %v7371_v11 }
 0x986   :  { %6285 = vmatprep.mubr.msk.f32.mxu1 %vm1142_vm4, %v7372_v29 }
 0x989   :  { %4174 = vmatmul.mubr.f32.gmra.mxu1 %v7373_v48 }
 0x98a   :  { %7148 = vmatprep.mubr.msk.f32.mxu1 %vm7484_vm1, %v11976_v45 }
 0x9b1   :  { %v3497_v14 = vpop.f32.mrf.mxu1 }
 0x9b2   :  { %v3531_v21 = vadd.f32 %v3497_v14, %v10418_v13 }
 0x9b3   :  { %v7034_v25 = vpop.f32.mrf.mxu1 }
 0x9b4   :  { %v10716_v17 = vadd.f32 %v6383_v20, %v3531_v21 }
 0x9b5   :  { %v3502_v56 = vpop.f32.mrf.mxu1 }
 0x9b6   :  { %v3532_v23 = vadd.f32 %v3502_v56, %v10421_v58  ;;  %v5760_v63 = vmul.f32 %v10716_v17, %v10716_v17  ;;  %v5726_v10 = vsel %vm559_vm3, %v10716_v17, 0.0 }
 0x9b7   :  { %v7037_v55 = vpop.f32.mrf.mxu1 }
 0x9b8   :  { %v10721_v24 = vadd.f32 %v6383_v20, %v3532_v23  ;;  %v5773_v9 = vsel %vm559_vm3, %v5760_v63, 0.0 }
 0x9b9   :  { %v3507_v22 = vpop.f32.mrf.mxu1 }
 0x9ba   :  { %v5727_v41 = vsel %vm559_vm3, %v10721_v24, 0.0  ;;  %v5761_v13 = vmul.f32 %v10721_v24, %v10721_v24  ;;  %v3533_v33 = vadd.f32 %v3507_v22, %v10424_v16 }
 0x9bb   :  { %v5728_v43 = vadd.f32 %v5727_v41, %v5726_v10  ;;  %v7040_v58 = vpop.f32.mrf.mxu1 }
 0x9bc   :  { %v5774_v60 = vsel %vm559_vm3, %v5761_v13, 0.0  ;;  %v10732_v27 = vadd.f32 %v6383_v20, %v3533_v33 }
 0x9bd   :  { %v5775_v44 = vadd.f32 %v5774_v60, %v5773_v9  ;;  %v3512_v47 = vpop.f32.mrf.mxu1 }
 0x9be   :  { %v5729_v7 = vsel %vm559_vm3, %v10732_v27, 0.0  ;;  %v5762_v46 = vmul.f32 %v10732_v27, %v10732_v27  ;;  %v3534_v12 = vadd.f32 %v3512_v47, %v10427_v57 }
 0x9bf   :  { %v5730_v52 = vadd.f32 %v5729_v7, %v5728_v43  ;;  %v7043_v16 = vpop.f32.mrf.mxu1 }
 0x9c0   :  { %v5776_v49 = vsel %vm559_vm3, %v5762_v46, 0.0  ;;  %v10740_v8 = vadd.f32 %v6383_v20, %v3534_v12  ;;  %v7374_v12 = vld [vmem:[%s11908_s6 + $0x58] sm:$0xff] }
 0x9c1   :  { %v5777_v40 = vadd.f32 %v5776_v49, %v5775_v44  ;;  %v3517_v19 = vpop.f32.mrf.mxu1  ;;  %v7376_v49 = vld [vmem:[%s11908_s6 + $0x48] sm:$0xff] }
 0x9c2   :  { %v5731_v11 = vsel %vm559_vm3, %v10740_v8, 0.0  ;;  %v5763_v29 = vmul.f32 %v10740_v8, %v10740_v8  ;;  %v3535_v48 = vadd.f32 %v3517_v19, %v10430_v31  ;;  %v7377_v19 = vld [vmem:[%s11908_s6 + $0x40] sm:$0xff] }
 0x9c3   :  { %v5732_v14 = vadd.f32 %v5731_v11, %v5730_v52  ;;  %v7046_v21 = vpop.f32.mrf.mxu1  ;;  %v7375_v52 = vld [vmem:[%s11908_s6 + $0x50] sm:$0xff] }
 0x9c4   :  { %v5778_v57 = vsel %vm559_vm3, %v5763_v29, 0.0  ;;  %v10748_v25 = vadd.f32 %v6383_v20, %v3535_v48 }
 0x9c5   :  { %v5779_v56 = vadd.f32 %v5778_v57, %v5777_v40  ;;  %v3522_v23 = vpop.f32.mrf.mxu1 }
 0x9c6   :  { %v5733_v55 = vsel %vm559_vm3, %v10748_v25, 0.0  ;;  %v5764_v63 = vmul.f32 %v10748_v25, %v10748_v25  ;;  %v3536_v22 = vadd.f32 %v3522_v23, %v10433_v32 }
 0x9c7   :  { %v5734_v10 = vadd.f32 %v5733_v55, %v5732_v14  ;;  %v7049_v41 = vpop.f32.mrf.mxu1 }
 0x9c8   :  { %v5780_v31 = vsel %vm559_vm3, %v5764_v63, 0.0  ;;  %v10756_v13 = vadd.f32 %v6383_v20, %v3536_v22 }
 0x9c9   :  { %v5781_v33 = vadd.f32 %v5780_v31, %v5779_v56  ;;  %v3527_v43 = vpop.f32.mrf.mxu1 }
 0x9ca   :  { %v5735_v58 = vsel %vm559_vm3, %v10756_v13, 0.0  ;;  %v5765_v9 = vmul.f32 %v10756_v13, %v10756_v13  ;;  %v10763_v60 = vadd.f32 %v3527_v43, %v10436_v51 }
 0x9cb   :  { %v10765_v44 = vadd.f32 %v5735_v58, %v5734_v10  ;;  %v7052_v32 = vpop.f32.mrf.mxu1 }
 0x9cc   :  { %v5782_v47 = vsel %vm559_vm3, %v5765_v9, 0.0 }
 0x9cd   :  { %v10768_v7 = vadd.f32 %v5782_v47, %v5781_v33 }
 0x9e3   :  { %v3703_v20 = vpop.f32.mrf.mxu1 }
 0x9e4   :  { %7091 = vmatmul.mubr.msk.f32.vlgmr.msra.gmra.mxu0 %vm559_vm3, %v3703_v20 }
 0x9e5   :  { %v3705_v46 = vpop.f32.mrf.mxu1  ;;  %7093 = vmatprep.mubr.msk.f32.mxu0 %vm7484_vm1, %v11976_v45  ;;  %7112 = vmatpush3.msra.mxu0 %v7374_v12 }
 0x9e6   :  { %7113 = vmatprep.subr.mxu0 %v11976_v45 }
 0x9e7   :  { %v3708_v51 = vpop.f32.mrf.mxu1  ;;  %7114 = vmatpush3.msra.mxu0 %v7375_v52 }
 0x9e8   :  { %7094 = vmatmul.mubr.msk.f32.gmra.mxu0 %vm559_vm3, %v3708_v51  ;;  %7115 = vmatprep.subr.mxu0 %v11976_v45 }
 0x9e9   :  { %v3710_v16 = vpop.f32.mrf.mxu1  ;;  %7096 = vmatprep.mubr.msk.f32.mxu0 %vm7484_vm1, %v11976_v45  ;;  %7116 = vmatpush3.msra.mxu0 %v7376_v49 }
 0x9ea   :  { %7117 = vmatprep.subr.mxu0 %v11976_v45 }
 0x9eb   :  { %v3713_v40 = vpop.f32.mrf.mxu1  ;;  %7118 = vmatpush3.msra.mxu0 %v7377_v19 }
 0x9ec   :  { %7097 = vmatmul.mubr.msk.f32.gmra.mxu0 %vm559_vm3, %v3713_v40  ;;  %4307 = vmatprep.subr.mxu0 %v11976_v45 }
 0x9ed   :  { %v3715_v11 = vpop.f32.mrf.mxu1  ;;  %7099 = vmatprep.mubr.msk.f32.mxu0 %vm7484_vm1, %v11976_v45 }
 0x9ef   :  { %v3718_v29 = vpop.f32.mrf.mxu1 }
 0x9f0   :  { %7100 = vmatmul.mubr.msk.f32.gmra.mxu0 %vm559_vm3, %v3718_v29 }
 0x9f1   :  { %v3720_v48 = vpop.f32.mrf.mxu1  ;;  %7102 = vmatprep.mubr.msk.f32.mxu0 %vm7484_vm1, %v11976_v45 }
 0x9f3   :  { %v3723_v14 = vpop.f32.mrf.mxu1 }
 0x9f4   :  { %7103 = vmatmul.mubr.msk.f32.gmra.mxu0 %vm559_vm3, %v3723_v14 }
 0x9f5   :  { %v3725_v21 = vpop.f32.mrf.mxu1  ;;  %7105 = vmatprep.mubr.msk.f32.mxu0 %vm7484_vm1, %v11976_v45 }
 0x9f7   :  { %v3728_v57 = vpop.f32.mrf.mxu1 }
 0x9f8   :  { %7106 = vmatmul.mubr.msk.f32.gmra.mxu0 %vm559_vm3, %v3728_v57 }
 0x9f9   :  { %v3730_v56 = vpop.f32.mrf.mxu1  ;;  %7108 = vmatprep.mubr.msk.f32.mxu0 %vm7484_vm1, %v11976_v45 }
 0x9fb   :  { %v3733_v23 = vpop.f32.mrf.mxu1 }
 0x9fc   :  { %7109 = vmatmul.mubr.msk.f32.gmra.mxu0 %vm559_vm3, %v3733_v23  ;;  %v7378_v23 = vld [vmem:[%s11905_s5 + $0x158] sm:$0xff] }
 0x9fd   :  { %v3735_v55 = vpop.f32.mrf.mxu1  ;;  %7119 = vmatprep.mubr.msk.f32.mxu0 %vm7484_vm1, %v11976_v45 }
 0x9ff   :  { %v10807_v63 = vpop.f32.mrf.mxu1 }
 0xa01   :  { %v7063_v22 = vpop.f32.mrf.mxu1 }
 0xa02   :  { %v7379_v22 = vld [vmem:[%s11905_s5 + $0x150] sm:$0xff] }
 0xa03   :  { %v10809_v10 = vpop.f32.mrf.mxu1 }
 0xa05   :  { %v7066_v41 = vpop.f32.mrf.mxu1 }
 0xa06   :  { %v7380_v41 = vld [vmem:[%s11905_s5 + $0x168] sm:$0xff] }
 0xa07   :  { %v10811_v31 = vpop.f32.mrf.mxu1 }
 0xa09   :  { %v7069_v33 = vpop.f32.mrf.mxu1 }
 0xa0a   :  { %v7381_v33 = vld [vmem:[%s11908_s6 + $0x98] sm:$0xff] }
 0xa0b   :  { %v10813_v43 = vpop.f32.mrf.mxu1 }
 0xa0d   :  { %v7072_v58 = vpop.f32.mrf.mxu1 }
 0xa0e   :  { %v7382_v58 = vld [vmem:[%s11908_s6 + $0x90] sm:$0xff] }
 0xa0f   :  { %v10815_v9 = vpop.f32.mrf.mxu1 }
 0xa11   :  { %v7075_v32 = vpop.f32.mrf.mxu1 }
 0xa12   :  { %v7383_v32 = vld [vmem:[%s11905_s5 + $0x160] sm:$0xff] }
 0xa13   :  { %v10817_v47 = vpop.f32.mrf.mxu1 }
 0xa15   :  { %v7078_v20 = vpop.f32.mrf.mxu1 }
 0xa16   :  { %v7384_v20 = vld [vmem:[%s11905_s5 + $0x178] sm:$0xff] }
 0xa17   :  { %v10819_v46 = vpop.f32.mrf.mxu1 }
 0xa19   :  { %v7081_v12 = vpop.f32.mrf.mxu1 }
 0xa1a   :  { %v7385_v12 = vld [vmem:[%s11908_s6 + $0x88] sm:$0xff] }
 0xa31   :  { %v4145_v51 = vpop.f32.mrf.mxu1 }
 0xa32   :  { %7120 = vmatmul.mubr.msk.f32.vlgmr.msra.gmra.mxu0 %vm559_vm3, %v4145_v51  ;;  %v7386_v51 = vld [vmem:[%s11908_s6 + $0x80] sm:$0xff] }
 0xa33   :  { %4308 = vmatpush1.msra.mxu0 %v8839_v30  ;;  %v4147_v52 = vpop.f32.mrf.mxu1  ;;  %7122 = vmatprep.mubr.msk.f32.mxu0 %vm7484_vm1, %v11976_v45 }
 0xa34   :  { %4309 = vmatprep.subr.mxu0 %v11976_v45  ;;  %v7387_v52 = vld [vmem:[%s11905_s5 + $0x170] sm:$0xff] }
 0xa35   :  { %4310 = vmatpush1.msra.mxu0 %v8836_v0  ;;  %v4150_v16 = vpop.f32.mrf.mxu1 }
 0xa36   :  { %4311 = vmatprep.subr.mxu0 %v11976_v45  ;;  %7123 = vmatmul.mubr.msk.f32.gmra.mxu0 %vm559_vm3, %v4150_v16  ;;  %v7388_v16 = vld [vmem:[%s11905_s5 + $0x188] sm:$0xff] }
 0xa37   :  { %4312 = vmatpush1.msra.mxu0 %v8833_v38  ;;  %v4152_v49 = vpop.f32.mrf.mxu1  ;;  %7125 = vmatprep.mubr.msk.f32.mxu0 %vm7484_vm1, %v11976_v45 }
 0xa38   :  { %4313 = vmatprep.subr.mxu0 %v11976_v45  ;;  %v7389_v49 = vld [vmem:[%s11905_s5 + $0x180] sm:$0xff] }
 0xa39   :  { %4314 = vmatpush1.msra.mxu0 %v8829_v26  ;;  %v4155_v40 = vpop.f32.mrf.mxu1 }
 0xa3a   :  { %4315 = vmatprep.subr.mxu0 %v11976_v45  ;;  %7126 = vmatmul.mubr.msk.f32.gmra.mxu0 %vm559_vm3, %v4155_v40  ;;  %v7390_v40 = vld [vmem:[%s11905_s5 + $0x198] sm:$0xff] }
 0xa3b   :  { %4316 = vmatpush1.msra.mxu0 %v8826_v54  ;;  %v4157_v19 = vpop.f32.mrf.mxu1  ;;  %7128 = vmatprep.mubr.msk.f32.mxu0 %vm7484_vm1, %v11976_v45 }
 0xa3c   :  { %4317 = vmatprep.subr.mxu0 %v11976_v45  ;;  %v7391_v19 = vld [vmem:[%s11905_s5 + $0x190] sm:$0xff] }
 0xa3d   :  { %4318 = vmatpush1.msra.mxu0 %v8823_v42  ;;  %v4160_v11 = vpop.f32.mrf.mxu1 }
 0xa3e   :  { %4319 = vmatprep.subr.mxu0 %v11976_v45  ;;  %7129 = vmatmul.mubr.msk.f32.gmra.mxu0 %vm559_vm3, %v4160_v11  ;;  %v7392_v11 = vld [vmem:[%s11905_s5 + $0x1a8] sm:$0xff] }
 0xa3f   :  { %4320 = vmatpush1.msra.mxu0 %v8820_v35  ;;  %v4162_v29 = vpop.f32.mrf.mxu1  ;;  %7131 = vmatprep.mubr.msk.f32.mxu0 %vm7484_vm1, %v11976_v45 }
 0xa40   :  { %4321 = vmatprep.subr.mxu0 %v11976_v45  ;;  %v7393_v29 = vld [vmem:[%s11905_s5 + $0x1a0] sm:$0xff] }
 0xa41   :  { %4322 = vmatpush1.msra.mxu0 %v8816_v6  ;;  %v4165_v48 = vpop.f32.mrf.mxu1 }
 0xa42   :  { %4323 = vmatprep.subr.mxu0 %v11976_v45  ;;  %7132 = vmatmul.mubr.msk.f32.gmra.mxu0 %vm559_vm3, %v4165_v48  ;;  %v7394_v48 = vld [vmem:[%s11905_s5 + $0x1b8] sm:$0x1] }
 0xa43   :  { %4324 = vmatpush1.msra.mxu0 %v8813_v3  ;;  %v4167_v14 = vpop.f32.mrf.mxu1  ;;  %7134 = vmatprep.mubr.msk.f32.mxu0 %vm7484_vm1, %v11976_v45 }
 0xa44   :  { %4325 = vmatprep.subr.mxu0 %v11976_v45  ;;  %v7395_v14 = vld [vmem:[%s11905_s5 + $0x1b0] sm:$0x1] }
 0xa45   :  { %4326 = vmatpush1.msra.mxu0 %v8810_v2  ;;  %v4170_v21 = vpop.f32.mrf.mxu1 }
 0xa46   :  { %4327 = vmatprep.subr.mxu0 %v11976_v45  ;;  %7135 = vmatmul.mubr.msk.f32.gmra.mxu0 %vm559_vm3, %v4170_v21 }
 0xa47   :  { %4328 = vmatpush1.msra.mxu0 %v12012_v15  ;;  %v4172_v57 = vpop.f32.mrf.mxu1  ;;  %7137 = vmatprep.mubr.msk.f32.mxu0 %vm7484_vm1, %v11976_v45 }
 0xa48   :  { %4329 = vmatprep.subr.mxu0 %v11976_v45 }
 0xa49   :  { %4330 = vmatpush1.msra.mxu0 %v12014_v62  ;;  %v4175_v56 = vpop.f32.mrf.mxu1 }
 0xa4a   :  { %4331 = vmatprep.subr.mxu0 %v11976_v45  ;;  %7138 = vmatmul.mubr.msk.f32.gmra.mxu0 %vm559_vm3, %v4175_v56 }
 0xa4b   :  { %4332 = vmatpush1.msra.mxu0 %v12015_v36  ;;  %6294 = vmatprep.mubr.msk.f32.mxu0 %vm1142_vm4, %v7378_v23  ;;  %v4177_v55 = vpop.f32.mrf.mxu1 }
 0xa4c   :  { %4333 = vmatprep.subr.mxu0 %v11976_v45 }
 0xa4d   :  { %4334 = vmatpush1.msra.mxu0 %v12016_v37 }
 0xa4e   :  { %4335 = vmatprep.subr.mxu0 %v11976_v45 }
 0xa4f   :  { %4336 = vmatpush1.msra.mxu0 %v12017_v4 }
 0xa50   :  { %4337 = vmatprep.subr.mxu0 %v11976_v45 }
 0xa51   :  { %4338 = vmatpush1.msra.mxu0 %v10309_v50 }
 0xa52   :  { %4353 = vmatprep.subr.mxu0 %v11976_v45 }
 0xa53   :  { %6293 = vmatpush2.msk.msra.mxu0 %vm1164_vm5, %v10305_v1 }
 0xa54   :  { %4355 = vmatprep.subr.mxu0 %v11976_v45 }
 0xa55   :  { %4356 = vmatpush2.msra.mxu0 %v10320_v28 }
 0xa56   :  { %4357 = vmatprep.subr.mxu0 %v11976_v45 }
 0xa57   :  { %4358 = vmatpush2.msra.mxu0 %v12020_v59 }
 0xa58   :  { %4359 = vmatprep.subr.mxu0 %v11976_v45 }
 0xa59   :  { %4360 = vmatpush2.msra.mxu0 %v12021_v61 }
 0xa5a   :  { %4361 = vmatprep.subr.mxu0 %v11976_v45 }
 0xa5b   :  { %4362 = vmatpush2.msra.mxu0 %v12022_v18 }
 0xa5c   :  { %4363 = vmatprep.subr.mxu0 %v11976_v45 }
 0xa5d   :  { %4364 = vmatpush2.msra.mxu0 %v12023_v34 }
 0xa5e   :  { %4365 = vmatprep.subr.mxu0 %v11976_v45 }
 0xa5f   :  { %4366 = vmatpush2.msra.mxu0 %v12024_v39 }
 0xa60   :  { %4367 = vmatprep.subr.mxu0 %v11976_v45 }
 0xa61   :  { %4368 = vmatpush2.msra.mxu0 %v12025_v5 }
 0xa62   :  { %4369 = vmatprep.subr.mxu0 %v11976_v45 }
 0xa63   :  { %4370 = vmatpush2.msra.mxu0 %v12026_v53 }
 0xa64   :  { %4372 = vmatmul.mubr.f32.vlgmr.msra.gmra.mxu0 %v7379_v22  ;;  %7169 = vmatprep.subr.mxu0 %v11976_v45 }
 0xa65   :  { %6295 = vmatprep.mubr.msk.f32.mxu0 %vm1142_vm4, %v7380_v41  ;;  %7170 = vmatpush3.msra.mxu0 %v7381_v33 }
 0xa66   :  { %7171 = vmatprep.subr.mxu0 %v11976_v45 }
 0xa67   :  { %7172 = vmatpush3.msra.mxu0 %v7382_v58 }
 0xa68   :  { %4377 = vmatmul.mubr.f32.gmra.mxu0 %v7383_v32  ;;  %7173 = vmatprep.subr.mxu0 %v11976_v45 }
 0xa69   :  { %6296 = vmatprep.mubr.msk.f32.mxu0 %vm1142_vm4, %v7384_v20  ;;  %7174 = vmatpush3.msra.mxu0 %v7385_v12 }
 0xa6a   :  { %7175 = vmatprep.subr.mxu0 %v11976_v45 }
 0xa6b   :  { %7176 = vmatpush3.msra.mxu0 %v7386_v51 }
 0xa6c   :  { %4382 = vmatmul.mubr.f32.gmra.mxu0 %v7387_v52  ;;  %4763 = vmatprep.subr.mxu0 %v11976_v45 }
 0xa6d   :  { %6297 = vmatprep.mubr.msk.f32.mxu0 %vm1142_vm4, %v7388_v16 }
 0xa70   :  { %4387 = vmatmul.mubr.f32.gmra.mxu0 %v7389_v49 }
 0xa71   :  { %6298 = vmatprep.mubr.msk.f32.mxu0 %vm1142_vm4, %v7390_v40 }
 0xa74   :  { %4392 = vmatmul.mubr.f32.gmra.mxu0 %v7391_v19 }
 0xa75   :  { %6299 = vmatprep.mubr.msk.f32.mxu0 %vm1142_vm4, %v7392_v11 }
 0xa78   :  { %4397 = vmatmul.mubr.f32.gmra.mxu0 %v7393_v29 }
 0xa79   :  { %6300 = vmatprep.mubr.msk.f32.mxu0 %vm1142_vm4, %v7394_v48 }
 0xa7c   :  { %4402 = vmatmul.mubr.f32.gmra.mxu0 %v7395_v14 }
 0xa7d   :  { %7177 = vmatprep.mubr.msk.f32.mxu0 %vm7484_vm1, %v11976_v45 }
 0xaa4   :  { %v4045_v21 = vpop.f32.mrf.mxu0 }
 0xaa5   :  { %v4046_v16 = vadd.f32 %v4045_v21, %v10807_v63 }
 0xaa6   :  { %v7092_v57 = vpop.f32.mrf.mxu0 }
 0xaa8   :  { %v4050_v56 = vpop.f32.mrf.mxu0 }
 0xaa9   :  { %v4051_v11 = vadd.f32 %v4050_v56, %v10809_v10 }
 0xaaa   :  { %v7095_v23 = vpop.f32.mrf.mxu0 }
 0xaac   :  { %v4055_v55 = vpop.f32.mrf.mxu0 }
 0xaad   :  { %v4056_v57 = vadd.f32 %v4055_v55, %v10811_v31 }
 0xaae   :  { %v7098_v22 = vpop.f32.mrf.mxu0 }
 0xab0   :  { %v4060_v41 = vpop.f32.mrf.mxu0 }
 0xab2   :  { %v7101_v33 = vpop.f32.mrf.mxu0 }
 0xab4   :  { %v4065_v58 = vpop.f32.mrf.mxu0 }
 0xab6   :  { %v7104_v32 = vpop.f32.mrf.mxu0 }
 0xab7   :  { %v4061_v32 = vadd.f32 %v4060_v41, %v10813_v43 }
 0xab8   :  { %v4070_v20 = vpop.f32.mrf.mxu0 }
 0xaba   :  { %v7107_v12 = vpop.f32.mrf.mxu0 }
 0xabc   :  { %v4075_v51 = vpop.f32.mrf.mxu0 }
 0xabe   :  { %v7110_v52 = vpop.f32.mrf.mxu0 }
 0xabf   :  { %v4066_v52 = vadd.f32 %v4065_v58, %v10815_v9 }
 0xaf2   :  { %v4266_v49 = vpop.f32.mrf.mxu0 }
 0xaf3   :  { %v10959_v40 = vadd.f32 %v4266_v49, %v4046_v16  ;;  %v4071_v49 = vadd.f32 %v4070_v20, %v10817_v47 }
 0xaf4   :  { %v7121_v19 = vpop.f32.mrf.mxu0 }
 0xaf6   :  { %v4271_v29 = vpop.f32.mrf.mxu0 }
 0xaf7   :  { %v10962_v48 = vadd.f32 %v4271_v29, %v4051_v11  ;;  %v4076_v11 = vadd.f32 %v4075_v51, %v10819_v46 }
 0xaf8   :  { %v7124_v14 = vpop.f32.mrf.mxu0 }
 0xafa   :  { %v4276_v23 = vpop.f32.mrf.mxu0 }
 0xafb   :  { %v10965_v22 = vadd.f32 %v4276_v23, %v4056_v57 }
 0xafc   :  { %v7127_v33 = vpop.f32.mrf.mxu0 }
 0xafe   :  { %v4281_v12 = vpop.f32.mrf.mxu0 }
 0xaff   :  { %v10968_v63 = vadd.f32 %v4281_v12, %v4061_v32 }
 0xb00   :  { %v7130_v21 = vpop.f32.mrf.mxu0 }
 0xb02   :  { %v4286_v16 = vpop.f32.mrf.mxu0 }
 0xb03   :  { %v10971_v10 = vadd.f32 %v4286_v16, %v4066_v52  ;;  %v7396_v52 = vld [vmem:[%s11905_s5 + $0x1c8] sm:$0xff] }
 0xb04   :  { %v7133_v56 = vpop.f32.mrf.mxu0 }
 0xb05   :  { %v7397_v56 = vld [vmem:[%s11905_s5 + $0x1c0] sm:$0xff] }
 0xb06   :  { %v4291_v19 = vpop.f32.mrf.mxu0 }
 0xb07   :  { %v10974_v31 = vadd.f32 %v4291_v19, %v4071_v49  ;;  %v7398_v49 = vld [vmem:[%s11905_s5 + $0x1d8] sm:$0xff] }
 0xb08   :  { %v7136_v55 = vpop.f32.mrf.mxu0  ;;  %v7399_v19 = vld [vmem:[%s11908_s6 + $0xb8] sm:$0xff] }
 0xb09   :  { %v7400_v55 = vld [vmem:[%s11908_s6 + $0xb0] sm:$0xff] }
 0xb0a   :  { %v4296_v29 = vpop.f32.mrf.mxu0 }
 0xb0b   :  { %v10977_v43 = vadd.f32 %v4296_v29, %v4076_v11  ;;  %v7401_v11 = vld [vmem:[%s11905_s5 + $0x1d0] sm:$0xff]  ;;  %v7402_v29 = vld [vmem:[%s11905_s5 + $0x1e8] sm:$0xff] }
 0xb0c   :  { %v7139_v41 = vpop.f32.mrf.mxu0 }
 0xb0d   :  { %v7403_v41 = vld [vmem:[%s11908_s6 + $0xa8] sm:$0xff] }
 0xb24   :  { %v4373_v14 = vpop.f32.mrf.mxu0 }
 0xb25   :  { %7149 = vmatmul.mubr.msk.f32.vlgmr.msra.gmra.mxu1 %vm559_vm3, %v4373_v14  ;;  %v7404_v14 = vld [vmem:[%s11908_s6 + $0xa0] sm:$0xff] }
 0xb26   :  { %4536 = vmatpush1.msra.mxu1 %v8839_v30  ;;  %v4375_v9 = vpop.f32.mrf.mxu0  ;;  %7151 = vmatprep.mubr.msk.f32.mxu1 %vm7484_vm1, %v11976_v45 }
 0xb27   :  { %4537 = vmatprep.subr.mxu1 %v11976_v45  ;;  %v7405_v9 = vld [vmem:[%s11905_s5 + $0x1e0] sm:$0xff] }
 0xb28   :  { %4538 = vmatpush1.msra.mxu1 %v8836_v0  ;;  %v4378_v47 = vpop.f32.mrf.mxu0 }
 0xb29   :  { %4539 = vmatprep.subr.mxu1 %v11976_v45  ;;  %7152 = vmatmul.mubr.msk.f32.gmra.mxu1 %vm559_vm3, %v4378_v47  ;;  %v7406_v47 = vld [vmem:[%s11905_s5 + $0x1f8] sm:$0xff] }
 0xb2a   :  { %4540 = vmatpush1.msra.mxu1 %v8833_v38  ;;  %v4380_v46 = vpop.f32.mrf.mxu0  ;;  %7154 = vmatprep.mubr.msk.f32.mxu1 %vm7484_vm1, %v11976_v45 }
 0xb2b   :  { %4541 = vmatprep.subr.mxu1 %v11976_v45  ;;  %v7407_v46 = vld [vmem:[%s11905_s5 + $0x1f0] sm:$0xff] }
 0xb2c   :  { %4542 = vmatpush1.msra.mxu1 %v8829_v26  ;;  %v4383_v58 = vpop.f32.mrf.mxu0 }
 0xb2d   :  { %4543 = vmatprep.subr.mxu1 %v11976_v45  ;;  %7155 = vmatmul.mubr.msk.f32.gmra.mxu1 %vm559_vm3, %v4383_v58  ;;  %v7408_v58 = vld [vmem:[%s11905_s5 + $0x208] sm:$0xff] }
 0xb2e   :  { %4544 = vmatpush1.msra.mxu1 %v8826_v54  ;;  %v4385_v20 = vpop.f32.mrf.mxu0  ;;  %7157 = vmatprep.mubr.msk.f32.mxu1 %vm7484_vm1, %v11976_v45 }
 0xb2f   :  { %4545 = vmatprep.subr.mxu1 %v11976_v45  ;;  %v7409_v20 = vld [vmem:[%s11905_s5 + $0x200] sm:$0xff] }
 0xb30   :  { %4546 = vmatpush1.msra.mxu1 %v8823_v42  ;;  %v4388_v51 = vpop.f32.mrf.mxu0 }
 0xb31   :  { %4547 = vmatprep.subr.mxu1 %v11976_v45  ;;  %7158 = vmatmul.mubr.msk.f32.gmra.mxu1 %vm559_vm3, %v4388_v51  ;;  %v7410_v51 = vld [vmem:[%s11905_s5 + $0x218] sm:$0xff] }
 0xb32   :  { %4548 = vmatpush1.msra.mxu1 %v8820_v35  ;;  %v4390_v57 = vpop.f32.mrf.mxu0  ;;  %7160 = vmatprep.mubr.msk.f32.mxu1 %vm7484_vm1, %v11976_v45 }
 0xb33   :  { %4549 = vmatprep.subr.mxu1 %v11976_v45  ;;  %v7411_v57 = vld [vmem:[%s11905_s5 + $0x210] sm:$0xff] }
 0xb34   :  { %4550 = vmatpush1.msra.mxu1 %v8816_v6  ;;  %v4393_v23 = vpop.f32.mrf.mxu0 }
 0xb35   :  { %4551 = vmatprep.subr.mxu1 %v11976_v45  ;;  %7161 = vmatmul.mubr.msk.f32.gmra.mxu1 %vm559_vm3, %v4393_v23  ;;  %v7412_v23 = vld [vmem:[%s11905_s5 + $0x228] sm:$0x1] }
 0xb36   :  { %4552 = vmatpush1.msra.mxu1 %v8813_v3  ;;  %v4395_v33 = vpop.f32.mrf.mxu0  ;;  %7163 = vmatprep.mubr.msk.f32.mxu1 %vm7484_vm1, %v11976_v45 }
 0xb37   :  { %4553 = vmatprep.subr.mxu1 %v11976_v45  ;;  %v7413_v33 = vld [vmem:[%s11905_s5 + $0x220] sm:$0x1] }
 0xb38   :  { %4554 = vmatpush1.msra.mxu1 %v8810_v2  ;;  %v4398_v32 = vpop.f32.mrf.mxu0 }
 0xb39   :  { %4555 = vmatprep.subr.mxu1 %v11976_v45  ;;  %7164 = vmatmul.mubr.msk.f32.gmra.mxu1 %vm559_vm3, %v4398_v32 }
 0xb3a   :  { %4556 = vmatpush1.msra.mxu1 %v12012_v15  ;;  %v4400_v12 = vpop.f32.mrf.mxu0  ;;  %7166 = vmatprep.mubr.msk.f32.mxu1 %vm7484_vm1, %v11976_v45 }
 0xb3b   :  { %4557 = vmatprep.subr.mxu1 %v11976_v45 }
 0xb3c   :  { %4558 = vmatpush1.msra.mxu1 %v12014_v62  ;;  %v4403_v21 = vpop.f32.mrf.mxu0 }
 0xb3d   :  { %4559 = vmatprep.subr.mxu1 %v11976_v45  ;;  %7167 = vmatmul.mubr.msk.f32.gmra.mxu1 %vm559_vm3, %v4403_v21 }
 0xb3e   :  { %4560 = vmatpush1.msra.mxu1 %v12015_v36  ;;  %6309 = vmatprep.mubr.msk.f32.mxu1 %vm1142_vm4, %v7396_v52  ;;  %v4405_v16 = vpop.f32.mrf.mxu0 }
 0xb3f   :  { %4561 = vmatprep.subr.mxu1 %v11976_v45 }
 0xb40   :  { %4562 = vmatpush1.msra.mxu1 %v12016_v37 }
 0xb41   :  { %4563 = vmatprep.subr.mxu1 %v11976_v45 }
 0xb42   :  { %4564 = vmatpush1.msra.mxu1 %v12017_v4 }
 0xb43   :  { %4565 = vmatprep.subr.mxu1 %v11976_v45 }
 0xb44   :  { %4566 = vmatpush1.msra.mxu1 %v10309_v50 }
 0xb45   :  { %4581 = vmatprep.subr.mxu1 %v11976_v45 }
 0xb46   :  { %6308 = vmatpush2.msk.msra.mxu1 %vm1164_vm5, %v10305_v1 }
 0xb47   :  { %4583 = vmatprep.subr.mxu1 %v11976_v45 }
 0xb48   :  { %4584 = vmatpush2.msra.mxu1 %v10320_v28 }
 0xb49   :  { %4585 = vmatprep.subr.mxu1 %v11976_v45 }
 0xb4a   :  { %4586 = vmatpush2.msra.mxu1 %v12020_v59 }
 0xb4b   :  { %4587 = vmatprep.subr.mxu1 %v11976_v45 }
 0xb4c   :  { %4588 = vmatpush2.msra.mxu1 %v12021_v61 }
 0xb4d   :  { %4589 = vmatprep.subr.mxu1 %v11976_v45 }
 0xb4e   :  { %4590 = vmatpush2.msra.mxu1 %v12022_v18 }
 0xb4f   :  { %4591 = vmatprep.subr.mxu1 %v11976_v45 }
 0xb50   :  { %4592 = vmatpush2.msra.mxu1 %v12023_v34 }
 0xb51   :  { %4593 = vmatprep.subr.mxu1 %v11976_v45 }
 0xb52   :  { %4594 = vmatpush2.msra.mxu1 %v12024_v39 }
 0xb53   :  { %4595 = vmatprep.subr.mxu1 %v11976_v45 }
 0xb54   :  { %4596 = vmatpush2.msra.mxu1 %v12025_v5 }
 0xb55   :  { %4597 = vmatprep.subr.mxu1 %v11976_v45 }
 0xb56   :  { %4598 = vmatpush2.msra.mxu1 %v12026_v53 }
 0xb57   :  { %4600 = vmatmul.mubr.f32.vlgmr.msra.gmra.mxu1 %v7397_v56  ;;  %7198 = vmatprep.subr.mxu1 %v11976_v45 }
 0xb58   :  { %6310 = vmatprep.mubr.msk.f32.mxu1 %vm1142_vm4, %v7398_v49  ;;  %7199 = vmatpush3.msra.mxu1 %v7399_v19 }
 0xb59   :  { %7200 = vmatprep.subr.mxu1 %v11976_v45 }
 0xb5a   :  { %7201 = vmatpush3.msra.mxu1 %v7400_v55 }
 0xb5b   :  { %4605 = vmatmul.mubr.f32.gmra.mxu1 %v7401_v11  ;;  %7202 = vmatprep.subr.mxu1 %v11976_v45 }
 0xb5c   :  { %6311 = vmatprep.mubr.msk.f32.mxu1 %vm1142_vm4, %v7402_v29  ;;  %7203 = vmatpush3.msra.mxu1 %v7403_v41 }
 0xb5d   :  { %7204 = vmatprep.subr.mxu1 %v11976_v45 }
 0xb5e   :  { %7205 = vmatpush3.msra.mxu1 %v7404_v14 }
 0xb5f   :  { %4610 = vmatmul.mubr.f32.gmra.mxu1 %v7405_v9  ;;  %4991 = vmatprep.subr.mxu1 %v11976_v45 }
 0xb60   :  { %6312 = vmatprep.mubr.msk.f32.mxu1 %vm1142_vm4, %v7406_v47 }
 0xb63   :  { %4615 = vmatmul.mubr.f32.gmra.mxu1 %v7407_v46 }
 0xb64   :  { %6313 = vmatprep.mubr.msk.f32.mxu1 %vm1142_vm4, %v7408_v58 }
 0xb67   :  { %4620 = vmatmul.mubr.f32.gmra.mxu1 %v7409_v20 }
 0xb68   :  { %6314 = vmatprep.mubr.msk.f32.mxu1 %vm1142_vm4, %v7410_v51 }
 0xb6b   :  { %4625 = vmatmul.mubr.f32.gmra.mxu1 %v7411_v57 }
 0xb6c   :  { %6315 = vmatprep.mubr.msk.f32.mxu1 %vm1142_vm4, %v7412_v23 }
 0xb6f   :  { %4630 = vmatmul.mubr.f32.gmra.mxu1 %v7413_v33 }
 0xb70   :  { %7206 = vmatprep.mubr.msk.f32.mxu1 %vm7484_vm1, %v11976_v45 }
 0xbe5   :  { %v4494_v32 = vpop.f32.mrf.mxu1 }
 0xbe6   :  { %v11117_v12 = vadd.f32 %v4494_v32, %v10959_v40 }
 0xbe7   :  { %v7150_v21 = vpop.f32.mrf.mxu1 }
 0xbe9   :  { %v4499_v52 = vpop.f32.mrf.mxu1 }
 0xbea   :  { %v11120_v16 = vadd.f32 %v4499_v52, %v10962_v48 }
 0xbeb   :  { %v7153_v56 = vpop.f32.mrf.mxu1 }
 0xbed   :  { %v4504_v49 = vpop.f32.mrf.mxu1 }
 0xbee   :  { %v11123_v19 = vadd.f32 %v4504_v49, %v10965_v22 }
 0xbef   :  { %v7156_v55 = vpop.f32.mrf.mxu1 }
 0xbf0   :  { %v7414_v55 = vld [vmem:[%s11905_s5 + $0x238] sm:$0xff] }
 0xbf1   :  { %v4509_v11 = vpop.f32.mrf.mxu1 }
 0xbf2   :  { %v11126_v29 = vadd.f32 %v4509_v11, %v10968_v63 }
 0xbf3   :  { %v7159_v41 = vpop.f32.mrf.mxu1 }
 0xbf4   :  { %v7415_v41 = vld [vmem:[%s11905_s5 + $0x230] sm:$0xff] }
 0xbf5   :  { %v4514_v14 = vpop.f32.mrf.mxu1 }
 0xbf6   :  { %v11129_v40 = vadd.f32 %v4514_v14, %v10971_v10  ;;  %v7416_v14 = vld [vmem:[%s11905_s5 + $0x248] sm:$0xff] }
 0xbf7   :  { %v7162_v9 = vpop.f32.mrf.mxu1 }
 0xbf8   :  { %v7417_v9 = vld [vmem:[%s11908_s6 + $0xd8] sm:$0xff] }
 0xbf9   :  { %v4519_v47 = vpop.f32.mrf.mxu1 }
 0xbfa   :  { %v11132_v48 = vadd.f32 %v4519_v47, %v10974_v31  ;;  %v7418_v47 = vld [vmem:[%s11908_s6 + $0xd0] sm:$0xff] }
 0xbfb   :  { %v7165_v46 = vpop.f32.mrf.mxu1 }
 0xbfc   :  { %v7419_v46 = vld [vmem:[%s11905_s5 + $0x240] sm:$0xff] }
 0xbfd   :  { %v4524_v58 = vpop.f32.mrf.mxu1 }
 0xbfe   :  { %v11135_v22 = vadd.f32 %v4524_v58, %v10977_v43  ;;  %v7420_v58 = vld [vmem:[%s11905_s5 + $0x258] sm:$0xff] }
 0xbff   :  { %v7168_v20 = vpop.f32.mrf.mxu1 }
 0xc00   :  { %v7421_v20 = vld [vmem:[%s11908_s6 + $0xc8] sm:$0xff] }
 0xc17   :  { %v4601_v51 = vpop.f32.mrf.mxu1 }
 0xc18   :  { %7178 = vmatmul.mubr.msk.f32.vlgmr.msra.gmra.mxu0 %vm559_vm3, %v4601_v51  ;;  %v7422_v51 = vld [vmem:[%s11908_s6 + $0xc0] sm:$0xff] }
 0xc19   :  { %4764 = vmatpush1.msra.mxu0 %v8839_v30  ;;  %v4603_v63 = vpop.f32.mrf.mxu1  ;;  %7180 = vmatprep.mubr.msk.f32.mxu0 %vm7484_vm1, %v11976_v45 }
 0xc1a   :  { %4765 = vmatprep.subr.mxu0 %v11976_v45  ;;  %v7423_v63 = vld [vmem:[%s11905_s5 + $0x250] sm:$0xff] }
 0xc1b   :  { %4766 = vmatpush1.msra.mxu0 %v8836_v0  ;;  %v4606_v10 = vpop.f32.mrf.mxu1 }
 0xc1c   :  { %4767 = vmatprep.subr.mxu0 %v11976_v45  ;;  %7181 = vmatmul.mubr.msk.f32.gmra.mxu0 %vm559_vm3, %v4606_v10  ;;  %v7424_v10 = vld [vmem:[%s11905_s5 + $0x268] sm:$0xff] }
 0xc1d   :  { %4768 = vmatpush1.msra.mxu0 %v8833_v38  ;;  %v4608_v31 = vpop.f32.mrf.mxu1  ;;  %7183 = vmatprep.mubr.msk.f32.mxu0 %vm7484_vm1, %v11976_v45 }
 0xc1e   :  { %4769 = vmatprep.subr.mxu0 %v11976_v45  ;;  %v7425_v31 = vld [vmem:[%s11905_s5 + $0x260] sm:$0xff] }
 0xc1f   :  { %4770 = vmatpush1.msra.mxu0 %v8829_v26  ;;  %v4611_v43 = vpop.f32.mrf.mxu1 }
 0xc20   :  { %4771 = vmatprep.subr.mxu0 %v11976_v45  ;;  %7184 = vmatmul.mubr.msk.f32.gmra.mxu0 %vm559_vm3, %v4611_v43  ;;  %v7426_v43 = vld [vmem:[%s11905_s5 + $0x278] sm:$0xff] }
 0xc21   :  { %4772 = vmatpush1.msra.mxu0 %v8826_v54  ;;  %v4613_v57 = vpop.f32.mrf.mxu1  ;;  %7186 = vmatprep.mubr.msk.f32.mxu0 %vm7484_vm1, %v11976_v45 }
 0xc22   :  { %4773 = vmatprep.subr.mxu0 %v11976_v45  ;;  %v7427_v57 = vld [vmem:[%s11905_s5 + $0x270] sm:$0xff] }
 0xc23   :  { %4774 = vmatpush1.msra.mxu0 %v8823_v42  ;;  %v4616_v23 = vpop.f32.mrf.mxu1 }
 0xc24   :  { %4775 = vmatprep.subr.mxu0 %v11976_v45  ;;  %7187 = vmatmul.mubr.msk.f32.gmra.mxu0 %vm559_vm3, %v4616_v23  ;;  %v7428_v23 = vld [vmem:[%s11905_s5 + $0x288] sm:$0xff] }
 0xc25   :  { %4776 = vmatpush1.msra.mxu0 %v8820_v35  ;;  %v4618_v33 = vpop.f32.mrf.mxu1  ;;  %7189 = vmatprep.mubr.msk.f32.mxu0 %vm7484_vm1, %v11976_v45 }
 0xc26   :  { %4777 = vmatprep.subr.mxu0 %v11976_v45  ;;  %v7429_v33 = vld [vmem:[%s11905_s5 + $0x280] sm:$0xff] }
 0xc27   :  { %4778 = vmatpush1.msra.mxu0 %v8816_v6  ;;  %v4621_v32 = vpop.f32.mrf.mxu1 }
 0xc28   :  { %4779 = vmatprep.subr.mxu0 %v11976_v45  ;;  %7190 = vmatmul.mubr.msk.f32.gmra.mxu0 %vm559_vm3, %v4621_v32  ;;  %v7430_v32 = vld [vmem:[%s11905_s5 + $0x298] sm:$0x1] }
 0xc29   :  { %4780 = vmatpush1.msra.mxu0 %v8813_v3  ;;  %v4623_v21 = vpop.f32.mrf.mxu1  ;;  %7192 = vmatprep.mubr.msk.f32.mxu0 %vm7484_vm1, %v11976_v45 }
 0xc2a   :  { %4781 = vmatprep.subr.mxu0 %v11976_v45  ;;  %v7431_v21 = vld [vmem:[%s11905_s5 + $0x290] sm:$0x1] }
 0xc2b   :  { %4782 = vmatpush1.msra.mxu0 %v8810_v2  ;;  %v4626_v52 = vpop.f32.mrf.mxu1 }
 0xc2c   :  { %4783 = vmatprep.subr.mxu0 %v11976_v45  ;;  %7193 = vmatmul.mubr.msk.f32.gmra.mxu0 %vm559_vm3, %v4626_v52 }
 0xc2d   :  { %4784 = vmatpush1.msra.mxu0 %v12012_v15  ;;  %v4628_v56 = vpop.f32.mrf.mxu1  ;;  %7195 = vmatprep.mubr.msk.f32.mxu0 %vm7484_vm1, %v11976_v45 }
 0xc2e   :  { %4785 = vmatprep.subr.mxu0 %v11976_v45 }
 0xc2f   :  { %4786 = vmatpush1.msra.mxu0 %v12014_v62  ;;  %v4631_v49 = vpop.f32.mrf.mxu1 }
 0xc30   :  { %4787 = vmatprep.subr.mxu0 %v11976_v45  ;;  %7196 = vmatmul.mubr.msk.f32.gmra.mxu0 %vm559_vm3, %v4631_v49 }
 0xc31   :  { %4788 = vmatpush1.msra.mxu0 %v12015_v36  ;;  %6324 = vmatprep.mubr.msk.f32.mxu0 %vm1142_vm4, %v7414_v55  ;;  %v4633_v11 = vpop.f32.mrf.mxu1 }
 0xc32   :  { %4789 = vmatprep.subr.mxu0 %v11976_v45 }
 0xc33   :  { %4790 = vmatpush1.msra.mxu0 %v12016_v37 }
 0xc34   :  { %4791 = vmatprep.subr.mxu0 %v11976_v45 }
 0xc35   :  { %4792 = vmatpush1.msra.mxu0 %v12017_v4 }
 0xc36   :  { %4793 = vmatprep.subr.mxu0 %v11976_v45 }
 0xc37   :  { %4794 = vmatpush1.msra.mxu0 %v10309_v50 }
 0xc38   :  { %4809 = vmatprep.subr.mxu0 %v11976_v45 }
 0xc39   :  { %6323 = vmatpush2.msk.msra.mxu0 %vm1164_vm5, %v10305_v1 }
 0xc3a   :  { %4811 = vmatprep.subr.mxu0 %v11976_v45 }
 0xc3b   :  { %4812 = vmatpush2.msra.mxu0 %v10320_v28 }
 0xc3c   :  { %4813 = vmatprep.subr.mxu0 %v11976_v45 }
 0xc3d   :  { %4814 = vmatpush2.msra.mxu0 %v12020_v59 }
 0xc3e   :  { %4815 = vmatprep.subr.mxu0 %v11976_v45 }
 0xc3f   :  { %4816 = vmatpush2.msra.mxu0 %v12021_v61 }
 0xc40   :  { %4817 = vmatprep.subr.mxu0 %v11976_v45 }
 0xc41   :  { %4818 = vmatpush2.msra.mxu0 %v12022_v18 }
 0xc42   :  { %4819 = vmatprep.subr.mxu0 %v11976_v45 }
 0xc43   :  { %4820 = vmatpush2.msra.mxu0 %v12023_v34 }
 0xc44   :  { %4821 = vmatprep.subr.mxu0 %v11976_v45 }
 0xc45   :  { %4822 = vmatpush2.msra.mxu0 %v12024_v39 }
 0xc46   :  { %4823 = vmatprep.subr.mxu0 %v11976_v45 }
 0xc47   :  { %4824 = vmatpush2.msra.mxu0 %v12025_v5 }
 0xc48   :  { %4825 = vmatprep.subr.mxu0 %v11976_v45 }
 0xc49   :  { %4826 = vmatpush2.msra.mxu0 %v12026_v53 }
 0xc4a   :  { %4828 = vmatmul.mubr.f32.vlgmr.msra.gmra.mxu0 %v7415_v41  ;;  %7227 = vmatprep.subr.mxu0 %v11976_v45 }
 0xc4b   :  { %6325 = vmatprep.mubr.msk.f32.mxu0 %vm1142_vm4, %v7416_v14  ;;  %7228 = vmatpush3.msra.mxu0 %v7417_v9 }
 0xc4c   :  { %7229 = vmatprep.subr.mxu0 %v11976_v45 }
 0xc4d   :  { %7230 = vmatpush3.msra.mxu0 %v7418_v47 }
 0xc4e   :  { %4833 = vmatmul.mubr.f32.gmra.mxu0 %v7419_v46  ;;  %7231 = vmatprep.subr.mxu0 %v11976_v45 }
 0xc4f   :  { %6326 = vmatprep.mubr.msk.f32.mxu0 %vm1142_vm4, %v7420_v58  ;;  %7232 = vmatpush3.msra.mxu0 %v7421_v20 }
 0xc50   :  { %7233 = vmatprep.subr.mxu0 %v11976_v45 }
 0xc51   :  { %7234 = vmatpush3.msra.mxu0 %v7422_v51 }
 0xc52   :  { %4838 = vmatmul.mubr.f32.gmra.mxu0 %v7423_v63  ;;  %5219 = vmatprep.subr.mxu0 %v11976_v45 }
 0xc53   :  { %6327 = vmatprep.mubr.msk.f32.mxu0 %vm1142_vm4, %v7424_v10 }
 0xc56   :  { %4843 = vmatmul.mubr.f32.gmra.mxu0 %v7425_v31 }
 0xc57   :  { %6328 = vmatprep.mubr.msk.f32.mxu0 %vm1142_vm4, %v7426_v43 }
 0xc5a   :  { %4848 = vmatmul.mubr.f32.gmra.mxu0 %v7427_v57 }
 0xc5b   :  { %6329 = vmatprep.mubr.msk.f32.mxu0 %vm1142_vm4, %v7428_v23 }
 0xc5e   :  { %4853 = vmatmul.mubr.f32.gmra.mxu0 %v7429_v33 }
 0xc5f   :  { %6330 = vmatprep.mubr.msk.f32.mxu0 %vm1142_vm4, %v7430_v32 }
 0xc62   :  { %4858 = vmatmul.mubr.f32.gmra.mxu0 %v7431_v21 }
 0xc63   :  { %7235 = vmatprep.mubr.msk.f32.mxu0 %vm7484_vm1, %v11976_v45 }
 0xcd8   :  { %v4722_v52 = vpop.f32.mrf.mxu0 }
 0xcd9   :  { %v11275_v56 = vadd.f32 %v4722_v52, %v11117_v12 }
 0xcda   :  { %v7179_v49 = vpop.f32.mrf.mxu0 }
 0xcdc   :  { %v4727_v55 = vpop.f32.mrf.mxu0 }
 0xcdd   :  { %v11278_v11 = vadd.f32 %v4727_v55, %v11120_v16 }
 0xcde   :  { %v7182_v41 = vpop.f32.mrf.mxu0 }
 0xce0   :  { %v4732_v14 = vpop.f32.mrf.mxu0 }
 0xce1   :  { %v11281_v9 = vadd.f32 %v4732_v14, %v11123_v19 }
 0xce2   :  { %v7185_v47 = vpop.f32.mrf.mxu0 }
 0xce3   :  { %v7432_v47 = vld [vmem:[%s11905_s5 + $0x2a8] sm:$0xff] }
 0xce4   :  { %v4737_v46 = vpop.f32.mrf.mxu0 }
 0xce5   :  { %v11284_v58 = vadd.f32 %v4737_v46, %v11126_v29 }
 0xce6   :  { %v7188_v20 = vpop.f32.mrf.mxu0 }
 0xce7   :  { %v7433_v20 = vld [vmem:[%s11905_s5 + $0x2a0] sm:$0xff] }
 0xce8   :  { %v4742_v51 = vpop.f32.mrf.mxu0 }
 0xce9   :  { %v11287_v12 = vadd.f32 %v4742_v51, %v11129_v40  ;;  %v7434_v51 = vld [vmem:[%s11905_s5 + $0x2b8] sm:$0xff] }
 0xcea   :  { %v7191_v63 = vpop.f32.mrf.mxu0 }
 0xceb   :  { %v7435_v63 = vld [vmem:[%s11908_s6 + $0xf8] sm:$0xff] }
 0xcec   :  { %v4747_v10 = vpop.f32.mrf.mxu0 }
 0xced   :  { %v11290_v16 = vadd.f32 %v4747_v10, %v11132_v48  ;;  %v7436_v10 = vld [vmem:[%s11908_s6 + $0xf0] sm:$0xff] }
 0xcee   :  { %v7194_v31 = vpop.f32.mrf.mxu0 }
 0xcef   :  { %v7437_v31 = vld [vmem:[%s11905_s5 + $0x2b0] sm:$0xff] }
 0xcf0   :  { %v4752_v43 = vpop.f32.mrf.mxu0 }
 0xcf1   :  { %v11293_v19 = vadd.f32 %v4752_v43, %v11135_v22  ;;  %v7438_v43 = vld [vmem:[%s11905_s5 + $0x2c8] sm:$0xff] }
 0xcf2   :  { %v7197_v57 = vpop.f32.mrf.mxu0 }
 0xcf3   :  { %v7439_v57 = vld [vmem:[%s11908_s6 + $0xe8] sm:$0xff] }
 0xd0a   :  { %v4829_v23 = vpop.f32.mrf.mxu0 }
 0xd0b   :  { %7207 = vmatmul.mubr.msk.f32.vlgmr.msra.gmra.mxu1 %vm559_vm3, %v4829_v23  ;;  %v7440_v23 = vld [vmem:[%s11908_s6 + $0xe0] sm:$0xff] }
 0xd0c   :  { %4992 = vmatpush1.msra.mxu1 %v8839_v30  ;;  %v4831_v29 = vpop.f32.mrf.mxu0  ;;  %7209 = vmatprep.mubr.msk.f32.mxu1 %vm7484_vm1, %v11976_v45 }
 0xd0d   :  { %4993 = vmatprep.subr.mxu1 %v11976_v45  ;;  %v7441_v29 = vld [vmem:[%s11905_s5 + $0x2c0] sm:$0xff] }
 0xd0e   :  { %4994 = vmatpush1.msra.mxu1 %v8836_v0  ;;  %v4834_v40 = vpop.f32.mrf.mxu0 }
 0xd0f   :  { %4995 = vmatprep.subr.mxu1 %v11976_v45  ;;  %7210 = vmatmul.mubr.msk.f32.gmra.mxu1 %vm559_vm3, %v4834_v40  ;;  %v7442_v40 = vld [vmem:[%s11905_s5 + $0x2d8] sm:$0xff] }
 0xd10   :  { %4996 = vmatpush1.msra.mxu1 %v8833_v38  ;;  %v4836_v48 = vpop.f32.mrf.mxu0  ;;  %7212 = vmatprep.mubr.msk.f32.mxu1 %vm7484_vm1, %v11976_v45 }
 0xd11   :  { %4997 = vmatprep.subr.mxu1 %v11976_v45  ;;  %v7443_v48 = vld [vmem:[%s11905_s5 + $0x2d0] sm:$0xff] }
 0xd12   :  { %4998 = vmatpush1.msra.mxu1 %v8829_v26  ;;  %v4839_v22 = vpop.f32.mrf.mxu0 }
 0xd13   :  { %4999 = vmatprep.subr.mxu1 %v11976_v45  ;;  %7213 = vmatmul.mubr.msk.f32.gmra.mxu1 %vm559_vm3, %v4839_v22  ;;  %v7444_v22 = vld [vmem:[%s11905_s5 + $0x2e8] sm:$0xff] }
 0xd14   :  { %5000 = vmatpush1.msra.mxu1 %v8826_v54  ;;  %v4841_v33 = vpop.f32.mrf.mxu0  ;;  %7215 = vmatprep.mubr.msk.f32.mxu1 %vm7484_vm1, %v11976_v45 }
 0xd15   :  { %5001 = vmatprep.subr.mxu1 %v11976_v45  ;;  %v7445_v33 = vld [vmem:[%s11905_s5 + $0x2e0] sm:$0xff] }
 0xd16   :  { %5002 = vmatpush1.msra.mxu1 %v8823_v42  ;;  %v4844_v32 = vpop.f32.mrf.mxu0 }
 0xd17   :  { %5003 = vmatprep.subr.mxu1 %v11976_v45  ;;  %7216 = vmatmul.mubr.msk.f32.gmra.mxu1 %vm559_vm3, %v4844_v32  ;;  %v7446_v32 = vld [vmem:[%s11905_s5 + $0x2f8] sm:$0xff] }
 0xd18   :  { %5004 = vmatpush1.msra.mxu1 %v8820_v35  ;;  %v4846_v21 = vpop.f32.mrf.mxu0  ;;  %7218 = vmatprep.mubr.msk.f32.mxu1 %vm7484_vm1, %v11976_v45 }
 0xd19   :  { %5005 = vmatprep.subr.mxu1 %v11976_v45  ;;  %v7447_v21 = vld [vmem:[%s11905_s5 + $0x2f0] sm:$0xff] }
 0xd1a   :  { %5006 = vmatpush1.msra.mxu1 %v8816_v6  ;;  %v4849_v52 = vpop.f32.mrf.mxu0 }
 0xd1b   :  { %5007 = vmatprep.subr.mxu1 %v11976_v45  ;;  %7219 = vmatmul.mubr.msk.f32.gmra.mxu1 %vm559_vm3, %v4849_v52  ;;  %v7448_v52 = vld [vmem:[%s11905_s5 + $0x308] sm:$0x1] }
 0xd1c   :  { %5008 = vmatpush1.msra.mxu1 %v8813_v3  ;;  %v4851_v49 = vpop.f32.mrf.mxu0  ;;  %7221 = vmatprep.mubr.msk.f32.mxu1 %vm7484_vm1, %v11976_v45 }
 0xd1d   :  { %5009 = vmatprep.subr.mxu1 %v11976_v45  ;;  %v7449_v49 = vld [vmem:[%s11905_s5 + $0x300] sm:$0x1] }
 0xd1e   :  { %5010 = vmatpush1.msra.mxu1 %v8810_v2  ;;  %v4854_v55 = vpop.f32.mrf.mxu0 }
 0xd1f   :  { %5011 = vmatprep.subr.mxu1 %v11976_v45  ;;  %7222 = vmatmul.mubr.msk.f32.gmra.mxu1 %vm559_vm3, %v4854_v55 }
 0xd20   :  { %5012 = vmatpush1.msra.mxu1 %v12012_v15  ;;  %v4856_v41 = vpop.f32.mrf.mxu0  ;;  %7224 = vmatprep.mubr.msk.f32.mxu1 %vm7484_vm1, %v11976_v45 }
 0xd21   :  { %5013 = vmatprep.subr.mxu1 %v11976_v45 }
 0xd22   :  { %5014 = vmatpush1.msra.mxu1 %v12014_v62  ;;  %v4859_v14 = vpop.f32.mrf.mxu0 }
 0xd23   :  { %5015 = vmatprep.subr.mxu1 %v11976_v45  ;;  %7225 = vmatmul.mubr.msk.f32.gmra.mxu1 %vm559_vm3, %v4859_v14 }
 0xd24   :  { %5016 = vmatpush1.msra.mxu1 %v12015_v36  ;;  %6339 = vmatprep.mubr.msk.f32.mxu1 %vm1142_vm4, %v7432_v47  ;;  %v4861_v46 = vpop.f32.mrf.mxu0 }
 0xd25   :  { %5017 = vmatprep.subr.mxu1 %v11976_v45 }
 0xd26   :  { %5018 = vmatpush1.msra.mxu1 %v12016_v37 }
 0xd27   :  { %5019 = vmatprep.subr.mxu1 %v11976_v45 }
 0xd28   :  { %5020 = vmatpush1.msra.mxu1 %v12017_v4 }
 0xd29   :  { %5021 = vmatprep.subr.mxu1 %v11976_v45 }
 0xd2a   :  { %5022 = vmatpush1.msra.mxu1 %v10309_v50 }
 0xd2b   :  { %5037 = vmatprep.subr.mxu1 %v11976_v45 }
 0xd2c   :  { %6338 = vmatpush2.msk.msra.mxu1 %vm1164_vm5, %v10305_v1 }
 0xd2d   :  { %5039 = vmatprep.subr.mxu1 %v11976_v45 }
 0xd2e   :  { %5040 = vmatpush2.msra.mxu1 %v10320_v28 }
 0xd2f   :  { %5041 = vmatprep.subr.mxu1 %v11976_v45 }
 0xd30   :  { %5042 = vmatpush2.msra.mxu1 %v12020_v59 }
 0xd31   :  { %5043 = vmatprep.subr.mxu1 %v11976_v45 }
 0xd32   :  { %5044 = vmatpush2.msra.mxu1 %v12021_v61 }
 0xd33   :  { %5045 = vmatprep.subr.mxu1 %v11976_v45 }
 0xd34   :  { %5046 = vmatpush2.msra.mxu1 %v12022_v18 }
 0xd35   :  { %5047 = vmatprep.subr.mxu1 %v11976_v45 }
 0xd36   :  { %5048 = vmatpush2.msra.mxu1 %v12023_v34 }
 0xd37   :  { %5049 = vmatprep.subr.mxu1 %v11976_v45 }
 0xd38   :  { %5050 = vmatpush2.msra.mxu1 %v12024_v39 }
 0xd39   :  { %5051 = vmatprep.subr.mxu1 %v11976_v45 }
 0xd3a   :  { %5052 = vmatpush2.msra.mxu1 %v12025_v5 }
 0xd3b   :  { %5053 = vmatprep.subr.mxu1 %v11976_v45 }
 0xd3c   :  { %5054 = vmatpush2.msra.mxu1 %v12026_v53 }
 0xd3d   :  { %5056 = vmatmul.mubr.f32.vlgmr.msra.gmra.mxu1 %v7433_v20  ;;  %7256 = vmatprep.subr.mxu1 %v11976_v45 }
 0xd3e   :  { %6340 = vmatprep.mubr.msk.f32.mxu1 %vm1142_vm4, %v7434_v51  ;;  %7257 = vmatpush3.msra.mxu1 %v7435_v63 }
 0xd3f   :  { %7258 = vmatprep.subr.mxu1 %v11976_v45 }
 0xd40   :  { %7259 = vmatpush3.msra.mxu1 %v7436_v10 }
 0xd41   :  { %5061 = vmatmul.mubr.f32.gmra.mxu1 %v7437_v31  ;;  %7260 = vmatprep.subr.mxu1 %v11976_v45 }
 0xd42   :  { %6341 = vmatprep.mubr.msk.f32.mxu1 %vm1142_vm4, %v7438_v43  ;;  %7261 = vmatpush3.msra.mxu1 %v7439_v57 }
 0xd43   :  { %7262 = vmatprep.subr.mxu1 %v11976_v45 }
 0xd44   :  { %7263 = vmatpush3.msra.mxu1 %v7440_v23 }
 0xd45   :  { %5066 = vmatmul.mubr.f32.gmra.mxu1 %v7441_v29  ;;  %5447 = vmatprep.subr.mxu1 %v11976_v45 }
 0xd46   :  { %6342 = vmatprep.mubr.msk.f32.mxu1 %vm1142_vm4, %v7442_v40 }
 0xd49   :  { %5071 = vmatmul.mubr.f32.gmra.mxu1 %v7443_v48 }
 0xd4a   :  { %6343 = vmatprep.mubr.msk.f32.mxu1 %vm1142_vm4, %v7444_v22 }
 0xd4d   :  { %5076 = vmatmul.mubr.f32.gmra.mxu1 %v7445_v33 }
 0xd4e   :  { %6344 = vmatprep.mubr.msk.f32.mxu1 %vm1142_vm4, %v7446_v32 }
 0xd51   :  { %5081 = vmatmul.mubr.f32.gmra.mxu1 %v7447_v21 }
 0xd52   :  { %6345 = vmatprep.mubr.msk.f32.mxu1 %vm1142_vm4, %v7448_v52 }
 0xd55   :  { %5086 = vmatmul.mubr.f32.gmra.mxu1 %v7449_v49 }
 0xd56   :  { %7264 = vmatprep.mubr.msk.f32.mxu1 %vm7484_vm1, %v11976_v45 }
 0xdcb   :  { %v4950_v55 = vpop.f32.mrf.mxu1 }
 0xdcc   :  { %v11433_v41 = vadd.f32 %v4950_v55, %v11275_v56 }
 0xdcd   :  { %v7208_v14 = vpop.f32.mrf.mxu1 }
 0xdcf   :  { %v4955_v47 = vpop.f32.mrf.mxu1 }
 0xdd0   :  { %v11436_v46 = vadd.f32 %v4955_v47, %v11278_v11 }
 0xdd1   :  { %v7211_v20 = vpop.f32.mrf.mxu1 }
 0xdd3   :  { %v4960_v51 = vpop.f32.mrf.mxu1 }
 0xdd4   :  { %v11439_v63 = vadd.f32 %v4960_v51, %v11281_v9 }
 0xdd5   :  { %v7214_v10 = vpop.f32.mrf.mxu1 }
 0xdd6   :  { %v7450_v10 = vld [vmem:[%s11905_s5 + $0x318] sm:$0xff] }
 0xdd7   :  { %v4965_v31 = vpop.f32.mrf.mxu1 }
 0xdd8   :  { %v11442_v43 = vadd.f32 %v4965_v31, %v11284_v58 }
 0xdd9   :  { %v7217_v57 = vpop.f32.mrf.mxu1 }
 0xdda   :  { %v7451_v57 = vld [vmem:[%s11905_s5 + $0x310] sm:$0xff] }
 0xddb   :  { %v4970_v23 = vpop.f32.mrf.mxu1 }
 0xddc   :  { %v11445_v56 = vadd.f32 %v4970_v23, %v11287_v12  ;;  %v7452_v23 = vld [vmem:[%s11905_s5 + $0x328] sm:$0xff] }
 0xddd   :  { %v7220_v29 = vpop.f32.mrf.mxu1 }
 0xdde   :  { %v7453_v29 = vld [vmem:[%s11908_s6 + $0x118] sm:$0xff] }
 0xddf   :  { %v4975_v40 = vpop.f32.mrf.mxu1 }
 0xde0   :  { %v11448_v11 = vadd.f32 %v4975_v40, %v11290_v16  ;;  %v7454_v40 = vld [vmem:[%s11908_s6 + $0x110] sm:$0xff] }
 0xde1   :  { %v7223_v48 = vpop.f32.mrf.mxu1 }
 0xde2   :  { %v7455_v48 = vld [vmem:[%s11905_s5 + $0x320] sm:$0xff] }
 0xde3   :  { %v4980_v22 = vpop.f32.mrf.mxu1 }
 0xde4   :  { %v11451_v9 = vadd.f32 %v4980_v22, %v11293_v19  ;;  %v7456_v22 = vld [vmem:[%s11905_s5 + $0x338] sm:$0xff] }
 0xde5   :  { %v7226_v33 = vpop.f32.mrf.mxu1 }
 0xde6   :  { %v7457_v33 = vld [vmem:[%s11908_s6 + $0x108] sm:$0xff] }
 0xdfd   :  { %v5057_v32 = vpop.f32.mrf.mxu1 }
 0xdfe   :  { %7236 = vmatmul.mubr.msk.f32.vlgmr.msra.gmra.mxu0 %vm559_vm3, %v5057_v32  ;;  %v7458_v32 = vld [vmem:[%s11908_s6 + $0x100] sm:$0xff] }
 0xdff   :  { %5220 = vmatpush1.msra.mxu0 %v8839_v30  ;;  %v5059_v58 = vpop.f32.mrf.mxu1  ;;  %7238 = vmatprep.mubr.msk.f32.mxu0 %vm7484_vm1, %v11976_v45 }
 0xe00   :  { %5221 = vmatprep.subr.mxu0 %v11976_v45  ;;  %v7459_v58 = vld [vmem:[%s11905_s5 + $0x330] sm:$0xff] }
 0xe01   :  { %5222 = vmatpush1.msra.mxu0 %v8836_v0  ;;  %v5062_v12 = vpop.f32.mrf.mxu1 }
 0xe02   :  { %5223 = vmatprep.subr.mxu0 %v11976_v45  ;;  %7239 = vmatmul.mubr.msk.f32.gmra.mxu0 %vm559_vm3, %v5062_v12  ;;  %v7460_v12 = vld [vmem:[%s11905_s5 + $0x348] sm:$0xff] }
 0xe03   :  { %5224 = vmatpush1.msra.mxu0 %v8833_v38  ;;  %v5064_v16 = vpop.f32.mrf.mxu1  ;;  %7241 = vmatprep.mubr.msk.f32.mxu0 %vm7484_vm1, %v11976_v45 }
 0xe04   :  { %5225 = vmatprep.subr.mxu0 %v11976_v45  ;;  %v7461_v16 = vld [vmem:[%s11905_s5 + $0x340] sm:$0xff] }
 0xe05   :  { %5226 = vmatpush1.msra.mxu0 %v8829_v26  ;;  %v5067_v19 = vpop.f32.mrf.mxu1 }
 0xe06   :  { %5227 = vmatprep.subr.mxu0 %v11976_v45  ;;  %7242 = vmatmul.mubr.msk.f32.gmra.mxu0 %vm559_vm3, %v5067_v19  ;;  %v7462_v19 = vld [vmem:[%s11905_s5 + $0x358] sm:$0xff] }
 0xe07   :  { %5228 = vmatpush1.msra.mxu0 %v8826_v54  ;;  %v5069_v21 = vpop.f32.mrf.mxu1  ;;  %7244 = vmatprep.mubr.msk.f32.mxu0 %vm7484_vm1, %v11976_v45 }
 0xe08   :  { %5229 = vmatprep.subr.mxu0 %v11976_v45  ;;  %v7463_v21 = vld [vmem:[%s11905_s5 + $0x350] sm:$0xff] }
 0xe09   :  { %5230 = vmatpush1.msra.mxu0 %v8823_v42  ;;  %v5072_v52 = vpop.f32.mrf.mxu1 }
 0xe0a   :  { %5231 = vmatprep.subr.mxu0 %v11976_v45  ;;  %7245 = vmatmul.mubr.msk.f32.gmra.mxu0 %vm559_vm3, %v5072_v52  ;;  %v7464_v52 = vld [vmem:[%s11905_s5 + $0x368] sm:$0xff] }
 0xe0b   :  { %5232 = vmatpush1.msra.mxu0 %v8820_v35  ;;  %v5074_v49 = vpop.f32.mrf.mxu1  ;;  %7247 = vmatprep.mubr.msk.f32.mxu0 %vm7484_vm1, %v11976_v45 }
 0xe0c   :  { %5233 = vmatprep.subr.mxu0 %v11976_v45  ;;  %v7465_v49 = vld [vmem:[%s11905_s5 + $0x360] sm:$0xff] }
 0xe0d   :  { %5234 = vmatpush1.msra.mxu0 %v8816_v6  ;;  %v5077_v55 = vpop.f32.mrf.mxu1 }
 0xe0e   :  { %5235 = vmatprep.subr.mxu0 %v11976_v45  ;;  %7248 = vmatmul.mubr.msk.f32.gmra.mxu0 %vm559_vm3, %v5077_v55  ;;  %v7466_v55 = vld [vmem:[%s11905_s5 + $0x378] sm:$0x1] }
 0xe0f   :  { %5236 = vmatpush1.msra.mxu0 %v8813_v3  ;;  %v5079_v14 = vpop.f32.mrf.mxu1  ;;  %7250 = vmatprep.mubr.msk.f32.mxu0 %vm7484_vm1, %v11976_v45 }
 0xe10   :  { %5237 = vmatprep.subr.mxu0 %v11976_v45  ;;  %v7467_v14 = vld [vmem:[%s11905_s5 + $0x370] sm:$0x1] }
 0xe11   :  { %5238 = vmatpush1.msra.mxu0 %v8810_v2  ;;  %v5082_v47 = vpop.f32.mrf.mxu1 }
 0xe12   :  { %5239 = vmatprep.subr.mxu0 %v11976_v45  ;;  %7251 = vmatmul.mubr.msk.f32.gmra.mxu0 %vm559_vm3, %v5082_v47 }
 0xe13   :  { %5240 = vmatpush1.msra.mxu0 %v12012_v15  ;;  %v5084_v20 = vpop.f32.mrf.mxu1  ;;  %7253 = vmatprep.mubr.msk.f32.mxu0 %vm7484_vm1, %v11976_v45 }
 0xe14   :  { %5241 = vmatprep.subr.mxu0 %v11976_v45 }
 0xe15   :  { %5242 = vmatpush1.msra.mxu0 %v12014_v62  ;;  %v5087_v51 = vpop.f32.mrf.mxu1 }
 0xe16   :  { %5243 = vmatprep.subr.mxu0 %v11976_v45  ;;  %7254 = vmatmul.mubr.msk.f32.gmra.mxu0 %vm559_vm3, %v5087_v51 }
 0xe17   :  { %5244 = vmatpush1.msra.mxu0 %v12015_v36  ;;  %6354 = vmatprep.mubr.msk.f32.mxu0 %vm1142_vm4, %v7450_v10  ;;  %v5089_v31 = vpop.f32.mrf.mxu1 }
 0xe18   :  { %5245 = vmatprep.subr.mxu0 %v11976_v45 }
 0xe19   :  { %5246 = vmatpush1.msra.mxu0 %v12016_v37 }
 0xe1a   :  { %5247 = vmatprep.subr.mxu0 %v11976_v45 }
 0xe1b   :  { %5248 = vmatpush1.msra.mxu0 %v12017_v4 }
 0xe1c   :  { %5249 = vmatprep.subr.mxu0 %v11976_v45 }
 0xe1d   :  { %5250 = vmatpush1.msra.mxu0 %v10309_v50 }
 0xe1e   :  { %5265 = vmatprep.subr.mxu0 %v11976_v45 }
 0xe1f   :  { %6353 = vmatpush2.msk.msra.mxu0 %vm1164_vm5, %v10305_v1 }
 0xe20   :  { %5267 = vmatprep.subr.mxu0 %v11976_v45 }
 0xe21   :  { %5268 = vmatpush2.msra.mxu0 %v10320_v28 }
 0xe22   :  { %5269 = vmatprep.subr.mxu0 %v11976_v45 }
 0xe23   :  { %5270 = vmatpush2.msra.mxu0 %v12020_v59 }
 0xe24   :  { %5271 = vmatprep.subr.mxu0 %v11976_v45 }
 0xe25   :  { %5272 = vmatpush2.msra.mxu0 %v12021_v61 }
 0xe26   :  { %5273 = vmatprep.subr.mxu0 %v11976_v45 }
 0xe27   :  { %5274 = vmatpush2.msra.mxu0 %v12022_v18 }
 0xe28   :  { %5275 = vmatprep.subr.mxu0 %v11976_v45 }
 0xe29   :  { %5276 = vmatpush2.msra.mxu0 %v12023_v34 }
 0xe2a   :  { %5277 = vmatprep.subr.mxu0 %v11976_v45 }
 0xe2b   :  { %5278 = vmatpush2.msra.mxu0 %v12024_v39 }
 0xe2c   :  { %5279 = vmatprep.subr.mxu0 %v11976_v45 }
 0xe2d   :  { %5280 = vmatpush2.msra.mxu0 %v12025_v5 }
 0xe2e   :  { %5281 = vmatprep.subr.mxu0 %v11976_v45 }
 0xe2f   :  { %5282 = vmatpush2.msra.mxu0 %v12026_v53 }
 0xe30   :  { %5284 = vmatmul.mubr.f32.vlgmr.msra.gmra.mxu0 %v7451_v57  ;;  %7285 = vmatprep.subr.mxu0 %v11976_v45 }
 0xe31   :  { %6355 = vmatprep.mubr.msk.f32.mxu0 %vm1142_vm4, %v7452_v23  ;;  %7286 = vmatpush3.msra.mxu0 %v7453_v29 }
 0xe32   :  { %7287 = vmatprep.subr.mxu0 %v11976_v45 }
 0xe33   :  { %7288 = vmatpush3.msra.mxu0 %v7454_v40 }
 0xe34   :  { %5289 = vmatmul.mubr.f32.gmra.mxu0 %v7455_v48  ;;  %7289 = vmatprep.subr.mxu0 %v11976_v45 }
 0xe35   :  { %6356 = vmatprep.mubr.msk.f32.mxu0 %vm1142_vm4, %v7456_v22  ;;  %7290 = vmatpush3.msra.mxu0 %v7457_v33 }
 0xe36   :  { %7291 = vmatprep.subr.mxu0 %v11976_v45 }
 0xe37   :  { %7292 = vmatpush3.msra.mxu0 %v7458_v32 }
 0xe38   :  { %5294 = vmatmul.mubr.f32.gmra.mxu0 %v7459_v58 }
 0xe39   :  { %6357 = vmatprep.mubr.msk.f32.mxu0 %vm1142_vm4, %v7460_v12 }
 0xe3c   :  { %5299 = vmatmul.mubr.f32.gmra.mxu0 %v7461_v16 }
 0xe3d   :  { %6358 = vmatprep.mubr.msk.f32.mxu0 %vm1142_vm4, %v7462_v19 }
 0xe40   :  { %5304 = vmatmul.mubr.f32.gmra.mxu0 %v7463_v21 }
 0xe41   :  { %6359 = vmatprep.mubr.msk.f32.mxu0 %vm1142_vm4, %v7464_v52 }
 0xe44   :  { %5309 = vmatmul.mubr.f32.gmra.mxu0 %v7465_v49 }
 0xe45   :  { %6360 = vmatprep.mubr.msk.f32.mxu0 %vm1142_vm4, %v7466_v55 }
 0xe48   :  { %5314 = vmatmul.mubr.f32.gmra.mxu0 %v7467_v14 }
 0xe49   :  { %7293 = vmatprep.mubr.msk.f32.mxu0 %vm7484_vm1, %v11976_v45 }
 0xebe   :  { %v5178_v47 = vpop.f32.mrf.mxu0 }
 0xebf   :  { %v11590_v20 = vadd.f32 %v5178_v47, %v11433_v41 }
 0xec0   :  { %v7237_v51 = vpop.f32.mrf.mxu0 }
 0xec2   :  { %v5183_v10 = vpop.f32.mrf.mxu0 }
 0xec3   :  { %v11593_v31 = vadd.f32 %v5183_v10, %v11436_v46 }
 0xec4   :  { %v7240_v57 = vpop.f32.mrf.mxu0 }
 0xec6   :  { %v5188_v23 = vpop.f32.mrf.mxu0 }
 0xec7   :  { %v11596_v29 = vadd.f32 %v5188_v23, %v11439_v63 }
 0xec8   :  { %v7243_v40 = vpop.f32.mrf.mxu0 }
 0xeca   :  { %v5193_v48 = vpop.f32.mrf.mxu0 }
 0xecb   :  { %v11599_v22 = vadd.f32 %v5193_v48, %v11442_v43 }
 0xecc   :  { %v7246_v33 = vpop.f32.mrf.mxu0 }
 0xece   :  { %v5198_v32 = vpop.f32.mrf.mxu0 }
 0xecf   :  { %v11602_v41 = vadd.f32 %v5198_v32, %v11445_v56 }
 0xed0   :  { %v7249_v58 = vpop.f32.mrf.mxu0 }
 0xed2   :  { %v5203_v12 = vpop.f32.mrf.mxu0 }
 0xed3   :  { %v11605_v46 = vadd.f32 %v5203_v12, %v11448_v11 }
 0xed4   :  { %v7252_v16 = vpop.f32.mrf.mxu0 }
 0xed6   :  { %v5208_v19 = vpop.f32.mrf.mxu0 }
 0xed7   :  { %v11608_v63 = vadd.f32 %v5208_v19, %v11451_v9 }
 0xed8   :  { %v7255_v21 = vpop.f32.mrf.mxu0 }
 0xef0   :  { %v5285_v52 = vpop.f32.mrf.mxu0 }
 0xef1   :  { %7265 = vmatmul.mubr.msk.f32.vlgmr.msra.gmra.mxu1 %vm559_vm3, %v5285_v52 }
 0xef2   :  { %5448 = vmatpush1.msra.mxu1 %v8839_v30  ;;  %v5287_v43 = vpop.f32.mrf.mxu0  ;;  %7267 = vmatprep.mubr.msk.f32.mxu1 %vm7484_vm1, %v11976_v45 }
 0xef3   :  { %5449 = vmatprep.subr.mxu1 %v11976_v45 }
 0xef4   :  { %5450 = vmatpush1.msra.mxu1 %v8836_v0  ;;  %v5290_v56 = vpop.f32.mrf.mxu0 }
 0xef5   :  { %5451 = vmatprep.subr.mxu1 %v11976_v45  ;;  %7268 = vmatmul.mubr.msk.f32.gmra.mxu1 %vm559_vm3, %v5290_v56 }
 0xef6   :  { %5452 = vmatpush1.msra.mxu1 %v8833_v38  ;;  %v5292_v11 = vpop.f32.mrf.mxu0  ;;  %7270 = vmatprep.mubr.msk.f32.mxu1 %vm7484_vm1, %v11976_v45 }
 0xef7   :  { %5453 = vmatprep.subr.mxu1 %v11976_v45 }
 0xef8   :  { %5454 = vmatpush1.msra.mxu1 %v8829_v26  ;;  %v5295_v30 = vpop.f32.mrf.mxu0 }
 0xef9   :  { %5455 = vmatprep.subr.mxu1 %v11976_v45  ;;  %7271 = vmatmul.mubr.msk.f32.gmra.mxu1 %vm559_vm3, %v5295_v30 }
 0xefa   :  { %5456 = vmatpush1.msra.mxu1 %v8826_v54  ;;  %v5297_v0 = vpop.f32.mrf.mxu0  ;;  %7273 = vmatprep.mubr.msk.f32.mxu1 %vm7484_vm1, %v11976_v45 }
 0xefb   :  { %5457 = vmatprep.subr.mxu1 %v11976_v45 }
 0xefc   :  { %5458 = vmatpush1.msra.mxu1 %v8823_v42  ;;  %v5300_v38 = vpop.f32.mrf.mxu0 }
 0xefd   :  { %5459 = vmatprep.subr.mxu1 %v11976_v45  ;;  %7274 = vmatmul.mubr.msk.f32.gmra.mxu1 %vm559_vm3, %v5300_v38 }
 0xefe   :  { %5460 = vmatpush1.msra.mxu1 %v8820_v35  ;;  %v5302_v26 = vpop.f32.mrf.mxu0  ;;  %7276 = vmatprep.mubr.msk.f32.mxu1 %vm7484_vm1, %v11976_v45 }
 0xeff   :  { %5461 = vmatprep.subr.mxu1 %v11976_v45 }
 0xf00   :  { %5462 = vmatpush1.msra.mxu1 %v8816_v6  ;;  %v5305_v54 = vpop.f32.mrf.mxu0 }
 0xf01   :  { %5463 = vmatprep.subr.mxu1 %v11976_v45  ;;  %7277 = vmatmul.mubr.msk.f32.gmra.mxu1 %vm559_vm3, %v5305_v54 }
 0xf02   :  { %5464 = vmatpush1.msra.mxu1 %v8813_v3  ;;  %v5307_v42 = vpop.f32.mrf.mxu0  ;;  %7279 = vmatprep.mubr.msk.f32.mxu1 %vm7484_vm1, %v11976_v45 }
 0xf03   :  { %5465 = vmatprep.subr.mxu1 %v11976_v45 }
 0xf04   :  { %5466 = vmatpush1.msra.mxu1 %v8810_v2  ;;  %v5310_v35 = vpop.f32.mrf.mxu0  ;;  %v7468_v2 = vld [vmem:[%s11905_s5 + $0x388] sm:$0xff] }
 0xf05   :  { %5467 = vmatprep.subr.mxu1 %v11976_v45  ;;  %7280 = vmatmul.mubr.msk.f32.gmra.mxu1 %vm559_vm3, %v5310_v35 }
 0xf06   :  { %5468 = vmatpush1.msra.mxu1 %v12012_v15  ;;  %v5312_v6 = vpop.f32.mrf.mxu0  ;;  %7282 = vmatprep.mubr.msk.f32.mxu1 %vm7484_vm1, %v11976_v45 }
 0xf07   :  { %5469 = vmatprep.subr.mxu1 %v11976_v45 }
 0xf08   :  { %5470 = vmatpush1.msra.mxu1 %v12014_v62  ;;  %v5315_v3 = vpop.f32.mrf.mxu0  ;;  %v7469_v62 = vld [vmem:[%s11905_s5 + $0x380] sm:$0xff] }
 0xf09   :  { %5471 = vmatprep.subr.mxu1 %v11976_v45  ;;  %7283 = vmatmul.mubr.msk.f32.gmra.mxu1 %vm559_vm3, %v5315_v3 }
 0xf0a   :  { %5472 = vmatpush1.msra.mxu1 %v12015_v36  ;;  %6369 = vmatprep.mubr.msk.f32.mxu1 %vm1142_vm4, %v7468_v2  ;;  %v5317_v15 = vpop.f32.mrf.mxu0  ;;  %v7470_v36 = vld [vmem:[%s11905_s5 + $0x398] sm:$0xff] }
 0xf0b   :  { %5473 = vmatprep.subr.mxu1 %v11976_v45 }
 0xf0c   :  { %5474 = vmatpush1.msra.mxu1 %v12016_v37  ;;  %v7471_v37 = vld [vmem:[%s11905_s5 + $0x390] sm:$0xff] }
 0xf0d   :  { %5475 = vmatprep.subr.mxu1 %v11976_v45 }
 0xf0e   :  { %5476 = vmatpush1.msra.mxu1 %v12017_v4  ;;  %v7472_v4 = vld [vmem:[%s11905_s5 + $0x3a8] sm:$0xff] }
 0xf0f   :  { %5477 = vmatprep.subr.mxu1 %v11976_v45 }
 0xf10   :  { %5478 = vmatpush1.msra.mxu1 %v10309_v50  ;;  %v7474_v50 = vld [vmem:[%s11905_s5 + $0x3b8] sm:$0xff] }
 0xf11   :  { %5493 = vmatprep.subr.mxu1 %v11976_v45 }
 0xf12   :  { %6368 = vmatpush2.msk.msra.mxu1 %vm1164_vm5, %v10305_v1  ;;  %v7473_v1 = vld [vmem:[%s11905_s5 + $0x3a0] sm:$0xff] }
 0xf13   :  { %5495 = vmatprep.subr.mxu1 %v11976_v45 }
 0xf14   :  { %5496 = vmatpush2.msra.mxu1 %v10320_v28  ;;  %v7475_v28 = vld [vmem:[%s11905_s5 + $0x3b0] sm:$0xff] }
 0xf15   :  { %5497 = vmatprep.subr.mxu1 %v11976_v45 }
 0xf16   :  { %5498 = vmatpush2.msra.mxu1 %v12020_v59  ;;  %v7476_v59 = vld [vmem:[%s11905_s5 + $0x3c8] sm:$0xff] }
 0xf17   :  { %5499 = vmatprep.subr.mxu1 %v11976_v45 }
 0xf18   :  { %5500 = vmatpush2.msra.mxu1 %v12021_v61  ;;  %v7477_v61 = vld [vmem:[%s11905_s5 + $0x3c0] sm:$0xff] }
 0xf19   :  { %5501 = vmatprep.subr.mxu1 %v11976_v45 }
 0xf1a   :  { %5502 = vmatpush2.msra.mxu1 %v12022_v18  ;;  %v7478_v18 = vld [vmem:[%s11905_s5 + $0x3d8] sm:$0xff] }
 0xf1b   :  { %5503 = vmatprep.subr.mxu1 %v11976_v45 }
 0xf1c   :  { %5504 = vmatpush2.msra.mxu1 %v12023_v34  ;;  %v7479_v34 = vld [vmem:[%s11905_s5 + $0x3d0] sm:$0xff] }
 0xf1d   :  { %5505 = vmatprep.subr.mxu1 %v11976_v45 }
 0xf1e   :  { %5506 = vmatpush2.msra.mxu1 %v12024_v39  ;;  %v7480_v39 = vld [vmem:[%s11905_s5 + $0x3e8] sm:$0x1] }
 0xf1f   :  { %5507 = vmatprep.subr.mxu1 %v11976_v45 }
 0xf20   :  { %5508 = vmatpush2.msra.mxu1 %v12025_v5  ;;  %v7481_v5 = vld [vmem:[%s11905_s5 + $0x3e0] sm:$0x1] }
 0xf21   :  { %5509 = vmatprep.subr.mxu1 %v11976_v45 }
 0xf22   :  { %5510 = vmatpush2.msra.mxu1 %v12026_v53 }
 0xf23   :  { %5512 = vmatmul.mubr.f32.vlgmr.msra.gmra.mxu1 %v7469_v62 }
 0xf24   :  { %6370 = vmatprep.mubr.msk.f32.mxu1 %vm1142_vm4, %v7470_v36  ;;  %v11767_v36 = vld [vmem:[%s11909_s7] ss:$0 sm:$0xff] }
 0xf27   :  { %5517 = vmatmul.mubr.f32.gmra.mxu1 %v7471_v37 }
 0xf28   :  { %6371 = vmatprep.mubr.msk.f32.mxu1 %vm1142_vm4, %v7472_v4 }
 0xf2b   :  { %5522 = vmatmul.mubr.f32.gmra.mxu1 %v7473_v1 }
 0xf2c   :  { %6372 = vmatprep.mubr.msk.f32.mxu1 %vm1142_vm4, %v7474_v50 }
 0xf2f   :  { %5527 = vmatmul.mubr.f32.gmra.mxu1 %v7475_v28 }
 0xf30   :  { %6373 = vmatprep.mubr.msk.f32.mxu1 %vm1142_vm4, %v7476_v59 }
 0xf33   :  { %5532 = vmatmul.mubr.f32.gmra.mxu1 %v7477_v61 }
 0xf34   :  { %6374 = vmatprep.mubr.msk.f32.mxu1 %vm1142_vm4, %v7478_v18 }
 0xf37   :  { %5537 = vmatmul.mubr.f32.gmra.mxu1 %v7479_v34 }
 0xf38   :  { %6375 = vmatprep.mubr.msk.f32.mxu1 %vm1142_vm4, %v7480_v39 }
 0xf3b   :  { %5542 = vmatmul.mubr.f32.gmra.mxu1 %v7481_v5 }
 0xfb1   :  { %v5406_v53 = vpop.f32.mrf.mxu1 }
 0xfb2   :  { %v5440_v9 = vadd.f32 %v5406_v53, %v11590_v20 }
 0xfb3   :  { %v7266_v49 = vpop.f32.mrf.mxu1 }
 0xfb5   :  { %v5411_v55 = vpop.f32.mrf.mxu1 }
 0xfb6   :  { %v5441_v14 = vadd.f32 %v5411_v55, %v11593_v31 }
 0xfb7   :  { %v7269_v47 = vpop.f32.mrf.mxu1 }
 0xfb9   :  { %v5416_v51 = vpop.f32.mrf.mxu1 }
 0xfba   :  { %v5442_v10 = vadd.f32 %v5416_v51, %v11596_v29 }
 0xfbb   :  { %v7272_v57 = vpop.f32.mrf.mxu1 }
 0xfbd   :  { %v5421_v23 = vpop.f32.mrf.mxu1 }
 0xfbe   :  { %v11732_v40 = vadd.f32 %v5421_v23, %v11599_v22 }
 0xfbf   :  { %v7275_v48 = vpop.f32.mrf.mxu1 }
 0xfc1   :  { %v5426_v33 = vpop.f32.mrf.mxu1 }
 0xfc2   :  { %v11735_v32 = vadd.f32 %v5426_v33, %v11602_v41 }
 0xfc3   :  { %v7278_v58 = vpop.f32.mrf.mxu1 }
 0xfc5   :  { %v5431_v20 = vpop.f32.mrf.mxu1 }
 0xfc6   :  { %v11738_v12 = vadd.f32 %v5431_v20, %v11605_v46 }
 0xfc7   :  { %v7281_v31 = vpop.f32.mrf.mxu1 }
 0xfc9   :  { %v5436_v16 = vpop.f32.mrf.mxu1 }
 0xfca   :  { %v11741_v19 = vadd.f32 %v5436_v16, %v11608_v63 }
 0xfcb   :  { %v7284_v29 = vpop.f32.mrf.mxu1 }
 0xfe3   :  { %v5513_v21 = vpop.f32.mrf.mxu1 }
 0xfe4   :  { %7294 = vmatmul.mubr.msk.f32.vlgmr.msra.gmra.mxu0 %vm559_vm3, %v5513_v21 }
 0xfe5   :  { %v5515_v22 = vpop.f32.mrf.mxu1  ;;  %7296 = vmatprep.mubr.msk.f32.mxu0 %vm7484_vm1, %v11976_v45 }
 0xfe7   :  { %v5518_v41 = vpop.f32.mrf.mxu1 }
 0xfe8   :  { %7297 = vmatmul.mubr.msk.f32.gmra.mxu0 %vm559_vm3, %v5518_v41 }
 0xfe9   :  { %v5520_v52 = vpop.f32.mrf.mxu1  ;;  %7299 = vmatprep.mubr.msk.f32.mxu0 %vm7484_vm1, %v11976_v45 }
 0xfeb   :  { %v5523_v46 = vpop.f32.mrf.mxu1 }
 0xfec   :  { %7300 = vmatmul.mubr.msk.f32.gmra.mxu0 %vm559_vm3, %v5523_v46 }
 0xfed   :  { %v5525_v63 = vpop.f32.mrf.mxu1  ;;  %7302 = vmatprep.mubr.msk.f32.mxu0 %vm7484_vm1, %v11976_v45 }
 0xfef   :  { %v5528_v43 = vpop.f32.mrf.mxu1 }
 0xff0   :  { %7303 = vmatmul.mubr.msk.f32.gmra.mxu0 %vm559_vm3, %v5528_v43 }
 0xff1   :  { %v5530_v56 = vpop.f32.mrf.mxu1  ;;  %7305 = vmatprep.mubr.msk.f32.mxu0 %vm7484_vm1, %v11976_v45 }
 0xff3   :  { %v5533_v11 = vpop.f32.mrf.mxu1 }
 0xff4   :  { %7306 = vmatmul.mubr.msk.f32.gmra.mxu0 %vm559_vm3, %v5533_v11 }
 0xff5   :  { %v5535_v30 = vpop.f32.mrf.mxu1  ;;  %7308 = vmatprep.mubr.msk.f32.mxu0 %vm7484_vm1, %v11976_v45 }
 0xff7   :  { %v5538_v0 = vpop.f32.mrf.mxu1 }
 0xff8   :  { %7309 = vmatmul.mubr.msk.f32.gmra.mxu0 %vm559_vm3, %v5538_v0 }
 0xff9   :  { %v5540_v38 = vpop.f32.mrf.mxu1  ;;  %7311 = vmatprep.mubr.msk.f32.mxu0 %vm7484_vm1, %v11976_v45 }
 0xffb   :  { %v5543_v26 = vpop.f32.mrf.mxu1 }
 0xffc   :  { %7312 = vmatmul.mubr.msk.f32.gmra.mxu0 %vm559_vm3, %v5543_v26 }
 0xffd   :  { %v5545_v54 = vpop.f32.mrf.mxu1 }
0x10a4   :  { %v5634_v42 = vpop.f32.mrf.mxu0 }
0x10a5   :  { %v5668_v35 = vadd.f32 %v5634_v42, %v5440_v9 }
0x10a6   :  { %v7295_v6 = vpop.f32.mrf.mxu0 }
0x10a7   :  { %v5683_v3 = vrot.slane %v5668_v35, 7 }
0x10a8   :  { %v5639_v2 = vpop.f32.mrf.mxu0 }
0x10a9   :  { %v5703_v15 = vsel %vm5682_vm6, %v10763_v60, %v5683_v3  ;;  %v5669_v62 = vadd.f32 %v5639_v2, %v5441_v14 }
0x10aa   :  { %v11770_v45 = vadd.f32 %v11767_v36, %v5703_v15  ;;  %v7298_v37 = vpop.f32.mrf.mxu0 }
0x10ab   :  { %v5684_v4 = vrot.slane %v5669_v62, 7 }
0x10ac   :  { %v5737_v1 = vsel %vm559_vm3, %v11770_v45, 0.0  ;;  %v5766_v50 = vmul.f32 %v11770_v45, %v11770_v45  ;;  %v5644_v28 = vpop.f32.mrf.mxu0 }
0x10ad   :  { %v5738_v60 = vadd.f32 %v5737_v1, %v10765_v44  ;;  %v5685_v59 = vsel %vm5682_vm6, %v5683_v3, %v5684_v4  ;;  %v5670_v61 = vadd.f32 %v5644_v28, %v5442_v10 }
0x10ae   :  { %v5784_v18 = vsel %vm559_vm3, %v5766_v50, 0.0  ;;  %v11780_v34 = vadd.f32 %v11767_v36, %v5685_v59  ;;  %v7301_v39 = vpop.f32.mrf.mxu0 }
0x10af   :  { %v5785_v5 = vadd.f32 %v5784_v18, %v10768_v7  ;;  %v5686_v53 = vrot.slane %v5670_v61, 7 }
0x10b0   :  { %v5739_v9 = vsel %vm559_vm3, %v11780_v34, 0.0  ;;  %v5767_v49 = vmul.f32 %v11780_v34, %v11780_v34  ;;  %v5649_v55 = vpop.f32.mrf.mxu0 }
0x10b1   :  { %v5740_v44 = vadd.f32 %v5739_v9, %v5738_v60  ;;  %v5687_v14 = vsel %vm5682_vm6, %v5684_v4, %v5686_v53  ;;  %v5671_v47 = vadd.f32 %v5649_v55, %v11732_v40 }
0x10b2   :  { %v5786_v51 = vsel %vm559_vm3, %v5767_v49, 0.0  ;;  %v11791_v10 = vadd.f32 %v11767_v36, %v5687_v14  ;;  %v7304_v57 = vpop.f32.mrf.mxu0 }
0x10b3   :  { %v5787_v7 = vadd.f32 %v5786_v51, %v5785_v5  ;;  %v5688_v23 = vrot.slane %v5671_v47, 7 }
0x10b4   :  { %v5741_v48 = vsel %vm559_vm3, %v11791_v10, 0.0  ;;  %v5768_v33 = vmul.f32 %v11791_v10, %v11791_v10  ;;  %v5654_v58 = vpop.f32.mrf.mxu0 }
0x10b5   :  { %v5742_v20 = vadd.f32 %v5741_v48, %v5740_v44  ;;  %v5689_v31 = vsel %vm5682_vm6, %v5686_v53, %v5688_v23  ;;  %v5672_v40 = vadd.f32 %v5654_v58, %v11735_v32 }
0x10b6   :  { %v5788_v16 = vsel %vm559_vm3, %v5768_v33, 0.0  ;;  %v11801_v29 = vadd.f32 %v11767_v36, %v5689_v31  ;;  %v7307_v21 = vpop.f32.mrf.mxu0 }
0x10b7   :  { %v5789_v22 = vadd.f32 %v5788_v16, %v5787_v7  ;;  %v5690_v41 = vrot.slane %v5672_v40, 7 }
0x10b8   :  { %v5743_v52 = vsel %vm559_vm3, %v11801_v29, 0.0  ;;  %v5769_v46 = vmul.f32 %v11801_v29, %v11801_v29  ;;  %v5659_v63 = vpop.f32.mrf.mxu0 }
0x10b9   :  { %v5744_v43 = vadd.f32 %v5743_v52, %v5742_v20  ;;  %v5691_v56 = vsel %vm5682_vm6, %v5688_v23, %v5690_v41  ;;  %v5673_v32 = vadd.f32 %v5659_v63, %v11738_v12 }
0x10ba   :  { %v5790_v11 = vsel %vm559_vm3, %v5769_v46, 0.0  ;;  %v11811_v30 = vadd.f32 %v11767_v36, %v5691_v56  ;;  %v7310_v0 = vpop.f32.mrf.mxu0 }
0x10bb   :  { %v5791_v38 = vadd.f32 %v5790_v11, %v5789_v22  ;;  %v5692_v26 = vrot.slane %v5673_v32, 7 }
0x10bc   :  { %v5745_v54 = vsel %vm559_vm3, %v11811_v30, 0.0  ;;  %v5770_v42 = vmul.f32 %v11811_v30, %v11811_v30  ;;  %v5664_v35 = vpop.f32.mrf.mxu0 }
0x10bd   :  { %v5746_v6 = vadd.f32 %v5745_v54, %v5744_v43  ;;  %v5693_v3 = vsel %vm5682_vm6, %v5690_v41, %v5692_v26  ;;  %v5674_v12 = vadd.f32 %v5664_v35, %v11741_v19 }
0x10be   :  { %v5792_v2 = vsel %vm559_vm3, %v5770_v42, 0.0  ;;  %v11821_v15 = vadd.f32 %v11767_v36, %v5693_v3  ;;  %v7313_v62 = vpop.f32.mrf.mxu0 }
0x10bf   :  { %v5793_v37 = vadd.f32 %v5792_v2, %v5791_v38  ;;  %v5694_v4 = vrot.slane %v5674_v12, 7 }
0x10c0   :  { %v5747_v1 = vsel %vm559_vm3, %v11821_v15, 0.0  ;;  %v5771_v50 = vmul.f32 %v11821_v15, %v11821_v15 }
0x10c1   :  { %v5748_v28 = vadd.f32 %v5747_v1, %v5746_v6  ;;  %v5695_v60 = vsel %vm5682_vm6, %v5692_v26, %v5694_v4  ;;  %v6385_v6 = vld [vmem:[%s11911_s9] ss:$0 sm:$0xff] }
0x10c2   :  { %v5794_v19 = vsel %vm559_vm3, %v5771_v50, 0.0  ;;  %v5723_v59 = vadd.f32 %v11767_v36, %v5695_v60 }
0x10c3   :  { %v5795_v61 = vadd.f32 %v5794_v19, %v5793_v37 }
0x10c4   :  { %v5750_v18 = vsel %vm5749_vm7, %v5723_v59, 0.0  ;;  %v5772_v39 = vmul.f32 %v5723_v59, %v5723_v59 }
0x10c5   :  { %v5751_v5 = vadd.f32 %v5750_v18, %v5748_v28 }
0x10c6   :  { %v5796_v53 = vsel %vm5749_vm7, %v5772_v39, 0.0 }
0x10c7   :  { %v5752_v9 = vrot.slane %v5751_v5, 4  ;;  %v5797_v49 = vadd.f32 %v5796_v53, %v5795_v61 }
0x10c9   :  { %v5753_v55 = vadd.f32 %v5752_v9, %v5751_v5  ;;  %v5798_v44 = vrot.slane %v5797_v49, 4 }
0x10cb   :  { %v5754_v14 = vrot.slane %v5753_v55, 2  ;;  %v5799_v47 = vadd.f32 %v5798_v44, %v5797_v49 }
0x10cd   :  { %v5755_v51 = vadd.f32 %v5754_v14, %v5753_v55  ;;  %v5800_v57 = vrot.slane %v5799_v47, 2 }
0x10cf   :  { %v5756_v7 = vrot.slane %v5755_v51, 1  ;;  %v5801_v23 = vadd.f32 %v5800_v57, %v5799_v47 }
0x10d1   :  { %v5757_v48 = vadd.f32 %v5756_v7, %v5755_v51  ;;  %v5802_v33 = vrot.slane %v5801_v23, 1 }
0x10d3   :  { %v5759_v36 = vmul.f32 0.010204081, %v5757_v48  ;;  %v5803_v58 = vadd.f32 %v5802_v33, %v5801_v23 }
0x10d5   :  { %v5804_v20 = vmul.f32 0.010204081, %v5803_v58  ;;  %v5805_v31 = vmul.f32 %v5759_v36, %v5759_v36  ;;  %v5807_v40 = vsub.f32 %v10716_v17, %v5759_v36  ;;  %v5808_v16 = vsub.f32 %v10721_v24, %v5759_v36 }
0x10d6   :  { %v5809_v21 = vsub.f32 %v10732_v27, %v5759_v36  ;;  %v5810_v22 = vsub.f32 %v10740_v8, %v5759_v36  ;;  %v5811_v41 = vsub.f32 %v10748_v25, %v5759_v36  ;;  %v5812_v52 = vsub.f32 %v10756_v13, %v5759_v36  ;;  %v6384_v25 = vld [vmem:[%s11910_s8] ss:$0 sm:$0xff] }
0x10d7   :  { %v5806_v46 = vsub.f32 %v5804_v20, %v5805_v31  ;;  %v5813_v63 = vsub.f32 %v11770_v45, %v5759_v36  ;;  %v5814_v43 = vsub.f32 %v11780_v34, %v5759_v36  ;;  %v5815_v56 = vsub.f32 %v11791_v10, %v5759_v36 }
0x10d8   :  { %v5816_v32 = vsub.f32 %v11801_v29, %v5759_v36  ;;  %v5817_v17 = vsub.f32 %v11811_v30, %v5759_v36  ;;  %v5818_v24 = vsub.f32 %v11821_v15, %v5759_v36  ;;  %v5819_v27 = vsub.f32 %v5723_v59, %v5759_v36 }
0x10d9   :  { %v5820_v11 = vadd.f32 1e-05, %v5806_v46 }
0x10db   :  { %7318 = vrsqrt.f32 %v5820_v11 }
0x10e8   :  { %v7319_v8 = vpop.eup %7318 }
0x10e9   :  { %v5822_v13 = vmul.f32 %v7319_v8, %v5807_v40  ;;  %v5823_v45 = vmul.f32 %v7319_v8, %v5808_v16  ;;  %v5824_v0 = vmul.f32 %v7319_v8, %v5809_v21  ;;  %v5825_v34 = vmul.f32 %v7319_v8, %v5810_v22 }
0x10ea   :  { %v5826_v38 = vmul.f32 %v7319_v8, %v5811_v41  ;;  %v5827_v10 = vmul.f32 %v7319_v8, %v5812_v52  ;;  %v5828_v26 = vmul.f32 %v7319_v8, %v5813_v63  ;;  %v5829_v29 = vmul.f32 %v7319_v8, %v5814_v43 }
0x10eb   :  { %v5830_v54 = vmul.f32 %v7319_v8, %v5815_v56  ;;  %v5831_v30 = vmul.f32 %v7319_v8, %v5816_v32  ;;  %v5832_v42 = vmul.f32 %v7319_v8, %v5817_v17  ;;  %v5833_v35 = vmul.f32 %v7319_v8, %v5818_v24 }
0x10ec   :  { %v5834_v3 = vmul.f32 %v7319_v8, %v5819_v27  ;;  %v5841_v12 = vmul.f32 %v6384_v25, %v5822_v13  ;;  %v5842_v2 = vmul.f32 %v6384_v25, %v5823_v45  ;;  %v5843_v15 = vmul.f32 %v6384_v25, %v5824_v0 }
0x10ed   :  { %v5844_v62 = vmul.f32 %v6384_v25, %v5825_v34  ;;  %v5845_v37 = vmul.f32 %v6384_v25, %v5826_v38  ;;  %v5846_v4 = vmul.f32 %v6384_v25, %v5827_v10  ;;  %v5847_v1 = vmul.f32 %v6384_v25, %v5828_v26 }
0x10ee   :  { %v5848_v50 = vmul.f32 %v6384_v25, %v5829_v29  ;;  %v5849_v28 = vmul.f32 %v6384_v25, %v5830_v54  ;;  %v5850_v60 = vmul.f32 %v6384_v25, %v5831_v30  ;;  %v5851_v19 = vmul.f32 %v6384_v25, %v5832_v42 }
0x10ef   :  { %v5852_v59 = vmul.f32 %v6384_v25, %v5833_v35  ;;  %v5853_v61 = vmul.f32 %v6384_v25, %v5834_v3  ;;  %v5860_v18 = vadd.f32 %v6385_v6, %v5841_v12  ;;  %v5861_v39 = vadd.f32 %v6385_v6, %v5842_v2 }
0x10f0   :  { %v5862_v5 = vadd.f32 %v6385_v6, %v5843_v15  ;;  %v5863_v53 = vadd.f32 %v6385_v6, %v5844_v62  ;;  %v5864_v9 = vadd.f32 %v6385_v6, %v5845_v37  ;;  %v5865_v49 = vadd.f32 %v6385_v6, %v5846_v4 }
0x10f1   :  { %v5866_v55 = vadd.f32 %v6385_v6, %v5847_v1  ;;  %v5867_v44 = vadd.f32 %v6385_v6, %v5848_v50  ;;  %v5868_v14 = vadd.f32 %v6385_v6, %v5849_v28  ;;  %v5869_v47 = vadd.f32 %v6385_v6, %v5850_v60 }
0x10f2   :  { %v5870_v51 = vadd.f32 %v6385_v6, %v5851_v19  ;;  %v5871_v57 = vadd.f32 %v6385_v6, %v5852_v59  ;;  %v5872_v7 = vadd.f32 %v6385_v6, %v5853_v61  ;;  %v5873_v23 = vmul.f32 0.2, %v5860_v18 }
0x10f3   :  { %v5874_v48 = vmul.f32 0.2, %v5861_v39  ;;  %v5875_v33 = vmul.f32 0.2, %v5862_v5  ;;  %v5876_v36 = vmul.f32 0.2, %v5863_v53 }
0x10f4   :  { %v5877_v58 = vmul.f32 0.2, %v5864_v9  ;;  %v5878_v20 = vmul.f32 0.2, %v5865_v49  ;;  %v5879_v31 = vmul.f32 0.2, %v5866_v55  ;;  %v5886_v40 = vmax.f32 %v5860_v18, %v5873_v23 }
0x10f5   :  { %v5880_v16 = vmul.f32 0.2, %v5867_v44  ;;  %v5881_v21 = vmul.f32 0.2, %v5868_v14  ;;  %v5882_v22 = vmul.f32 0.2, %v5869_v47  ;;  %v5887_v41 = vmax.f32 %v5861_v39, %v5874_v48 }
0x10f6   :  { %v5883_v52 = vmul.f32 0.2, %v5870_v51  ;;  %v5884_v46 = vmul.f32 0.2, %v5871_v57  ;;  %v5885_v63 = vmul.f32 0.2, %v5872_v7  ;;  %v5888_v43 = vmax.f32 %v5862_v5, %v5875_v33 }
0x10f7   :  { %5899 = vst.msk [vmem:[%s11912_s10] sm:$0xff] %vm559_vm3, %v5886_v40  ;;  %v5889_v56 = vmax.f32 %v5863_v53, %v5876_v36  ;;  %v5890_v32 = vmax.f32 %v5864_v9, %v5877_v58  ;;  %v5891_v17 = vmax.f32 %v5865_v49, %v5878_v20  ;;  %v5892_v24 = vmax.f32 %v5866_v55, %v5879_v31 }
0x10f8   :  { %5900 = vst.msk [vmem:[%s11912_s10 + $0x8] sm:$0xff] %vm559_vm3, %v5887_v41  ;;  %v5893_v27 = vmax.f32 %v5867_v44, %v5880_v16  ;;  %v5894_v11 = vmax.f32 %v5868_v14, %v5881_v21  ;;  %v5895_v8 = vmax.f32 %v5869_v47, %v5882_v22  ;;  %v5896_v25 = vmax.f32 %v5870_v51, %v5883_v52 }
0x10f9   :  { %5901 = vst.msk [vmem:[%s11912_s10 + $0x10] sm:$0xff] %vm559_vm3, %v5888_v43  ;;  %v5897_v13 = vmax.f32 %v5871_v57, %v5884_v46  ;;  %v5898_v45 = vmax.f32 %v5872_v7, %v5885_v63  ;;  %5902 = vst.msk [vmem:[%s11912_s10 + $0x18] sm:$0xff] %vm559_vm3, %v5889_v56 }
0x10fa   :  { %5903 = vst.msk [vmem:[%s11912_s10 + $0x20] sm:$0xff] %vm559_vm3, %v5890_v32  ;;  %5904 = vst.msk [vmem:[%s11912_s10 + $0x28] sm:$0xff] %vm559_vm3, %v5891_v17 }
0x10fb   :  { %5905 = vst.msk [vmem:[%s11912_s10 + $0x30] sm:$0xff] %vm559_vm3, %v5892_v24  ;;  %5906 = vst.msk [vmem:[%s11912_s10 + $0x38] sm:$0xff] %vm559_vm3, %v5893_v27 }
0x10fc   :  { %5907 = vst.msk [vmem:[%s11912_s10 + $0x40] sm:$0xff] %vm559_vm3, %v5894_v11  ;;  %5908 = vst.msk [vmem:[%s11912_s10 + $0x48] sm:$0xff] %vm559_vm3, %v5895_v8 }
0x10fd   :  { %5909 = vst.msk [vmem:[%s11912_s10 + $0x50] sm:$0xff] %vm559_vm3, %v5896_v25  ;;  %5910 = vst.msk [vmem:[%s11912_s10 + $0x58] sm:$0xff] %vm559_vm3, %v5897_v13 }
0x10fe   :  { %5911 = vst.msk [vmem:[%s11912_s10 + $0x60] sm:$0x3] %vm5749_vm7, %v5898_v45 }

</bundles_post_ra>
